<compile_context>
chip_gen: v7x
topology: tpu7x:2x2x1
jax: 0.10.0
libtpu: 0.0.40
codegen_flags: <defaults>
</compile_context>

<pallas_src>
import functools

import jax
import jax.numpy as jnp
from jax.experimental import pallas as pl
from jax.experimental.pallas import tpu as pltpu


def _ceil_to(x, m):
    return ((x + m - 1) // m) * m


def _pick_tm(m):
    # Large M tiles (up to 2048 rows) amortize the ~0.35us per-grid-step cost
    # and approach the HBM roofline; cap so the grid keeps >= 2 steps where
    # possible (feeds both v7x TensorCores through the "parallel" axis).
    tm = max(16, min(2048, _ceil_to((m + 1) // 2, 16)))
    if tm >= m:
        tm = m                      # single full-extent block (always legal)
    return tm


# ----------------------------- tiled matmul -------------------------------

def _matmul_bias_kernel(a_ref, b_ref, bias_ref, o_ref, *, apply_relu):
    acc = jnp.dot(a_ref[...], b_ref[...], preferred_element_type=jnp.float32)
    acc = acc + bias_ref[...]
    if apply_relu:
        acc = jnp.maximum(acc, 0.0)
    o_ref[...] = acc.astype(o_ref.dtype)


def pallas_matmul(a, b, bias=None, relu=False, out_dtype=None):
    """out = relu?(a @ b + bias).  a:(M,K), b:(K,N), bias:(N,).

    Tiled over M only (weights resident); K/N are full-array blocks (no lane
    padding).  No host-side padding of A: grid = cdiv(M, tm) and Pallas masks
    the ragged last tile (each output row depends only on its own A row, so
    the unspecified remainder cannot leak into valid rows).
    """
    M, K = a.shape
    K2, N = b.shape
    assert K == K2
    if out_dtype is None:
        out_dtype = a.dtype
    if bias is None:
        bias = jnp.zeros((N,), jnp.float32)
    tm = _pick_tm(M)
    bias_2d = bias.astype(jnp.float32).reshape(1, N)
    return pl.pallas_call(
        functools.partial(_matmul_bias_kernel, apply_relu=relu),
        out_shape=jax.ShapeDtypeStruct((M, N), out_dtype),
        grid=(pl.cdiv(M, tm),),
        in_specs=[
            pl.BlockSpec((tm, K), lambda i: (i, 0)),   # A tile (streamed)
            pl.BlockSpec((K, N), lambda i: (0, 0)),    # B resident
            pl.BlockSpec((1, N), lambda i: (0, 0)),    # bias resident
        ],
        out_specs=pl.BlockSpec((tm, N), lambda i: (i, 0)),
        compiler_params=pltpu.CompilerParams(
            dimension_semantics=("parallel",),
            vmem_limit_bytes=32 * 1024 * 1024,
        ),
        cost_estimate=pl.CostEstimate(
            flops=2 * M * K * N,
            transcendentals=0,
            bytes_accessed=M * K * a.dtype.itemsize + K * N * b.dtype.itemsize
            + M * N * jnp.dtype(out_dtype).itemsize,
        ),
    )(a, b, bias_2d)


# --------------------- direct 3x3 conv (shift-trick) ----------------------

def _conv_shift_kernel(x_ref, w_ref, b_ref, o_ref, *, offsets, m_out, relu):
    # x_ref: (1, R, C) row-flattened padded image; w_ref: (T, C, Cout).
    # Conv = sum over taps of a contiguous row-offset slice @ per-tap weights.
    x = x_ref[...][0]                                          # (R, C)
    acc = jnp.zeros((m_out, w_ref.shape[-1]), jnp.float32)
    for tap, off in enumerate(offsets):
        acc = acc + jnp.dot(x[off:off + m_out, :], w_ref[tap],
                            preferred_element_type=jnp.float32)
    acc = acc + b_ref[...]
    if relu:
        acc = jnp.maximum(acc, 0.0)
    o_ref[...] = acc[None, :, :].astype(o_ref.dtype)


def _shift_conv(x_flat, w_taps, bias, *, wrow, th, tw, Ho, Wo, relu):
    """x_flat: (N, R, C) row-flattened padded NHWC image (row stride = wrow).

    Tap (di, dj) of the stride-1 conv corresponds to flat row offset
    di*wrow + dj.  Returns (N, Ho, Wo, Cout) bf16 (wrap-around garbage columns
    computed by the shift trick are dropped on the host).
    """
    N, R, C = x_flat.shape
    T, _, Cout = w_taps.shape
    m_out = (Ho - 1) * wrow + Wo
    offsets = tuple(di * wrow + dj for di in range(th) for dj in range(tw))
    assert offsets[-1] + m_out <= R
    out = pl.pallas_call(
        functools.partial(_conv_shift_kernel, offsets=offsets, m_out=m_out,
                          relu=relu),
        out_shape=jax.ShapeDtypeStruct((N, m_out, Cout), jnp.bfloat16),
        grid=(N,),
        in_specs=[
            pl.BlockSpec((1, R, C), lambda n: (n, 0, 0)),      # image (streamed)
            pl.BlockSpec((T, C, Cout), lambda n: (0, 0, 0)),   # weights resident
            pl.BlockSpec((1, Cout), lambda n: (0, 0)),         # bias resident
        ],
        out_specs=pl.BlockSpec((1, m_out, Cout), lambda n: (n, 0, 0)),
        compiler_params=pltpu.CompilerParams(
            dimension_semantics=("parallel",),
            vmem_limit_bytes=32 * 1024 * 1024,
        ),
        cost_estimate=pl.CostEstimate(
            flops=2 * N * m_out * T * C * Cout,
            transcendentals=0,
            bytes_accessed=N * R * C * 2 + T * C * Cout * 2
            + N * m_out * Cout * 2,
        ),
    )(x_flat, w_taps, bias.reshape(1, Cout).astype(jnp.float32))
    # drop the (wrow - Wo) wrap-around garbage columns per output row.
    out = jnp.pad(out, ((0, 0), (0, Ho * wrow - m_out), (0, 0)))
    return out.reshape(N, Ho, wrow, Cout)[:, :, :Wo, :]


def conv3x3(x, w, b, stride=1, relu=False):
    """3x3 conv, padding=1, stride in {1,2}; NHWC in / NHWC bf16 out.

    w: (Cout, Cin, 3, 3).  Stride-2 is lowered to a stride-1 2x2-tap conv on a
    space-to-depth (2x2 phase) repack of the padded input; the unused phase
    taps carry zero weights, so results are exact.
    """
    N, H, W, Cin = x.shape
    Cout = w.shape[0]
    x = x.astype(jnp.bfloat16)
    if stride == 1:
        Ho, Wo = H, W
        wrow = W + 2
        xp = jnp.pad(x, ((0, 0), (1, 1), (1, 1), (0, 0)))
        x_flat = xp.reshape(N, (H + 2) * wrow, Cin)            # free reshape
        w_taps = w.transpose(2, 3, 1, 0).reshape(9, Cin, Cout)
        th = tw = 3
    else:
        Ho, Wo = (H - 1) // 2 + 1, (W - 1) // 2 + 1
        hp, wp = 2 * (Ho + 1), 2 * (Wo + 1)
        xp = jnp.pad(x, ((0, 0), (1, hp - H - 1), (1, wp - W - 1), (0, 0)))
        s2d = xp.reshape(N, Ho + 1, 2, Wo + 1, 2, Cin)
        s2d = s2d.transpose(0, 1, 3, 2, 4, 5).reshape(N, Ho + 1, Wo + 1, 4 * Cin)
        wrow = Wo + 1
        x_flat = s2d.reshape(N, (Ho + 1) * wrow, 4 * Cin)      # free reshape
        wk = jnp.pad(w, ((0, 0), (0, 0), (0, 1), (0, 1)))      # (Cout,Cin,4,4)
        wk = wk.reshape(Cout, Cin, 2, 2, 2, 2)                 # (co,ci,di,pi,dj,pj)
        w_taps = wk.transpose(2, 4, 3, 5, 1, 0).reshape(4, 4 * Cin, Cout)
        th = tw = 2
    return _shift_conv(x_flat, w_taps.astype(jnp.bfloat16), b,
                       wrow=wrow, th=th, tw=tw, Ho=Ho, Wo=Wo, relu=relu)


def conv1x1(x, w, b, relu=False):
    """1x1 conv as a flattened M-tiled matmul; NHWC in / NHWC bf16 out."""
    N, H, W, Cin = x.shape
    Cout = w.shape[0]
    a = x.reshape(N * H * W, Cin).astype(jnp.bfloat16)
    wm = w.reshape(Cout, Cin).transpose(1, 0).astype(jnp.bfloat16)
    out = pallas_matmul(a, wm, bias=b, relu=relu, out_dtype=jnp.bfloat16)
    return out.reshape(N, H, W, Cout)


def upsample_nearest(x, f):
    return jnp.repeat(jnp.repeat(x, f, axis=1), f, axis=2)


# ------------------------------ fused DB head -----------------------------

def _db_head_kernel(x_ref, w1_ref, b1_ref, w2_ref, b2_ref, o_ref,
                    *, offsets, m_out, k):
    # 3x3 conv (shift taps) + ReLU + fused bin/thr 1x1 conv + exact sigmoids
    # + differentiable binarization, lane-dense (3, M) store.
    x = x_ref[...][0]                                          # (R, Cin)
    acc = jnp.zeros((m_out, w1_ref.shape[-1]), jnp.float32)
    for tap, off in enumerate(offsets):
        acc = acc + jnp.dot(x[off:off + m_out, :], w1_ref[tap],
                            preferred_element_type=jnp.float32)
    hidden = jnp.maximum(acc + b1_ref[...], 0.0)               # (M, 16) f32
    logits = jnp.dot(hidden, w2_ref[...],
                     preferred_element_type=jnp.float32) + b2_ref[...]
    s = 1.0 / (1.0 + jnp.exp(-logits))                         # exact sigmoid
    p = s[:, 0:1]
    thr = s[:, 1:2]
    bmap = 1.0 / (1.0 + jnp.exp(-k * (p - thr)))               # exact DB term
    out = jnp.concatenate([p, thr, bmap], axis=1)              # (M, 3)
    o_ref[...] = out.T[None, :, :].astype(o_ref.dtype)         # (1, 3, M)


def db_head_fused(feat, w1, b1, w2, b2, k):
    """feat: (N,H4,W4,32) NHWC -> (N,3,H4,W4) f32 [prob, thresh, binary]."""
    N, H4, W4, Cin = feat.shape
    Ch = w1.shape[0]                                           # 16 hidden ch
    wrow = W4 + 2
    xp = jnp.pad(feat.astype(jnp.bfloat16), ((0, 0), (1, 1), (1, 1), (0, 0)))
    x_flat = xp.reshape(N, (H4 + 2) * wrow, Cin)
    w1_taps = w1.transpose(2, 3, 1, 0).reshape(9, Cin, Ch).astype(jnp.bfloat16)
    m_out = (H4 - 1) * wrow + W4
    offsets = tuple(i * wrow + j for i in range(3) for j in range(3))
    out = pl.pallas_call(
        functools.partial(_db_head_kernel, offsets=offsets, m_out=m_out,
                          k=float(k)),
        out_shape=jax.ShapeDtypeStruct((N, 3, m_out), jnp.float32),
        grid=(N,),
        in_specs=[
            pl.BlockSpec((1, x_flat.shape[1], Cin), lambda n: (n, 0, 0)),
            pl.BlockSpec((9, Cin, Ch), lambda n: (0, 0, 0)),
            pl.BlockSpec((1, Ch), lambda n: (0, 0)),
            pl.BlockSpec((Ch, 2), lambda n: (0, 0)),
            pl.BlockSpec((1, 2), lambda n: (0, 0)),
        ],
        out_specs=pl.BlockSpec((1, 3, m_out), lambda n: (n, 0, 0)),
        compiler_params=pltpu.CompilerParams(
            dimension_semantics=("parallel",),
            vmem_limit_bytes=32 * 1024 * 1024,
        ),
    )(x_flat, w1_taps, b1.reshape(1, Ch).astype(jnp.float32),
      w2.astype(jnp.float32), b2.reshape(1, 2).astype(jnp.float32))
    # drop wrap-around garbage columns -> (N, 3, H4, W4)
    out = jnp.pad(out, ((0, 0), (0, 0), (0, H4 * wrow - m_out)))
    return out.reshape(N, 3, H4, wrow)[:, :, :, :W4]


# ----------------------------- bilinear resize ----------------------------

def _interp_matrix(n_out, n_in):
    """Row-stochastic matrix implementing 1-D bilinear, align_corners=True."""
    if n_in == 1:
        return jnp.ones((n_out, 1), jnp.float32)
    if n_out == 1:
        return jnp.zeros((1, n_in), jnp.float32).at[0, 0].set(1.0)
    idx = jnp.arange(n_out)
    src = idx.astype(jnp.float32) * (n_in - 1) / (n_out - 1)
    lo = jnp.clip(jnp.floor(src).astype(jnp.int32), 0, n_in - 2)
    frac = src - lo.astype(jnp.float32)
    A = jnp.zeros((n_out, n_in), jnp.float32)
    A = A.at[idx, lo].add(1.0 - frac)
    A = A.at[idx, lo + 1].add(frac)
    return A


def _hresize_kernel(x_ref, ah_ref, o_ref):
    out = jnp.dot(ah_ref[...], x_ref[...][0], preferred_element_type=jnp.float32)
    o_ref[...] = out[None, :, :].astype(o_ref.dtype)


def bilinear_resize(y, Hout, Wout):
    """F.interpolate(y, (Hout, Wout), 'bilinear', align_corners=True). y: NCHW f32.

    Width pass = one batched lane-dense matmul over all (n, c, h) rows;
    height pass = per-(n, c) (Hout, Hin) @ (Hin, Wout) matmul.
    """
    N, C, Hin, Win = y.shape
    AwT = _interp_matrix(Wout, Win).T                          # (Win, Wout)
    Ah = _interp_matrix(Hout, Hin)                             # (Hout, Hin)
    rows = y.reshape(N * C * Hin, Win).astype(jnp.float32)
    wide = pallas_matmul(rows, AwT, out_dtype=jnp.float32)     # (N*C*Hin, Wout)
    wide = wide.reshape(N * C, Hin, Wout)
    out = pl.pallas_call(
        _hresize_kernel,
        out_shape=jax.ShapeDtypeStruct((N * C, Hout, Wout), jnp.float32),
        grid=(N * C,),
        in_specs=[
            pl.BlockSpec((1, Hin, Wout), lambda i: (i, 0, 0)),
            pl.BlockSpec((Hout, Hin), lambda i: (0, 0)),
        ],
        out_specs=pl.BlockSpec((1, Hout, Wout), lambda i: (i, 0, 0)),
        compiler_params=pltpu.CompilerParams(
            dimension_semantics=("parallel",),
            vmem_limit_bytes=32 * 1024 * 1024,
        ),
    )(wide, Ah)
    return out.reshape(N, C, Hout, Wout)


# ------------------------------- parameters -------------------------------

def _conv_params(key, cin, cout, k):
    std = (2.0 / (cin * k * k)) ** 0.5
    w = jax.random.normal(key, (cout, cin, k, k), jnp.float32) * std
    b = jnp.zeros((cout,), jnp.float32)
    return w, b


def init_params(key, in_channels=3, inner=32):
    keys = iter(jax.random.split(key, 32))
    p = {}
    chs = [8, 16, 24, 32, 40]                       # stem, c2..c5 channels
    p['stem'] = _conv_params(next(keys), in_channels, chs[0], 3)
    p['stage2'] = _conv_params(next(keys), chs[0], chs[1], 3)
    p['stage3'] = _conv_params(next(keys), chs[1], chs[2], 3)
    p['stage4'] = _conv_params(next(keys), chs[2], chs[3], 3)
    p['stage5'] = _conv_params(next(keys), chs[3], chs[4], 3)
    for name, c in zip(['lat2', 'lat3', 'lat4', 'lat5'], chs[1:]):
        p[name] = _conv_params(next(keys), c, inner, 1)
    for name in ['smooth2', 'smooth3', 'smooth4', 'smooth5']:
        p[name] = _conv_params(next(keys), inner, inner // 4, 3)
    p['bin_conv1'] = _conv_params(next(keys), inner, inner // 4, 3)
    p['bin_conv2'] = _conv_params(next(keys), inner // 4, 1, 1)
    p['thr_conv1'] = _conv_params(next(keys), inner, inner // 4, 3)
    p['thr_conv2'] = _conv_params(next(keys), inner // 4, 1, 1)
    return p


def _combine_head_params(params):
    """Fuse bin/thr conv1 into one 3x3 conv and conv2 into one block-diag 1x1."""
    wb1, bb1 = params['bin_conv1']
    wt1, bt1 = params['thr_conv1']
    w1 = jnp.concatenate([wb1, wt1], axis=0)                   # (16, inner, 3, 3)
    b1 = jnp.concatenate([bb1, bt1])
    wb2, _ = params['bin_conv2']                               # (1, 8, 1, 1)
    wt2, _ = params['thr_conv2']
    hidden = wb2.shape[1]
    w2 = jnp.zeros((2 * hidden, 2), jnp.float32)
    w2 = w2.at[:hidden, 0].set(wb2.reshape(-1))
    w2 = w2.at[hidden:, 1].set(wt2.reshape(-1))
    b2 = jnp.concatenate([params['bin_conv2'][1], params['thr_conv2'][1]])
    return (w1, b1), (w2, b2)


# --------------------------------- forward --------------------------------

def dbnet_forward(params, x, k=50.0):
    N, C, H, W = x.shape
    xh = x.transpose(0, 2, 3, 1).astype(jnp.bfloat16)          # NCHW -> NHWC
    # backbone (ResNet-lite): features at strides /4, /8, /16, /32
    s1 = conv3x3(xh, *params['stem'], stride=2, relu=True)     # /2
    c2 = conv3x3(s1, *params['stage2'], stride=2, relu=True)   # /4
    c3 = conv3x3(c2, *params['stage3'], stride=2, relu=True)   # /8
    c4 = conv3x3(c3, *params['stage4'], stride=2, relu=True)   # /16
    c5 = conv3x3(c4, *params['stage5'], stride=2, relu=True)   # /32
    # neck (FPN): lateral 1x1, top-down add, smooth 3x3, concat at /4
    p5 = conv1x1(c5, *params['lat5'])
    p4 = conv1x1(c4, *params['lat4']) + upsample_nearest(p5, 2)
    p3 = conv1x1(c3, *params['lat3']) + upsample_nearest(p4, 2)
    p2 = conv1x1(c2, *params['lat2']) + upsample_nearest(p3, 2)
    f2 = conv3x3(p2, *params['smooth2'])
    f3 = upsample_nearest(conv3x3(p3, *params['smooth3']), 2)
    f4 = upsample_nearest(conv3x3(p4, *params['smooth4']), 4)
    f5 = upsample_nearest(conv3x3(p5, *params['smooth5']), 8)
    feat = jnp.concatenate([f5, f4, f3, f2], axis=-1)          # (N, H/4, W/4, 32)
    # head (DBHead): one fused kernel (3x3 conv + 1x1 + sigmoid + DB)
    (w1, b1), (w2, b2) = _combine_head_params(params)
    y = db_head_fused(feat, w1, b1, w2, b2, k)                 # (N, 3, H/4, W/4)
    # F.interpolate(y, size=(H, W), mode='bilinear', align_corners=True)
    return bilinear_resize(y, H, W)


if __name__ == "__main__":
    key = jax.random.PRNGKey(0)
    pkey, xkey = jax.random.split(key)
    params = init_params(pkey, in_channels=3, inner=32)
    x = jax.random.normal(xkey, (2, 3, 32, 32), jnp.float32)
    fwd = jax.jit(lambda p, xx: dbnet_forward(p, xx, k=50.0))
    out = jax.block_until_ready(fwd(params, x))
    assert out.shape == (2, 3, 32, 32), out.shape
    assert bool(jnp.all(jnp.isfinite(out)))
    print("KERNEL_OK")
</pallas_src>

<mosaic_0001>
module attributes {stable_mosaic.version = 11 : i64} {
  func.func private @main(%arg0: i32) attributes {dimension_semantics = [#tpu.dimension_semantics<core_parallel>], iteration_bounds = array<i64: 2>, tpu.core_type = #tpu.core_type<sc_scalar_subcore>, window_params = []} {
    return
  }
}

module attributes {stable_mosaic.version = 11 : i64} {
  func.func private @main(%arg0: i32) attributes {dimension_semantics = [#tpu.dimension_semantics<core_parallel>], iteration_bounds = array<i64: 2>, tpu.core_type = #tpu.core_type<sc_scalar_subcore>, window_params = []} {
    return
  }
}

module attributes {stable_mosaic.version = 11 : i64} {
  func.func @_conv_shift_kernel(%arg0: i32, %arg1: memref<1x289x12xbf16, #tpu.memory_space<vmem>>, %arg2: memref<4x12x8xbf16, #tpu.memory_space<vmem>>, %arg3: memref<1x8xf32, #tpu.memory_space<vmem>>, %arg4: memref<1x271x8xbf16, #tpu.memory_space<vmem>>) attributes {dimension_semantics = [#tpu.dimension_semantics<parallel>], iteration_bounds = array<i64: 2>, scalar_prefetch = 0 : i64, scratch_operands = 0 : i64, tpu.core_type = #tpu.core_type<tc>, window_params = [{transform_indices = @transform_0, window_bounds = array<i64: 1, 289, 12>}, {pipeline_mode = #tpu.pipeline_mode<synchronous>, transform_indices = @transform_1, window_bounds = array<i64: 4, 12, 8>}, {pipeline_mode = #tpu.pipeline_mode<synchronous>, transform_indices = @transform_2, window_bounds = array<i64: 1, 8>}, {transform_indices = @transform_3, window_bounds = array<i64: 1, 271, 8>}]} {
    %c0 = arith.constant 0 : index
    %c0_0 = arith.constant 0 : index
    %c0_1 = arith.constant 0 : index
    %0 = vector.load %arg1[%c0, %c0_0, %c0_1] : memref<1x289x12xbf16, #tpu.memory_space<vmem>>, vector<1x289x12xbf16>
    %1 = vector.shape_cast %0 : vector<1x289x12xbf16> to vector<289x12xbf16>
    %cst = arith.constant 0.000000e+00 : f32
    %2 = vector.broadcast %cst : f32 to vector<271x8xf32>
    %3 = vector.extract_strided_slice %1 {offsets = [0, 0], sizes = [271, 12], strides = [1, 1]} : vector<289x12xbf16> to vector<271x12xbf16>
    %c0_2 = arith.constant 0 : index
    %c0_3 = arith.constant 0 : index
    %c0_4 = arith.constant 0 : index
    %4 = vector.load %arg2[%c0_2, %c0_3, %c0_4] : memref<4x12x8xbf16, #tpu.memory_space<vmem>>, vector<1x12x8xbf16>
    %5 = vector.shape_cast %4 : vector<1x12x8xbf16> to vector<12x8xbf16>
    %cst_5 = arith.constant dense<0.000000e+00> : vector<271x8xf32>
    %6 = tpu.matmul %3, %5, %cst_5 {dimension_numbers = #tpu.dot_dimension_numbers<[1], [0], [0], [1], [0, 0, 1, 1], [], []>} : vector<271x12xbf16>, vector<12x8xbf16>, vector<271x8xf32> -> vector<271x8xf32>
    %7 = arith.addf %2, %6 : vector<271x8xf32>
    %8 = vector.extract_strided_slice %1 {offsets = [1, 0], sizes = [271, 12], strides = [1, 1]} : vector<289x12xbf16> to vector<271x12xbf16>
    %c1 = arith.constant 1 : index
    %c0_6 = arith.constant 0 : index
    %c0_7 = arith.constant 0 : index
    %9 = vector.load %arg2[%c1, %c0_6, %c0_7] : memref<4x12x8xbf16, #tpu.memory_space<vmem>>, vector<1x12x8xbf16>
    %10 = vector.shape_cast %9 : vector<1x12x8xbf16> to vector<12x8xbf16>
    %cst_8 = arith.constant dense<0.000000e+00> : vector<271x8xf32>
    %11 = tpu.matmul %8, %10, %cst_8 {dimension_numbers = #tpu.dot_dimension_numbers<[1], [0], [0], [1], [0, 0, 1, 1], [], []>} : vector<271x12xbf16>, vector<12x8xbf16>, vector<271x8xf32> -> vector<271x8xf32>
    %12 = arith.addf %7, %11 : vector<271x8xf32>
    %13 = vector.extract_strided_slice %1 {offsets = [17, 0], sizes = [271, 12], strides = [1, 1]} : vector<289x12xbf16> to vector<271x12xbf16>
    %c2 = arith.constant 2 : index
    %c0_9 = arith.constant 0 : index
    %c0_10 = arith.constant 0 : index
    %14 = vector.load %arg2[%c2, %c0_9, %c0_10] : memref<4x12x8xbf16, #tpu.memory_space<vmem>>, vector<1x12x8xbf16>
    %15 = vector.shape_cast %14 : vector<1x12x8xbf16> to vector<12x8xbf16>
    %cst_11 = arith.constant dense<0.000000e+00> : vector<271x8xf32>
    %16 = tpu.matmul %13, %15, %cst_11 {dimension_numbers = #tpu.dot_dimension_numbers<[1], [0], [0], [1], [0, 0, 1, 1], [], []>} : vector<271x12xbf16>, vector<12x8xbf16>, vector<271x8xf32> -> vector<271x8xf32>
    %17 = arith.addf %12, %16 : vector<271x8xf32>
    %18 = vector.extract_strided_slice %1 {offsets = [18, 0], sizes = [271, 12], strides = [1, 1]} : vector<289x12xbf16> to vector<271x12xbf16>
    %c3 = arith.constant 3 : index
    %c0_12 = arith.constant 0 : index
    %c0_13 = arith.constant 0 : index
    %19 = vector.load %arg2[%c3, %c0_12, %c0_13] : memref<4x12x8xbf16, #tpu.memory_space<vmem>>, vector<1x12x8xbf16>
    %20 = vector.shape_cast %19 : vector<1x12x8xbf16> to vector<12x8xbf16>
    %cst_14 = arith.constant dense<0.000000e+00> : vector<271x8xf32>
    %21 = tpu.matmul %18, %20, %cst_14 {dimension_numbers = #tpu.dot_dimension_numbers<[1], [0], [0], [1], [0, 0, 1, 1], [], []>} : vector<271x12xbf16>, vector<12x8xbf16>, vector<271x8xf32> -> vector<271x8xf32>
    %22 = arith.addf %17, %21 : vector<271x8xf32>
    %c0_15 = arith.constant 0 : index
    %c0_16 = arith.constant 0 : index
    %23 = vector.load %arg3[%c0_15, %c0_16] : memref<1x8xf32, #tpu.memory_space<vmem>>, vector<1x8xf32>
    %24 = vector.broadcast %23 : vector<1x8xf32> to vector<271x8xf32>
    %25 = arith.addf %22, %24 : vector<271x8xf32>
    %cst_17 = arith.constant 0.000000e+00 : f32
    %26 = vector.broadcast %cst_17 : f32 to vector<271x8xf32>
    %27 = arith.maximumf %25, %26 : vector<271x8xf32>
    %28 = vector.shape_cast %27 : vector<271x8xf32> to vector<1x271x8xf32>
    %29 = arith.truncf %28 : vector<1x271x8xf32> to vector<1x271x8xbf16>
    %c0_18 = arith.constant 0 : index
    %c0_19 = arith.constant 0 : index
    %c0_20 = arith.constant 0 : index
    %30 = vector.load %arg4[%c0_18, %c0_19, %c0_20] : memref<1x271x8xbf16, #tpu.memory_space<vmem>>, vector<1x271x8xbf16>
    tpu.vector_store %arg4[%c0_18, %c0_19, %c0_20], %29 {strides = array<i32>} : memref<1x271x8xbf16, #tpu.memory_space<vmem>>, vector<1x271x8xbf16>,
    return
  }
  func.func @transform_0(%arg0: i32) -> (i32, i32, i32) {
    %c0_i32 = arith.constant 0 : i32
    %c0_i32_0 = arith.constant 0 : i32
    %c0_i32_1 = arith.constant 0 : i32
    return %arg0, %c0_i32, %c0_i32_0 : i32, i32, i32
  }
  func.func @transform_1(%arg0: i32) -> (i32, i32, i32) {
    %c0_i32 = arith.constant 0 : i32
    %c0_i32_0 = arith.constant 0 : i32
    %c0_i32_1 = arith.constant 0 : i32
    %c0_i32_2 = arith.constant 0 : i32
    return %c0_i32, %c0_i32_0, %c0_i32_1 : i32, i32, i32
  }
  func.func @transform_2(%arg0: i32) -> (i32, i32) {
    %c0_i32 = arith.constant 0 : i32
    %c0_i32_0 = arith.constant 0 : i32
    %c0_i32_1 = arith.constant 0 : i32
    return %c0_i32, %c0_i32_0 : i32, i32
  }
  func.func @transform_3(%arg0: i32) -> (i32, i32, i32) {
    %c0_i32 = arith.constant 0 : i32
    %c0_i32_0 = arith.constant 0 : i32
    %c0_i32_1 = arith.constant 0 : i32
    return %arg0, %c0_i32, %c0_i32_0 : i32, i32, i32
  }
}

module attributes {stable_mosaic.version = 11 : i64} {
  func.func @_conv_shift_kernel(%arg0: i32, %arg1: memref<1x81x32xbf16, #tpu.memory_space<vmem>>, %arg2: memref<4x32x16xbf16, #tpu.memory_space<vmem>>, %arg3: memref<1x16xf32, #tpu.memory_space<vmem>>, %arg4: memref<1x71x16xbf16, #tpu.memory_space<vmem>>) attributes {dimension_semantics = [#tpu.dimension_semantics<parallel>], iteration_bounds = array<i64: 2>, scalar_prefetch = 0 : i64, scratch_operands = 0 : i64, tpu.core_type = #tpu.core_type<tc>, window_params = [{transform_indices = @transform_0, window_bounds = array<i64: 1, 81, 32>}, {pipeline_mode = #tpu.pipeline_mode<synchronous>, transform_indices = @transform_1, window_bounds = array<i64: 4, 32, 16>}, {pipeline_mode = #tpu.pipeline_mode<synchronous>, transform_indices = @transform_2, window_bounds = array<i64: 1, 16>}, {transform_indices = @transform_3, window_bounds = array<i64: 1, 71, 16>}]} {
    %c0 = arith.constant 0 : index
    %c0_0 = arith.constant 0 : index
    %c0_1 = arith.constant 0 : index
    %0 = vector.load %arg1[%c0, %c0_0, %c0_1] : memref<1x81x32xbf16, #tpu.memory_space<vmem>>, vector<1x81x32xbf16>
    %1 = vector.shape_cast %0 : vector<1x81x32xbf16> to vector<81x32xbf16>
    %cst = arith.constant 0.000000e+00 : f32
    %2 = vector.broadcast %cst : f32 to vector<71x16xf32>
    %3 = vector.extract_strided_slice %1 {offsets = [0, 0], sizes = [71, 32], strides = [1, 1]} : vector<81x32xbf16> to vector<71x32xbf16>
    %c0_2 = arith.constant 0 : index
    %c0_3 = arith.constant 0 : index
    %c0_4 = arith.constant 0 : index
    %4 = vector.load %arg2[%c0_2, %c0_3, %c0_4] : memref<4x32x16xbf16, #tpu.memory_space<vmem>>, vector<1x32x16xbf16>
    %5 = vector.shape_cast %4 : vector<1x32x16xbf16> to vector<32x16xbf16>
    %cst_5 = arith.constant dense<0.000000e+00> : vector<71x16xf32>
    %6 = tpu.matmul %3, %5, %cst_5 {dimension_numbers = #tpu.dot_dimension_numbers<[1], [0], [0], [1], [0, 0, 1, 1], [], []>} : vector<71x32xbf16>, vector<32x16xbf16>, vector<71x16xf32> -> vector<71x16xf32>
    %7 = arith.addf %2, %6 : vector<71x16xf32>
    %8 = vector.extract_strided_slice %1 {offsets = [1, 0], sizes = [71, 32], strides = [1, 1]} : vector<81x32xbf16> to vector<71x32xbf16>
    %c1 = arith.constant 1 : index
    %c0_6 = arith.constant 0 : index
    %c0_7 = arith.constant 0 : index
    %9 = vector.load %arg2[%c1, %c0_6, %c0_7] : memref<4x32x16xbf16, #tpu.memory_space<vmem>>, vector<1x32x16xbf16>
    %10 = vector.shape_cast %9 : vector<1x32x16xbf16> to vector<32x16xbf16>
    %cst_8 = arith.constant dense<0.000000e+00> : vector<71x16xf32>
    %11 = tpu.matmul %8, %10, %cst_8 {dimension_numbers = #tpu.dot_dimension_numbers<[1], [0], [0], [1], [0, 0, 1, 1], [], []>} : vector<71x32xbf16>, vector<32x16xbf16>, vector<71x16xf32> -> vector<71x16xf32>
    %12 = arith.addf %7, %11 : vector<71x16xf32>
    %13 = vector.extract_strided_slice %1 {offsets = [9, 0], sizes = [71, 32], strides = [1, 1]} : vector<81x32xbf16> to vector<71x32xbf16>
    %c2 = arith.constant 2 : index
    %c0_9 = arith.constant 0 : index
    %c0_10 = arith.constant 0 : index
    %14 = vector.load %arg2[%c2, %c0_9, %c0_10] : memref<4x32x16xbf16, #tpu.memory_space<vmem>>, vector<1x32x16xbf16>
    %15 = vector.shape_cast %14 : vector<1x32x16xbf16> to vector<32x16xbf16>
    %cst_11 = arith.constant dense<0.000000e+00> : vector<71x16xf32>
    %16 = tpu.matmul %13, %15, %cst_11 {dimension_numbers = #tpu.dot_dimension_numbers<[1], [0], [0], [1], [0, 0, 1, 1], [], []>} : vector<71x32xbf16>, vector<32x16xbf16>, vector<71x16xf32> -> vector<71x16xf32>
    %17 = arith.addf %12, %16 : vector<71x16xf32>
    %18 = vector.extract_strided_slice %1 {offsets = [10, 0], sizes = [71, 32], strides = [1, 1]} : vector<81x32xbf16> to vector<71x32xbf16>
    %c3 = arith.constant 3 : index
    %c0_12 = arith.constant 0 : index
    %c0_13 = arith.constant 0 : index
    %19 = vector.load %arg2[%c3, %c0_12, %c0_13] : memref<4x32x16xbf16, #tpu.memory_space<vmem>>, vector<1x32x16xbf16>
    %20 = vector.shape_cast %19 : vector<1x32x16xbf16> to vector<32x16xbf16>
    %cst_14 = arith.constant dense<0.000000e+00> : vector<71x16xf32>
    %21 = tpu.matmul %18, %20, %cst_14 {dimension_numbers = #tpu.dot_dimension_numbers<[1], [0], [0], [1], [0, 0, 1, 1], [], []>} : vector<71x32xbf16>, vector<32x16xbf16>, vector<71x16xf32> -> vector<71x16xf32>
    %22 = arith.addf %17, %21 : vector<71x16xf32>
    %c0_15 = arith.constant 0 : index
    %c0_16 = arith.constant 0 : index
    %23 = vector.load %arg3[%c0_15, %c0_16] : memref<1x16xf32, #tpu.memory_space<vmem>>, vector<1x16xf32>
    %24 = vector.broadcast %23 : vector<1x16xf32> to vector<71x16xf32>
    %25 = arith.addf %22, %24 : vector<71x16xf32>
    %cst_17 = arith.constant 0.000000e+00 : f32
    %26 = vector.broadcast %cst_17 : f32 to vector<71x16xf32>
    %27 = arith.maximumf %25, %26 : vector<71x16xf32>
    %28 = vector.shape_cast %27 : vector<71x16xf32> to vector<1x71x16xf32>
    %29 = arith.truncf %28 : vector<1x71x16xf32> to vector<1x71x16xbf16>
    %c0_18 = arith.constant 0 : index
    %c0_19 = arith.constant 0 : index
    %c0_20 = arith.constant 0 : index
    %30 = vector.load %arg4[%c0_18, %c0_19, %c0_20] : memref<1x71x16xbf16, #tpu.memory_space<vmem>>, vector<1x71x16xbf16>
    tpu.vector_store %arg4[%c0_18, %c0_19, %c0_20], %29 {strides = array<i32>} : memref<1x71x16xbf16, #tpu.memory_space<vmem>>, vector<1x71x16xbf16>,
    return
  }
  func.func @transform_0(%arg0: i32) -> (i32, i32, i32) {
    %c0_i32 = arith.constant 0 : i32
    %c0_i32_0 = arith.constant 0 : i32
    %c0_i32_1 = arith.constant 0 : i32
    return %arg0, %c0_i32, %c0_i32_0 : i32, i32, i32
  }
  func.func @transform_1(%arg0: i32) -> (i32, i32, i32) {
    %c0_i32 = arith.constant 0 : i32
    %c0_i32_0 = arith.constant 0 : i32
    %c0_i32_1 = arith.constant 0 : i32
    %c0_i32_2 = arith.constant 0 : i32
    return %c0_i32, %c0_i32_0, %c0_i32_1 : i32, i32, i32
  }
  func.func @transform_2(%arg0: i32) -> (i32, i32) {
    %c0_i32 = arith.constant 0 : i32
    %c0_i32_0 = arith.constant 0 : i32
    %c0_i32_1 = arith.constant 0 : i32
    return %c0_i32, %c0_i32_0 : i32, i32
  }
  func.func @transform_3(%arg0: i32) -> (i32, i32, i32) {
    %c0_i32 = arith.constant 0 : i32
    %c0_i32_0 = arith.constant 0 : i32
    %c0_i32_1 = arith.constant 0 : i32
    return %arg0, %c0_i32, %c0_i32_0 : i32, i32, i32
  }
}

module attributes {stable_mosaic.version = 11 : i64} {
  func.func @_conv_shift_kernel(%arg0: i32, %arg1: memref<1x25x64xbf16, #tpu.memory_space<vmem>>, %arg2: memref<4x64x24xbf16, #tpu.memory_space<vmem>>, %arg3: memref<1x24xf32, #tpu.memory_space<vmem>>, %arg4: memref<1x19x24xbf16, #tpu.memory_space<vmem>>) attributes {dimension_semantics = [#tpu.dimension_semantics<parallel>], iteration_bounds = array<i64: 2>, scalar_prefetch = 0 : i64, scratch_operands = 0 : i64, tpu.core_type = #tpu.core_type<tc>, window_params = [{transform_indices = @transform_0, window_bounds = array<i64: 1, 25, 64>}, {pipeline_mode = #tpu.pipeline_mode<synchronous>, transform_indices = @transform_1, window_bounds = array<i64: 4, 64, 24>}, {pipeline_mode = #tpu.pipeline_mode<synchronous>, transform_indices = @transform_2, window_bounds = array<i64: 1, 24>}, {transform_indices = @transform_3, window_bounds = array<i64: 1, 19, 24>}]} {
    %c0 = arith.constant 0 : index
    %c0_0 = arith.constant 0 : index
    %c0_1 = arith.constant 0 : index
    %0 = vector.load %arg1[%c0, %c0_0, %c0_1] : memref<1x25x64xbf16, #tpu.memory_space<vmem>>, vector<1x25x64xbf16>
    %1 = vector.shape_cast %0 : vector<1x25x64xbf16> to vector<25x64xbf16>
    %cst = arith.constant 0.000000e+00 : f32
    %2 = vector.broadcast %cst : f32 to vector<19x24xf32>
    %3 = vector.extract_strided_slice %1 {offsets = [0, 0], sizes = [19, 64], strides = [1, 1]} : vector<25x64xbf16> to vector<19x64xbf16>
    %c0_2 = arith.constant 0 : index
    %c0_3 = arith.constant 0 : index
    %c0_4 = arith.constant 0 : index
    %4 = vector.load %arg2[%c0_2, %c0_3, %c0_4] : memref<4x64x24xbf16, #tpu.memory_space<vmem>>, vector<1x64x24xbf16>
    %5 = vector.shape_cast %4 : vector<1x64x24xbf16> to vector<64x24xbf16>
    %cst_5 = arith.constant dense<0.000000e+00> : vector<19x24xf32>
    %6 = tpu.matmul %3, %5, %cst_5 {dimension_numbers = #tpu.dot_dimension_numbers<[1], [0], [0], [1], [0, 0, 1, 1], [], []>} : vector<19x64xbf16>, vector<64x24xbf16>, vector<19x24xf32> -> vector<19x24xf32>
    %7 = arith.addf %2, %6 : vector<19x24xf32>
    %8 = vector.extract_strided_slice %1 {offsets = [1, 0], sizes = [19, 64], strides = [1, 1]} : vector<25x64xbf16> to vector<19x64xbf16>
    %c1 = arith.constant 1 : index
    %c0_6 = arith.constant 0 : index
    %c0_7 = arith.constant 0 : index
    %9 = vector.load %arg2[%c1, %c0_6, %c0_7] : memref<4x64x24xbf16, #tpu.memory_space<vmem>>, vector<1x64x24xbf16>
    %10 = vector.shape_cast %9 : vector<1x64x24xbf16> to vector<64x24xbf16>
    %cst_8 = arith.constant dense<0.000000e+00> : vector<19x24xf32>
    %11 = tpu.matmul %8, %10, %cst_8 {dimension_numbers = #tpu.dot_dimension_numbers<[1], [0], [0], [1], [0, 0, 1, 1], [], []>} : vector<19x64xbf16>, vector<64x24xbf16>, vector<19x24xf32> -> vector<19x24xf32>
    %12 = arith.addf %7, %11 : vector<19x24xf32>
    %13 = vector.extract_strided_slice %1 {offsets = [5, 0], sizes = [19, 64], strides = [1, 1]} : vector<25x64xbf16> to vector<19x64xbf16>
    %c2 = arith.constant 2 : index
    %c0_9 = arith.constant 0 : index
    %c0_10 = arith.constant 0 : index
    %14 = vector.load %arg2[%c2, %c0_9, %c0_10] : memref<4x64x24xbf16, #tpu.memory_space<vmem>>, vector<1x64x24xbf16>
    %15 = vector.shape_cast %14 : vector<1x64x24xbf16> to vector<64x24xbf16>
    %cst_11 = arith.constant dense<0.000000e+00> : vector<19x24xf32>
    %16 = tpu.matmul %13, %15, %cst_11 {dimension_numbers = #tpu.dot_dimension_numbers<[1], [0], [0], [1], [0, 0, 1, 1], [], []>} : vector<19x64xbf16>, vector<64x24xbf16>, vector<19x24xf32> -> vector<19x24xf32>
    %17 = arith.addf %12, %16 : vector<19x24xf32>
    %18 = vector.extract_strided_slice %1 {offsets = [6, 0], sizes = [19, 64], strides = [1, 1]} : vector<25x64xbf16> to vector<19x64xbf16>
    %c3 = arith.constant 3 : index
    %c0_12 = arith.constant 0 : index
    %c0_13 = arith.constant 0 : index
    %19 = vector.load %arg2[%c3, %c0_12, %c0_13] : memref<4x64x24xbf16, #tpu.memory_space<vmem>>, vector<1x64x24xbf16>
    %20 = vector.shape_cast %19 : vector<1x64x24xbf16> to vector<64x24xbf16>
    %cst_14 = arith.constant dense<0.000000e+00> : vector<19x24xf32>
    %21 = tpu.matmul %18, %20, %cst_14 {dimension_numbers = #tpu.dot_dimension_numbers<[1], [0], [0], [1], [0, 0, 1, 1], [], []>} : vector<19x64xbf16>, vector<64x24xbf16>, vector<19x24xf32> -> vector<19x24xf32>
    %22 = arith.addf %17, %21 : vector<19x24xf32>
    %c0_15 = arith.constant 0 : index
    %c0_16 = arith.constant 0 : index
    %23 = vector.load %arg3[%c0_15, %c0_16] : memref<1x24xf32, #tpu.memory_space<vmem>>, vector<1x24xf32>
    %24 = vector.broadcast %23 : vector<1x24xf32> to vector<19x24xf32>
    %25 = arith.addf %22, %24 : vector<19x24xf32>
    %cst_17 = arith.constant 0.000000e+00 : f32
    %26 = vector.broadcast %cst_17 : f32 to vector<19x24xf32>
    %27 = arith.maximumf %25, %26 : vector<19x24xf32>
    %28 = vector.shape_cast %27 : vector<19x24xf32> to vector<1x19x24xf32>
    %29 = arith.truncf %28 : vector<1x19x24xf32> to vector<1x19x24xbf16>
    %c0_18 = arith.constant 0 : index
    %c0_19 = arith.constant 0 : index
    %c0_20 = arith.constant 0 : index
    %30 = vector.load %arg4[%c0_18, %c0_19, %c0_20] : memref<1x19x24xbf16, #tpu.memory_space<vmem>>, vector<1x19x24xbf16>
    tpu.vector_store %arg4[%c0_18, %c0_19, %c0_20], %29 {strides = array<i32>} : memref<1x19x24xbf16, #tpu.memory_space<vmem>>, vector<1x19x24xbf16>,
    return
  }
  func.func @transform_0(%arg0: i32) -> (i32, i32, i32) {
    %c0_i32 = arith.constant 0 : i32
    %c0_i32_0 = arith.constant 0 : i32
    %c0_i32_1 = arith.constant 0 : i32
    return %arg0, %c0_i32, %c0_i32_0 : i32, i32, i32
  }
  func.func @transform_1(%arg0: i32) -> (i32, i32, i32) {
    %c0_i32 = arith.constant 0 : i32
    %c0_i32_0 = arith.constant 0 : i32
    %c0_i32_1 = arith.constant 0 : i32
    %c0_i32_2 = arith.constant 0 : i32
    return %c0_i32, %c0_i32_0, %c0_i32_1 : i32, i32, i32
  }
  func.func @transform_2(%arg0: i32) -> (i32, i32) {
    %c0_i32 = arith.constant 0 : i32
    %c0_i32_0 = arith.constant 0 : i32
    %c0_i32_1 = arith.constant 0 : i32
    return %c0_i32, %c0_i32_0 : i32, i32
  }
  func.func @transform_3(%arg0: i32) -> (i32, i32, i32) {
    %c0_i32 = arith.constant 0 : i32
    %c0_i32_0 = arith.constant 0 : i32
    %c0_i32_1 = arith.constant 0 : i32
    return %arg0, %c0_i32, %c0_i32_0 : i32, i32, i32
  }
}

module attributes {stable_mosaic.version = 11 : i64} {
  func.func @_conv_shift_kernel(%arg0: i32, %arg1: memref<1x9x96xbf16, #tpu.memory_space<vmem>>, %arg2: memref<4x96x32xbf16, #tpu.memory_space<vmem>>, %arg3: memref<1x32xf32, #tpu.memory_space<vmem>>, %arg4: memref<1x5x32xbf16, #tpu.memory_space<vmem>>) attributes {dimension_semantics = [#tpu.dimension_semantics<parallel>], iteration_bounds = array<i64: 2>, scalar_prefetch = 0 : i64, scratch_operands = 0 : i64, tpu.core_type = #tpu.core_type<tc>, window_params = [{transform_indices = @transform_0, window_bounds = array<i64: 1, 9, 96>}, {pipeline_mode = #tpu.pipeline_mode<synchronous>, transform_indices = @transform_1, window_bounds = array<i64: 4, 96, 32>}, {pipeline_mode = #tpu.pipeline_mode<synchronous>, transform_indices = @transform_2, window_bounds = array<i64: 1, 32>}, {transform_indices = @transform_3, window_bounds = array<i64: 1, 5, 32>}]} {
    %c0 = arith.constant 0 : index
    %c0_0 = arith.constant 0 : index
    %c0_1 = arith.constant 0 : index
    %0 = vector.load %arg1[%c0, %c0_0, %c0_1] : memref<1x9x96xbf16, #tpu.memory_space<vmem>>, vector<1x9x96xbf16>
    %1 = vector.shape_cast %0 : vector<1x9x96xbf16> to vector<9x96xbf16>
    %cst = arith.constant 0.000000e+00 : f32
    %2 = vector.broadcast %cst : f32 to vector<5x32xf32>
    %3 = vector.extract_strided_slice %1 {offsets = [0, 0], sizes = [5, 96], strides = [1, 1]} : vector<9x96xbf16> to vector<5x96xbf16>
    %c0_2 = arith.constant 0 : index
    %c0_3 = arith.constant 0 : index
    %c0_4 = arith.constant 0 : index
    %4 = vector.load %arg2[%c0_2, %c0_3, %c0_4] : memref<4x96x32xbf16, #tpu.memory_space<vmem>>, vector<1x96x32xbf16>
    %5 = vector.shape_cast %4 : vector<1x96x32xbf16> to vector<96x32xbf16>
    %cst_5 = arith.constant dense<0.000000e+00> : vector<5x32xf32>
    %6 = tpu.matmul %3, %5, %cst_5 {dimension_numbers = #tpu.dot_dimension_numbers<[1], [0], [0], [1], [0, 0, 1, 1], [], []>} : vector<5x96xbf16>, vector<96x32xbf16>, vector<5x32xf32> -> vector<5x32xf32>
    %7 = arith.addf %2, %6 : vector<5x32xf32>
    %8 = vector.extract_strided_slice %1 {offsets = [1, 0], sizes = [5, 96], strides = [1, 1]} : vector<9x96xbf16> to vector<5x96xbf16>
    %c1 = arith.constant 1 : index
    %c0_6 = arith.constant 0 : index
    %c0_7 = arith.constant 0 : index
    %9 = vector.load %arg2[%c1, %c0_6, %c0_7] : memref<4x96x32xbf16, #tpu.memory_space<vmem>>, vector<1x96x32xbf16>
    %10 = vector.shape_cast %9 : vector<1x96x32xbf16> to vector<96x32xbf16>
    %cst_8 = arith.constant dense<0.000000e+00> : vector<5x32xf32>
    %11 = tpu.matmul %8, %10, %cst_8 {dimension_numbers = #tpu.dot_dimension_numbers<[1], [0], [0], [1], [0, 0, 1, 1], [], []>} : vector<5x96xbf16>, vector<96x32xbf16>, vector<5x32xf32> -> vector<5x32xf32>
    %12 = arith.addf %7, %11 : vector<5x32xf32>
    %13 = vector.extract_strided_slice %1 {offsets = [3, 0], sizes = [5, 96], strides = [1, 1]} : vector<9x96xbf16> to vector<5x96xbf16>
    %c2 = arith.constant 2 : index
    %c0_9 = arith.constant 0 : index
    %c0_10 = arith.constant 0 : index
    %14 = vector.load %arg2[%c2, %c0_9, %c0_10] : memref<4x96x32xbf16, #tpu.memory_space<vmem>>, vector<1x96x32xbf16>
    %15 = vector.shape_cast %14 : vector<1x96x32xbf16> to vector<96x32xbf16>
    %cst_11 = arith.constant dense<0.000000e+00> : vector<5x32xf32>
    %16 = tpu.matmul %13, %15, %cst_11 {dimension_numbers = #tpu.dot_dimension_numbers<[1], [0], [0], [1], [0, 0, 1, 1], [], []>} : vector<5x96xbf16>, vector<96x32xbf16>, vector<5x32xf32> -> vector<5x32xf32>
    %17 = arith.addf %12, %16 : vector<5x32xf32>
    %18 = vector.extract_strided_slice %1 {offsets = [4, 0], sizes = [5, 96], strides = [1, 1]} : vector<9x96xbf16> to vector<5x96xbf16>
    %c3 = arith.constant 3 : index
    %c0_12 = arith.constant 0 : index
    %c0_13 = arith.constant 0 : index
    %19 = vector.load %arg2[%c3, %c0_12, %c0_13] : memref<4x96x32xbf16, #tpu.memory_space<vmem>>, vector<1x96x32xbf16>
    %20 = vector.shape_cast %19 : vector<1x96x32xbf16> to vector<96x32xbf16>
    %cst_14 = arith.constant dense<0.000000e+00> : vector<5x32xf32>
    %21 = tpu.matmul %18, %20, %cst_14 {dimension_numbers = #tpu.dot_dimension_numbers<[1], [0], [0], [1], [0, 0, 1, 1], [], []>} : vector<5x96xbf16>, vector<96x32xbf16>, vector<5x32xf32> -> vector<5x32xf32>
    %22 = arith.addf %17, %21 : vector<5x32xf32>
    %c0_15 = arith.constant 0 : index
    %c0_16 = arith.constant 0 : index
    %23 = vector.load %arg3[%c0_15, %c0_16] : memref<1x32xf32, #tpu.memory_space<vmem>>, vector<1x32xf32>
    %24 = vector.broadcast %23 : vector<1x32xf32> to vector<5x32xf32>
    %25 = arith.addf %22, %24 : vector<5x32xf32>
    %cst_17 = arith.constant 0.000000e+00 : f32
    %26 = vector.broadcast %cst_17 : f32 to vector<5x32xf32>
    %27 = arith.maximumf %25, %26 : vector<5x32xf32>
    %28 = vector.shape_cast %27 : vector<5x32xf32> to vector<1x5x32xf32>
    %29 = arith.truncf %28 : vector<1x5x32xf32> to vector<1x5x32xbf16>
    %c0_18 = arith.constant 0 : index
    %c0_19 = arith.constant 0 : index
    %c0_20 = arith.constant 0 : index
    %30 = vector.load %arg4[%c0_18, %c0_19, %c0_20] : memref<1x5x32xbf16, #tpu.memory_space<vmem>>, vector<1x5x32xbf16>
    tpu.vector_store %arg4[%c0_18, %c0_19, %c0_20], %29 {strides = array<i32>} : memref<1x5x32xbf16, #tpu.memory_space<vmem>>, vector<1x5x32xbf16>,
    return
  }
  func.func @transform_0(%arg0: i32) -> (i32, i32, i32) {
    %c0_i32 = arith.constant 0 : i32
    %c0_i32_0 = arith.constant 0 : i32
    %c0_i32_1 = arith.constant 0 : i32
    return %arg0, %c0_i32, %c0_i32_0 : i32, i32, i32
  }
  func.func @transform_1(%arg0: i32) -> (i32, i32, i32) {
    %c0_i32 = arith.constant 0 : i32
    %c0_i32_0 = arith.constant 0 : i32
    %c0_i32_1 = arith.constant 0 : i32
    %c0_i32_2 = arith.constant 0 : i32
    return %c0_i32, %c0_i32_0, %c0_i32_1 : i32, i32, i32
  }
  func.func @transform_2(%arg0: i32) -> (i32, i32) {
    %c0_i32 = arith.constant 0 : i32
    %c0_i32_0 = arith.constant 0 : i32
    %c0_i32_1 = arith.constant 0 : i32
    return %c0_i32, %c0_i32_0 : i32, i32
  }
  func.func @transform_3(%arg0: i32) -> (i32, i32, i32) {
    %c0_i32 = arith.constant 0 : i32
    %c0_i32_0 = arith.constant 0 : i32
    %c0_i32_1 = arith.constant 0 : i32
    return %arg0, %c0_i32, %c0_i32_0 : i32, i32, i32
  }
}

module attributes {stable_mosaic.version = 11 : i64} {
  func.func @_conv_shift_kernel(%arg0: i32, %arg1: memref<1x4x128xbf16, #tpu.memory_space<vmem>>, %arg2: memref<4x128x40xbf16, #tpu.memory_space<vmem>>, %arg3: memref<1x40xf32, #tpu.memory_space<vmem>>, %arg4: memref<1x1x40xbf16, #tpu.memory_space<vmem>>) attributes {dimension_semantics = [#tpu.dimension_semantics<parallel>], iteration_bounds = array<i64: 2>, scalar_prefetch = 0 : i64, scratch_operands = 0 : i64, tpu.core_type = #tpu.core_type<tc>, window_params = [{transform_indices = @transform_0, window_bounds = array<i64: 1, 4, 128>}, {pipeline_mode = #tpu.pipeline_mode<synchronous>, transform_indices = @transform_1, window_bounds = array<i64: 4, 128, 40>}, {pipeline_mode = #tpu.pipeline_mode<synchronous>, transform_indices = @transform_2, window_bounds = array<i64: 1, 40>}, {transform_indices = @transform_3, window_bounds = array<i64: 1, 1, 40>}]} {
    %c0 = arith.constant 0 : index
    %c0_0 = arith.constant 0 : index
    %c0_1 = arith.constant 0 : index
    %0 = vector.load %arg1[%c0, %c0_0, %c0_1] : memref<1x4x128xbf16, #tpu.memory_space<vmem>>, vector<1x4x128xbf16>
    %1 = vector.shape_cast %0 : vector<1x4x128xbf16> to vector<4x128xbf16>
    %cst = arith.constant 0.000000e+00 : f32
    %2 = vector.broadcast %cst : f32 to vector<1x40xf32>
    %3 = vector.extract_strided_slice %1 {offsets = [0, 0], sizes = [1, 128], strides = [1, 1]} : vector<4x128xbf16> to vector<1x128xbf16>
    %c0_2 = arith.constant 0 : index
    %c0_3 = arith.constant 0 : index
    %c0_4 = arith.constant 0 : index
    %4 = vector.load %arg2[%c0_2, %c0_3, %c0_4] : memref<4x128x40xbf16, #tpu.memory_space<vmem>>, vector<1x128x40xbf16>
    %5 = vector.shape_cast %4 : vector<1x128x40xbf16> to vector<128x40xbf16>
    %cst_5 = arith.constant dense<0.000000e+00> : vector<1x40xf32>
    %6 = tpu.matmul %3, %5, %cst_5 {dimension_numbers = #tpu.dot_dimension_numbers<[1], [0], [0], [1], [0, 0, 1, 1], [], []>} : vector<1x128xbf16>, vector<128x40xbf16>, vector<1x40xf32> -> vector<1x40xf32>
    %7 = arith.addf %2, %6 : vector<1x40xf32>
    %8 = vector.extract_strided_slice %1 {offsets = [1, 0], sizes = [1, 128], strides = [1, 1]} : vector<4x128xbf16> to vector<1x128xbf16>
    %c1 = arith.constant 1 : index
    %c0_6 = arith.constant 0 : index
    %c0_7 = arith.constant 0 : index
    %9 = vector.load %arg2[%c1, %c0_6, %c0_7] : memref<4x128x40xbf16, #tpu.memory_space<vmem>>, vector<1x128x40xbf16>
    %10 = vector.shape_cast %9 : vector<1x128x40xbf16> to vector<128x40xbf16>
    %cst_8 = arith.constant dense<0.000000e+00> : vector<1x40xf32>
    %11 = tpu.matmul %8, %10, %cst_8 {dimension_numbers = #tpu.dot_dimension_numbers<[1], [0], [0], [1], [0, 0, 1, 1], [], []>} : vector<1x128xbf16>, vector<128x40xbf16>, vector<1x40xf32> -> vector<1x40xf32>
    %12 = arith.addf %7, %11 : vector<1x40xf32>
    %13 = vector.extract_strided_slice %1 {offsets = [2, 0], sizes = [1, 128], strides = [1, 1]} : vector<4x128xbf16> to vector<1x128xbf16>
    %c2 = arith.constant 2 : index
    %c0_9 = arith.constant 0 : index
    %c0_10 = arith.constant 0 : index
    %14 = vector.load %arg2[%c2, %c0_9, %c0_10] : memref<4x128x40xbf16, #tpu.memory_space<vmem>>, vector<1x128x40xbf16>
    %15 = vector.shape_cast %14 : vector<1x128x40xbf16> to vector<128x40xbf16>
    %cst_11 = arith.constant dense<0.000000e+00> : vector<1x40xf32>
    %16 = tpu.matmul %13, %15, %cst_11 {dimension_numbers = #tpu.dot_dimension_numbers<[1], [0], [0], [1], [0, 0, 1, 1], [], []>} : vector<1x128xbf16>, vector<128x40xbf16>, vector<1x40xf32> -> vector<1x40xf32>
    %17 = arith.addf %12, %16 : vector<1x40xf32>
    %18 = vector.extract_strided_slice %1 {offsets = [3, 0], sizes = [1, 128], strides = [1, 1]} : vector<4x128xbf16> to vector<1x128xbf16>
    %c3 = arith.constant 3 : index
    %c0_12 = arith.constant 0 : index
    %c0_13 = arith.constant 0 : index
    %19 = vector.load %arg2[%c3, %c0_12, %c0_13] : memref<4x128x40xbf16, #tpu.memory_space<vmem>>, vector<1x128x40xbf16>
    %20 = vector.shape_cast %19 : vector<1x128x40xbf16> to vector<128x40xbf16>
    %cst_14 = arith.constant dense<0.000000e+00> : vector<1x40xf32>
    %21 = tpu.matmul %18, %20, %cst_14 {dimension_numbers = #tpu.dot_dimension_numbers<[1], [0], [0], [1], [0, 0, 1, 1], [], []>} : vector<1x128xbf16>, vector<128x40xbf16>, vector<1x40xf32> -> vector<1x40xf32>
    %22 = arith.addf %17, %21 : vector<1x40xf32>
    %c0_15 = arith.constant 0 : index
    %c0_16 = arith.constant 0 : index
    %23 = vector.load %arg3[%c0_15, %c0_16] : memref<1x40xf32, #tpu.memory_space<vmem>>, vector<1x40xf32>
    %24 = arith.addf %22, %23 : vector<1x40xf32>
    %cst_17 = arith.constant 0.000000e+00 : f32
    %25 = vector.broadcast %cst_17 : f32 to vector<1x40xf32>
    %26 = arith.maximumf %24, %25 : vector<1x40xf32>
    %27 = vector.shape_cast %26 : vector<1x40xf32> to vector<1x1x40xf32>
    %28 = arith.truncf %27 : vector<1x1x40xf32> to vector<1x1x40xbf16>
    %c0_18 = arith.constant 0 : index
    %c0_19 = arith.constant 0 : index
    %c0_20 = arith.constant 0 : index
    %29 = vector.load %arg4[%c0_18, %c0_19, %c0_20] : memref<1x1x40xbf16, #tpu.memory_space<vmem>>, vector<1x1x40xbf16>
    tpu.vector_store %arg4[%c0_18, %c0_19, %c0_20], %28 {strides = array<i32>} : memref<1x1x40xbf16, #tpu.memory_space<vmem>>, vector<1x1x40xbf16>,
    return
  }
  func.func @transform_0(%arg0: i32) -> (i32, i32, i32) {
    %c0_i32 = arith.constant 0 : i32
    %c0_i32_0 = arith.constant 0 : i32
    %c0_i32_1 = arith.constant 0 : i32
    return %arg0, %c0_i32, %c0_i32_0 : i32, i32, i32
  }
  func.func @transform_1(%arg0: i32) -> (i32, i32, i32) {
    %c0_i32 = arith.constant 0 : i32
    %c0_i32_0 = arith.constant 0 : i32
    %c0_i32_1 = arith.constant 0 : i32
    %c0_i32_2 = arith.constant 0 : i32
    return %c0_i32, %c0_i32_0, %c0_i32_1 : i32, i32, i32
  }
  func.func @transform_2(%arg0: i32) -> (i32, i32) {
    %c0_i32 = arith.constant 0 : i32
    %c0_i32_0 = arith.constant 0 : i32
    %c0_i32_1 = arith.constant 0 : i32
    return %c0_i32, %c0_i32_0 : i32, i32
  }
  func.func @transform_3(%arg0: i32) -> (i32, i32, i32) {
    %c0_i32 = arith.constant 0 : i32
    %c0_i32_0 = arith.constant 0 : i32
    %c0_i32_1 = arith.constant 0 : i32
    return %arg0, %c0_i32, %c0_i32_0 : i32, i32, i32
  }
}

module attributes {stable_mosaic.version = 11 : i64} {
  func.func @_matmul_bias_kernel(%arg0: i32, %arg1: memref<2x40xbf16, #tpu.memory_space<vmem>>, %arg2: memref<40x32xbf16, #tpu.memory_space<vmem>>, %arg3: memref<1x32xf32, #tpu.memory_space<vmem>>, %arg4: memref<2x32xbf16, #tpu.memory_space<vmem>>) attributes {dimension_semantics = [#tpu.dimension_semantics<parallel>], iteration_bounds = array<i64: 1>, scalar_prefetch = 0 : i64, scratch_operands = 0 : i64, tpu.core_type = #tpu.core_type<tc>, window_params = [{transform_indices = @transform_0, window_bounds = array<i64: 2, 40>}, {pipeline_mode = #tpu.pipeline_mode<synchronous>, transform_indices = @transform_1, window_bounds = array<i64: 40, 32>}, {pipeline_mode = #tpu.pipeline_mode<synchronous>, transform_indices = @transform_2, window_bounds = array<i64: 1, 32>}, {transform_indices = @transform_3, window_bounds = array<i64: 2, 32>}]} {
    %c0 = arith.constant 0 : index
    %c0_0 = arith.constant 0 : index
    %0 = vector.load %arg1[%c0, %c0_0] : memref<2x40xbf16, #tpu.memory_space<vmem>>, vector<2x40xbf16>
    %c0_1 = arith.constant 0 : index
    %c0_2 = arith.constant 0 : index
    %1 = vector.load %arg2[%c0_1, %c0_2] : memref<40x32xbf16, #tpu.memory_space<vmem>>, vector<40x32xbf16>
    %cst = arith.constant dense<0.000000e+00> : vector<2x32xf32>
    %2 = tpu.matmul %0, %1, %cst {dimension_numbers = #tpu.dot_dimension_numbers<[1], [0], [0], [1], [0, 0, 1, 1], [], []>} : vector<2x40xbf16>, vector<40x32xbf16>, vector<2x32xf32> -> vector<2x32xf32>
    %c0_3 = arith.constant 0 : index
    %c0_4 = arith.constant 0 : index
    %3 = vector.load %arg3[%c0_3, %c0_4] : memref<1x32xf32, #tpu.memory_space<vmem>>, vector<1x32xf32>
    %4 = vector.broadcast %3 : vector<1x32xf32> to vector<2x32xf32>
    %5 = arith.addf %2, %4 : vector<2x32xf32>
    %6 = arith.truncf %5 : vector<2x32xf32> to vector<2x32xbf16>
    %c0_5 = arith.constant 0 : index
    %c0_6 = arith.constant 0 : index
    %7 = vector.load %arg4[%c0_5, %c0_6] : memref<2x32xbf16, #tpu.memory_space<vmem>>, vector<2x32xbf16>
    tpu.vector_store %arg4[%c0_5, %c0_6], %6 {strides = array<i32>} : memref<2x32xbf16, #tpu.memory_space<vmem>>, vector<2x32xbf16>,
    return
  }
  func.func @transform_0(%arg0: i32) -> (i32, i32) {
    %c0_i32 = arith.constant 0 : i32
    %c0_i32_0 = arith.constant 0 : i32
    return %arg0, %c0_i32 : i32, i32
  }
  func.func @transform_1(%arg0: i32) -> (i32, i32) {
    %c0_i32 = arith.constant 0 : i32
    %c0_i32_0 = arith.constant 0 : i32
    %c0_i32_1 = arith.constant 0 : i32
    return %c0_i32, %c0_i32_0 : i32, i32
  }
  func.func @transform_2(%arg0: i32) -> (i32, i32) {
    %c0_i32 = arith.constant 0 : i32
    %c0_i32_0 = arith.constant 0 : i32
    %c0_i32_1 = arith.constant 0 : i32
    return %c0_i32, %c0_i32_0 : i32, i32
  }
  func.func @transform_3(%arg0: i32) -> (i32, i32) {
    %c0_i32 = arith.constant 0 : i32
    %c0_i32_0 = arith.constant 0 : i32
    return %arg0, %c0_i32 : i32, i32
  }
}

module attributes {stable_mosaic.version = 11 : i64} {
  func.func @_matmul_bias_kernel(%arg0: i32, %arg1: memref<8x32xbf16, #tpu.memory_space<vmem>>, %arg2: memref<32x32xbf16, #tpu.memory_space<vmem>>, %arg3: memref<1x32xf32, #tpu.memory_space<vmem>>, %arg4: memref<8x32xbf16, #tpu.memory_space<vmem>>) attributes {dimension_semantics = [#tpu.dimension_semantics<parallel>], iteration_bounds = array<i64: 1>, scalar_prefetch = 0 : i64, scratch_operands = 0 : i64, tpu.core_type = #tpu.core_type<tc>, window_params = [{transform_indices = @transform_0, window_bounds = array<i64: 8, 32>}, {pipeline_mode = #tpu.pipeline_mode<synchronous>, transform_indices = @transform_1, window_bounds = array<i64: 32, 32>}, {pipeline_mode = #tpu.pipeline_mode<synchronous>, transform_indices = @transform_2, window_bounds = array<i64: 1, 32>}, {transform_indices = @transform_3, window_bounds = array<i64: 8, 32>}]} {
    %c0 = arith.constant 0 : index
    %c0_0 = arith.constant 0 : index
    %0 = vector.load %arg1[%c0, %c0_0] : memref<8x32xbf16, #tpu.memory_space<vmem>>, vector<8x32xbf16>
    %c0_1 = arith.constant 0 : index
    %c0_2 = arith.constant 0 : index
    %1 = vector.load %arg2[%c0_1, %c0_2] : memref<32x32xbf16, #tpu.memory_space<vmem>>, vector<32x32xbf16>
    %cst = arith.constant dense<0.000000e+00> : vector<8x32xf32>
    %2 = tpu.matmul %0, %1, %cst {dimension_numbers = #tpu.dot_dimension_numbers<[1], [0], [0], [1], [0, 0, 1, 1], [], []>} : vector<8x32xbf16>, vector<32x32xbf16>, vector<8x32xf32> -> vector<8x32xf32>
    %c0_3 = arith.constant 0 : index
    %c0_4 = arith.constant 0 : index
    %3 = vector.load %arg3[%c0_3, %c0_4] : memref<1x32xf32, #tpu.memory_space<vmem>>, vector<1x32xf32>
    %4 = vector.broadcast %3 : vector<1x32xf32> to vector<8x32xf32>
    %5 = arith.addf %2, %4 : vector<8x32xf32>
    %6 = arith.truncf %5 : vector<8x32xf32> to vector<8x32xbf16>
    %c0_5 = arith.constant 0 : index
    %c0_6 = arith.constant 0 : index
    %7 = vector.load %arg4[%c0_5, %c0_6] : memref<8x32xbf16, #tpu.memory_space<vmem>>, vector<8x32xbf16>
    tpu.vector_store %arg4[%c0_5, %c0_6], %6 {strides = array<i32>} : memref<8x32xbf16, #tpu.memory_space<vmem>>, vector<8x32xbf16>,
    return
  }
  func.func @transform_0(%arg0: i32) -> (i32, i32) {
    %c0_i32 = arith.constant 0 : i32
    %c0_i32_0 = arith.constant 0 : i32
    return %arg0, %c0_i32 : i32, i32
  }
  func.func @transform_1(%arg0: i32) -> (i32, i32) {
    %c0_i32 = arith.constant 0 : i32
    %c0_i32_0 = arith.constant 0 : i32
    %c0_i32_1 = arith.constant 0 : i32
    return %c0_i32, %c0_i32_0 : i32, i32
  }
  func.func @transform_2(%arg0: i32) -> (i32, i32) {
    %c0_i32 = arith.constant 0 : i32
    %c0_i32_0 = arith.constant 0 : i32
    %c0_i32_1 = arith.constant 0 : i32
    return %c0_i32, %c0_i32_0 : i32, i32
  }
  func.func @transform_3(%arg0: i32) -> (i32, i32) {
    %c0_i32 = arith.constant 0 : i32
    %c0_i32_0 = arith.constant 0 : i32
    return %arg0, %c0_i32 : i32, i32
  }
}

module attributes {stable_mosaic.version = 11 : i64} {
  func.func @_matmul_bias_kernel(%arg0: i32, %arg1: memref<16x24xbf16, #tpu.memory_space<vmem>>, %arg2: memref<24x32xbf16, #tpu.memory_space<vmem>>, %arg3: memref<1x32xf32, #tpu.memory_space<vmem>>, %arg4: memref<16x32xbf16, #tpu.memory_space<vmem>>) attributes {dimension_semantics = [#tpu.dimension_semantics<parallel>], iteration_bounds = array<i64: 2>, scalar_prefetch = 0 : i64, scratch_operands = 0 : i64, tpu.core_type = #tpu.core_type<tc>, window_params = [{transform_indices = @transform_0, window_bounds = array<i64: 16, 24>}, {pipeline_mode = #tpu.pipeline_mode<synchronous>, transform_indices = @transform_1, window_bounds = array<i64: 24, 32>}, {pipeline_mode = #tpu.pipeline_mode<synchronous>, transform_indices = @transform_2, window_bounds = array<i64: 1, 32>}, {transform_indices = @transform_3, window_bounds = array<i64: 16, 32>}]} {
    %c0 = arith.constant 0 : index
    %c0_0 = arith.constant 0 : index
    %0 = vector.load %arg1[%c0, %c0_0] : memref<16x24xbf16, #tpu.memory_space<vmem>>, vector<16x24xbf16>
    %c0_1 = arith.constant 0 : index
    %c0_2 = arith.constant 0 : index
    %1 = vector.load %arg2[%c0_1, %c0_2] : memref<24x32xbf16, #tpu.memory_space<vmem>>, vector<24x32xbf16>
    %cst = arith.constant dense<0.000000e+00> : vector<16x32xf32>
    %2 = tpu.matmul %0, %1, %cst {dimension_numbers = #tpu.dot_dimension_numbers<[1], [0], [0], [1], [0, 0, 1, 1], [], []>} : vector<16x24xbf16>, vector<24x32xbf16>, vector<16x32xf32> -> vector<16x32xf32>
    %c0_3 = arith.constant 0 : index
    %c0_4 = arith.constant 0 : index
    %3 = vector.load %arg3[%c0_3, %c0_4] : memref<1x32xf32, #tpu.memory_space<vmem>>, vector<1x32xf32>
    %4 = vector.broadcast %3 : vector<1x32xf32> to vector<16x32xf32>
    %5 = arith.addf %2, %4 : vector<16x32xf32>
    %6 = arith.truncf %5 : vector<16x32xf32> to vector<16x32xbf16>
    %c0_5 = arith.constant 0 : index
    %c0_6 = arith.constant 0 : index
    %7 = vector.load %arg4[%c0_5, %c0_6] : memref<16x32xbf16, #tpu.memory_space<vmem>>, vector<16x32xbf16>
    tpu.vector_store %arg4[%c0_5, %c0_6], %6 {strides = array<i32>} : memref<16x32xbf16, #tpu.memory_space<vmem>>, vector<16x32xbf16>,
    return
  }
  func.func @transform_0(%arg0: i32) -> (i32, i32) {
    %c0_i32 = arith.constant 0 : i32
    %c0_i32_0 = arith.constant 0 : i32
    return %arg0, %c0_i32 : i32, i32
  }
  func.func @transform_1(%arg0: i32) -> (i32, i32) {
    %c0_i32 = arith.constant 0 : i32
    %c0_i32_0 = arith.constant 0 : i32
    %c0_i32_1 = arith.constant 0 : i32
    return %c0_i32, %c0_i32_0 : i32, i32
  }
  func.func @transform_2(%arg0: i32) -> (i32, i32) {
    %c0_i32 = arith.constant 0 : i32
    %c0_i32_0 = arith.constant 0 : i32
    %c0_i32_1 = arith.constant 0 : i32
    return %c0_i32, %c0_i32_0 : i32, i32
  }
  func.func @transform_3(%arg0: i32) -> (i32, i32) {
    %c0_i32 = arith.constant 0 : i32
    %c0_i32_0 = arith.constant 0 : i32
    return %arg0, %c0_i32 : i32, i32
  }
}

module attributes {stable_mosaic.version = 11 : i64} {
  func.func @_matmul_bias_kernel(%arg0: i32, %arg1: memref<64x16xbf16, #tpu.memory_space<vmem>>, %arg2: memref<16x32xbf16, #tpu.memory_space<vmem>>, %arg3: memref<1x32xf32, #tpu.memory_space<vmem>>, %arg4: memref<64x32xbf16, #tpu.memory_space<vmem>>) attributes {dimension_semantics = [#tpu.dimension_semantics<parallel>], iteration_bounds = array<i64: 2>, scalar_prefetch = 0 : i64, scratch_operands = 0 : i64, tpu.core_type = #tpu.core_type<tc>, window_params = [{transform_indices = @transform_0, window_bounds = array<i64: 64, 16>}, {pipeline_mode = #tpu.pipeline_mode<synchronous>, transform_indices = @transform_1, window_bounds = array<i64: 16, 32>}, {pipeline_mode = #tpu.pipeline_mode<synchronous>, transform_indices = @transform_2, window_bounds = array<i64: 1, 32>}, {transform_indices = @transform_3, window_bounds = array<i64: 64, 32>}]} {
    %c0 = arith.constant 0 : index
    %c0_0 = arith.constant 0 : index
    %0 = vector.load %arg1[%c0, %c0_0] : memref<64x16xbf16, #tpu.memory_space<vmem>>, vector<64x16xbf16>
    %c0_1 = arith.constant 0 : index
    %c0_2 = arith.constant 0 : index
    %1 = vector.load %arg2[%c0_1, %c0_2] : memref<16x32xbf16, #tpu.memory_space<vmem>>, vector<16x32xbf16>
    %cst = arith.constant dense<0.000000e+00> : vector<64x32xf32>
    %2 = tpu.matmul %0, %1, %cst {dimension_numbers = #tpu.dot_dimension_numbers<[1], [0], [0], [1], [0, 0, 1, 1], [], []>} : vector<64x16xbf16>, vector<16x32xbf16>, vector<64x32xf32> -> vector<64x32xf32>
    %c0_3 = arith.constant 0 : index
    %c0_4 = arith.constant 0 : index
    %3 = vector.load %arg3[%c0_3, %c0_4] : memref<1x32xf32, #tpu.memory_space<vmem>>, vector<1x32xf32>
    %4 = vector.broadcast %3 : vector<1x32xf32> to vector<64x32xf32>
    %5 = arith.addf %2, %4 : vector<64x32xf32>
    %6 = arith.truncf %5 : vector<64x32xf32> to vector<64x32xbf16>
    %c0_5 = arith.constant 0 : index
    %c0_6 = arith.constant 0 : index
    %7 = vector.load %arg4[%c0_5, %c0_6] : memref<64x32xbf16, #tpu.memory_space<vmem>>, vector<64x32xbf16>
    tpu.vector_store %arg4[%c0_5, %c0_6], %6 {strides = array<i32>} : memref<64x32xbf16, #tpu.memory_space<vmem>>, vector<64x32xbf16>,
    return
  }
  func.func @transform_0(%arg0: i32) -> (i32, i32) {
    %c0_i32 = arith.constant 0 : i32
    %c0_i32_0 = arith.constant 0 : i32
    return %arg0, %c0_i32 : i32, i32
  }
  func.func @transform_1(%arg0: i32) -> (i32, i32) {
    %c0_i32 = arith.constant 0 : i32
    %c0_i32_0 = arith.constant 0 : i32
    %c0_i32_1 = arith.constant 0 : i32
    return %c0_i32, %c0_i32_0 : i32, i32
  }
  func.func @transform_2(%arg0: i32) -> (i32, i32) {
    %c0_i32 = arith.constant 0 : i32
    %c0_i32_0 = arith.constant 0 : i32
    %c0_i32_1 = arith.constant 0 : i32
    return %c0_i32, %c0_i32_0 : i32, i32
  }
  func.func @transform_3(%arg0: i32) -> (i32, i32) {
    %c0_i32 = arith.constant 0 : i32
    %c0_i32_0 = arith.constant 0 : i32
    return %arg0, %c0_i32 : i32, i32
  }
}

module attributes {stable_mosaic.version = 11 : i64} {
  func.func @_conv_shift_kernel(%arg0: i32, %arg1: memref<1x100x32xbf16, #tpu.memory_space<vmem>>, %arg2: memref<9x32x8xbf16, #tpu.memory_space<vmem>>, %arg3: memref<1x8xf32, #tpu.memory_space<vmem>>, %arg4: memref<1x78x8xbf16, #tpu.memory_space<vmem>>) attributes {dimension_semantics = [#tpu.dimension_semantics<parallel>], iteration_bounds = array<i64: 2>, scalar_prefetch = 0 : i64, scratch_operands = 0 : i64, tpu.core_type = #tpu.core_type<tc>, window_params = [{transform_indices = @transform_0, window_bounds = array<i64: 1, 100, 32>}, {pipeline_mode = #tpu.pipeline_mode<synchronous>, transform_indices = @transform_1, window_bounds = array<i64: 9, 32, 8>}, {pipeline_mode = #tpu.pipeline_mode<synchronous>, transform_indices = @transform_2, window_bounds = array<i64: 1, 8>}, {transform_indices = @transform_3, window_bounds = array<i64: 1, 78, 8>}]} {
    %c0 = arith.constant 0 : index
    %c0_0 = arith.constant 0 : index
    %c0_1 = arith.constant 0 : index
    %0 = vector.load %arg1[%c0, %c0_0, %c0_1] : memref<1x100x32xbf16, #tpu.memory_space<vmem>>, vector<1x100x32xbf16>
    %1 = vector.shape_cast %0 : vector<1x100x32xbf16> to vector<100x32xbf16>
    %cst = arith.constant 0.000000e+00 : f32
    %2 = vector.broadcast %cst : f32 to vector<78x8xf32>
    %3 = vector.extract_strided_slice %1 {offsets = [0, 0], sizes = [78, 32], strides = [1, 1]} : vector<100x32xbf16> to vector<78x32xbf16>
    %c0_2 = arith.constant 0 : index
    %c0_3 = arith.constant 0 : index
    %c0_4 = arith.constant 0 : index
    %4 = vector.load %arg2[%c0_2, %c0_3, %c0_4] : memref<9x32x8xbf16, #tpu.memory_space<vmem>>, vector<1x32x8xbf16>
    %5 = vector.shape_cast %4 : vector<1x32x8xbf16> to vector<32x8xbf16>
    %cst_5 = arith.constant dense<0.000000e+00> : vector<78x8xf32>
    %6 = tpu.matmul %3, %5, %cst_5 {dimension_numbers = #tpu.dot_dimension_numbers<[1], [0], [0], [1], [0, 0, 1, 1], [], []>} : vector<78x32xbf16>, vector<32x8xbf16>, vector<78x8xf32> -> vector<78x8xf32>
    %7 = arith.addf %2, %6 : vector<78x8xf32>
    %8 = vector.extract_strided_slice %1 {offsets = [1, 0], sizes = [78, 32], strides = [1, 1]} : vector<100x32xbf16> to vector<78x32xbf16>
    %c1 = arith.constant 1 : index
    %c0_6 = arith.constant 0 : index
    %c0_7 = arith.constant 0 : index
    %9 = vector.load %arg2[%c1, %c0_6, %c0_7] : memref<9x32x8xbf16, #tpu.memory_space<vmem>>, vector<1x32x8xbf16>
    %10 = vector.shape_cast %9 : vector<1x32x8xbf16> to vector<32x8xbf16>
    %cst_8 = arith.constant dense<0.000000e+00> : vector<78x8xf32>
    %11 = tpu.matmul %8, %10, %cst_8 {dimension_numbers = #tpu.dot_dimension_numbers<[1], [0], [0], [1], [0, 0, 1, 1], [], []>} : vector<78x32xbf16>, vector<32x8xbf16>, vector<78x8xf32> -> vector<78x8xf32>
    %12 = arith.addf %7, %11 : vector<78x8xf32>
    %13 = vector.extract_strided_slice %1 {offsets = [2, 0], sizes = [78, 32], strides = [1, 1]} : vector<100x32xbf16> to vector<78x32xbf16>
    %c2 = arith.constant 2 : index
    %c0_9 = arith.constant 0 : index
    %c0_10 = arith.constant 0 : index
    %14 = vector.load %arg2[%c2, %c0_9, %c0_10] : memref<9x32x8xbf16, #tpu.memory_space<vmem>>, vector<1x32x8xbf16>
    %15 = vector.shape_cast %14 : vector<1x32x8xbf16> to vector<32x8xbf16>
    %cst_11 = arith.constant dense<0.000000e+00> : vector<78x8xf32>
    %16 = tpu.matmul %13, %15, %cst_11 {dimension_numbers = #tpu.dot_dimension_numbers<[1], [0], [0], [1], [0, 0, 1, 1], [], []>} : vector<78x32xbf16>, vector<32x8xbf16>, vector<78x8xf32> -> vector<78x8xf32>
    %17 = arith.addf %12, %16 : vector<78x8xf32>
    %18 = vector.extract_strided_slice %1 {offsets = [10, 0], sizes = [78, 32], strides = [1, 1]} : vector<100x32xbf16> to vector<78x32xbf16>
    %c3 = arith.constant 3 : index
    %c0_12 = arith.constant 0 : index
    %c0_13 = arith.constant 0 : index
    %19 = vector.load %arg2[%c3, %c0_12, %c0_13] : memref<9x32x8xbf16, #tpu.memory_space<vmem>>, vector<1x32x8xbf16>
    %20 = vector.shape_cast %19 : vector<1x32x8xbf16> to vector<32x8xbf16>
    %cst_14 = arith.constant dense<0.000000e+00> : vector<78x8xf32>
    %21 = tpu.matmul %18, %20, %cst_14 {dimension_numbers = #tpu.dot_dimension_numbers<[1], [0], [0], [1], [0, 0, 1, 1], [], []>} : vector<78x32xbf16>, vector<32x8xbf16>, vector<78x8xf32> -> vector<78x8xf32>
    %22 = arith.addf %17, %21 : vector<78x8xf32>
    %23 = vector.extract_strided_slice %1 {offsets = [11, 0], sizes = [78, 32], strides = [1, 1]} : vector<100x32xbf16> to vector<78x32xbf16>
    %c4 = arith.constant 4 : index
    %c0_15 = arith.constant 0 : index
    %c0_16 = arith.constant 0 : index
    %24 = vector.load %arg2[%c4, %c0_15, %c0_16] : memref<9x32x8xbf16, #tpu.memory_space<vmem>>, vector<1x32x8xbf16>
    %25 = vector.shape_cast %24 : vector<1x32x8xbf16> to vector<32x8xbf16>
    %cst_17 = arith.constant dense<0.000000e+00> : vector<78x8xf32>
    %26 = tpu.matmul %23, %25, %cst_17 {dimension_numbers = #tpu.dot_dimension_numbers<[1], [0], [0], [1], [0, 0, 1, 1], [], []>} : vector<78x32xbf16>, vector<32x8xbf16>, vector<78x8xf32> -> vector<78x8xf32>
    %27 = arith.addf %22, %26 : vector<78x8xf32>
    %28 = vector.extract_strided_slice %1 {offsets = [12, 0], sizes = [78, 32], strides = [1, 1]} : vector<100x32xbf16> to vector<78x32xbf16>
    %c5 = arith.constant 5 : index
    %c0_18 = arith.constant 0 : index
    %c0_19 = arith.constant 0 : index
    %29 = vector.load %arg2[%c5, %c0_18, %c0_19] : memref<9x32x8xbf16, #tpu.memory_space<vmem>>, vector<1x32x8xbf16>
    %30 = vector.shape_cast %29 : vector<1x32x8xbf16> to vector<32x8xbf16>
    %cst_20 = arith.constant dense<0.000000e+00> : vector<78x8xf32>
    %31 = tpu.matmul %28, %30, %cst_20 {dimension_numbers = #tpu.dot_dimension_numbers<[1], [0], [0], [1], [0, 0, 1, 1], [], []>} : vector<78x32xbf16>, vector<32x8xbf16>, vector<78x8xf32> -> vector<78x8xf32>
    %32 = arith.addf %27, %31 : vector<78x8xf32>
    %33 = vector.extract_strided_slice %1 {offsets = [20, 0], sizes = [78, 32], strides = [1, 1]} : vector<100x32xbf16> to vector<78x32xbf16>
    %c6 = arith.constant 6 : index
    %c0_21 = arith.constant 0 : index
    %c0_22 = arith.constant 0 : index
    %34 = vector.load %arg2[%c6, %c0_21, %c0_22] : memref<9x32x8xbf16, #tpu.memory_space<vmem>>, vector<1x32x8xbf16>
    %35 = vector.shape_cast %34 : vector<1x32x8xbf16> to vector<32x8xbf16>
    %cst_23 = arith.constant dense<0.000000e+00> : vector<78x8xf32>
    %36 = tpu.matmul %33, %35, %cst_23 {dimension_numbers = #tpu.dot_dimension_numbers<[1], [0], [0], [1], [0, 0, 1, 1], [], []>} : vector<78x32xbf16>, vector<32x8xbf16>, vector<78x8xf32> -> vector<78x8xf32>
    %37 = arith.addf %32, %36 : vector<78x8xf32>
    %38 = vector.extract_strided_slice %1 {offsets = [21, 0], sizes = [78, 32], strides = [1, 1]} : vector<100x32xbf16> to vector<78x32xbf16>
    %c7 = arith.constant 7 : index
    %c0_24 = arith.constant 0 : index
    %c0_25 = arith.constant 0 : index
    %39 = vector.load %arg2[%c7, %c0_24, %c0_25] : memref<9x32x8xbf16, #tpu.memory_space<vmem>>, vector<1x32x8xbf16>
    %40 = vector.shape_cast %39 : vector<1x32x8xbf16> to vector<32x8xbf16>
    %cst_26 = arith.constant dense<0.000000e+00> : vector<78x8xf32>
    %41 = tpu.matmul %38, %40, %cst_26 {dimension_numbers = #tpu.dot_dimension_numbers<[1], [0], [0], [1], [0, 0, 1, 1], [], []>} : vector<78x32xbf16>, vector<32x8xbf16>, vector<78x8xf32> -> vector<78x8xf32>
    %42 = arith.addf %37, %41 : vector<78x8xf32>
    %43 = vector.extract_strided_slice %1 {offsets = [22, 0], sizes = [78, 32], strides = [1, 1]} : vector<100x32xbf16> to vector<78x32xbf16>
    %c8 = arith.constant 8 : index
    %c0_27 = arith.constant 0 : index
    %c0_28 = arith.constant 0 : index
    %44 = vector.load %arg2[%c8, %c0_27, %c0_28] : memref<9x32x8xbf16, #tpu.memory_space<vmem>>, vector<1x32x8xbf16>
    %45 = vector.shape_cast %44 : vector<1x32x8xbf16> to vector<32x8xbf16>
    %cst_29 = arith.constant dense<0.000000e+00> : vector<78x8xf32>
    %46 = tpu.matmul %43, %45, %cst_29 {dimension_numbers = #tpu.dot_dimension_numbers<[1], [0], [0], [1], [0, 0, 1, 1], [], []>} : vector<78x32xbf16>, vector<32x8xbf16>, vector<78x8xf32> -> vector<78x8xf32>
    %47 = arith.addf %42, %46 : vector<78x8xf32>
    %c0_30 = arith.constant 0 : index
    %c0_31 = arith.constant 0 : index
    %48 = vector.load %arg3[%c0_30, %c0_31] : memref<1x8xf32, #tpu.memory_space<vmem>>, vector<1x8xf32>
    %49 = vector.broadcast %48 : vector<1x8xf32> to vector<78x8xf32>
    %50 = arith.addf %47, %49 : vector<78x8xf32>
    %51 = vector.shape_cast %50 : vector<78x8xf32> to vector<1x78x8xf32>
    %52 = arith.truncf %51 : vector<1x78x8xf32> to vector<1x78x8xbf16>
    %c0_32 = arith.constant 0 : index
    %c0_33 = arith.constant 0 : index
    %c0_34 = arith.constant 0 : index
    %53 = vector.load %arg4[%c0_32, %c0_33, %c0_34] : memref<1x78x8xbf16, #tpu.memory_space<vmem>>, vector<1x78x8xbf16>
    tpu.vector_store %arg4[%c0_32, %c0_33, %c0_34], %52 {strides = array<i32>} : memref<1x78x8xbf16, #tpu.memory_space<vmem>>, vector<1x78x8xbf16>,
    return
  }
  func.func @transform_0(%arg0: i32) -> (i32, i32, i32) {
    %c0_i32 = arith.constant 0 : i32
    %c0_i32_0 = arith.constant 0 : i32
    %c0_i32_1 = arith.constant 0 : i32
    return %arg0, %c0_i32, %c0_i32_0 : i32, i32, i32
  }
  func.func @transform_1(%arg0: i32) -> (i32, i32, i32) {
    %c0_i32 = arith.constant 0 : i32
    %c0_i32_0 = arith.constant 0 : i32
    %c0_i32_1 = arith.constant 0 : i32
    %c0_i32_2 = arith.constant 0 : i32
    return %c0_i32, %c0_i32_0, %c0_i32_1 : i32, i32, i32
  }
  func.func @transform_2(%arg0: i32) -> (i32, i32) {
    %c0_i32 = arith.constant 0 : i32
    %c0_i32_0 = arith.constant 0 : i32
    %c0_i32_1 = arith.constant 0 : i32
    return %c0_i32, %c0_i32_0 : i32, i32
  }
  func.func @transform_3(%arg0: i32) -> (i32, i32, i32) {
    %c0_i32 = arith.constant 0 : i32
    %c0_i32_0 = arith.constant 0 : i32
    %c0_i32_1 = arith.constant 0 : i32
    return %arg0, %c0_i32, %c0_i32_0 : i32, i32, i32
  }
}

module attributes {stable_mosaic.version = 11 : i64} {
  func.func @_conv_shift_kernel(%arg0: i32, %arg1: memref<1x36x32xbf16, #tpu.memory_space<vmem>>, %arg2: memref<9x32x8xbf16, #tpu.memory_space<vmem>>, %arg3: memref<1x8xf32, #tpu.memory_space<vmem>>, %arg4: memref<1x22x8xbf16, #tpu.memory_space<vmem>>) attributes {dimension_semantics = [#tpu.dimension_semantics<parallel>], iteration_bounds = array<i64: 2>, scalar_prefetch = 0 : i64, scratch_operands = 0 : i64, tpu.core_type = #tpu.core_type<tc>, window_params = [{transform_indices = @transform_0, window_bounds = array<i64: 1, 36, 32>}, {pipeline_mode = #tpu.pipeline_mode<synchronous>, transform_indices = @transform_1, window_bounds = array<i64: 9, 32, 8>}, {pipeline_mode = #tpu.pipeline_mode<synchronous>, transform_indices = @transform_2, window_bounds = array<i64: 1, 8>}, {transform_indices = @transform_3, window_bounds = array<i64: 1, 22, 8>}]} {
    %c0 = arith.constant 0 : index
    %c0_0 = arith.constant 0 : index
    %c0_1 = arith.constant 0 : index
    %0 = vector.load %arg1[%c0, %c0_0, %c0_1] : memref<1x36x32xbf16, #tpu.memory_space<vmem>>, vector<1x36x32xbf16>
    %1 = vector.shape_cast %0 : vector<1x36x32xbf16> to vector<36x32xbf16>
    %cst = arith.constant 0.000000e+00 : f32
    %2 = vector.broadcast %cst : f32 to vector<22x8xf32>
    %3 = vector.extract_strided_slice %1 {offsets = [0, 0], sizes = [22, 32], strides = [1, 1]} : vector<36x32xbf16> to vector<22x32xbf16>
    %c0_2 = arith.constant 0 : index
    %c0_3 = arith.constant 0 : index
    %c0_4 = arith.constant 0 : index
    %4 = vector.load %arg2[%c0_2, %c0_3, %c0_4] : memref<9x32x8xbf16, #tpu.memory_space<vmem>>, vector<1x32x8xbf16>
    %5 = vector.shape_cast %4 : vector<1x32x8xbf16> to vector<32x8xbf16>
    %cst_5 = arith.constant dense<0.000000e+00> : vector<22x8xf32>
    %6 = tpu.matmul %3, %5, %cst_5 {dimension_numbers = #tpu.dot_dimension_numbers<[1], [0], [0], [1], [0, 0, 1, 1], [], []>} : vector<22x32xbf16>, vector<32x8xbf16>, vector<22x8xf32> -> vector<22x8xf32>
    %7 = arith.addf %2, %6 : vector<22x8xf32>
    %8 = vector.extract_strided_slice %1 {offsets = [1, 0], sizes = [22, 32], strides = [1, 1]} : vector<36x32xbf16> to vector<22x32xbf16>
    %c1 = arith.constant 1 : index
    %c0_6 = arith.constant 0 : index
    %c0_7 = arith.constant 0 : index
    %9 = vector.load %arg2[%c1, %c0_6, %c0_7] : memref<9x32x8xbf16, #tpu.memory_space<vmem>>, vector<1x32x8xbf16>
    %10 = vector.shape_cast %9 : vector<1x32x8xbf16> to vector<32x8xbf16>
    %cst_8 = arith.constant dense<0.000000e+00> : vector<22x8xf32>
    %11 = tpu.matmul %8, %10, %cst_8 {dimension_numbers = #tpu.dot_dimension_numbers<[1], [0], [0], [1], [0, 0, 1, 1], [], []>} : vector<22x32xbf16>, vector<32x8xbf16>, vector<22x8xf32> -> vector<22x8xf32>
    %12 = arith.addf %7, %11 : vector<22x8xf32>
    %13 = vector.extract_strided_slice %1 {offsets = [2, 0], sizes = [22, 32], strides = [1, 1]} : vector<36x32xbf16> to vector<22x32xbf16>
    %c2 = arith.constant 2 : index
    %c0_9 = arith.constant 0 : index
    %c0_10 = arith.constant 0 : index
    %14 = vector.load %arg2[%c2, %c0_9, %c0_10] : memref<9x32x8xbf16, #tpu.memory_space<vmem>>, vector<1x32x8xbf16>
    %15 = vector.shape_cast %14 : vector<1x32x8xbf16> to vector<32x8xbf16>
    %cst_11 = arith.constant dense<0.000000e+00> : vector<22x8xf32>
    %16 = tpu.matmul %13, %15, %cst_11 {dimension_numbers = #tpu.dot_dimension_numbers<[1], [0], [0], [1], [0, 0, 1, 1], [], []>} : vector<22x32xbf16>, vector<32x8xbf16>, vector<22x8xf32> -> vector<22x8xf32>
    %17 = arith.addf %12, %16 : vector<22x8xf32>
    %18 = vector.extract_strided_slice %1 {offsets = [6, 0], sizes = [22, 32], strides = [1, 1]} : vector<36x32xbf16> to vector<22x32xbf16>
    %c3 = arith.constant 3 : index
    %c0_12 = arith.constant 0 : index
    %c0_13 = arith.constant 0 : index
    %19 = vector.load %arg2[%c3, %c0_12, %c0_13] : memref<9x32x8xbf16, #tpu.memory_space<vmem>>, vector<1x32x8xbf16>
    %20 = vector.shape_cast %19 : vector<1x32x8xbf16> to vector<32x8xbf16>
    %cst_14 = arith.constant dense<0.000000e+00> : vector<22x8xf32>
    %21 = tpu.matmul %18, %20, %cst_14 {dimension_numbers = #tpu.dot_dimension_numbers<[1], [0], [0], [1], [0, 0, 1, 1], [], []>} : vector<22x32xbf16>, vector<32x8xbf16>, vector<22x8xf32> -> vector<22x8xf32>
    %22 = arith.addf %17, %21 : vector<22x8xf32>
    %23 = vector.extract_strided_slice %1 {offsets = [7, 0], sizes = [22, 32], strides = [1, 1]} : vector<36x32xbf16> to vector<22x32xbf16>
    %c4 = arith.constant 4 : index
    %c0_15 = arith.constant 0 : index
    %c0_16 = arith.constant 0 : index
    %24 = vector.load %arg2[%c4, %c0_15, %c0_16] : memref<9x32x8xbf16, #tpu.memory_space<vmem>>, vector<1x32x8xbf16>
    %25 = vector.shape_cast %24 : vector<1x32x8xbf16> to vector<32x8xbf16>
    %cst_17 = arith.constant dense<0.000000e+00> : vector<22x8xf32>
    %26 = tpu.matmul %23, %25, %cst_17 {dimension_numbers = #tpu.dot_dimension_numbers<[1], [0], [0], [1], [0, 0, 1, 1], [], []>} : vector<22x32xbf16>, vector<32x8xbf16>, vector<22x8xf32> -> vector<22x8xf32>
    %27 = arith.addf %22, %26 : vector<22x8xf32>
    %28 = vector.extract_strided_slice %1 {offsets = [8, 0], sizes = [22, 32], strides = [1, 1]} : vector<36x32xbf16> to vector<22x32xbf16>
    %c5 = arith.constant 5 : index
    %c0_18 = arith.constant 0 : index
    %c0_19 = arith.constant 0 : index
    %29 = vector.load %arg2[%c5, %c0_18, %c0_19] : memref<9x32x8xbf16, #tpu.memory_space<vmem>>, vector<1x32x8xbf16>
    %30 = vector.shape_cast %29 : vector<1x32x8xbf16> to vector<32x8xbf16>
    %cst_20 = arith.constant dense<0.000000e+00> : vector<22x8xf32>
    %31 = tpu.matmul %28, %30, %cst_20 {dimension_numbers = #tpu.dot_dimension_numbers<[1], [0], [0], [1], [0, 0, 1, 1], [], []>} : vector<22x32xbf16>, vector<32x8xbf16>, vector<22x8xf32> -> vector<22x8xf32>
    %32 = arith.addf %27, %31 : vector<22x8xf32>
    %33 = vector.extract_strided_slice %1 {offsets = [12, 0], sizes = [22, 32], strides = [1, 1]} : vector<36x32xbf16> to vector<22x32xbf16>
    %c6 = arith.constant 6 : index
    %c0_21 = arith.constant 0 : index
    %c0_22 = arith.constant 0 : index
    %34 = vector.load %arg2[%c6, %c0_21, %c0_22] : memref<9x32x8xbf16, #tpu.memory_space<vmem>>, vector<1x32x8xbf16>
    %35 = vector.shape_cast %34 : vector<1x32x8xbf16> to vector<32x8xbf16>
    %cst_23 = arith.constant dense<0.000000e+00> : vector<22x8xf32>
    %36 = tpu.matmul %33, %35, %cst_23 {dimension_numbers = #tpu.dot_dimension_numbers<[1], [0], [0], [1], [0, 0, 1, 1], [], []>} : vector<22x32xbf16>, vector<32x8xbf16>, vector<22x8xf32> -> vector<22x8xf32>
    %37 = arith.addf %32, %36 : vector<22x8xf32>
    %38 = vector.extract_strided_slice %1 {offsets = [13, 0], sizes = [22, 32], strides = [1, 1]} : vector<36x32xbf16> to vector<22x32xbf16>
    %c7 = arith.constant 7 : index
    %c0_24 = arith.constant 0 : index
    %c0_25 = arith.constant 0 : index
    %39 = vector.load %arg2[%c7, %c0_24, %c0_25] : memref<9x32x8xbf16, #tpu.memory_space<vmem>>, vector<1x32x8xbf16>
    %40 = vector.shape_cast %39 : vector<1x32x8xbf16> to vector<32x8xbf16>
    %cst_26 = arith.constant dense<0.000000e+00> : vector<22x8xf32>
    %41 = tpu.matmul %38, %40, %cst_26 {dimension_numbers = #tpu.dot_dimension_numbers<[1], [0], [0], [1], [0, 0, 1, 1], [], []>} : vector<22x32xbf16>, vector<32x8xbf16>, vector<22x8xf32> -> vector<22x8xf32>
    %42 = arith.addf %37, %41 : vector<22x8xf32>
    %43 = vector.extract_strided_slice %1 {offsets = [14, 0], sizes = [22, 32], strides = [1, 1]} : vector<36x32xbf16> to vector<22x32xbf16>
    %c8 = arith.constant 8 : index
    %c0_27 = arith.constant 0 : index
    %c0_28 = arith.constant 0 : index
    %44 = vector.load %arg2[%c8, %c0_27, %c0_28] : memref<9x32x8xbf16, #tpu.memory_space<vmem>>, vector<1x32x8xbf16>
    %45 = vector.shape_cast %44 : vector<1x32x8xbf16> to vector<32x8xbf16>
    %cst_29 = arith.constant dense<0.000000e+00> : vector<22x8xf32>
    %46 = tpu.matmul %43, %45, %cst_29 {dimension_numbers = #tpu.dot_dimension_numbers<[1], [0], [0], [1], [0, 0, 1, 1], [], []>} : vector<22x32xbf16>, vector<32x8xbf16>, vector<22x8xf32> -> vector<22x8xf32>
    %47 = arith.addf %42, %46 : vector<22x8xf32>
    %c0_30 = arith.constant 0 : index
    %c0_31 = arith.constant 0 : index
    %48 = vector.load %arg3[%c0_30, %c0_31] : memref<1x8xf32, #tpu.memory_space<vmem>>, vector<1x8xf32>
    %49 = vector.broadcast %48 : vector<1x8xf32> to vector<22x8xf32>
    %50 = arith.addf %47, %49 : vector<22x8xf32>
    %51 = vector.shape_cast %50 : vector<22x8xf32> to vector<1x22x8xf32>
    %52 = arith.truncf %51 : vector<1x22x8xf32> to vector<1x22x8xbf16>
    %c0_32 = arith.constant 0 : index
    %c0_33 = arith.constant 0 : index
    %c0_34 = arith.constant 0 : index
    %53 = vector.load %arg4[%c0_32, %c0_33, %c0_34] : memref<1x22x8xbf16, #tpu.memory_space<vmem>>, vector<1x22x8xbf16>
    tpu.vector_store %arg4[%c0_32, %c0_33, %c0_34], %52 {strides = array<i32>} : memref<1x22x8xbf16, #tpu.memory_space<vmem>>, vector<1x22x8xbf16>,
    return
  }
  func.func @transform_0(%arg0: i32) -> (i32, i32, i32) {
    %c0_i32 = arith.constant 0 : i32
    %c0_i32_0 = arith.constant 0 : i32
    %c0_i32_1 = arith.constant 0 : i32
    return %arg0, %c0_i32, %c0_i32_0 : i32, i32, i32
  }
  func.func @transform_1(%arg0: i32) -> (i32, i32, i32) {
    %c0_i32 = arith.constant 0 : i32
    %c0_i32_0 = arith.constant 0 : i32
    %c0_i32_1 = arith.constant 0 : i32
    %c0_i32_2 = arith.constant 0 : i32
    return %c0_i32, %c0_i32_0, %c0_i32_1 : i32, i32, i32
  }
  func.func @transform_2(%arg0: i32) -> (i32, i32) {
    %c0_i32 = arith.constant 0 : i32
    %c0_i32_0 = arith.constant 0 : i32
    %c0_i32_1 = arith.constant 0 : i32
    return %c0_i32, %c0_i32_0 : i32, i32
  }
  func.func @transform_3(%arg0: i32) -> (i32, i32, i32) {
    %c0_i32 = arith.constant 0 : i32
    %c0_i32_0 = arith.constant 0 : i32
    %c0_i32_1 = arith.constant 0 : i32
    return %arg0, %c0_i32, %c0_i32_0 : i32, i32, i32
  }
}

module attributes {stable_mosaic.version = 11 : i64} {
  func.func @_conv_shift_kernel(%arg0: i32, %arg1: memref<1x16x32xbf16, #tpu.memory_space<vmem>>, %arg2: memref<9x32x8xbf16, #tpu.memory_space<vmem>>, %arg3: memref<1x8xf32, #tpu.memory_space<vmem>>, %arg4: memref<1x6x8xbf16, #tpu.memory_space<vmem>>) attributes {dimension_semantics = [#tpu.dimension_semantics<parallel>], iteration_bounds = array<i64: 2>, scalar_prefetch = 0 : i64, scratch_operands = 0 : i64, tpu.core_type = #tpu.core_type<tc>, window_params = [{transform_indices = @transform_0, window_bounds = array<i64: 1, 16, 32>}, {pipeline_mode = #tpu.pipeline_mode<synchronous>, transform_indices = @transform_1, window_bounds = array<i64: 9, 32, 8>}, {pipeline_mode = #tpu.pipeline_mode<synchronous>, transform_indices = @transform_2, window_bounds = array<i64: 1, 8>}, {transform_indices = @transform_3, window_bounds = array<i64: 1, 6, 8>}]} {
    %c0 = arith.constant 0 : index
    %c0_0 = arith.constant 0 : index
    %c0_1 = arith.constant 0 : index
    %0 = vector.load %arg1[%c0, %c0_0, %c0_1] : memref<1x16x32xbf16, #tpu.memory_space<vmem>>, vector<1x16x32xbf16>
    %1 = vector.shape_cast %0 : vector<1x16x32xbf16> to vector<16x32xbf16>
    %cst = arith.constant 0.000000e+00 : f32
    %2 = vector.broadcast %cst : f32 to vector<6x8xf32>
    %3 = vector.extract_strided_slice %1 {offsets = [0, 0], sizes = [6, 32], strides = [1, 1]} : vector<16x32xbf16> to vector<6x32xbf16>
    %c0_2 = arith.constant 0 : index
    %c0_3 = arith.constant 0 : index
    %c0_4 = arith.constant 0 : index
    %4 = vector.load %arg2[%c0_2, %c0_3, %c0_4] : memref<9x32x8xbf16, #tpu.memory_space<vmem>>, vector<1x32x8xbf16>
    %5 = vector.shape_cast %4 : vector<1x32x8xbf16> to vector<32x8xbf16>
    %cst_5 = arith.constant dense<0.000000e+00> : vector<6x8xf32>
    %6 = tpu.matmul %3, %5, %cst_5 {dimension_numbers = #tpu.dot_dimension_numbers<[1], [0], [0], [1], [0, 0, 1, 1], [], []>} : vector<6x32xbf16>, vector<32x8xbf16>, vector<6x8xf32> -> vector<6x8xf32>
    %7 = arith.addf %2, %6 : vector<6x8xf32>
    %8 = vector.extract_strided_slice %1 {offsets = [1, 0], sizes = [6, 32], strides = [1, 1]} : vector<16x32xbf16> to vector<6x32xbf16>
    %c1 = arith.constant 1 : index
    %c0_6 = arith.constant 0 : index
    %c0_7 = arith.constant 0 : index
    %9 = vector.load %arg2[%c1, %c0_6, %c0_7] : memref<9x32x8xbf16, #tpu.memory_space<vmem>>, vector<1x32x8xbf16>
    %10 = vector.shape_cast %9 : vector<1x32x8xbf16> to vector<32x8xbf16>
    %cst_8 = arith.constant dense<0.000000e+00> : vector<6x8xf32>
    %11 = tpu.matmul %8, %10, %cst_8 {dimension_numbers = #tpu.dot_dimension_numbers<[1], [0], [0], [1], [0, 0, 1, 1], [], []>} : vector<6x32xbf16>, vector<32x8xbf16>, vector<6x8xf32> -> vector<6x8xf32>
    %12 = arith.addf %7, %11 : vector<6x8xf32>
    %13 = vector.extract_strided_slice %1 {offsets = [2, 0], sizes = [6, 32], strides = [1, 1]} : vector<16x32xbf16> to vector<6x32xbf16>
    %c2 = arith.constant 2 : index
    %c0_9 = arith.constant 0 : index
    %c0_10 = arith.constant 0 : index
    %14 = vector.load %arg2[%c2, %c0_9, %c0_10] : memref<9x32x8xbf16, #tpu.memory_space<vmem>>, vector<1x32x8xbf16>
    %15 = vector.shape_cast %14 : vector<1x32x8xbf16> to vector<32x8xbf16>
    %cst_11 = arith.constant dense<0.000000e+00> : vector<6x8xf32>
    %16 = tpu.matmul %13, %15, %cst_11 {dimension_numbers = #tpu.dot_dimension_numbers<[1], [0], [0], [1], [0, 0, 1, 1], [], []>} : vector<6x32xbf16>, vector<32x8xbf16>, vector<6x8xf32> -> vector<6x8xf32>
    %17 = arith.addf %12, %16 : vector<6x8xf32>
    %18 = vector.extract_strided_slice %1 {offsets = [4, 0], sizes = [6, 32], strides = [1, 1]} : vector<16x32xbf16> to vector<6x32xbf16>
    %c3 = arith.constant 3 : index
    %c0_12 = arith.constant 0 : index
    %c0_13 = arith.constant 0 : index
    %19 = vector.load %arg2[%c3, %c0_12, %c0_13] : memref<9x32x8xbf16, #tpu.memory_space<vmem>>, vector<1x32x8xbf16>
    %20 = vector.shape_cast %19 : vector<1x32x8xbf16> to vector<32x8xbf16>
    %cst_14 = arith.constant dense<0.000000e+00> : vector<6x8xf32>
    %21 = tpu.matmul %18, %20, %cst_14 {dimension_numbers = #tpu.dot_dimension_numbers<[1], [0], [0], [1], [0, 0, 1, 1], [], []>} : vector<6x32xbf16>, vector<32x8xbf16>, vector<6x8xf32> -> vector<6x8xf32>
    %22 = arith.addf %17, %21 : vector<6x8xf32>
    %23 = vector.extract_strided_slice %1 {offsets = [5, 0], sizes = [6, 32], strides = [1, 1]} : vector<16x32xbf16> to vector<6x32xbf16>
    %c4 = arith.constant 4 : index
    %c0_15 = arith.constant 0 : index
    %c0_16 = arith.constant 0 : index
    %24 = vector.load %arg2[%c4, %c0_15, %c0_16] : memref<9x32x8xbf16, #tpu.memory_space<vmem>>, vector<1x32x8xbf16>
    %25 = vector.shape_cast %24 : vector<1x32x8xbf16> to vector<32x8xbf16>
    %cst_17 = arith.constant dense<0.000000e+00> : vector<6x8xf32>
    %26 = tpu.matmul %23, %25, %cst_17 {dimension_numbers = #tpu.dot_dimension_numbers<[1], [0], [0], [1], [0, 0, 1, 1], [], []>} : vector<6x32xbf16>, vector<32x8xbf16>, vector<6x8xf32> -> vector<6x8xf32>
    %27 = arith.addf %22, %26 : vector<6x8xf32>
    %28 = vector.extract_strided_slice %1 {offsets = [6, 0], sizes = [6, 32], strides = [1, 1]} : vector<16x32xbf16> to vector<6x32xbf16>
    %c5 = arith.constant 5 : index
    %c0_18 = arith.constant 0 : index
    %c0_19 = arith.constant 0 : index
    %29 = vector.load %arg2[%c5, %c0_18, %c0_19] : memref<9x32x8xbf16, #tpu.memory_space<vmem>>, vector<1x32x8xbf16>
    %30 = vector.shape_cast %29 : vector<1x32x8xbf16> to vector<32x8xbf16>
    %cst_20 = arith.constant dense<0.000000e+00> : vector<6x8xf32>
    %31 = tpu.matmul %28, %30, %cst_20 {dimension_numbers = #tpu.dot_dimension_numbers<[1], [0], [0], [1], [0, 0, 1, 1], [], []>} : vector<6x32xbf16>, vector<32x8xbf16>, vector<6x8xf32> -> vector<6x8xf32>
    %32 = arith.addf %27, %31 : vector<6x8xf32>
    %33 = vector.extract_strided_slice %1 {offsets = [8, 0], sizes = [6, 32], strides = [1, 1]} : vector<16x32xbf16> to vector<6x32xbf16>
    %c6 = arith.constant 6 : index
    %c0_21 = arith.constant 0 : index
    %c0_22 = arith.constant 0 : index
    %34 = vector.load %arg2[%c6, %c0_21, %c0_22] : memref<9x32x8xbf16, #tpu.memory_space<vmem>>, vector<1x32x8xbf16>
    %35 = vector.shape_cast %34 : vector<1x32x8xbf16> to vector<32x8xbf16>
    %cst_23 = arith.constant dense<0.000000e+00> : vector<6x8xf32>
    %36 = tpu.matmul %33, %35, %cst_23 {dimension_numbers = #tpu.dot_dimension_numbers<[1], [0], [0], [1], [0, 0, 1, 1], [], []>} : vector<6x32xbf16>, vector<32x8xbf16>, vector<6x8xf32> -> vector<6x8xf32>
    %37 = arith.addf %32, %36 : vector<6x8xf32>
    %38 = vector.extract_strided_slice %1 {offsets = [9, 0], sizes = [6, 32], strides = [1, 1]} : vector<16x32xbf16> to vector<6x32xbf16>
    %c7 = arith.constant 7 : index
    %c0_24 = arith.constant 0 : index
    %c0_25 = arith.constant 0 : index
    %39 = vector.load %arg2[%c7, %c0_24, %c0_25] : memref<9x32x8xbf16, #tpu.memory_space<vmem>>, vector<1x32x8xbf16>
    %40 = vector.shape_cast %39 : vector<1x32x8xbf16> to vector<32x8xbf16>
    %cst_26 = arith.constant dense<0.000000e+00> : vector<6x8xf32>
    %41 = tpu.matmul %38, %40, %cst_26 {dimension_numbers = #tpu.dot_dimension_numbers<[1], [0], [0], [1], [0, 0, 1, 1], [], []>} : vector<6x32xbf16>, vector<32x8xbf16>, vector<6x8xf32> -> vector<6x8xf32>
    %42 = arith.addf %37, %41 : vector<6x8xf32>
    %43 = vector.extract_strided_slice %1 {offsets = [10, 0], sizes = [6, 32], strides = [1, 1]} : vector<16x32xbf16> to vector<6x32xbf16>
    %c8 = arith.constant 8 : index
    %c0_27 = arith.constant 0 : index
    %c0_28 = arith.constant 0 : index
    %44 = vector.load %arg2[%c8, %c0_27, %c0_28] : memref<9x32x8xbf16, #tpu.memory_space<vmem>>, vector<1x32x8xbf16>
    %45 = vector.shape_cast %44 : vector<1x32x8xbf16> to vector<32x8xbf16>
    %cst_29 = arith.constant dense<0.000000e+00> : vector<6x8xf32>
    %46 = tpu.matmul %43, %45, %cst_29 {dimension_numbers = #tpu.dot_dimension_numbers<[1], [0], [0], [1], [0, 0, 1, 1], [], []>} : vector<6x32xbf16>, vector<32x8xbf16>, vector<6x8xf32> -> vector<6x8xf32>
    %47 = arith.addf %42, %46 : vector<6x8xf32>
    %c0_30 = arith.constant 0 : index
    %c0_31 = arith.constant 0 : index
    %48 = vector.load %arg3[%c0_30, %c0_31] : memref<1x8xf32, #tpu.memory_space<vmem>>, vector<1x8xf32>
    %49 = vector.broadcast %48 : vector<1x8xf32> to vector<6x8xf32>
    %50 = arith.addf %47, %49 : vector<6x8xf32>
    %51 = vector.shape_cast %50 : vector<6x8xf32> to vector<1x6x8xf32>
    %52 = arith.truncf %51 : vector<1x6x8xf32> to vector<1x6x8xbf16>
    %c0_32 = arith.constant 0 : index
    %c0_33 = arith.constant 0 : index
    %c0_34 = arith.constant 0 : index
    %53 = vector.load %arg4[%c0_32, %c0_33, %c0_34] : memref<1x6x8xbf16, #tpu.memory_space<vmem>>, vector<1x6x8xbf16>
    tpu.vector_store %arg4[%c0_32, %c0_33, %c0_34], %52 {strides = array<i32>} : memref<1x6x8xbf16, #tpu.memory_space<vmem>>, vector<1x6x8xbf16>,
    return
  }
  func.func @transform_0(%arg0: i32) -> (i32, i32, i32) {
    %c0_i32 = arith.constant 0 : i32
    %c0_i32_0 = arith.constant 0 : i32
    %c0_i32_1 = arith.constant 0 : i32
    return %arg0, %c0_i32, %c0_i32_0 : i32, i32, i32
  }
  func.func @transform_1(%arg0: i32) -> (i32, i32, i32) {
    %c0_i32 = arith.constant 0 : i32
    %c0_i32_0 = arith.constant 0 : i32
    %c0_i32_1 = arith.constant 0 : i32
    %c0_i32_2 = arith.constant 0 : i32
    return %c0_i32, %c0_i32_0, %c0_i32_1 : i32, i32, i32
  }
  func.func @transform_2(%arg0: i32) -> (i32, i32) {
    %c0_i32 = arith.constant 0 : i32
    %c0_i32_0 = arith.constant 0 : i32
    %c0_i32_1 = arith.constant 0 : i32
    return %c0_i32, %c0_i32_0 : i32, i32
  }
  func.func @transform_3(%arg0: i32) -> (i32, i32, i32) {
    %c0_i32 = arith.constant 0 : i32
    %c0_i32_0 = arith.constant 0 : i32
    %c0_i32_1 = arith.constant 0 : i32
    return %arg0, %c0_i32, %c0_i32_0 : i32, i32, i32
  }
}

module attributes {stable_mosaic.version = 11 : i64} {
  func.func @_conv_shift_kernel(%arg0: i32, %arg1: memref<1x9x32xbf16, #tpu.memory_space<vmem>>, %arg2: memref<9x32x8xbf16, #tpu.memory_space<vmem>>, %arg3: memref<1x8xf32, #tpu.memory_space<vmem>>, %arg4: memref<1x1x8xbf16, #tpu.memory_space<vmem>>) attributes {dimension_semantics = [#tpu.dimension_semantics<parallel>], iteration_bounds = array<i64: 2>, scalar_prefetch = 0 : i64, scratch_operands = 0 : i64, tpu.core_type = #tpu.core_type<tc>, window_params = [{transform_indices = @transform_0, window_bounds = array<i64: 1, 9, 32>}, {pipeline_mode = #tpu.pipeline_mode<synchronous>, transform_indices = @transform_1, window_bounds = array<i64: 9, 32, 8>}, {pipeline_mode = #tpu.pipeline_mode<synchronous>, transform_indices = @transform_2, window_bounds = array<i64: 1, 8>}, {transform_indices = @transform_3, window_bounds = array<i64: 1, 1, 8>}]} {
    %c0 = arith.constant 0 : index
    %c0_0 = arith.constant 0 : index
    %c0_1 = arith.constant 0 : index
    %0 = vector.load %arg1[%c0, %c0_0, %c0_1] : memref<1x9x32xbf16, #tpu.memory_space<vmem>>, vector<1x9x32xbf16>
    %1 = vector.shape_cast %0 : vector<1x9x32xbf16> to vector<9x32xbf16>
    %cst = arith.constant 0.000000e+00 : f32
    %2 = vector.broadcast %cst : f32 to vector<1x8xf32>
    %3 = vector.extract_strided_slice %1 {offsets = [0, 0], sizes = [1, 32], strides = [1, 1]} : vector<9x32xbf16> to vector<1x32xbf16>
    %c0_2 = arith.constant 0 : index
    %c0_3 = arith.constant 0 : index
    %c0_4 = arith.constant 0 : index
    %4 = vector.load %arg2[%c0_2, %c0_3, %c0_4] : memref<9x32x8xbf16, #tpu.memory_space<vmem>>, vector<1x32x8xbf16>
    %5 = vector.shape_cast %4 : vector<1x32x8xbf16> to vector<32x8xbf16>
    %cst_5 = arith.constant dense<0.000000e+00> : vector<1x8xf32>
    %6 = tpu.matmul %3, %5, %cst_5 {dimension_numbers = #tpu.dot_dimension_numbers<[1], [0], [0], [1], [0, 0, 1, 1], [], []>} : vector<1x32xbf16>, vector<32x8xbf16>, vector<1x8xf32> -> vector<1x8xf32>
    %7 = arith.addf %2, %6 : vector<1x8xf32>
    %8 = vector.extract_strided_slice %1 {offsets = [1, 0], sizes = [1, 32], strides = [1, 1]} : vector<9x32xbf16> to vector<1x32xbf16>
    %c1 = arith.constant 1 : index
    %c0_6 = arith.constant 0 : index
    %c0_7 = arith.constant 0 : index
    %9 = vector.load %arg2[%c1, %c0_6, %c0_7] : memref<9x32x8xbf16, #tpu.memory_space<vmem>>, vector<1x32x8xbf16>
    %10 = vector.shape_cast %9 : vector<1x32x8xbf16> to vector<32x8xbf16>
    %cst_8 = arith.constant dense<0.000000e+00> : vector<1x8xf32>
    %11 = tpu.matmul %8, %10, %cst_8 {dimension_numbers = #tpu.dot_dimension_numbers<[1], [0], [0], [1], [0, 0, 1, 1], [], []>} : vector<1x32xbf16>, vector<32x8xbf16>, vector<1x8xf32> -> vector<1x8xf32>
    %12 = arith.addf %7, %11 : vector<1x8xf32>
    %13 = vector.extract_strided_slice %1 {offsets = [2, 0], sizes = [1, 32], strides = [1, 1]} : vector<9x32xbf16> to vector<1x32xbf16>
    %c2 = arith.constant 2 : index
    %c0_9 = arith.constant 0 : index
    %c0_10 = arith.constant 0 : index
    %14 = vector.load %arg2[%c2, %c0_9, %c0_10] : memref<9x32x8xbf16, #tpu.memory_space<vmem>>, vector<1x32x8xbf16>
    %15 = vector.shape_cast %14 : vector<1x32x8xbf16> to vector<32x8xbf16>
    %cst_11 = arith.constant dense<0.000000e+00> : vector<1x8xf32>
    %16 = tpu.matmul %13, %15, %cst_11 {dimension_numbers = #tpu.dot_dimension_numbers<[1], [0], [0], [1], [0, 0, 1, 1], [], []>} : vector<1x32xbf16>, vector<32x8xbf16>, vector<1x8xf32> -> vector<1x8xf32>
    %17 = arith.addf %12, %16 : vector<1x8xf32>
    %18 = vector.extract_strided_slice %1 {offsets = [3, 0], sizes = [1, 32], strides = [1, 1]} : vector<9x32xbf16> to vector<1x32xbf16>
    %c3 = arith.constant 3 : index
    %c0_12 = arith.constant 0 : index
    %c0_13 = arith.constant 0 : index
    %19 = vector.load %arg2[%c3, %c0_12, %c0_13] : memref<9x32x8xbf16, #tpu.memory_space<vmem>>, vector<1x32x8xbf16>
    %20 = vector.shape_cast %19 : vector<1x32x8xbf16> to vector<32x8xbf16>
    %cst_14 = arith.constant dense<0.000000e+00> : vector<1x8xf32>
    %21 = tpu.matmul %18, %20, %cst_14 {dimension_numbers = #tpu.dot_dimension_numbers<[1], [0], [0], [1], [0, 0, 1, 1], [], []>} : vector<1x32xbf16>, vector<32x8xbf16>, vector<1x8xf32> -> vector<1x8xf32>
    %22 = arith.addf %17, %21 : vector<1x8xf32>
    %23 = vector.extract_strided_slice %1 {offsets = [4, 0], sizes = [1, 32], strides = [1, 1]} : vector<9x32xbf16> to vector<1x32xbf16>
    %c4 = arith.constant 4 : index
    %c0_15 = arith.constant 0 : index
    %c0_16 = arith.constant 0 : index
    %24 = vector.load %arg2[%c4, %c0_15, %c0_16] : memref<9x32x8xbf16, #tpu.memory_space<vmem>>, vector<1x32x8xbf16>
    %25 = vector.shape_cast %24 : vector<1x32x8xbf16> to vector<32x8xbf16>
    %cst_17 = arith.constant dense<0.000000e+00> : vector<1x8xf32>
    %26 = tpu.matmul %23, %25, %cst_17 {dimension_numbers = #tpu.dot_dimension_numbers<[1], [0], [0], [1], [0, 0, 1, 1], [], []>} : vector<1x32xbf16>, vector<32x8xbf16>, vector<1x8xf32> -> vector<1x8xf32>
    %27 = arith.addf %22, %26 : vector<1x8xf32>
    %28 = vector.extract_strided_slice %1 {offsets = [5, 0], sizes = [1, 32], strides = [1, 1]} : vector<9x32xbf16> to vector<1x32xbf16>
    %c5 = arith.constant 5 : index
    %c0_18 = arith.constant 0 : index
    %c0_19 = arith.constant 0 : index
    %29 = vector.load %arg2[%c5, %c0_18, %c0_19] : memref<9x32x8xbf16, #tpu.memory_space<vmem>>, vector<1x32x8xbf16>
    %30 = vector.shape_cast %29 : vector<1x32x8xbf16> to vector<32x8xbf16>
    %cst_20 = arith.constant dense<0.000000e+00> : vector<1x8xf32>
    %31 = tpu.matmul %28, %30, %cst_20 {dimension_numbers = #tpu.dot_dimension_numbers<[1], [0], [0], [1], [0, 0, 1, 1], [], []>} : vector<1x32xbf16>, vector<32x8xbf16>, vector<1x8xf32> -> vector<1x8xf32>
    %32 = arith.addf %27, %31 : vector<1x8xf32>
    %33 = vector.extract_strided_slice %1 {offsets = [6, 0], sizes = [1, 32], strides = [1, 1]} : vector<9x32xbf16> to vector<1x32xbf16>
    %c6 = arith.constant 6 : index
    %c0_21 = arith.constant 0 : index
    %c0_22 = arith.constant 0 : index
    %34 = vector.load %arg2[%c6, %c0_21, %c0_22] : memref<9x32x8xbf16, #tpu.memory_space<vmem>>, vector<1x32x8xbf16>
    %35 = vector.shape_cast %34 : vector<1x32x8xbf16> to vector<32x8xbf16>
    %cst_23 = arith.constant dense<0.000000e+00> : vector<1x8xf32>
    %36 = tpu.matmul %33, %35, %cst_23 {dimension_numbers = #tpu.dot_dimension_numbers<[1], [0], [0], [1], [0, 0, 1, 1], [], []>} : vector<1x32xbf16>, vector<32x8xbf16>, vector<1x8xf32> -> vector<1x8xf32>
    %37 = arith.addf %32, %36 : vector<1x8xf32>
    %38 = vector.extract_strided_slice %1 {offsets = [7, 0], sizes = [1, 32], strides = [1, 1]} : vector<9x32xbf16> to vector<1x32xbf16>
    %c7 = arith.constant 7 : index
    %c0_24 = arith.constant 0 : index
    %c0_25 = arith.constant 0 : index
    %39 = vector.load %arg2[%c7, %c0_24, %c0_25] : memref<9x32x8xbf16, #tpu.memory_space<vmem>>, vector<1x32x8xbf16>
    %40 = vector.shape_cast %39 : vector<1x32x8xbf16> to vector<32x8xbf16>
    %cst_26 = arith.constant dense<0.000000e+00> : vector<1x8xf32>
    %41 = tpu.matmul %38, %40, %cst_26 {dimension_numbers = #tpu.dot_dimension_numbers<[1], [0], [0], [1], [0, 0, 1, 1], [], []>} : vector<1x32xbf16>, vector<32x8xbf16>, vector<1x8xf32> -> vector<1x8xf32>
    %42 = arith.addf %37, %41 : vector<1x8xf32>
    %43 = vector.extract_strided_slice %1 {offsets = [8, 0], sizes = [1, 32], strides = [1, 1]} : vector<9x32xbf16> to vector<1x32xbf16>
    %c8 = arith.constant 8 : index
    %c0_27 = arith.constant 0 : index
    %c0_28 = arith.constant 0 : index
    %44 = vector.load %arg2[%c8, %c0_27, %c0_28] : memref<9x32x8xbf16, #tpu.memory_space<vmem>>, vector<1x32x8xbf16>
    %45 = vector.shape_cast %44 : vector<1x32x8xbf16> to vector<32x8xbf16>
    %cst_29 = arith.constant dense<0.000000e+00> : vector<1x8xf32>
    %46 = tpu.matmul %43, %45, %cst_29 {dimension_numbers = #tpu.dot_dimension_numbers<[1], [0], [0], [1], [0, 0, 1, 1], [], []>} : vector<1x32xbf16>, vector<32x8xbf16>, vector<1x8xf32> -> vector<1x8xf32>
    %47 = arith.addf %42, %46 : vector<1x8xf32>
    %c0_30 = arith.constant 0 : index
    %c0_31 = arith.constant 0 : index
    %48 = vector.load %arg3[%c0_30, %c0_31] : memref<1x8xf32, #tpu.memory_space<vmem>>, vector<1x8xf32>
    %49 = arith.addf %47, %48 : vector<1x8xf32>
    %50 = vector.shape_cast %49 : vector<1x8xf32> to vector<1x1x8xf32>
    %51 = arith.truncf %50 : vector<1x1x8xf32> to vector<1x1x8xbf16>
    %c0_32 = arith.constant 0 : index
    %c0_33 = arith.constant 0 : index
    %c0_34 = arith.constant 0 : index
    %52 = vector.load %arg4[%c0_32, %c0_33, %c0_34] : memref<1x1x8xbf16, #tpu.memory_space<vmem>>, vector<1x1x8xbf16>
    tpu.vector_store %arg4[%c0_32, %c0_33, %c0_34], %51 {strides = array<i32>} : memref<1x1x8xbf16, #tpu.memory_space<vmem>>, vector<1x1x8xbf16>,
    return
  }
  func.func @transform_0(%arg0: i32) -> (i32, i32, i32) {
    %c0_i32 = arith.constant 0 : i32
    %c0_i32_0 = arith.constant 0 : i32
    %c0_i32_1 = arith.constant 0 : i32
    return %arg0, %c0_i32, %c0_i32_0 : i32, i32, i32
  }
  func.func @transform_1(%arg0: i32) -> (i32, i32, i32) {
    %c0_i32 = arith.constant 0 : i32
    %c0_i32_0 = arith.constant 0 : i32
    %c0_i32_1 = arith.constant 0 : i32
    %c0_i32_2 = arith.constant 0 : i32
    return %c0_i32, %c0_i32_0, %c0_i32_1 : i32, i32, i32
  }
  func.func @transform_2(%arg0: i32) -> (i32, i32) {
    %c0_i32 = arith.constant 0 : i32
    %c0_i32_0 = arith.constant 0 : i32
    %c0_i32_1 = arith.constant 0 : i32
    return %c0_i32, %c0_i32_0 : i32, i32
  }
  func.func @transform_3(%arg0: i32) -> (i32, i32, i32) {
    %c0_i32 = arith.constant 0 : i32
    %c0_i32_0 = arith.constant 0 : i32
    %c0_i32_1 = arith.constant 0 : i32
    return %arg0, %c0_i32, %c0_i32_0 : i32, i32, i32
  }
}

module attributes {stable_mosaic.version = 11 : i64} {
  func.func @_db_head_kernel(%arg0: i32, %arg1: memref<1x100x32xbf16, #tpu.memory_space<vmem>>, %arg2: memref<9x32x16xbf16, #tpu.memory_space<vmem>>, %arg3: memref<1x16xf32, #tpu.memory_space<vmem>>, %arg4: memref<16x2xf32, #tpu.memory_space<vmem>>, %arg5: memref<1x2xf32, #tpu.memory_space<vmem>>, %arg6: memref<1x3x78xf32, #tpu.memory_space<vmem>>) attributes {dimension_semantics = [#tpu.dimension_semantics<parallel>], iteration_bounds = array<i64: 2>, scalar_prefetch = 0 : i64, scratch_operands = 0 : i64, tpu.core_type = #tpu.core_type<tc>, window_params = [{transform_indices = @transform_0, window_bounds = array<i64: 1, 100, 32>}, {pipeline_mode = #tpu.pipeline_mode<synchronous>, transform_indices = @transform_1, window_bounds = array<i64: 9, 32, 16>}, {pipeline_mode = #tpu.pipeline_mode<synchronous>, transform_indices = @transform_2, window_bounds = array<i64: 1, 16>}, {pipeline_mode = #tpu.pipeline_mode<synchronous>, transform_indices = @transform_3, window_bounds = array<i64: 16, 2>}, {pipeline_mode = #tpu.pipeline_mode<synchronous>, transform_indices = @transform_4, window_bounds = array<i64: 1, 2>}, {transform_indices = @transform_5, window_bounds = array<i64: 1, 3, 78>}]} {
    %c0 = arith.constant 0 : index
    %c0_0 = arith.constant 0 : index
    %c0_1 = arith.constant 0 : index
    %0 = vector.load %arg1[%c0, %c0_0, %c0_1] : memref<1x100x32xbf16, #tpu.memory_space<vmem>>, vector<1x100x32xbf16>
    %1 = vector.shape_cast %0 : vector<1x100x32xbf16> to vector<100x32xbf16>
    %cst = arith.constant 0.000000e+00 : f32
    %2 = vector.broadcast %cst : f32 to vector<78x16xf32>
    %3 = vector.extract_strided_slice %1 {offsets = [0, 0], sizes = [78, 32], strides = [1, 1]} : vector<100x32xbf16> to vector<78x32xbf16>
    %c0_2 = arith.constant 0 : index
    %c0_3 = arith.constant 0 : index
    %c0_4 = arith.constant 0 : index
    %4 = vector.load %arg2[%c0_2, %c0_3, %c0_4] : memref<9x32x16xbf16, #tpu.memory_space<vmem>>, vector<1x32x16xbf16>
    %5 = vector.shape_cast %4 : vector<1x32x16xbf16> to vector<32x16xbf16>
    %cst_5 = arith.constant dense<0.000000e+00> : vector<78x16xf32>
    %6 = tpu.matmul %3, %5, %cst_5 {dimension_numbers = #tpu.dot_dimension_numbers<[1], [0], [0], [1], [0, 0, 1, 1], [], []>} : vector<78x32xbf16>, vector<32x16xbf16>, vector<78x16xf32> -> vector<78x16xf32>
    %7 = arith.addf %2, %6 : vector<78x16xf32>
    %8 = vector.extract_strided_slice %1 {offsets = [1, 0], sizes = [78, 32], strides = [1, 1]} : vector<100x32xbf16> to vector<78x32xbf16>
    %c1 = arith.constant 1 : index
    %c0_6 = arith.constant 0 : index
    %c0_7 = arith.constant 0 : index
    %9 = vector.load %arg2[%c1, %c0_6, %c0_7] : memref<9x32x16xbf16, #tpu.memory_space<vmem>>, vector<1x32x16xbf16>
    %10 = vector.shape_cast %9 : vector<1x32x16xbf16> to vector<32x16xbf16>
    %cst_8 = arith.constant dense<0.000000e+00> : vector<78x16xf32>
    %11 = tpu.matmul %8, %10, %cst_8 {dimension_numbers = #tpu.dot_dimension_numbers<[1], [0], [0], [1], [0, 0, 1, 1], [], []>} : vector<78x32xbf16>, vector<32x16xbf16>, vector<78x16xf32> -> vector<78x16xf32>
    %12 = arith.addf %7, %11 : vector<78x16xf32>
    %13 = vector.extract_strided_slice %1 {offsets = [2, 0], sizes = [78, 32], strides = [1, 1]} : vector<100x32xbf16> to vector<78x32xbf16>
    %c2 = arith.constant 2 : index
    %c0_9 = arith.constant 0 : index
    %c0_10 = arith.constant 0 : index
    %14 = vector.load %arg2[%c2, %c0_9, %c0_10] : memref<9x32x16xbf16, #tpu.memory_space<vmem>>, vector<1x32x16xbf16>
    %15 = vector.shape_cast %14 : vector<1x32x16xbf16> to vector<32x16xbf16>
    %cst_11 = arith.constant dense<0.000000e+00> : vector<78x16xf32>
    %16 = tpu.matmul %13, %15, %cst_11 {dimension_numbers = #tpu.dot_dimension_numbers<[1], [0], [0], [1], [0, 0, 1, 1], [], []>} : vector<78x32xbf16>, vector<32x16xbf16>, vector<78x16xf32> -> vector<78x16xf32>
    %17 = arith.addf %12, %16 : vector<78x16xf32>
    %18 = vector.extract_strided_slice %1 {offsets = [10, 0], sizes = [78, 32], strides = [1, 1]} : vector<100x32xbf16> to vector<78x32xbf16>
    %c3 = arith.constant 3 : index
    %c0_12 = arith.constant 0 : index
    %c0_13 = arith.constant 0 : index
    %19 = vector.load %arg2[%c3, %c0_12, %c0_13] : memref<9x32x16xbf16, #tpu.memory_space<vmem>>, vector<1x32x16xbf16>
    %20 = vector.shape_cast %19 : vector<1x32x16xbf16> to vector<32x16xbf16>
    %cst_14 = arith.constant dense<0.000000e+00> : vector<78x16xf32>
    %21 = tpu.matmul %18, %20, %cst_14 {dimension_numbers = #tpu.dot_dimension_numbers<[1], [0], [0], [1], [0, 0, 1, 1], [], []>} : vector<78x32xbf16>, vector<32x16xbf16>, vector<78x16xf32> -> vector<78x16xf32>
    %22 = arith.addf %17, %21 : vector<78x16xf32>
    %23 = vector.extract_strided_slice %1 {offsets = [11, 0], sizes = [78, 32], strides = [1, 1]} : vector<100x32xbf16> to vector<78x32xbf16>
    %c4 = arith.constant 4 : index
    %c0_15 = arith.constant 0 : index
    %c0_16 = arith.constant 0 : index
    %24 = vector.load %arg2[%c4, %c0_15, %c0_16] : memref<9x32x16xbf16, #tpu.memory_space<vmem>>, vector<1x32x16xbf16>
    %25 = vector.shape_cast %24 : vector<1x32x16xbf16> to vector<32x16xbf16>
    %cst_17 = arith.constant dense<0.000000e+00> : vector<78x16xf32>
    %26 = tpu.matmul %23, %25, %cst_17 {dimension_numbers = #tpu.dot_dimension_numbers<[1], [0], [0], [1], [0, 0, 1, 1], [], []>} : vector<78x32xbf16>, vector<32x16xbf16>, vector<78x16xf32> -> vector<78x16xf32>
    %27 = arith.addf %22, %26 : vector<78x16xf32>
    %28 = vector.extract_strided_slice %1 {offsets = [12, 0], sizes = [78, 32], strides = [1, 1]} : vector<100x32xbf16> to vector<78x32xbf16>
    %c5 = arith.constant 5 : index
    %c0_18 = arith.constant 0 : index
    %c0_19 = arith.constant 0 : index
    %29 = vector.load %arg2[%c5, %c0_18, %c0_19] : memref<9x32x16xbf16, #tpu.memory_space<vmem>>, vector<1x32x16xbf16>
    %30 = vector.shape_cast %29 : vector<1x32x16xbf16> to vector<32x16xbf16>
    %cst_20 = arith.constant dense<0.000000e+00> : vector<78x16xf32>
    %31 = tpu.matmul %28, %30, %cst_20 {dimension_numbers = #tpu.dot_dimension_numbers<[1], [0], [0], [1], [0, 0, 1, 1], [], []>} : vector<78x32xbf16>, vector<32x16xbf16>, vector<78x16xf32> -> vector<78x16xf32>
    %32 = arith.addf %27, %31 : vector<78x16xf32>
    %33 = vector.extract_strided_slice %1 {offsets = [20, 0], sizes = [78, 32], strides = [1, 1]} : vector<100x32xbf16> to vector<78x32xbf16>
    %c6 = arith.constant 6 : index
    %c0_21 = arith.constant 0 : index
    %c0_22 = arith.constant 0 : index
    %34 = vector.load %arg2[%c6, %c0_21, %c0_22] : memref<9x32x16xbf16, #tpu.memory_space<vmem>>, vector<1x32x16xbf16>
    %35 = vector.shape_cast %34 : vector<1x32x16xbf16> to vector<32x16xbf16>
    %cst_23 = arith.constant dense<0.000000e+00> : vector<78x16xf32>
    %36 = tpu.matmul %33, %35, %cst_23 {dimension_numbers = #tpu.dot_dimension_numbers<[1], [0], [0], [1], [0, 0, 1, 1], [], []>} : vector<78x32xbf16>, vector<32x16xbf16>, vector<78x16xf32> -> vector<78x16xf32>
    %37 = arith.addf %32, %36 : vector<78x16xf32>
    %38 = vector.extract_strided_slice %1 {offsets = [21, 0], sizes = [78, 32], strides = [1, 1]} : vector<100x32xbf16> to vector<78x32xbf16>
    %c7 = arith.constant 7 : index
    %c0_24 = arith.constant 0 : index
    %c0_25 = arith.constant 0 : index
    %39 = vector.load %arg2[%c7, %c0_24, %c0_25] : memref<9x32x16xbf16, #tpu.memory_space<vmem>>, vector<1x32x16xbf16>
    %40 = vector.shape_cast %39 : vector<1x32x16xbf16> to vector<32x16xbf16>
    %cst_26 = arith.constant dense<0.000000e+00> : vector<78x16xf32>
    %41 = tpu.matmul %38, %40, %cst_26 {dimension_numbers = #tpu.dot_dimension_numbers<[1], [0], [0], [1], [0, 0, 1, 1], [], []>} : vector<78x32xbf16>, vector<32x16xbf16>, vector<78x16xf32> -> vector<78x16xf32>
    %42 = arith.addf %37, %41 : vector<78x16xf32>
    %43 = vector.extract_strided_slice %1 {offsets = [22, 0], sizes = [78, 32], strides = [1, 1]} : vector<100x32xbf16> to vector<78x32xbf16>
    %c8 = arith.constant 8 : index
    %c0_27 = arith.constant 0 : index
    %c0_28 = arith.constant 0 : index
    %44 = vector.load %arg2[%c8, %c0_27, %c0_28] : memref<9x32x16xbf16, #tpu.memory_space<vmem>>, vector<1x32x16xbf16>
    %45 = vector.shape_cast %44 : vector<1x32x16xbf16> to vector<32x16xbf16>
    %cst_29 = arith.constant dense<0.000000e+00> : vector<78x16xf32>
    %46 = tpu.matmul %43, %45, %cst_29 {dimension_numbers = #tpu.dot_dimension_numbers<[1], [0], [0], [1], [0, 0, 1, 1], [], []>} : vector<78x32xbf16>, vector<32x16xbf16>, vector<78x16xf32> -> vector<78x16xf32>
    %47 = arith.addf %42, %46 : vector<78x16xf32>
    %c0_30 = arith.constant 0 : index
    %c0_31 = arith.constant 0 : index
    %48 = vector.load %arg3[%c0_30, %c0_31] : memref<1x16xf32, #tpu.memory_space<vmem>>, vector<1x16xf32>
    %49 = vector.broadcast %48 : vector<1x16xf32> to vector<78x16xf32>
    %50 = arith.addf %47, %49 : vector<78x16xf32>
    %cst_32 = arith.constant 0.000000e+00 : f32
    %51 = vector.broadcast %cst_32 : f32 to vector<78x16xf32>
    %52 = arith.maximumf %50, %51 : vector<78x16xf32>
    %c0_33 = arith.constant 0 : index
    %c0_34 = arith.constant 0 : index
    %53 = vector.load %arg4[%c0_33, %c0_34] : memref<16x2xf32, #tpu.memory_space<vmem>>, vector<16x2xf32>
    %cst_35 = arith.constant dense<0.000000e+00> : vector<78x2xf32>
    %54 = tpu.matmul %52, %53, %cst_35 {dimension_numbers = #tpu.dot_dimension_numbers<[1], [0], [0], [1], [0, 0, 1, 1], [], []>} : vector<78x16xf32>, vector<16x2xf32>, vector<78x2xf32> -> vector<78x2xf32>
    %c0_36 = arith.constant 0 : index
    %c0_37 = arith.constant 0 : index
    %55 = vector.load %arg5[%c0_36, %c0_37] : memref<1x2xf32, #tpu.memory_space<vmem>>, vector<1x2xf32>
    %56 = vector.broadcast %55 : vector<1x2xf32> to vector<78x2xf32>
    %57 = arith.addf %54, %56 : vector<78x2xf32>
    %cst_38 = arith.constant 0.000000e+00 : f32
    %58 = vector.broadcast %cst_38 : f32 to vector<78x2xf32>
    %59 = arith.subf %58, %57 : vector<78x2xf32>
    %60 = math.exp %59 : vector<78x2xf32>
    %cst_39 = arith.constant 1.000000e+00 : f32
    %61 = vector.broadcast %cst_39 : f32 to vector<78x2xf32>
    %62 = arith.addf %61, %60 : vector<78x2xf32>
    %cst_40 = arith.constant 1.000000e+00 : f32
    %63 = vector.broadcast %cst_40 : f32 to vector<78x2xf32>
    %64 = arith.divf %63, %62 : vector<78x2xf32>
    %65 = vector.extract_strided_slice %64 {offsets = [0, 0], sizes = [78, 1], strides = [1, 1]} : vector<78x2xf32> to vector<78x1xf32>
    %66 = vector.extract_strided_slice %64 {offsets = [0, 1], sizes = [78, 1], strides = [1, 1]} : vector<78x2xf32> to vector<78x1xf32>
    %67 = arith.subf %65, %66 : vector<78x1xf32>
    %cst_41 = arith.constant -5.000000e+01 : f32
    %68 = vector.broadcast %cst_41 : f32 to vector<78x1xf32>
    %69 = arith.mulf %68, %67 : vector<78x1xf32>
    %70 = math.exp %69 : vector<78x1xf32>
    %cst_42 = arith.constant 1.000000e+00 : f32
    %71 = vector.broadcast %cst_42 : f32 to vector<78x1xf32>
    %72 = arith.addf %71, %70 : vector<78x1xf32>
    %cst_43 = arith.constant 1.000000e+00 : f32
    %73 = vector.broadcast %cst_43 : f32 to vector<78x1xf32>
    %74 = arith.divf %73, %72 : vector<78x1xf32>
    %75 = tpu.concatenate %65, %66, %74 in 1 : vector<78x1xf32>, vector<78x1xf32>, vector<78x1xf32> -> vector<78x3xf32>
    %76 = tpu.transpose %75, [1, 0] : vector<78x3xf32> -> vector<3x78xf32>
    %77 = vector.shape_cast %76 : vector<3x78xf32> to vector<1x3x78xf32>
    %c0_44 = arith.constant 0 : index
    %c0_45 = arith.constant 0 : index
    %c0_46 = arith.constant 0 : index
    %78 = vector.load %arg6[%c0_44, %c0_45, %c0_46] : memref<1x3x78xf32, #tpu.memory_space<vmem>>, vector<1x3x78xf32>
    tpu.vector_store %arg6[%c0_44, %c0_45, %c0_46], %77 {strides = array<i32>} : memref<1x3x78xf32, #tpu.memory_space<vmem>>, vector<1x3x78xf32>,
    return
  }
  func.func @transform_0(%arg0: i32) -> (i32, i32, i32) {
    %c0_i32 = arith.constant 0 : i32
    %c0_i32_0 = arith.constant 0 : i32
    %c0_i32_1 = arith.constant 0 : i32
    return %arg0, %c0_i32, %c0_i32_0 : i32, i32, i32
  }
  func.func @transform_1(%arg0: i32) -> (i32, i32, i32) {
    %c0_i32 = arith.constant 0 : i32
    %c0_i32_0 = arith.constant 0 : i32
    %c0_i32_1 = arith.constant 0 : i32
    %c0_i32_2 = arith.constant 0 : i32
    return %c0_i32, %c0_i32_0, %c0_i32_1 : i32, i32, i32
  }
  func.func @transform_2(%arg0: i32) -> (i32, i32) {
    %c0_i32 = arith.constant 0 : i32
    %c0_i32_0 = arith.constant 0 : i32
    %c0_i32_1 = arith.constant 0 : i32
    return %c0_i32, %c0_i32_0 : i32, i32
  }
  func.func @transform_3(%arg0: i32) -> (i32, i32) {
    %c0_i32 = arith.constant 0 : i32
    %c0_i32_0 = arith.constant 0 : i32
    %c0_i32_1 = arith.constant 0 : i32
    return %c0_i32, %c0_i32_0 : i32, i32
  }
  func.func @transform_4(%arg0: i32) -> (i32, i32) {
    %c0_i32 = arith.constant 0 : i32
    %c0_i32_0 = arith.constant 0 : i32
    %c0_i32_1 = arith.constant 0 : i32
    return %c0_i32, %c0_i32_0 : i32, i32
  }
  func.func @transform_5(%arg0: i32) -> (i32, i32, i32) {
    %c0_i32 = arith.constant 0 : i32
    %c0_i32_0 = arith.constant 0 : i32
    %c0_i32_1 = arith.constant 0 : i32
    return %arg0, %c0_i32, %c0_i32_0 : i32, i32, i32
  }
}

module attributes {stable_mosaic.version = 11 : i64} {
  func.func @_matmul_bias_kernel(%arg0: i32, %arg1: memref<32x8xf32, #tpu.memory_space<vmem>>, %arg2: memref<8x32xf32, #tpu.memory_space<vmem>>, %arg3: memref<1x32xf32, #tpu.memory_space<vmem>>, %arg4: memref<32x32xf32, #tpu.memory_space<vmem>>) attributes {dimension_semantics = [#tpu.dimension_semantics<parallel>], iteration_bounds = array<i64: 2>, scalar_prefetch = 0 : i64, scratch_operands = 0 : i64, tpu.core_type = #tpu.core_type<tc>, window_params = [{transform_indices = @transform_0, window_bounds = array<i64: 32, 8>}, {pipeline_mode = #tpu.pipeline_mode<synchronous>, transform_indices = @transform_1, window_bounds = array<i64: 8, 32>}, {pipeline_mode = #tpu.pipeline_mode<synchronous>, transform_indices = @transform_2, window_bounds = array<i64: 1, 32>}, {transform_indices = @transform_3, window_bounds = array<i64: 32, 32>}]} {
    %c0 = arith.constant 0 : index
    %c0_0 = arith.constant 0 : index
    %0 = vector.load %arg1[%c0, %c0_0] : memref<32x8xf32, #tpu.memory_space<vmem>>, vector<32x8xf32>
    %c0_1 = arith.constant 0 : index
    %c0_2 = arith.constant 0 : index
    %1 = vector.load %arg2[%c0_1, %c0_2] : memref<8x32xf32, #tpu.memory_space<vmem>>, vector<8x32xf32>
    %cst = arith.constant dense<0.000000e+00> : vector<32x32xf32>
    %2 = tpu.matmul %0, %1, %cst {dimension_numbers = #tpu.dot_dimension_numbers<[1], [0], [0], [1], [0, 0, 1, 1], [], []>} : vector<32x8xf32>, vector<8x32xf32>, vector<32x32xf32> -> vector<32x32xf32>
    %c0_3 = arith.constant 0 : index
    %c0_4 = arith.constant 0 : index
    %3 = vector.load %arg3[%c0_3, %c0_4] : memref<1x32xf32, #tpu.memory_space<vmem>>, vector<1x32xf32>
    %4 = vector.broadcast %3 : vector<1x32xf32> to vector<32x32xf32>
    %5 = arith.addf %2, %4 : vector<32x32xf32>
    %c0_5 = arith.constant 0 : index
    %c0_6 = arith.constant 0 : index
    %6 = vector.load %arg4[%c0_5, %c0_6] : memref<32x32xf32, #tpu.memory_space<vmem>>, vector<32x32xf32>
    tpu.vector_store %arg4[%c0_5, %c0_6], %5 {strides = array<i32>} : memref<32x32xf32, #tpu.memory_space<vmem>>, vector<32x32xf32>,
    return
  }
  func.func @transform_0(%arg0: i32) -> (i32, i32) {
    %c0_i32 = arith.constant 0 : i32
    %c0_i32_0 = arith.constant 0 : i32
    return %arg0, %c0_i32 : i32, i32
  }
  func.func @transform_1(%arg0: i32) -> (i32, i32) {
    %c0_i32 = arith.constant 0 : i32
    %c0_i32_0 = arith.constant 0 : i32
    %c0_i32_1 = arith.constant 0 : i32
    return %c0_i32, %c0_i32_0 : i32, i32
  }
  func.func @transform_2(%arg0: i32) -> (i32, i32) {
    %c0_i32 = arith.constant 0 : i32
    %c0_i32_0 = arith.constant 0 : i32
    %c0_i32_1 = arith.constant 0 : i32
    return %c0_i32, %c0_i32_0 : i32, i32
  }
  func.func @transform_3(%arg0: i32) -> (i32, i32) {
    %c0_i32 = arith.constant 0 : i32
    %c0_i32_0 = arith.constant 0 : i32
    return %arg0, %c0_i32 : i32, i32
  }
}

module attributes {stable_mosaic.version = 11 : i64} {
  func.func @_hresize_kernel(%arg0: i32, %arg1: memref<1x8x32xf32, #tpu.memory_space<vmem>>, %arg2: memref<32x8xf32, #tpu.memory_space<vmem>>, %arg3: memref<1x32x32xf32, #tpu.memory_space<vmem>>) attributes {dimension_semantics = [#tpu.dimension_semantics<parallel>], iteration_bounds = array<i64: 6>, scalar_prefetch = 0 : i64, scratch_operands = 0 : i64, tpu.core_type = #tpu.core_type<tc>, window_params = [{transform_indices = @transform_0, window_bounds = array<i64: 1, 8, 32>}, {pipeline_mode = #tpu.pipeline_mode<synchronous>, transform_indices = @transform_1, window_bounds = array<i64: 32, 8>}, {transform_indices = @transform_2, window_bounds = array<i64: 1, 32, 32>}]} {
    %c0 = arith.constant 0 : index
    %c0_0 = arith.constant 0 : index
    %0 = vector.load %arg2[%c0, %c0_0] : memref<32x8xf32, #tpu.memory_space<vmem>>, vector<32x8xf32>
    %c0_1 = arith.constant 0 : index
    %c0_2 = arith.constant 0 : index
    %c0_3 = arith.constant 0 : index
    %1 = vector.load %arg1[%c0_1, %c0_2, %c0_3] : memref<1x8x32xf32, #tpu.memory_space<vmem>>, vector<1x8x32xf32>
    %2 = vector.shape_cast %1 : vector<1x8x32xf32> to vector<8x32xf32>
    %cst = arith.constant dense<0.000000e+00> : vector<32x32xf32>
    %3 = tpu.matmul %0, %2, %cst {dimension_numbers = #tpu.dot_dimension_numbers<[1], [0], [0], [1], [0, 0, 1, 1], [], []>} : vector<32x8xf32>, vector<8x32xf32>, vector<32x32xf32> -> vector<32x32xf32>
    %4 = vector.shape_cast %3 : vector<32x32xf32> to vector<1x32x32xf32>
    %c0_4 = arith.constant 0 : index
    %c0_5 = arith.constant 0 : index
    %c0_6 = arith.constant 0 : index
    %5 = vector.load %arg3[%c0_4, %c0_5, %c0_6] : memref<1x32x32xf32, #tpu.memory_space<vmem>>, vector<1x32x32xf32>
    tpu.vector_store %arg3[%c0_4, %c0_5, %c0_6], %4 {strides = array<i32>} : memref<1x32x32xf32, #tpu.memory_space<vmem>>, vector<1x32x32xf32>,
    return
  }
  func.func @transform_0(%arg0: i32) -> (i32, i32, i32) {
    %c0_i32 = arith.constant 0 : i32
    %c0_i32_0 = arith.constant 0 : i32
    %c0_i32_1 = arith.constant 0 : i32
    return %arg0, %c0_i32, %c0_i32_0 : i32, i32, i32
  }
  func.func @transform_1(%arg0: i32) -> (i32, i32) {
    %c0_i32 = arith.constant 0 : i32
    %c0_i32_0 = arith.constant 0 : i32
    %c0_i32_1 = arith.constant 0 : i32
    return %c0_i32, %c0_i32_0 : i32, i32
  }
  func.func @transform_2(%arg0: i32) -> (i32, i32, i32) {
    %c0_i32 = arith.constant 0 : i32
    %c0_i32_0 = arith.constant 0 : i32
    %c0_i32_1 = arith.constant 0 : i32
    return %arg0, %c0_i32, %c0_i32_0 : i32, i32, i32
  }
}

</mosaic_0001>

<bundles_post_ra>
// kernel: _lambda_.16
= control target key start
LH: loop header
LB: loop body
LE: loop exit
PB: predicated region body
PF: predicated region fallthrough
CT: control target
= control target key end

     0   :  { %s2311_s12 = smov 0   ;;  %s2963_s0 = inlined_call_operand.vmem [shape: bf16[2,289,12], index: 0, kind: input, shape index: {}]   ;;  %s2964_s1 = inlined_call_operand.vmem [shape: bf16[4,12,8], index: 1, kind: input, shape index: {}]   ;;  %s2965_s2 = inlined_call_operand.vmem [shape: f32[1,8], index: 2, kind: input, shape index: {}]   ;;  %s2966_s3 = inlined_call_operand.vmem [shape: bf16[2,271,8], index: 3, kind: output, shape index: {}]  }
   0x1 LB: > { %s1719_s13 = sadd.s32 4294967295, %s2287_s12   ;;  %p1723_p0 = scmp.ge.s32.totalorder %s2287_s12, 1  ;;  %s2287_s12 = sphi %s2311_s12, %s13_s12  }
   0x2   : > { %p137_p1 = scmp.lt.s32.totalorder %s2287_s12, 3 }
   0x4   : > { %p138_p2 = pnand %p1723_p0, %p137_p1 }
   0x5   : > { %vm492_vm0 = vcmask (!%p138_p2), 1045504   ;;  %v2289_v0 = vmov (!%p138_p2), 0.0   ;;  %v2258_v1 = vld [vmem:[%s2964_s1 + $0x8] sm:$0x3f] (!%p138_p2)   ;;  %v2259_v2 = vld [vmem:[%s2964_s1] sm:$0x3f] (!%p138_p2)  }
   0x6   : > { %141 = sbr.rel (%p138_p2) target bundleno = 515 (0x203), region = 32  ;;  %1966 = vmatprep.subr.bf16.mxu0 (!%p138_p2), %v2289_v0  ;;  %2036 = vmatprep.subr.bf16.mxu1 (!%p138_p2), %v2289_v0  ;;  %p161_p3 = scmp.lt.s32.totalorder (!%p138_p2), %s1719_s13, 1  ;;  %v494_v3 = vsel (!%p138_p2), %vm492_vm0, %v2258_v1, 0  ;;  %vm2290_vm1 = vmmov (!%p138_p2), 0   ;;  %v705_v4 = vsel (!%p138_p2), %vm492_vm0, %v2259_v2, 0  ;;  %vm440_vm2 = vcmask (!%p138_p2), 97280  }
   0x7   : > { %2038 = vmatprep.mubr.msk.bf16.mxu1 (!%p138_p2), %vm2290_vm1, %v2289_v0  ;;  %1968 = vmatprep.mubr.msk.bf16.mxu0 (!%p138_p2), %vm2290_vm1, %v2289_v0  ;;  %v2263_v5 = vld [vmem:[%s2964_s1 + $0x18] sm:$0x3f] (!%p138_p2)   ;;  %v2262_v12 = vld [vmem:[%s2964_s1 + $0x10] sm:$0x3f] (!%p138_p2)   ;;  %vm299_vm3 = vsmask.f32 (!%p138_p2), 7424 }
   0x8   : > { %1967 = vmatpush3.bf16.msra.mxu0 (!%p138_p2), %v494_v3  ;;  %2037 = vmatpush3.bf16.msra.mxu1 (!%p138_p2), %v705_v4  ;;  %v1208_v7 = vsel (!%p138_p2), %vm492_vm0, %v2263_v5, 0  ;;  %v904_v19 = vsel (!%p138_p2), %vm492_vm0, %v2262_v12, 0  ;;  %vm1115_vm4 = vcmask (!%p138_p2), 1046528   ;;  %vm1624_vm5 = vcmask (!%p138_p2), 60416  }
   0x9   : > { %2106 = vmatprep.subr.bf16.mxu0 (!%p138_p2), %v2289_v0  ;;  %2176 = vmatprep.subr.bf16.mxu1 (!%p138_p2), %v2289_v0  ;;  %vm1659_vm6 = vsmask.f32 (!%p138_p2), 3328 }
   0xa   : > { %vm1660_vm7 = vmand (!%p138_p2), %vm1624_vm5, %vm1659_vm6 }
   0xd   : > { %s2968_s13 = smov (!%p161_p3, %s1719_s13), 1 }
   0xe   : > { %s2246_s20 = smul.u32 148, %s2968_s13 }
   0xf   : > { %s2247_s28 = smul.u32 136, %s2968_s13 }
  0x10   : > { %s2344_s23 = scalar_lea.vmem %s2963_s0, %s2246_s20 }
  0x11   : > { %v2260_v6 = vld [vmem:[%s2344_s23] sm:$0xff]   ;;  %v2261_v8 = vld [vmem:[%s2344_s23 + $0x8] sm:$0xff]   ;;  %v2264_v13 = vld [vmem:[%s2344_s23 + $0x10] sm:$0xff]   ;;  %s2825_s4 = scalar_lea.vmem %s2966_s3, %s2247_s28 }
  0x12   : > { %2039 = vmatmul.mubr.msk.bf16.vlgmr.msra.gmra.mrb[0].mxu1 %vm440_vm2, %v2260_v6  ;;  %v301_v9 = vshrl.u32 %v2260_v6, 16  ;;  %v303_v10 = vshll.u32 %v2260_v6, 16  ;;  %v308_v11 = vshll.u32 %v2261_v8, 16  ;;  %v312_v17 = vshrl.u32 %v2261_v8, 16  ;;  %v2265_v23 = vld [vmem:[%s2344_s23 + $0x18] sm:$0xff]   ;;  %v2266_v29 = vld [vmem:[%s2344_s23 + $0x20] sm:$0xff]  }
  0x13   : > { %2177 = vmatpush3.bf16.msra.mxu1 %v1208_v7  ;;  %2042 = vmatprep.mubr.msk.bf16.mxu1 %vm2290_vm1, %v2289_v0  ;;  %v316_v18 = vshll.u32 %v2264_v13, 16  ;;  %v320_v25 = vshrl.u32 %v2264_v13, 16  ;;  %v324_v26 = vshll.u32 %v2265_v23, 16  ;;  %v328_v31 = vshrl.u32 %v2265_v23, 16  ;;  %v2267_v38 = vld [vmem:[%s2344_s23 + $0x28] sm:$0xff]   ;;  %v2268_v48 = vld [vmem:[%s2344_s23 + $0x30] sm:$0xff]  }
  0x14   : > { %v305_v14 = vrot.slane %v303_v10, 1  ;;  %v310_v15 = vrot.slane %v308_v11, 1  ;;  %v332_v32 = vshll.u32 %v2266_v29, 16  ;;  %v1116_v33 = vrot.slane %v2261_v8, 1  ;;  %v2269_v56 = vld [vmem:[%s2344_s23 + $0x38] sm:$0xff]   ;;  %v2270_v1 = vld [vmem:[%s2344_s23 + $0x40] sm:$0xff]  }
  0x15   : > { %v318_v22 = vrot.slane %v316_v18, 1  ;;  %v326_v28 = vrot.slane %v324_v26, 1  ;;  %v1117_v34 = vrot.slane %v2264_v13, 1  ;;  %v1119_v35 = vrot.slane %v2265_v23, 1  ;;  %v2484_v26 = vld [vmem:[%s2344_s23 + $0x58] sm:$0xff]  }
  0x16   : > { %v306_v16 = vor.u32 %v305_v14, %v301_v9  ;;  %v314_v21 = vor.u32 %v312_v17, %v310_v15  ;;  %v334_v37 = vrot.slane %v332_v32, 1  ;;  %v1121_v40 = vrot.slane %v2266_v29, 1  ;;  %v2446_v9 = vld [vmem:[%s2344_s23 + $0x48] sm:$0xff]   ;;  %v2463_v17 = vld [vmem:[%s2344_s23 + $0x50] sm:$0xff]  }
  0x17   : > { %v322_v27 = vor.u32 %v320_v25, %v318_v22  ;;  %v330_v36 = vor.u32 %v328_v31, %v326_v28  ;;  %v2385_v39 = vsel %vm1115_vm4, %v1116_v33, %v1117_v34  ;;  %v2389_v41 = vsel %vm1115_vm4, %v1117_v34, %v1119_v35  ;;  %v2500_v33 = vld [vmem:[%s2344_s23 + $0x60] sm:$0xff]  }
  0x18   : > { %v311_v20 = vsel %vm299_vm3, %v306_v16, %v310_v15  ;;  %v2366_v24 = vsel %vm299_vm3, %v314_v21, %v318_v22  ;;  %v2394_v42 = vsel %vm1115_vm4, %v1119_v35, %v1121_v40  ;;  %v336_v44 = vshrl.u32 %v2266_v29, 16 }
  0x19   : > { %1969 = vmatmul.mubr.msk.bf16.vlgmr.msra.gmra.mrb[0].mxu0 %vm440_vm2, %v311_v20  ;;  %v2377_v30 = vsel %vm299_vm3, %v322_v27, %v326_v28  ;;  %v2397_v43 = vsel %vm299_vm3, %v330_v36, %v334_v37  ;;  %v340_v45 = vshll.u32 %v2267_v38, 16  ;;  %v1123_v49 = vrot.slane %v2267_v38, 1 }
  0x1a   : > { %2107 = vmatpush3.bf16.msra.mxu0 %v904_v19  ;;  %1972 = vmatprep.mubr.msk.bf16.mxu0 %vm2290_vm1, %v2289_v0  ;;  %v338_v46 = vor.u32 %v336_v44, %v334_v37  ;;  %v344_v52 = vshrl.u32 %v2267_v38, 16  ;;  %v348_v53 = vshll.u32 %v2268_v48, 16  ;;  %v1125_v57 = vrot.slane %v2268_v48, 1 }
  0x1b   : > { %2043 = vmatmul.mubr.msk.bf16.gmra.mrb[4].mxu1 %vm440_vm2, %v2261_v8  ;;  %v342_v47 = vrot.slane %v340_v45, 1  ;;  %v2408_v50 = vsel %vm1115_vm4, %v1121_v40, %v1123_v49  ;;  %v352_v60 = vshrl.u32 %v2268_v48, 16  ;;  %v356_v61 = vshll.u32 %v2269_v56, 16  ;;  %v2516_v40 = vld [vmem:[%s2344_s23 + $0x68] sm:$0xff]  }
  0x1c   : > { %2046 = vmatprep.mubr.msk.bf16.mxu1 %vm2290_vm1, %v2289_v0  ;;  %v350_v55 = vrot.slane %v348_v53, 1  ;;  %v2422_v58 = vsel %vm1115_vm4, %v1123_v49, %v1125_v57  ;;  %v1127_v2 = vrot.slane %v2269_v56, 1  ;;  %v360_v5 = vshrl.u32 %v2269_v56, 16  ;;  %v2532_v49 = vld [vmem:[%s2344_s23 + $0x70] sm:$0xff]  }
  0x1d   : > { %v2411_v51 = vsel %vm299_vm3, %v338_v46, %v342_v47  ;;  %v346_v54 = vor.u32 %v344_v52, %v342_v47  ;;  %v358_v63 = vrot.slane %v356_v61, 1  ;;  %v364_v6 = vshll.u32 %v2270_v1, 16 }
  0x1e   : > { %v354_v62 = vor.u32 %v352_v60, %v350_v55  ;;  %v2436_v3 = vsel %vm1115_vm4, %v1125_v57, %v1127_v2  ;;  %v1129_v10 = vrot.slane %v2270_v1, 1  ;;  %v372_v14 = vshll.u32 %v2446_v9, 16  ;;  %v2548_v57 = vld [vmem:[%s2344_s23 + $0x78] sm:$0xff]  }
  0x1f   : > { %v2425_v59 = vsel %vm299_vm3, %v346_v54, %v350_v55  ;;  %v362_v7 = vor.u32 %v360_v5, %v358_v63  ;;  %v366_v8 = vrot.slane %v364_v6, 1  ;;  %v1131_v18 = vrot.slane %v2446_v9, 1 }
  0x20   : > { %v2439_v4 = vsel %vm299_vm3, %v354_v62, %v358_v63  ;;  %v2452_v11 = vsel %vm1115_vm4, %v1127_v2, %v1129_v10  ;;  %v374_v16 = vrot.slane %v372_v14, 1  ;;  %v376_v21 = vshrl.u32 %v2446_v9, 16  ;;  %v2564_v2 = vld [vmem:[%s2344_s23 + $0x80] sm:$0xff]  }
  0x21   : > { %1973 = vmatmul.mubr.msk.bf16.gmra.mrb[4].mxu0 %vm440_vm2, %v2366_v24  ;;  %v2455_v12 = vsel %vm299_vm3, %v362_v7, %v366_v8  ;;  %v2472_v19 = vsel %vm1115_vm4, %v1129_v10, %v1131_v18  ;;  %v380_v22 = vshll.u32 %v2463_v17, 16  ;;  %v384_v28 = vshrl.u32 %v2463_v17, 16 }
  0x22   : > { %1976 = vmatprep.mubr.msk.bf16.mxu0 %vm2290_vm1, %v2289_v0  ;;  %v392_v35 = vshrl.u32 %v2484_v26, 16  ;;  %v396_v36 = vshll.u32 %v2500_v33, 16  ;;  %v400_v45 = vshrl.u32 %v2500_v33, 16  ;;  %v404_v46 = vshll.u32 %v2516_v40, 16 }
  0x23   : > { %2047 = vmatmul.mubr.msk.bf16.gmra.mrb[8].mxu1 %vm440_vm2, %v2264_v13  ;;  %v368_v13 = vshrl.u32 %v2270_v1, 16  ;;  %v382_v25 = vrot.slane %v380_v22, 1  ;;  %v408_v53 = vshrl.u32 %v2516_v40, 16  ;;  %v412_v54 = vshll.u32 %v2532_v49, 16 }
  0x24   : > { %2050 = vmatprep.mubr.msk.bf16.mxu1 %vm2290_vm1, %v2289_v0  ;;  %v416_v61 = vshrl.u32 %v2532_v49, 16  ;;  %v420_v62 = vshll.u32 %v2548_v57, 16  ;;  %v424_v6 = vshrl.u32 %v2548_v57, 16  ;;  %v428_v7 = vshll.u32 %v2564_v2, 16 }
  0x25   : > { %v370_v15 = vor.u32 %v368_v13, %v366_v8  ;;  %v386_v31 = vor.u32 %v384_v28, %v382_v25  ;;  %v432_v14 = vshrl.u32 %v2564_v2, 16 }
  0x26   : > { %v430_v10 = vrot.slane %v428_v7, 1 }
  0x27   : > { %v2475_v20 = vsel %vm299_vm3, %v370_v15, %v374_v16 }
  0x28   : > { %v2595_v15 = vor.u32 %v432_v14, %v430_v10 }
  0x29   : > { %1977 = vmatmul.mubr.msk.bf16.gmra.mrb[8].mxu0 %vm440_vm2, %v2377_v30 }
  0x2a   : > { %1980 = vmatprep.mubr.msk.bf16.mxu0 %vm2290_vm1, %v2289_v0 }
  0x2b   : > { %2051 = vmatmul.mubr.msk.bf16.gmra.mrb[12].mxu1 %vm440_vm2, %v2265_v23  ;;  %v378_v23 = vor.u32 %v376_v21, %v374_v16 }
  0x2c   : > { %2054 = vmatprep.mubr.msk.bf16.mxu1 %vm2290_vm1, %v2289_v0 }
  0x2d   : > { %v2491_v27 = vsel %vm299_vm3, %v378_v23, %v382_v25  ;;  %v1141_v25 = vrot.slane %v2532_v49, 1 }
  0x31   : > { %1981 = vmatmul.mubr.msk.bf16.gmra.mrb[12].mxu0 %vm440_vm2, %v2397_v43 }
  0x32   : > { %1984 = vmatprep.mubr.msk.bf16.mxu0 %vm2290_vm1, %v2289_v0 }
  0x33   : > { %2055 = vmatmul.mubr.msk.bf16.gmra.mrb[16].mxu1 %vm440_vm2, %v2266_v29  ;;  %v388_v29 = vshll.u32 %v2484_v26, 16 }
  0x34   : > { %2058 = vmatprep.mubr.msk.bf16.mxu1 %vm2290_vm1, %v2289_v0 }
  0x35   : > { %v390_v32 = vrot.slane %v388_v29, 1 }
  0x37   : > { %v2507_v34 = vsel %vm299_vm3, %v386_v31, %v390_v32  ;;  %v394_v37 = vor.u32 %v392_v35, %v390_v32 }
  0x39   : > { %1985 = vmatmul.mubr.msk.bf16.gmra.mrb[16].mxu0 %vm440_vm2, %v2411_v51 }
  0x3a   : > { %1988 = vmatprep.mubr.msk.bf16.mxu0 %vm2290_vm1, %v2289_v0 }
  0x3b   : > { %2059 = vmatmul.mubr.msk.bf16.gmra.mrb[20].mxu1 %vm440_vm2, %v2267_v38  ;;  %v398_v38 = vrot.slane %v396_v36, 1 }
  0x3c   : > { %2062 = vmatprep.mubr.msk.bf16.mxu1 %vm2290_vm1, %v2289_v0 }
  0x3d   : > { %v2523_v44 = vsel %vm299_vm3, %v394_v37, %v398_v38  ;;  %v402_v47 = vor.u32 %v400_v45, %v398_v38  ;;  %v1143_v38 = vrot.slane %v2548_v57, 1 }
  0x41   : > { %1989 = vmatmul.mubr.msk.bf16.gmra.mrb[20].mxu0 %vm440_vm2, %v2425_v59 }
  0x42   : > { %1992 = vmatprep.mubr.msk.bf16.mxu0 %vm2290_vm1, %v2289_v0 }
  0x43   : > { %2063 = vmatmul.mubr.msk.bf16.gmra.mrb[24].mxu1 %vm440_vm2, %v2268_v48  ;;  %v406_v48 = vrot.slane %v404_v46, 1 }
  0x44   : > { %2066 = vmatprep.mubr.msk.bf16.mxu1 %vm2290_vm1, %v2289_v0 }
  0x45   : > { %v2539_v52 = vsel %vm299_vm3, %v402_v47, %v406_v48  ;;  %v410_v55 = vor.u32 %v408_v53, %v406_v48  ;;  %v1144_v53 = vsel %vm1115_vm4, %v1141_v25, %v1143_v38 }
  0x49   : > { %1993 = vmatmul.mubr.msk.bf16.gmra.mrb[24].mxu0 %vm440_vm2, %v2439_v4 }
  0x4a   : > { %1996 = vmatprep.mubr.msk.bf16.mxu0 %vm2290_vm1, %v2289_v0 }
  0x4b   : > { %2067 = vmatmul.mubr.msk.bf16.gmra.mrb[28].mxu1 %vm440_vm2, %v2269_v56  ;;  %v414_v56 = vrot.slane %v412_v54, 1 }
  0x4c   : > { %2070 = vmatprep.mubr.msk.bf16.mxu1 %vm2290_vm1, %v2289_v0 }
  0x4d   : > { %v2555_v60 = vsel %vm299_vm3, %v410_v55, %v414_v56  ;;  %v418_v63 = vor.u32 %v416_v61, %v414_v56  ;;  %v1145_v56 = vrot.slane %v2564_v2, 1 }
  0x51   : > { %1997 = vmatmul.mubr.msk.bf16.gmra.mrb[28].mxu0 %vm440_vm2, %v2455_v12 }
  0x52   : > { %2000 = vmatprep.mubr.msk.bf16.mxu0 %vm2290_vm1, %v2289_v0 }
  0x53   : > { %2071 = vmatmul.mubr.msk.bf16.gmra.mrb[32].mxu1 %vm440_vm2, %v2270_v1  ;;  %v422_v1 = vrot.slane %v420_v62, 1 }
  0x54   : > { %2074 = vmatprep.mubr.msk.bf16.mxu1 %vm2290_vm1, %v2289_v0 }
  0x55   : > { %v2571_v5 = vsel %vm299_vm3, %v418_v63, %v422_v1  ;;  %v426_v8 = vor.u32 %v424_v6, %v422_v1 }
  0x57   : > { %v2584_v13 = vsel %vm299_vm3, %v426_v8, %v430_v10  ;;  %v1146_v8 = vsel %vm1115_vm4, %v1143_v38, %v1145_v56  ;;  %v2279_v10 = vld [vmem:[%s2344_s23 + $0x88] sm:$0xff]  }
  0x59   : > { %2001 = vmatmul.mubr.msk.bf16.gmra.mrb[32].mxu0 %vm440_vm2, %v2475_v20 }
  0x5a   : > { %2004 = vmatprep.mubr.msk.bf16.mxu0 %vm2290_vm1, %v2289_v0 }
  0x5b   : > { %2075 = vmatmul.mubr.msk.bf16.gmra.mrb[36].mxu1 %vm440_vm2, %v2446_v9 }
  0x5c   : > { %2078 = vmatprep.mubr.msk.bf16.mxu1 %vm2290_vm1, %v2289_v0 }
  0x61   : > { %2005 = vmatmul.mubr.msk.bf16.gmra.mrb[36].mxu0 %vm440_vm2, %v2491_v27 }
  0x62   : > { %2008 = vmatprep.mubr.msk.bf16.mxu0 %vm2290_vm1, %v2289_v0 }
  0x63   : > { %2079 = vmatmul.mubr.msk.bf16.gmra.mrb[40].mxu1 %vm440_vm2, %v2463_v17 }
  0x64   : > { %2082 = vmatprep.mubr.msk.bf16.mxu1 %vm2290_vm1, %v2289_v0 }
  0x69   : > { %2009 = vmatmul.mubr.msk.bf16.gmra.mrb[40].mxu0 %vm440_vm2, %v2507_v34 }
  0x6a   : > { %2012 = vmatprep.mubr.msk.bf16.mxu0 %vm2290_vm1, %v2289_v0 }
  0x6b   : > { %2083 = vmatmul.mubr.msk.bf16.gmra.mrb[44].mxu1 %vm440_vm2, %v2484_v26 }
  0x6c   : > { %2086 = vmatprep.mubr.msk.bf16.mxu1 %vm2290_vm1, %v2289_v0 }
  0x71   : > { %2013 = vmatmul.mubr.msk.bf16.gmra.mrb[44].mxu0 %vm440_vm2, %v2523_v44 }
  0x72   : > { %2016 = vmatprep.mubr.msk.bf16.mxu0 %vm2290_vm1, %v2289_v0 }
  0x73   : > { %2087 = vmatmul.mubr.msk.bf16.gmra.mrb[48].mxu1 %vm440_vm2, %v2500_v33 }
  0x74   : > { %2090 = vmatprep.mubr.msk.bf16.mxu1 %vm2290_vm1, %v2289_v0 }
  0x79   : > { %2017 = vmatmul.mubr.msk.bf16.gmra.mrb[48].mxu0 %vm440_vm2, %v2539_v52 }
  0x7a   : > { %2020 = vmatprep.mubr.msk.bf16.mxu0 %vm2290_vm1, %v2289_v0 }
  0x7b   : > { %2091 = vmatmul.mubr.msk.bf16.gmra.mrb[52].mxu1 %vm440_vm2, %v2516_v40 }
  0x7c   : > { %2094 = vmatprep.mubr.msk.bf16.mxu1 %vm2290_vm1, %v2289_v0 }
  0x81   : > { %2021 = vmatmul.mubr.msk.bf16.gmra.mrb[52].mxu0 %vm440_vm2, %v2555_v60 }
  0x82   : > { %2024 = vmatprep.mubr.msk.bf16.mxu0 %vm2290_vm1, %v2289_v0 }
  0x83   : > { %2095 = vmatmul.mubr.msk.bf16.gmra.mrb[56].mxu1 %vm440_vm2, %v2532_v49 }
  0x84   : > { %2098 = vmatprep.mubr.msk.bf16.mxu1 %vm2290_vm1, %v2289_v0 }
  0x89   : > { %2025 = vmatmul.mubr.msk.bf16.gmra.mrb[56].mxu0 %vm440_vm2, %v2571_v5 }
  0x8a   : > { %2028 = vmatprep.mubr.msk.bf16.mxu0 %vm2290_vm1, %v2289_v0 }
  0x8b   : > { %2099 = vmatmul.mubr.msk.bf16.gmra.mrb[60].mxu1 %vm440_vm2, %v2548_v57 }
  0x8c   : > { %2102 = vmatprep.mubr.msk.bf16.mxu1 %vm2290_vm1, %v2289_v0 }
  0x91   : > { %2029 = vmatmul.mubr.msk.bf16.gmra.mrb[60].mxu0 %vm440_vm2, %v2584_v13 }
  0x92   : > { %2032 = vmatprep.mubr.msk.bf16.mxu0 %vm2290_vm1, %v2289_v0 }
  0x93   : > { %2103 = vmatmul.mubr.msk.bf16.gmra.mrb[64].mxu1 %vm440_vm2, %v2564_v2 }
  0x94   : > { %2178 = vmatprep.mubr.msk.bf16.mxu1 %vm2290_vm1, %v2289_v0 }
  0x99   : > { %2033 = vmatmul.mubr.msk.bf16.gmra.mrb[64].mxu0 %vm440_vm2, %v2595_v15 }
  0x9a   : > { %2108 = vmatprep.mubr.msk.bf16.mxu0 %vm2290_vm1, %v2289_v0 }
  0x9b   : > { %2179 = vmatmul.mubr.msk.bf16.vlgmr.msra.gmra.mrb[68].mxu1 %vm440_vm2, %v2385_v39  ;;  %v1135_v39 = vrot.slane %v2484_v26, 1 }
  0x9c   : > { %2182 = vmatprep.mubr.msk.bf16.mxu1 %vm2290_vm1, %v2289_v0 }
  0xa1   : > { %2109 = vmatmul.mubr.msk.bf16.vlgmr.msra.gmra.mrb[68].mxu0 %vm440_vm2, %v2366_v24  ;;  %v1133_v24 = vrot.slane %v2463_v17, 1 }
  0xa2   : > { %2112 = vmatprep.mubr.msk.bf16.mxu0 %vm2290_vm1, %v2289_v0 }
  0xa3   : > { %2183 = vmatmul.mubr.msk.bf16.gmra.mrb[72].mxu1 %vm440_vm2, %v2389_v41  ;;  %v1136_v41 = vsel %vm1115_vm4, %v1133_v24, %v1135_v39 }
  0xa4   : > { %2186 = vmatprep.mubr.msk.bf16.mxu1 %vm2290_vm1, %v2289_v0 }
  0xa9   : > { %2113 = vmatmul.mubr.msk.bf16.gmra.mrb[72].mxu0 %vm440_vm2, %v2377_v30  ;;  %v1134_v30 = vsel %vm1115_vm4, %v1131_v18, %v1133_v24  ;;  %v1147_v24 = vrot.slane %v2279_v10, 1 }
  0xaa   : > { %2116 = vmatprep.mubr.msk.bf16.mxu0 %vm2290_vm1, %v2289_v0 }
  0xab   : > { %2187 = vmatmul.mubr.msk.bf16.gmra.mrb[76].mxu1 %vm440_vm2, %v2394_v42  ;;  %v1137_v42 = vrot.slane %v2500_v33, 1 }
  0xac   : > { %2190 = vmatprep.mubr.msk.bf16.mxu1 %vm2290_vm1, %v2289_v0 }
  0xb1   : > { %2117 = vmatmul.mubr.msk.bf16.gmra.mrb[76].mxu0 %vm440_vm2, %v2397_v43 }
  0xb2   : > { %2120 = vmatprep.mubr.msk.bf16.mxu0 %vm2290_vm1, %v2289_v0 }
  0xb3   : > { %2191 = vmatmul.mubr.msk.bf16.gmra.mrb[80].mxu1 %vm440_vm2, %v2408_v50 }
  0xb4   : > { %2194 = vmatprep.mubr.msk.bf16.mxu1 %vm2290_vm1, %v2289_v0 }
  0xb9   : > { %2121 = vmatmul.mubr.msk.bf16.gmra.mrb[80].mxu0 %vm440_vm2, %v2411_v51 }
  0xba   : > { %2124 = vmatprep.mubr.msk.bf16.mxu0 %vm2290_vm1, %v2289_v0 }
  0xbb   : > { %2195 = vmatmul.mubr.msk.bf16.gmra.mrb[84].mxu1 %vm440_vm2, %v2422_v58 }
  0xbc   : > { %2198 = vmatprep.mubr.msk.bf16.mxu1 %vm2290_vm1, %v2289_v0 }
  0xc1   : > { %2125 = vmatmul.mubr.msk.bf16.gmra.mrb[84].mxu0 %vm440_vm2, %v2425_v59  ;;  %v1138_v59 = vsel %vm1115_vm4, %v1135_v39, %v1137_v42 }
  0xc2   : > { %2128 = vmatprep.mubr.msk.bf16.mxu0 %vm2290_vm1, %v2289_v0 }
  0xc3   : > { %2199 = vmatmul.mubr.msk.bf16.gmra.mrb[88].mxu1 %vm440_vm2, %v2436_v3 }
  0xc4   : > { %2202 = vmatprep.mubr.msk.bf16.mxu1 %vm2290_vm1, %v2289_v0 }
  0xc9   : > { %2129 = vmatmul.mubr.msk.bf16.gmra.mrb[88].mxu0 %vm440_vm2, %v2439_v4  ;;  %v1139_v4 = vrot.slane %v2516_v40, 1 }
  0xca   : > { %2132 = vmatprep.mubr.msk.bf16.mxu0 %vm2290_vm1, %v2289_v0 }
  0xcb   : > { %2203 = vmatmul.mubr.msk.bf16.gmra.mrb[92].mxu1 %vm440_vm2, %v2452_v11  ;;  %v1140_v21 = vsel %vm1115_vm4, %v1137_v42, %v1139_v4  ;;  %v1142_v35 = vsel %vm1115_vm4, %v1139_v4, %v1141_v25 }
  0xcc   : > { %2206 = vmatprep.mubr.msk.bf16.mxu1 %vm2290_vm1, %v2289_v0 }
  0xd1   : > { %2133 = vmatmul.mubr.msk.bf16.gmra.mrb[92].mxu0 %vm440_vm2, %v2455_v12 }
  0xd2   : > { %2136 = vmatprep.mubr.msk.bf16.mxu0 %vm2290_vm1, %v2289_v0 }
  0xd3   : > { %2207 = vmatmul.mubr.msk.bf16.gmra.mrb[96].mxu1 %vm440_vm2, %v2472_v19 }
  0xd4   : > { %2210 = vmatprep.mubr.msk.bf16.mxu1 %vm2290_vm1, %v2289_v0 }
  0xd9   : > { %2137 = vmatmul.mubr.msk.bf16.gmra.mrb[96].mxu0 %vm440_vm2, %v2475_v20 }
  0xda   : > { %2140 = vmatprep.mubr.msk.bf16.mxu0 %vm2290_vm1, %v2289_v0 }
  0xdb   : > { %2211 = vmatmul.mubr.msk.bf16.gmra.mrb[100].mxu1 %vm440_vm2, %v1134_v30 }
  0xdc   : > { %2214 = vmatprep.mubr.msk.bf16.mxu1 %vm2290_vm1, %v2289_v0 }
  0xe1   : > { %2141 = vmatmul.mubr.msk.bf16.gmra.mrb[100].mxu0 %vm440_vm2, %v2491_v27 }
  0xe2   : > { %2144 = vmatprep.mubr.msk.bf16.mxu0 %vm2290_vm1, %v2289_v0 }
  0xe3   : > { %2215 = vmatmul.mubr.msk.bf16.gmra.mrb[104].mxu1 %vm440_vm2, %v1136_v41 }
  0xe4   : > { %2218 = vmatprep.mubr.msk.bf16.mxu1 %vm2290_vm1, %v2289_v0 }
  0xe5   : > { %v741_v43 = vpop.f32.mrb[0].mxu1 }
  0xe6   : > { %v2040_v50 = vpop.f32.mrb[1].mxu1 }
  0xe7   : > { %v744_v51 = vpop.f32.mrb[2].mxu1 }
  0xe8   : > { %v2041_v58 = vpop.f32.mrb[3].mxu1 }
  0xe9   : > { %2145 = vmatmul.mubr.msk.bf16.gmra.mrb[104].mxu0 %vm440_vm2, %v2507_v34 }
  0xea   : > { %2148 = vmatprep.mubr.msk.bf16.mxu0 %vm2290_vm1, %v2289_v0 }
  0xeb   : > { %2219 = vmatmul.mubr.msk.bf16.gmra.mrb[108].mxu1 %vm440_vm2, %v1138_v59  ;;  %v1148_v59 = vsel %vm1115_vm4, %v1145_v56, %v1147_v24 }
  0xec   : > { %v530_v3 = vpop.f32.mrb[0].mxu0  ;;  %2222 = vmatprep.mubr.msk.bf16.mxu1 %vm2290_vm1, %v2289_v0 }
  0xed   : > { %v2691_v9 = vadd.f32 %v741_v43, %v530_v3  ;;  %v1970_v11 = vpop.f32.mrb[1].mxu0  ;;  %v885_v43 = vshll.u32 %v2279_v10, 16  ;;  %v2280_v3 = vld [vmem:[%s2344_s23 + $0x90] ss:$0 sps:$4 sm:$0x11]  }
  0xee   : > { %v533_v12 = vpop.f32.mrb[2].mxu0  ;;  %v749_v16 = vpop.f32.mrb[4].mxu1 }
  0xef   : > { %v2693_v17 = vadd.f32 %v744_v51, %v533_v12  ;;  %v1971_v18 = vpop.f32.mrb[3].mxu0  ;;  %v2044_v19 = vpop.f32.mrb[5].mxu1  ;;  %v887_v11 = vrot.slane %v885_v43, 1 }
  0xf0   : > { %v752_v20 = vpop.f32.mrb[6].mxu1 }
  0xf1   : > { %2149 = vmatmul.mubr.msk.bf16.gmra.mrb[108].mxu0 %vm440_vm2, %v2523_v44  ;;  %v2045_v22 = vpop.f32.mrb[7].mxu1 }
  0xf2   : > { %2152 = vmatprep.mubr.msk.bf16.mxu0 %vm2290_vm1, %v2289_v0 }
  0xf3   : > { %2223 = vmatmul.mubr.msk.bf16.gmra.mrb[112].mxu1 %vm440_vm2, %v1140_v21  ;;  %v888_v21 = vsel %vm299_vm3, %v2595_v15, %v887_v11 }
  0xf4   : > { %v538_v23 = vpop.f32.mrb[4].mxu0  ;;  %2226 = vmatprep.mubr.msk.bf16.mxu1 %vm2290_vm1, %v2289_v0 }
  0xf5   : > { %v2704_v26 = vadd.f32 %v749_v16, %v538_v23  ;;  %v1974_v27 = vpop.f32.mrb[5].mxu0  ;;  %v1149_v16 = vrot.slane %v2280_v3, 1 }
  0xf6   : > { %v541_v28 = vpop.f32.mrb[6].mxu0  ;;  %v757_v29 = vpop.f32.mrb[8].mxu1 }
  0xf7   : > { %v2706_v31 = vadd.f32 %v752_v20, %v541_v28  ;;  %v1975_v32 = vpop.f32.mrb[7].mxu0  ;;  %v2048_v33 = vpop.f32.mrb[9].mxu1  ;;  %v1150_v28 = vsel %vm1115_vm4, %v1147_v24, %v1149_v16 }
  0xf8   : > { %v760_v34 = vpop.f32.mrb[10].mxu1  ;;  %v889_v32 = vshrl.u32 %v2279_v10, 16 }
  0xf9   : > { %2153 = vmatmul.mubr.msk.bf16.gmra.mrb[112].mxu0 %vm440_vm2, %v2539_v52  ;;  %v2049_v36 = vpop.f32.mrb[11].mxu1 }
  0xfa   : > { %2156 = vmatprep.mubr.msk.bf16.mxu0 %vm2290_vm1, %v2289_v0 }
  0xfb   : > { %2227 = vmatmul.mubr.msk.bf16.gmra.mrb[116].mxu1 %vm440_vm2, %v1142_v35  ;;  %v891_v35 = vor.u32 %v889_v32, %v887_v11 }
  0xfc   : > { %v546_v37 = vpop.f32.mrb[8].mxu0  ;;  %2230 = vmatprep.mubr.msk.bf16.mxu1 %vm2290_vm1, %v2289_v0 }
  0xfd   : > { %v2717_v40 = vadd.f32 %v757_v29, %v546_v37  ;;  %v1978_v44 = vpop.f32.mrb[9].mxu0 }
  0xfe   : > { %v549_v45 = vpop.f32.mrb[10].mxu0  ;;  %v765_v46 = vpop.f32.mrb[12].mxu1 }
  0xff   : > { %v2719_v47 = vadd.f32 %v760_v34, %v549_v45  ;;  %v1979_v48 = vpop.f32.mrb[11].mxu0  ;;  %v2052_v49 = vpop.f32.mrb[13].mxu1 }
 0x100   : > { %v768_v52 = vpop.f32.mrb[14].mxu1 }
 0x101   : > { %2157 = vmatmul.mubr.msk.bf16.gmra.mrb[116].mxu0 %vm440_vm2, %v2555_v60  ;;  %v2053_v54 = vpop.f32.mrb[15].mxu1 }
 0x102   : > { %2160 = vmatprep.mubr.msk.bf16.mxu0 %vm2290_vm1, %v2289_v0 }
 0x103   : > { %2231 = vmatmul.mubr.msk.bf16.gmra.mrb[120].mxu1 %vm440_vm2, %v1144_v53 }
 0x104   : > { %v554_v55 = vpop.f32.mrb[12].mxu0  ;;  %2234 = vmatprep.mubr.msk.bf16.mxu1 %vm2290_vm1, %v2289_v0 }
 0x105   : > { %v2730_v57 = vadd.f32 %v765_v46, %v554_v55  ;;  %v1982_v61 = vpop.f32.mrb[13].mxu0 }
 0x106   : > { %v557_v62 = vpop.f32.mrb[14].mxu0  ;;  %v773_v63 = vpop.f32.mrb[16].mxu1 }
 0x107   : > { %v2732_v1 = vadd.f32 %v768_v52, %v557_v62  ;;  %v1983_v60 = vpop.f32.mrb[15].mxu0  ;;  %v2056_v6 = vpop.f32.mrb[17].mxu1 }
 0x108   : > { %v776_v7 = vpop.f32.mrb[18].mxu1 }
 0x109   : > { %2161 = vmatmul.mubr.msk.bf16.gmra.mrb[120].mxu0 %vm440_vm2, %v2571_v5  ;;  %v2057_v14 = vpop.f32.mrb[19].mxu1 }
 0x10a   : > { %2164 = vmatprep.mubr.msk.bf16.mxu0 %vm2290_vm1, %v2289_v0 }
 0x10b   : > { %2235 = vmatmul.mubr.msk.bf16.gmra.mrb[124].mxu1 %vm440_vm2, %v1146_v8 }
 0x10c   : > { %v562_v2 = vpop.f32.mrb[16].mxu0  ;;  %2238 = vmatprep.mubr.msk.bf16.mxu1 %vm2290_vm1, %v2289_v0 }
 0x10d   : > { %v2743_v30 = vadd.f32 %v773_v63, %v562_v2  ;;  %v1986_v39 = vpop.f32.mrb[17].mxu0 }
 0x10e   : > { %v565_v41 = vpop.f32.mrb[18].mxu0  ;;  %v781_v42 = vpop.f32.mrb[20].mxu1 }
 0x10f   : > { %v2745_v50 = vadd.f32 %v776_v7, %v565_v41  ;;  %v1987_v5 = vpop.f32.mrb[19].mxu0  ;;  %v2060_v51 = vpop.f32.mrb[21].mxu1 }
 0x110   : > { %v784_v58 = vpop.f32.mrb[22].mxu1 }
 0x111   : > { %2165 = vmatmul.mubr.msk.bf16.gmra.mrb[124].mxu0 %vm440_vm2, %v2584_v13  ;;  %v2061_v4 = vpop.f32.mrb[23].mxu1 }
 0x112   : > { %2168 = vmatprep.mubr.msk.bf16.mxu0 %vm2290_vm1, %v2289_v0 }
 0x113   : > { %2239 = vmatmul.mubr.msk.bf16.gmra.mrb[128].mxu1 %vm440_vm2, %v1148_v59 }
 0x114   : > { %v570_v12 = vpop.f32.mrb[20].mxu0  ;;  %2242 = vmatprep.mubr.msk.bf16.mxu1 %vm2290_vm1, %v2289_v0 }
 0x115   : > { %v2756_v18 = vadd.f32 %v781_v42, %v570_v12  ;;  %v1990_v19 = vpop.f32.mrb[21].mxu0 }
 0x116   : > { %v573_v20 = vpop.f32.mrb[22].mxu0  ;;  %v789_v13 = vpop.f32.mrb[24].mxu1 }
 0x117   : > { %v2760_v22 = vadd.f32 %v784_v58, %v573_v20  ;;  %v1991_v23 = vpop.f32.mrb[23].mxu0  ;;  %v2064_v25 = vpop.f32.mrb[25].mxu1 }
 0x118   : > { %v792_v27 = vpop.f32.mrb[26].mxu1 }
 0x119   : > { %2169 = vmatmul.mubr.msk.bf16.gmra.mrb[128].mxu0 %vm440_vm2, %v888_v21  ;;  %v2065_v29 = vpop.f32.mrb[27].mxu1 }
 0x11a   : > { %2172 = vmatprep.mubr.msk.bf16.mxu0 %vm2290_vm1, %v2289_v0 }
 0x11b   : > { %2243 = vmatmul.mubr.msk.bf16.gmra.mrb[132].mxu1 %vm440_vm2, %v1150_v28 }
 0x11c   : > { %v578_v33 = vpop.f32.mrb[24].mxu0 }
 0x11d   : > { %v2767_v34 = vadd.f32 %v789_v13, %v578_v33  ;;  %v1994_v15 = vpop.f32.mrb[25].mxu0 }
 0x11e   : > { %v581_v36 = vpop.f32.mrb[26].mxu0  ;;  %v797_v37 = vpop.f32.mrb[28].mxu1 }
 0x11f   : > { %v2769_v38 = vadd.f32 %v792_v27, %v581_v36  ;;  %v1995_v44 = vpop.f32.mrb[27].mxu0  ;;  %v2068_v45 = vpop.f32.mrb[29].mxu1 }
 0x120   : > { %v800_v46 = vpop.f32.mrb[30].mxu1 }
 0x121   : > { %2173 = vmatmul.mubr.msk.bf16.gmra.mrb[132].mxu0 %vm440_vm2, %v891_v35  ;;  %v2069_v48 = vpop.f32.mrb[31].mxu1 }
 0x124   : > { %v586_v49 = vpop.f32.mrb[28].mxu0 }
 0x125   : > { %v2772_v52 = vadd.f32 %v797_v37, %v586_v49  ;;  %v1998_v0 = vpop.f32.mrb[29].mxu0 }
 0x126   : > { %v589_v53 = vpop.f32.mrb[30].mxu0  ;;  %v805_v54 = vpop.f32.mrb[32].mxu1 }
 0x127   : > { %v2774_v55 = vadd.f32 %v800_v46, %v589_v53  ;;  %v1999_v56 = vpop.f32.mrb[31].mxu0  ;;  %v2072_v61 = vpop.f32.mrb[33].mxu1 }
 0x128   : > { %v808_v62 = vpop.f32.mrb[34].mxu1 }
 0x129   : > { %v2073_v63 = vpop.f32.mrb[35].mxu1 }
 0x12c   : > { %v594_v60 = vpop.f32.mrb[32].mxu0 }
 0x12d   : > { %v2776_v6 = vadd.f32 %v805_v54, %v594_v60  ;;  %v2002_v7 = vpop.f32.mrb[33].mxu0 }
 0x12e   : > { %v597_v8 = vpop.f32.mrb[34].mxu0  ;;  %v813_v10 = vpop.f32.mrb[36].mxu1 }
 0x12f   : > { %v2778_v14 = vadd.f32 %v808_v62, %v597_v8  ;;  %v2003_v2 = vpop.f32.mrb[35].mxu0  ;;  %v2076_v24 = vpop.f32.mrb[37].mxu1 }
 0x130   : > { %v816_v39 = vpop.f32.mrb[38].mxu1 }
 0x131   : > { %v2077_v41 = vpop.f32.mrb[39].mxu1 }
 0x134   : > { %v602_v42 = vpop.f32.mrb[36].mxu0 }
 0x135   : > { %v2780_v43 = vadd.f32 %v813_v10, %v602_v42  ;;  %v2006_v5 = vpop.f32.mrb[37].mxu0 }
 0x136   : > { %v605_v51 = vpop.f32.mrb[38].mxu0  ;;  %v821_v58 = vpop.f32.mrb[40].mxu1 }
 0x137   : > { %v2782_v59 = vadd.f32 %v816_v39, %v605_v51  ;;  %v2007_v3 = vpop.f32.mrb[39].mxu0  ;;  %v2080_v4 = vpop.f32.mrb[41].mxu1 }
 0x138   : > { %v824_v11 = vpop.f32.mrb[42].mxu1 }
 0x139   : > { %v2081_v12 = vpop.f32.mrb[43].mxu1 }
 0x13c   : > { %v610_v16 = vpop.f32.mrb[40].mxu0 }
 0x13d   : > { %v2784_v19 = vadd.f32 %v821_v58, %v610_v16  ;;  %v2010_v20 = vpop.f32.mrb[41].mxu0 }
 0x13e   : > { %v613_v21 = vpop.f32.mrb[42].mxu0  ;;  %v829_v13 = vpop.f32.mrb[44].mxu1 }
 0x13f   : > { %v2786_v23 = vadd.f32 %v824_v11, %v613_v21  ;;  %v2011_v25 = vpop.f32.mrb[43].mxu0  ;;  %v2084_v27 = vpop.f32.mrb[45].mxu1 }
 0x140   : > { %v832_v28 = vpop.f32.mrb[46].mxu1 }
 0x141   : > { %v2085_v29 = vpop.f32.mrb[47].mxu1 }
 0x144   : > { %v618_v32 = vpop.f32.mrb[44].mxu0 }
 0x145   : > { %v2788_v33 = vadd.f32 %v829_v13, %v618_v32  ;;  %v2014_v15 = vpop.f32.mrb[45].mxu0 }
 0x146   : > { %v621_v35 = vpop.f32.mrb[46].mxu0  ;;  %v837_v36 = vpop.f32.mrb[48].mxu1 }
 0x147   : > { %v2790_v37 = vadd.f32 %v832_v28, %v621_v35  ;;  %v2015_v44 = vpop.f32.mrb[47].mxu0  ;;  %v2088_v45 = vpop.f32.mrb[49].mxu1 }
 0x148   : > { %v840_v46 = vpop.f32.mrb[50].mxu1 }
 0x149   : > { %v2089_v48 = vpop.f32.mrb[51].mxu1 }
 0x14c   : > { %v626_v49 = vpop.f32.mrb[48].mxu0 }
 0x14d   : > { %v2792_v0 = vadd.f32 %v837_v36, %v626_v49  ;;  %v2018_v53 = vpop.f32.mrb[49].mxu0 }
 0x14e   : > { %v629_v54 = vpop.f32.mrb[50].mxu0  ;;  %v845_v56 = vpop.f32.mrb[52].mxu1 }
 0x14f   : > { %v2794_v61 = vadd.f32 %v840_v46, %v629_v54  ;;  %v2019_v62 = vpop.f32.mrb[51].mxu0  ;;  %v2092_v63 = vpop.f32.mrb[53].mxu1 }
 0x150   : > { %v848_v60 = vpop.f32.mrb[54].mxu1 }
 0x151   : > { %v2093_v7 = vpop.f32.mrb[55].mxu1 }
 0x154   : > { %v634_v8 = vpop.f32.mrb[52].mxu0 }
 0x155   : > { %v2796_v10 = vadd.f32 %v845_v56, %v634_v8  ;;  %v2022_v2 = vpop.f32.mrb[53].mxu0 }
 0x156   : > { %v637_v24 = vpop.f32.mrb[54].mxu0  ;;  %v853_v39 = vpop.f32.mrb[56].mxu1 }
 0x157   : > { %v2798_v41 = vadd.f32 %v848_v60, %v637_v24  ;;  %v2023_v42 = vpop.f32.mrb[55].mxu0  ;;  %v2096_v5 = vpop.f32.mrb[57].mxu1 }
 0x158   : > { %v856_v51 = vpop.f32.mrb[58].mxu1  ;;  %v2816_v5 = vld [vmem:[%s2965_s2] ss:$0 sm:$0xff] }
 0x159   : > { %v2097_v58 = vpop.f32.mrb[59].mxu1 }
 0x15c   : > { %v642_v3 = vpop.f32.mrb[56].mxu0 }
 0x15d   : > { %v2800_v4 = vadd.f32 %v853_v39, %v642_v3  ;;  %v2026_v11 = vpop.f32.mrb[57].mxu0 }
 0x15e   : > { %v645_v12 = vpop.f32.mrb[58].mxu0  ;;  %v861_v16 = vpop.f32.mrb[60].mxu1 }
 0x15f   : > { %v2802_v20 = vadd.f32 %v856_v51, %v645_v12  ;;  %v2027_v21 = vpop.f32.mrb[59].mxu0  ;;  %v2100_v13 = vpop.f32.mrb[61].mxu1 }
 0x160   : > { %v864_v25 = vpop.f32.mrb[62].mxu1 }
 0x161   : > { %v2101_v27 = vpop.f32.mrb[63].mxu1 }
 0x164   : > { %v650_v28 = vpop.f32.mrb[60].mxu0 }
 0x165   : > { %v2804_v29 = vadd.f32 %v861_v16, %v650_v28  ;;  %v2030_v32 = vpop.f32.mrb[61].mxu0 }
 0x166   : > { %v653_v15 = vpop.f32.mrb[62].mxu0  ;;  %v869_v35 = vpop.f32.mrb[64].mxu1 }
 0x167   : > { %v2806_v36 = vadd.f32 %v864_v25, %v653_v15  ;;  %v2031_v44 = vpop.f32.mrb[63].mxu0  ;;  %v2104_v45 = vpop.f32.mrb[65].mxu1 }
 0x168   : > { %v872_v46 = vpop.f32.mrb[66].mxu1 }
 0x169   : > { %v2105_v48 = vpop.f32.mrb[67].mxu1 }
 0x16c   : > { %v658_v49 = vpop.f32.mrb[64].mxu0 }
 0x16d   : > { %v2808_v53 = vadd.f32 %v869_v35, %v658_v49  ;;  %v2034_v54 = vpop.f32.mrb[65].mxu0 }
 0x16e   : > { %v661_v56 = vpop.f32.mrb[66].mxu0  ;;  %v1244_v62 = vpop.f32.mrb[68].mxu1 }
 0x16f   : > { %v2810_v63 = vadd.f32 %v872_v46, %v661_v56  ;;  %v2035_v60 = vpop.f32.mrb[67].mxu0  ;;  %v2180_v7 = vpop.f32.mrb[69].mxu1 }
 0x170   : > { %v1247_v8 = vpop.f32.mrb[70].mxu1 }
 0x171   : > { %v2181_v2 = vpop.f32.mrb[71].mxu1 }
 0x174   : > { %v940_v24 = vpop.f32.mrb[68].mxu0 }
 0x175   : > { %v1075_v39 = vadd.f32 %v940_v24, %v2691_v9  ;;  %v2110_v42 = vpop.f32.mrb[69].mxu0 }
 0x176   : > { %v943_v51 = vpop.f32.mrb[70].mxu0  ;;  %v1252_v58 = vpop.f32.mrb[72].mxu1 }
 0x177   : > { %v1379_v3 = vadd.f32 %v1244_v62, %v1075_v39  ;;  %v1076_v11 = vadd.f32 %v943_v51, %v2693_v17  ;;  %v2111_v12 = vpop.f32.mrb[71].mxu0  ;;  %v2184_v16 = vpop.f32.mrb[73].mxu1 }
 0x178   : > { %v1255_v21 = vpop.f32.mrb[74].mxu1 }
 0x179   : > { %v1420_v13 = vadd.f32 %v2816_v5, %v1379_v3  ;;  %v1380_v25 = vadd.f32 %v1247_v8, %v1076_v11  ;;  %v2185_v27 = vpop.f32.mrb[75].mxu1 }
 0x17b   : > { %v1454_v9 = vmax.f32 %v1420_v13, 0.0  ;;  %v1421_v28 = vadd.f32 %v2816_v5, %v1380_v25 }
 0x17c   : > { %v948_v17 = vpop.f32.mrb[72].mxu0 }
 0x17d   : > { %v1860_v32 = vpack.c.bf16 %v1454_v9, %v1454_v9  ;;  %v1455_v15 = vmax.f32 %v1421_v28, 0.0  ;;  %v1077_v35 = vadd.f32 %v948_v17, %v2704_v26  ;;  %v2114_v44 = vpop.f32.mrb[73].mxu0 }
 0x17e   : > { %v951_v45 = vpop.f32.mrb[74].mxu0  ;;  %v1260_v46 = vpop.f32.mrb[76].mxu1 }
 0x17f   : > { %1625 = vst.msk [vmem:[%s2825_s4] sm:$0xf] %vm1624_vm5, %v1860_v32  ;;  %v1861_v48 = vpack.c.bf16 %v1455_v15, %v1455_v15  ;;  %v1381_v49 = vadd.f32 %v1252_v58, %v1077_v35  ;;  %v1078_v54 = vadd.f32 %v951_v45, %v2706_v31  ;;  %v2115_v56 = vpop.f32.mrb[75].mxu0  ;;  %v2188_v62 = vpop.f32.mrb[77].mxu1 }
 0x180   : > { %v1263_v60 = vpop.f32.mrb[78].mxu1 }
 0x181   : > { %1626 = vst.msk [vmem:[%s2825_s4 + $0x4] sm:$0xf] %vm1624_vm5, %v1861_v48  ;;  %v1422_v7 = vadd.f32 %v2816_v5, %v1381_v49  ;;  %v1382_v8 = vadd.f32 %v1255_v21, %v1078_v54  ;;  %v2189_v2 = vpop.f32.mrb[79].mxu1 }
 0x183   : > { %v1456_v26 = vmax.f32 %v1422_v7, 0.0  ;;  %v1423_v24 = vadd.f32 %v2816_v5, %v1382_v8 }
 0x184   : > { %v956_v39 = vpop.f32.mrb[76].mxu0 }
 0x185   : > { %v1862_v42 = vpack.c.bf16 %v1456_v26, %v1456_v26  ;;  %v1457_v51 = vmax.f32 %v1423_v24, 0.0  ;;  %v1079_v58 = vadd.f32 %v956_v39, %v2717_v40  ;;  %v2118_v31 = vpop.f32.mrb[77].mxu0 }
 0x186   : > { %v959_v3 = vpop.f32.mrb[78].mxu0  ;;  %v1268_v11 = vpop.f32.mrb[80].mxu1 }
 0x187   : > { %1627 = vst.msk [vmem:[%s2825_s4 + $0x8] sm:$0xf] %vm1624_vm5, %v1862_v42  ;;  %v1863_v12 = vpack.c.bf16 %v1457_v51, %v1457_v51  ;;  %v1383_v16 = vadd.f32 %v1260_v46, %v1079_v58  ;;  %v1080_v13 = vadd.f32 %v959_v3, %v2719_v47  ;;  %v2119_v21 = vpop.f32.mrb[79].mxu0  ;;  %v2192_v25 = vpop.f32.mrb[81].mxu1 }
 0x188   : > { %v1271_v27 = vpop.f32.mrb[82].mxu1 }
 0x189   : > { %1628 = vst.msk [vmem:[%s2825_s4 + $0xc] sm:$0xf] %vm1624_vm5, %v1863_v12  ;;  %v1424_v9 = vadd.f32 %v2816_v5, %v1383_v16  ;;  %v1384_v28 = vadd.f32 %v1263_v60, %v1080_v13  ;;  %v2193_v17 = vpop.f32.mrb[83].mxu1 }
 0x18b   : > { %v1458_v40 = vmax.f32 %v1424_v9, 0.0  ;;  %v1425_v32 = vadd.f32 %v2816_v5, %v1384_v28 }
 0x18c   : > { %v964_v15 = vpop.f32.mrb[80].mxu0 }
 0x18d   : > { %v1864_v35 = vpack.c.bf16 %v1458_v40, %v1458_v40  ;;  %v1459_v44 = vmax.f32 %v1425_v32, 0.0  ;;  %v1081_v45 = vadd.f32 %v964_v15, %v2730_v57  ;;  %v2122_v47 = vpop.f32.mrb[81].mxu0 }
 0x18e   : > { %v967_v46 = vpop.f32.mrb[82].mxu0  ;;  %v1276_v48 = vpop.f32.mrb[84].mxu1 }
 0x18f   : > { %1629 = vst.msk [vmem:[%s2825_s4 + $0x10] sm:$0xf] %vm1624_vm5, %v1864_v35  ;;  %v1865_v49 = vpack.c.bf16 %v1459_v44, %v1459_v44  ;;  %v1385_v54 = vadd.f32 %v1268_v11, %v1081_v45  ;;  %v1082_v56 = vadd.f32 %v967_v46, %v2732_v1  ;;  %v2123_v62 = vpop.f32.mrb[83].mxu0  ;;  %v2196_v60 = vpop.f32.mrb[85].mxu1 }
 0x190   : > { %v1279_v7 = vpop.f32.mrb[86].mxu1 }
 0x191   : > { %1630 = vst.msk [vmem:[%s2825_s4 + $0x14] sm:$0xf] %vm1624_vm5, %v1865_v49  ;;  %v1426_v8 = vadd.f32 %v2816_v5, %v1385_v54  ;;  %v1386_v2 = vadd.f32 %v1271_v27, %v1082_v56  ;;  %v2197_v26 = vpop.f32.mrb[87].mxu1 }
 0x193   : > { %v1460_v57 = vmax.f32 %v1426_v8, 0.0  ;;  %v1427_v24 = vadd.f32 %v2816_v5, %v1386_v2 }
 0x194   : > { %v972_v39 = vpop.f32.mrb[84].mxu0 }
 0x195   : > { %v1866_v42 = vpack.c.bf16 %v1460_v57, %v1460_v57  ;;  %v1461_v51 = vmax.f32 %v1427_v24, 0.0  ;;  %v1083_v58 = vadd.f32 %v972_v39, %v2743_v30  ;;  %v2126_v1 = vpop.f32.mrb[85].mxu0 }
 0x196   : > { %v975_v31 = vpop.f32.mrb[86].mxu0  ;;  %v1284_v3 = vpop.f32.mrb[88].mxu1 }
 0x197   : > { %1631 = vst.msk [vmem:[%s2825_s4 + $0x18] sm:$0xf] %vm1624_vm5, %v1866_v42  ;;  %v1867_v11 = vpack.c.bf16 %v1461_v51, %v1461_v51  ;;  %v1387_v12 = vadd.f32 %v1276_v48, %v1083_v58  ;;  %v1084_v16 = vadd.f32 %v975_v31, %v2745_v50  ;;  %v2127_v13 = vpop.f32.mrb[87].mxu0  ;;  %v2200_v21 = vpop.f32.mrb[89].mxu1 }
 0x198   : > { %v1287_v25 = vpop.f32.mrb[90].mxu1 }
 0x199   : > { %1632 = vst.msk [vmem:[%s2825_s4 + $0x1c] sm:$0xf] %vm1624_vm5, %v1867_v11  ;;  %v1428_v27 = vadd.f32 %v2816_v5, %v1387_v12  ;;  %v1388_v9 = vadd.f32 %v1279_v7, %v1084_v16  ;;  %v2201_v28 = vpop.f32.mrb[91].mxu1 }
 0x19b   : > { %v1462_v30 = vmax.f32 %v1428_v27, 0.0  ;;  %v1429_v17 = vadd.f32 %v2816_v5, %v1388_v9 }
 0x19c   : > { %v980_v40 = vpop.f32.mrb[88].mxu0 }
 0x19d   : > { %v1868_v32 = vpack.c.bf16 %v1462_v30, %v1462_v30  ;;  %v1463_v15 = vmax.f32 %v1429_v17, 0.0  ;;  %v1085_v35 = vadd.f32 %v980_v40, %v2756_v18  ;;  %v2130_v50 = vpop.f32.mrb[89].mxu0 }
 0x19e   : > { %v983_v44 = vpop.f32.mrb[90].mxu0  ;;  %v1292_v45 = vpop.f32.mrb[92].mxu1 }
 0x19f   : > { %1633 = vst.msk [vmem:[%s2825_s4 + $0x20] sm:$0xf] %vm1624_vm5, %v1868_v32  ;;  %v1869_v47 = vpack.c.bf16 %v1463_v15, %v1463_v15  ;;  %v1389_v46 = vadd.f32 %v1284_v3, %v1085_v35  ;;  %v1086_v48 = vadd.f32 %v983_v44, %v2760_v22  ;;  %v2131_v49 = vpop.f32.mrb[91].mxu0  ;;  %v2204_v54 = vpop.f32.mrb[93].mxu1 }
 0x1a0   : > { %v1295_v56 = vpop.f32.mrb[94].mxu1 }
 0x1a1   : > { %1634 = vst.msk [vmem:[%s2825_s4 + $0x24] sm:$0xf] %vm1624_vm5, %v1869_v47  ;;  %v1430_v62 = vadd.f32 %v2816_v5, %v1389_v46  ;;  %v1390_v60 = vadd.f32 %v1287_v25, %v1086_v48  ;;  %v2205_v7 = vpop.f32.mrb[95].mxu1 }
 0x1a3   : > { %v1464_v18 = vmax.f32 %v1430_v62, 0.0  ;;  %v1431_v8 = vadd.f32 %v2816_v5, %v1390_v60 }
 0x1a4   : > { %v988_v2 = vpop.f32.mrb[92].mxu0 }
 0x1a5   : > { %v1870_v26 = vpack.c.bf16 %v1464_v18, %v1464_v18  ;;  %v1465_v57 = vmax.f32 %v1431_v8, 0.0  ;;  %v1087_v24 = vadd.f32 %v988_v2, %v2767_v34  ;;  %v2134_v22 = vpop.f32.mrb[93].mxu0 }
 0x1a6   : > { %v991_v39 = vpop.f32.mrb[94].mxu0  ;;  %v1300_v42 = vpop.f32.mrb[96].mxu1 }
 0x1a7   : > { %1635 = vst.msk [vmem:[%s2825_s4 + $0x28] sm:$0xf] %vm1624_vm5, %v1870_v26  ;;  %v1871_v51 = vpack.c.bf16 %v1465_v57, %v1465_v57  ;;  %v1391_v58 = vadd.f32 %v1292_v45, %v1087_v24  ;;  %v1088_v1 = vadd.f32 %v991_v39, %v2769_v38  ;;  %v2135_v31 = vpop.f32.mrb[95].mxu0  ;;  %v2208_v3 = vpop.f32.mrb[97].mxu1 }
 0x1a8   : > { %v1303_v11 = vpop.f32.mrb[98].mxu1 }
 0x1a9   : > { %1636 = vst.msk [vmem:[%s2825_s4 + $0x2c] sm:$0xf] %vm1624_vm5, %v1871_v51  ;;  %v1432_v12 = vadd.f32 %v2816_v5, %v1391_v58  ;;  %v1392_v16 = vadd.f32 %v1295_v56, %v1088_v1  ;;  %v2209_v13 = vpop.f32.mrb[99].mxu1 }
 0x1ab   : > { %v1466_v34 = vmax.f32 %v1432_v12, 0.0  ;;  %v1433_v21 = vadd.f32 %v2816_v5, %v1392_v16 }
 0x1ac   : > { %v996_v25 = vpop.f32.mrb[96].mxu0 }
 0x1ad   : > { %v1872_v27 = vpack.c.bf16 %v1466_v34, %v1466_v34  ;;  %v1467_v9 = vmax.f32 %v1433_v21, 0.0  ;;  %v1089_v28 = vadd.f32 %v996_v25, %v2772_v52  ;;  %v2138_v38 = vpop.f32.mrb[97].mxu0 }
 0x1ae   : > { %v999_v30 = vpop.f32.mrb[98].mxu0  ;;  %v1308_v17 = vpop.f32.mrb[100].mxu1 }
 0x1af   : > { %1637 = vst.msk [vmem:[%s2825_s4 + $0x30] sm:$0xf] %vm1624_vm5, %v1872_v27  ;;  %v1873_v40 = vpack.c.bf16 %v1467_v9, %v1467_v9  ;;  %v1393_v32 = vadd.f32 %v1300_v42, %v1089_v28  ;;  %v1090_v15 = vadd.f32 %v999_v30, %v2774_v55  ;;  %v2139_v35 = vpop.f32.mrb[99].mxu0  ;;  %v2212_v50 = vpop.f32.mrb[101].mxu1 }
 0x1b0   : > { %v1311_v44 = vpop.f32.mrb[102].mxu1 }
 0x1b1   : > { %1638 = vst.msk [vmem:[%s2825_s4 + $0x34] sm:$0xf] %vm1624_vm5, %v1873_v40  ;;  %v1434_v45 = vadd.f32 %v2816_v5, %v1393_v32  ;;  %v1394_v47 = vadd.f32 %v1303_v11, %v1090_v15  ;;  %v2213_v46 = vpop.f32.mrb[103].mxu1 }
 0x1b3   : > { %v1468_v52 = vmax.f32 %v1434_v45, 0.0  ;;  %v1435_v48 = vadd.f32 %v2816_v5, %v1394_v47 }
 0x1b4   : > { %v1004_v49 = vpop.f32.mrb[100].mxu0 }
 0x1b5   : > { %v1874_v54 = vpack.c.bf16 %v1468_v52, %v1468_v52  ;;  %v1469_v56 = vmax.f32 %v1435_v48, 0.0  ;;  %v1091_v62 = vadd.f32 %v1004_v49, %v2776_v6  ;;  %v2142_v55 = vpop.f32.mrb[101].mxu0 }
 0x1b6   : > { %v1007_v60 = vpop.f32.mrb[102].mxu0  ;;  %v1316_v7 = vpop.f32.mrb[104].mxu1 }
 0x1b7   : > { %1639 = vst.msk [vmem:[%s2825_s4 + $0x38] sm:$0xf] %vm1624_vm5, %v1874_v54  ;;  %v1875_v18 = vpack.c.bf16 %v1469_v56, %v1469_v56  ;;  %v1395_v8 = vadd.f32 %v1308_v17, %v1091_v62  ;;  %v1092_v2 = vadd.f32 %v1007_v60, %v2778_v14  ;;  %v2143_v26 = vpop.f32.mrb[103].mxu0  ;;  %v2216_v57 = vpop.f32.mrb[105].mxu1 }
 0x1b8   : > { %v1319_v24 = vpop.f32.mrb[106].mxu1 }
 0x1b9   : > { %1640 = vst.msk [vmem:[%s2825_s4 + $0x3c] sm:$0xf] %vm1624_vm5, %v1875_v18  ;;  %v1436_v22 = vadd.f32 %v2816_v5, %v1395_v8  ;;  %v1396_v39 = vadd.f32 %v1311_v44, %v1092_v2  ;;  %v2217_v42 = vpop.f32.mrb[107].mxu1 }
 0x1bb   : > { %v1470_v6 = vmax.f32 %v1436_v22, 0.0  ;;  %v1437_v51 = vadd.f32 %v2816_v5, %v1396_v39 }
 0x1bc   : > { %v1012_v58 = vpop.f32.mrb[104].mxu0 }
 0x1bd   : > { %v1876_v1 = vpack.c.bf16 %v1470_v6, %v1470_v6  ;;  %v1471_v31 = vmax.f32 %v1437_v51, 0.0  ;;  %v1093_v3 = vadd.f32 %v1012_v58, %v2780_v43  ;;  %v2146_v14 = vpop.f32.mrb[105].mxu0 }
 0x1be   : > { %v1015_v11 = vpop.f32.mrb[106].mxu0  ;;  %v1324_v12 = vpop.f32.mrb[108].mxu1 }
 0x1bf   : > { %1641 = vst.msk [vmem:[%s2825_s4 + $0x40] sm:$0xf] %vm1624_vm5, %v1876_v1  ;;  %v1877_v16 = vpack.c.bf16 %v1471_v31, %v1471_v31  ;;  %v1397_v13 = vadd.f32 %v1316_v7, %v1093_v3  ;;  %v1094_v34 = vadd.f32 %v1015_v11, %v2782_v59  ;;  %v2147_v21 = vpop.f32.mrb[107].mxu0  ;;  %v2220_v25 = vpop.f32.mrb[109].mxu1 }
 0x1c0   : > { %v1327_v27 = vpop.f32.mrb[110].mxu1 }
 0x1c1   : > { %1642 = vst.msk [vmem:[%s2825_s4 + $0x44] sm:$0xf] %vm1624_vm5, %v1877_v16  ;;  %v1438_v9 = vadd.f32 %v2816_v5, %v1397_v13  ;;  %v1398_v28 = vadd.f32 %v1319_v24, %v1094_v34  ;;  %v2221_v38 = vpop.f32.mrb[111].mxu1 }
 0x1c3   : > { %v1472_v43 = vmax.f32 %v1438_v9, 0.0  ;;  %v1439_v30 = vadd.f32 %v2816_v5, %v1398_v28 }
 0x1c4   : > { %v1020_v17 = vpop.f32.mrb[108].mxu0 }
 0x1c5   : > { %v1878_v40 = vpack.c.bf16 %v1472_v43, %v1472_v43  ;;  %v1473_v32 = vmax.f32 %v1439_v30, 0.0  ;;  %v1095_v15 = vadd.f32 %v1020_v17, %v2784_v19  ;;  %v2150_v59 = vpop.f32.mrb[109].mxu0 }
 0x1c6   : > { %v1023_v35 = vpop.f32.mrb[110].mxu0  ;;  %v1332_v50 = vpop.f32.mrb[112].mxu1 }
 0x1c7   : > { %1643 = vst.msk [vmem:[%s2825_s4 + $0x48] sm:$0xf] %vm1624_vm5, %v1878_v40  ;;  %v1879_v44 = vpack.c.bf16 %v1473_v32, %v1473_v32  ;;  %v1399_v45 = vadd.f32 %v1324_v12, %v1095_v15  ;;  %v1096_v47 = vadd.f32 %v1023_v35, %v2786_v23  ;;  %v2151_v46 = vpop.f32.mrb[111].mxu0  ;;  %v2224_v52 = vpop.f32.mrb[113].mxu1 }
 0x1c8   : > { %v1335_v48 = vpop.f32.mrb[114].mxu1 }
 0x1c9   : > { %1644 = vst.msk [vmem:[%s2825_s4 + $0x4c] sm:$0xf] %vm1624_vm5, %v1879_v44  ;;  %v1440_v49 = vadd.f32 %v2816_v5, %v1399_v45  ;;  %v1400_v54 = vadd.f32 %v1327_v27, %v1096_v47  ;;  %v2225_v56 = vpop.f32.mrb[115].mxu1 }
 0x1cb   : > { %v1474_v19 = vmax.f32 %v1440_v49, 0.0  ;;  %v1441_v62 = vadd.f32 %v2816_v5, %v1400_v54 }
 0x1cc   : > { %v1028_v55 = vpop.f32.mrb[112].mxu0 }
 0x1cd   : > { %v1880_v60 = vpack.c.bf16 %v1474_v19, %v1474_v19  ;;  %v1475_v7 = vmax.f32 %v1441_v62, 0.0  ;;  %v1097_v18 = vadd.f32 %v1028_v55, %v2788_v33  ;;  %v2154_v23 = vpop.f32.mrb[113].mxu0 }
 0x1ce   : > { %v1031_v8 = vpop.f32.mrb[114].mxu0  ;;  %v1340_v2 = vpop.f32.mrb[116].mxu1 }
 0x1cf   : > { %1645 = vst.msk [vmem:[%s2825_s4 + $0x50] sm:$0xf] %vm1624_vm5, %v1880_v60  ;;  %v1881_v26 = vpack.c.bf16 %v1475_v7, %v1475_v7  ;;  %v1401_v57 = vadd.f32 %v1332_v50, %v1097_v18  ;;  %v1098_v24 = vadd.f32 %v1031_v8, %v2790_v37  ;;  %v2155_v22 = vpop.f32.mrb[115].mxu0  ;;  %v2228_v39 = vpop.f32.mrb[117].mxu1 }
 0x1d0   : > { %v1343_v42 = vpop.f32.mrb[118].mxu1 }
 0x1d1   : > { %1646 = vst.msk [vmem:[%s2825_s4 + $0x54] sm:$0xf] %vm1624_vm5, %v1881_v26  ;;  %v1442_v6 = vadd.f32 %v2816_v5, %v1401_v57  ;;  %v1402_v51 = vadd.f32 %v1335_v48, %v1098_v24  ;;  %v2229_v58 = vpop.f32.mrb[119].mxu1 }
 0x1d3   : > { %v1476_v33 = vmax.f32 %v1442_v6, 0.0  ;;  %v1443_v1 = vadd.f32 %v2816_v5, %v1402_v51 }
 0x1d4   : > { %v1036_v31 = vpop.f32.mrb[116].mxu0 }
 0x1d5   : > { %v1882_v3 = vpack.c.bf16 %v1476_v33, %v1476_v33  ;;  %v1477_v14 = vmax.f32 %v1443_v1, 0.0  ;;  %v1099_v11 = vadd.f32 %v1036_v31, %v2792_v0  ;;  %v2158_v37 = vpop.f32.mrb[117].mxu0 }
 0x1d6   : > { %v1039_v12 = vpop.f32.mrb[118].mxu0  ;;  %v1348_v16 = vpop.f32.mrb[120].mxu1 }
 0x1d7   : > { %1647 = vst.msk [vmem:[%s2825_s4 + $0x58] sm:$0xf] %vm1624_vm5, %v1882_v3  ;;  %v1883_v13 = vpack.c.bf16 %v1477_v14, %v1477_v14  ;;  %v1403_v34 = vadd.f32 %v1340_v2, %v1099_v11  ;;  %v1100_v21 = vadd.f32 %v1039_v12, %v2794_v61  ;;  %v2159_v25 = vpop.f32.mrb[119].mxu0  ;;  %v2232_v27 = vpop.f32.mrb[121].mxu1 }
 0x1d8   : > { %v1351_v9 = vpop.f32.mrb[122].mxu1 }
 0x1d9   : > { %1648 = vst.msk [vmem:[%s2825_s4 + $0x5c] sm:$0xf] %vm1624_vm5, %v1883_v13  ;;  %v1444_v28 = vadd.f32 %v2816_v5, %v1403_v34  ;;  %v1404_v38 = vadd.f32 %v1343_v42, %v1100_v21  ;;  %v2233_v43 = vpop.f32.mrb[123].mxu1 }
 0x1db   : > { %v1478_v0 = vmax.f32 %v1444_v28, 0.0  ;;  %v1445_v30 = vadd.f32 %v2816_v5, %v1404_v38 }
 0x1dc   : > { %v1044_v17 = vpop.f32.mrb[120].mxu0 }
 0x1dd   : > { %v1884_v40 = vpack.c.bf16 %v1478_v0, %v1478_v0  ;;  %v1479_v32 = vmax.f32 %v1445_v30, 0.0  ;;  %v1101_v15 = vadd.f32 %v1044_v17, %v2796_v10  ;;  %v2162_v61 = vpop.f32.mrb[121].mxu0 }
 0x1de   : > { %v1047_v59 = vpop.f32.mrb[122].mxu0  ;;  %v1356_v35 = vpop.f32.mrb[124].mxu1 }
 0x1df   : > { %1649 = vst.msk [vmem:[%s2825_s4 + $0x60] sm:$0xf] %vm1624_vm5, %v1884_v40  ;;  %v1885_v50 = vpack.c.bf16 %v1479_v32, %v1479_v32  ;;  %v1405_v44 = vadd.f32 %v1348_v16, %v1101_v15  ;;  %v1102_v45 = vadd.f32 %v1047_v59, %v2798_v41  ;;  %v2163_v47 = vpop.f32.mrb[123].mxu0  ;;  %v2236_v46 = vpop.f32.mrb[125].mxu1 }
 0x1e0   : > { %v1359_v52 = vpop.f32.mrb[126].mxu1 }
 0x1e1   : > { %1650 = vst.msk [vmem:[%s2825_s4 + $0x64] sm:$0xf] %vm1624_vm5, %v1885_v50  ;;  %v1446_v48 = vadd.f32 %v2816_v5, %v1405_v44  ;;  %v1406_v49 = vadd.f32 %v1351_v9, %v1102_v45  ;;  %v2237_v54 = vpop.f32.mrb[127].mxu1  ;;  %v1661_v44 = vld [vmem:[%s2825_s4 + $0x84] sm:$0xf] }
 0x1e3   : > { %v1480_v10 = vmax.f32 %v1446_v48, 0.0  ;;  %v1447_v56 = vadd.f32 %v2816_v5, %v1406_v49 }
 0x1e4   : > { %v1052_v19 = vpop.f32.mrb[124].mxu0 }
 0x1e5   : > { %v1886_v62 = vpack.c.bf16 %v1480_v10, %v1480_v10  ;;  %v1481_v55 = vmax.f32 %v1447_v56, 0.0  ;;  %v1103_v60 = vadd.f32 %v1052_v19, %v2800_v4  ;;  %v2166_v41 = vpop.f32.mrb[125].mxu0 }
 0x1e6   : > { %v1055_v7 = vpop.f32.mrb[126].mxu0  ;;  %v1364_v18 = vpop.f32.mrb[128].mxu1 }
 0x1e7   : > { %1651 = vst.msk [vmem:[%s2825_s4 + $0x68] sm:$0xf] %vm1624_vm5, %v1886_v62  ;;  %v1887_v23 = vpack.c.bf16 %v1481_v55, %v1481_v55  ;;  %v1407_v8 = vadd.f32 %v1356_v35, %v1103_v60  ;;  %v1104_v2 = vadd.f32 %v1055_v7, %v2802_v20  ;;  %v2167_v26 = vpop.f32.mrb[127].mxu0  ;;  %v2240_v57 = vpop.f32.mrb[129].mxu1 }
 0x1e8   : > { %v1367_v24 = vpop.f32.mrb[130].mxu1 }
 0x1e9   : > { %1652 = vst.msk [vmem:[%s2825_s4 + $0x6c] sm:$0xf] %vm1624_vm5, %v1887_v23  ;;  %v1448_v22 = vadd.f32 %v2816_v5, %v1407_v8  ;;  %v1408_v39 = vadd.f32 %v1359_v52, %v1104_v2  ;;  %v2241_v42 = vpop.f32.mrb[131].mxu1 }
 0x1eb   : > { %v1482_v4 = vmax.f32 %v1448_v22, 0.0  ;;  %v1449_v6 = vadd.f32 %v2816_v5, %v1408_v39 }
 0x1ec   : > { %v1060_v51 = vpop.f32.mrb[128].mxu0 }
 0x1ed   : > { %v1888_v58 = vpack.c.bf16 %v1482_v4, %v1482_v4  ;;  %v1483_v33 = vmax.f32 %v1449_v6, 0.0  ;;  %v1105_v1 = vadd.f32 %v1060_v51, %v2804_v29  ;;  %v2170_v20 = vpop.f32.mrb[129].mxu0 }
 0x1ee   : > { %v1063_v31 = vpop.f32.mrb[130].mxu0  ;;  %v1372_v3 = vpop.f32.mrb[132].mxu1 }
 0x1ef   : > { %1653 = vst.msk [vmem:[%s2825_s4 + $0x70] sm:$0xf] %vm1624_vm5, %v1888_v58  ;;  %v1889_v14 = vpack.c.bf16 %v1483_v33, %v1483_v33  ;;  %v1409_v11 = vadd.f32 %v1364_v18, %v1105_v1  ;;  %v1106_v37 = vadd.f32 %v1063_v31, %v2806_v36  ;;  %v2171_v12 = vpop.f32.mrb[131].mxu0  ;;  %v2244_v16 = vpop.f32.mrb[133].mxu1 }
 0x1f0   : > { %v1375_v13 = vpop.f32.mrb[134].mxu1 }
 0x1f1   : > { %1654 = vst.msk [vmem:[%s2825_s4 + $0x74] sm:$0xf] %vm1624_vm5, %v1889_v14  ;;  %v1450_v34 = vadd.f32 %v2816_v5, %v1409_v11  ;;  %v1410_v21 = vadd.f32 %v1367_v24, %v1106_v37  ;;  %v2245_v29 = vpop.f32.mrb[135].mxu1 }
 0x1f3   : > { %v1484_v25 = vmax.f32 %v1450_v34, 0.0  ;;  %v1451_v27 = vadd.f32 %v2816_v5, %v1410_v21 }
 0x1f4   : > { %v1068_v9 = vpop.f32.mrb[132].mxu0 }
 0x1f5   : > { %v1890_v28 = vpack.c.bf16 %v1484_v25, %v1484_v25  ;;  %v1485_v38 = vmax.f32 %v1451_v27, 0.0  ;;  %v1107_v43 = vadd.f32 %v1068_v9, %v2808_v53  ;;  %v2174_v36 = vpop.f32.mrb[133].mxu0 }
 0x1f6   : > { %v1071_v0 = vpop.f32.mrb[134].mxu0 }
 0x1f7   : > { %1655 = vst.msk [vmem:[%s2825_s4 + $0x78] sm:$0xf] %vm1624_vm5, %v1890_v28  ;;  %v1891_v30 = vpack.c.bf16 %v1485_v38, %v1485_v38  ;;  %v1411_v17 = vadd.f32 %v1372_v3, %v1107_v43  ;;  %v1108_v40 = vadd.f32 %v1071_v0, %v2810_v63  ;;  %v2175_v32 = vpop.f32.mrb[135].mxu0 }
 0x1f9   : > { %1656 = vst.msk [vmem:[%s2825_s4 + $0x7c] sm:$0xf] %vm1624_vm5, %v1891_v30  ;;  %v1452_v15 = vadd.f32 %v2816_v5, %v1411_v17  ;;  %v1412_v61 = vadd.f32 %v1375_v13, %v1108_v40 }
 0x1fb   : > { %v1486_v59 = vmax.f32 %v1452_v15, 0.0  ;;  %v1453_v53 = vadd.f32 %v2816_v5, %v1412_v61 }
 0x1fd   : > { %v1892_v35 = vpack.c.bf16 %v1486_v59, %v1486_v59  ;;  %v1487_v50 = vmax.f32 %v1453_v53, 0.0 }
 0x1ff   : > { %1657 = vst.msk [vmem:[%s2825_s4 + $0x80] sm:$0xf] %vm1624_vm5, %v1892_v35  ;;  %v1893_v45 = vpack.c.bf16 %v1487_v50, %v1487_v50 }
 0x201   : > { %v1662_v47 = vsel %vm1660_vm7, %v1893_v45, %v1661_v44 }
 0x202   : > { %1663 = vst [vmem:[%s2825_s4 + $0x84] sm:$0xf] %v1662_v47 }
 0x203 PF: > { %s13_s12 = sadd.s32 1, %s2287_s12  }
 0x204   : > { %p10_p4 = scmp.ge.s32.totalorder %s13_s12, 4  }
 0x206   :  { %12 = sbr.rel (!%p10_p4) target bundleno = 1 (0x1), region = 65 }

// kernel: _lambda_.17
= control target key start
LH: loop header
LB: loop body
LE: loop exit
PB: predicated region body
PF: predicated region fallthrough
CT: control target
= control target key end

     0   :  { %s1130_s12 = smov 0   ;;  %s1329_s0 = inlined_call_operand.vmem [shape: bf16[2,81,32], index: 0, kind: input, shape index: {}]   ;;  %s1330_s1 = inlined_call_operand.vmem [shape: bf16[4,32,16], index: 1, kind: input, shape index: {}]   ;;  %s1331_s2 = inlined_call_operand.vmem [shape: f32[1,16], index: 2, kind: input, shape index: {}]   ;;  %s1332_s3 = inlined_call_operand.vmem [shape: bf16[2,71,16], index: 3, kind: output, shape index: {}]  }
   0x1 LB: > { %s866_s13 = sadd.s32 4294967295, %s1106_s12   ;;  %p870_p0 = scmp.ge.s32.totalorder %s1106_s12, 1  ;;  %s1106_s12 = sphi %s1130_s12, %s13_s12  }
   0x2   : > { %p137_p1 = scmp.lt.s32.totalorder %s1106_s12, 3 }
   0x4   : > { %p138_p2 = pnand %p870_p0, %p137_p1 }
   0x5   : > { %v1081_v0 = vld [vmem:[%s1330_s1 + $0x10] sm:$0xff] (!%p138_p2)   ;;  %v1108_v1 = vmov (!%p138_p2), 0.0   ;;  %v1082_v2 = vld [vmem:[%s1330_s1] sm:$0xff] (!%p138_p2)   ;;  %v1083_v3 = vld [vmem:[%s1330_s1 + $0x18] sm:$0xff] (!%p138_p2)   ;;  %vm1109_vm0 = vmmov (!%p138_p2), 0   ;;  %p161_p3 = scmp.lt.s32.totalorder (!%p138_p2), %s866_s13, 1 }
   0x6   : > { %141 = sbr.rel (%p138_p2) target bundleno = 323 (0x143), region = 32  ;;  %973 = vmatprep.subr.bf16.mxu0 (!%p138_p2), %v1108_v1  ;;  %997 = vmatprep.subr.bf16.mxu1 (!%p138_p2), %v1108_v1  ;;  %v1084_v4 = vld [vmem:[%s1330_s1 + $0x8] sm:$0xff] (!%p138_p2)   ;;  %vm267_vm1 = vcmask (!%p138_p2), 261120   ;;  %v1090_v5 = vld [vmem:[%s1330_s1 + $0x30] sm:$0xff] (!%p138_p2)   ;;  %v1094_v18 = vld [vmem:[%s1330_s1 + $0x38] sm:$0xff] (!%p138_p2)   ;;  %vm616_vm3 = vcmask (!%p138_p2), 1046528  }
   0x7   : > { %974 = vmatpush3.bf16.msra.mxu0 (!%p138_p2), %v1081_v0  ;;  %1001 = vmatprep.mubr.msk.bf16.mxu1 (!%p138_p2), %vm1109_vm0, %v1108_v1  ;;  %vm215_vm2 = vsmask.f32 (!%p138_p2), 7424  ;;  %v1089_v22 = vld [vmem:[%s1330_s1 + $0x20] sm:$0xff] (!%p138_p2)   ;;  %v1093_v31 = vld [vmem:[%s1330_s1 + $0x28] sm:$0xff] (!%p138_p2)   ;;  %vm796_vm4 = vcmask (!%p138_p2), 125952  }
   0x8   : > { %998 = vmatpush3.bf16.msra.mxu1 (!%p138_p2), %v1082_v2  ;;  %975 = vmatprep.subr.bf16.mxu0 (!%p138_p2), %v1108_v1  ;;  %vm806_vm5 = vsmask.f32 (!%p138_p2), 3328 }
   0x9   : > { %999 = vmatprep.subr.bf16.mxu1 (!%p138_p2), %v1108_v1  ;;  %977 = vmatprep.mubr.msk.bf16.mxu0 (!%p138_p2), %vm1109_vm0, %v1108_v1  ;;  %vm807_vm6 = vmand (!%p138_p2), %vm796_vm4, %vm806_vm5 }
   0xb   : > { %976 = vmatpush3.bf16.msra.mxu0 (!%p138_p2), %v1083_v3 }
   0xc   : > { %1000 = vmatpush3.bf16.msra.mxu1 (!%p138_p2), %v1084_v4  ;;  %1021 = vmatprep.subr.bf16.mxu0 (!%p138_p2), %v1108_v1 }
   0xd   : > { %s1334_s13 = smov (!%p161_p3, %s866_s13), 1  ;;  %1045 = vmatprep.subr.bf16.mxu1 %v1108_v1 }
   0xe   : > { %s1069_s22 = smul.u32 44, %s1334_s13 }
   0xf   : > { %s1070_s9 = smul.u32 36, %s1334_s13 }
  0x10   : > { %s1165_s25 = scalar_lea.vmem %s1329_s0, %s1069_s22 }
  0x11   : > { %v172_v6 = vld [vmem:[%s1165_s25] sm:$0xf]  ;;  %v173_v7 = vld [vmem:[%s1165_s25 + $0x4] sm:$0xf]  ;;  %v174_v8 = vld [vmem:[%s1165_s25 + $0x8] sm:$0xf]  ;;  %s1292_s14 = scalar_lea.vmem %s1332_s3, %s1070_s9 }
  0x12   : > { %v175_v9 = vld [vmem:[%s1165_s25 + $0xc] sm:$0xf]  ;;  %v176_v10 = vld [vmem:[%s1165_s25 + $0x10] sm:$0xf]  ;;  %v877_v11 = vcombine.low %v172_v6, %v173_v7  ;;  %v1177_v12 = vld [vmem:[%s1165_s25 + $0x14] sm:$0xf]  ;;  %v900_v44 = vcombine.low %v173_v7, %v174_v8 }
  0x13   : > { %v878_v13 = vcombine.low %v174_v8, %v175_v9  ;;  %v879_v16 = vcombine.low %v176_v10, %v1177_v12  ;;  %v178_v25 = vld [vmem:[%s1165_s25 + $0x18] sm:$0xf]  ;;  %v1192_v26 = vld [vmem:[%s1165_s25 + $0x1c] sm:$0xf]  ;;  %v180_v35 = vld [vmem:[%s1165_s25 + $0x20] sm:$0xf]  ;;  %v901_v46 = vcombine.low %v175_v9, %v176_v10 }
  0x14   : > { %1002 = vmatmul.mubr.msk.bf16.vlgmr.msra.gmra.mrb[0].mxu1 %vm267_vm1, %v877_v11  ;;  %v217_v14 = vshrl.u32 %v877_v11, 16  ;;  %v219_v15 = vshll.u32 %v877_v11, 16  ;;  %v880_v30 = vcombine.low %v178_v25, %v1192_v26  ;;  %v881_v38 = vcombine.low %v180_v35, %v180_v35  ;;  %v182_v6 = vld [vmem:[%s1165_s25 + $0x28] sm:$0x1] }
  0x15   : > { %v224_v17 = vshll.u32 %v878_v13, 16  ;;  %1046 = vmatpush3.bf16.msra.mxu1 %v1090_v5  ;;  %1005 = vmatprep.mubr.msk.bf16.mxu1 %vm1109_vm0, %v1108_v1  ;;  %v228_v23 = vshrl.u32 %v878_v13, 16  ;;  %v232_v24 = vshll.u32 %v879_v16, 16  ;;  %v236_v33 = vshrl.u32 %v879_v16, 16  ;;  %v181_v5 = vld [vmem:[%s1165_s25 + $0x24] sm:$0xf] }
  0x16   : > { %v221_v19 = vrot.slane %v219_v15, 1  ;;  %1047 = vmatprep.subr.bf16.mxu1 %v1108_v1  ;;  %v240_v34 = vshll.u32 %v880_v30, 16  ;;  %v244_v40 = vshrl.u32 %v880_v30, 16  ;;  %v248_v41 = vshll.u32 %v881_v38, 16 }
  0x17   : > { %v226_v20 = vrot.slane %v224_v17, 1  ;;  %v234_v29 = vrot.slane %v232_v24, 1  ;;  %v252_v47 = vshrl.u32 %v881_v38, 16  ;;  %v464_v48 = vshll.u32 %v900_v44, 16 }
  0x18   : > { %v222_v21 = vor.u32 %v221_v19, %v217_v14  ;;  %v242_v37 = vrot.slane %v240_v34, 1  ;;  %v250_v43 = vrot.slane %v248_v41, 1  ;;  %v617_v49 = vrot.slane %v900_v44, 1 }
  0x19   : > { %1048 = vmatpush3.bf16.msra.mxu1 %v1094_v18  ;;  %v230_v28 = vor.u32 %v228_v23, %v226_v20  ;;  %v238_v36 = vor.u32 %v236_v33, %v234_v29  ;;  %v618_v50 = vrot.slane %v901_v46, 1  ;;  %v462_v52 = vshrl.u32 %v900_v44, 16 }
  0x1a   : > { %v227_v27 = vsel %vm215_vm2, %v222_v21, %v226_v20  ;;  %v246_v42 = vor.u32 %v244_v40, %v242_v37  ;;  %v254_v51 = vor.u32 %v252_v47, %v250_v43  ;;  %v466_v53 = vrot.slane %v464_v48, 1 }
  0x1b   : > { %978 = vmatmul.mubr.msk.bf16.vlgmr.msra.gmra.mrb[0].mxu0 %vm267_vm1, %v227_v27  ;;  %v235_v32 = vsel %vm215_vm2, %v230_v28, %v234_v29  ;;  %v243_v39 = vsel %vm215_vm2, %v238_v36, %v242_v37  ;;  %v469_v54 = vshll.u32 %v901_v46, 16  ;;  %v619_v55 = vsel %vm616_vm3, %v617_v49, %v618_v50 }
  0x1c   : > { %1022 = vmatpush3.bf16.msra.mxu0 %v1089_v22  ;;  %981 = vmatprep.mubr.msk.bf16.mxu0 %vm1109_vm0, %v1108_v1  ;;  %v251_v45 = vsel %vm215_vm2, %v246_v42, %v250_v43  ;;  %v902_v56 = vcombine.low %v1177_v12, %v178_v25  ;;  %v467_v57 = vor.u32 %v466_v53, %v462_v52  ;;  %v473_v61 = vshrl.u32 %v901_v46, 16 }
  0x1d   : > { %1006 = vmatmul.mubr.msk.bf16.gmra.mrb[4].mxu1 %vm267_vm1, %v878_v13  ;;  %1023 = vmatprep.subr.bf16.mxu0 %v1108_v1  ;;  %v471_v58 = vrot.slane %v469_v54, 1  ;;  %v903_v0 = vcombine.low %v1192_v26, %v180_v35  ;;  %v916_v11 = vcombine.low %v181_v5, %v182_v6  ;;  %v904_v14 = vcombine.low %v181_v5, %v181_v5 }
  0x1e   : > { %1009 = vmatprep.mubr.msk.bf16.mxu1 %vm1109_vm0, %v1108_v1  ;;  %v620_v59 = vrot.slane %v902_v56, 1  ;;  %v477_v62 = vshll.u32 %v902_v56, 16  ;;  %v481_v8 = vshrl.u32 %v902_v56, 16 }
  0x1f   : > { %v472_v60 = vsel %vm215_vm2, %v467_v57, %v471_v58  ;;  %v475_v2 = vor.u32 %v473_v61, %v471_v58  ;;  %v622_v4 = vrot.slane %v903_v0, 1  ;;  %v485_v9 = vshll.u32 %v903_v0, 16 }
  0x20   : > { %1024 = vmatpush3.bf16.msra.mxu0 %v1093_v31  ;;  %v621_v63 = vsel %vm616_vm3, %v618_v50, %v620_v59  ;;  %v479_v3 = vrot.slane %v477_v62, 1  ;;  %v624_v15 = vrot.slane %v916_v11, 1  ;;  %v489_v17 = vshrl.u32 %v903_v0, 16 }
  0x21   : > { %v623_v10 = vsel %vm616_vm3, %v620_v59, %v622_v4  ;;  %v487_v13 = vrot.slane %v485_v9, 1  ;;  %v493_v18 = vshll.u32 %v904_v14, 16  ;;  %v497_v23 = vshrl.u32 %v904_v14, 16 }
  0x22   : > { %v480_v7 = vsel %vm215_vm2, %v475_v2, %v479_v3  ;;  %v483_v12 = vor.u32 %v481_v8, %v479_v3  ;;  %v625_v19 = vsel %vm616_vm3, %v622_v4, %v624_v15 }
  0x23   : > { %982 = vmatmul.mubr.msk.bf16.gmra.mrb[4].mxu0 %vm267_vm1, %v235_v32  ;;  %v491_v20 = vor.u32 %v489_v17, %v487_v13  ;;  %v495_v21 = vrot.slane %v493_v18, 1  ;;  %v1284_v17 = vld [vmem:[%s1331_s2] ss:$0 sm:$0xff] }
  0x24   : > { %985 = vmatprep.mubr.msk.bf16.mxu0 %vm1109_vm0, %v1108_v1 }
  0x25   : > { %1010 = vmatmul.mubr.msk.bf16.gmra.mrb[8].mxu1 %vm267_vm1, %v879_v16  ;;  %v488_v16 = vsel %vm215_vm2, %v483_v12, %v487_v13  ;;  %v496_v22 = vsel %vm215_vm2, %v491_v20, %v495_v21  ;;  %v499_v24 = vor.u32 %v497_v23, %v495_v21 }
  0x26   : > { %1013 = vmatprep.mubr.msk.bf16.mxu1 %vm1109_vm0, %v1108_v1 }
  0x2b   : > { %986 = vmatmul.mubr.msk.bf16.gmra.mrb[8].mxu0 %vm267_vm1, %v243_v39 }
  0x2c   : > { %989 = vmatprep.mubr.msk.bf16.mxu0 %vm1109_vm0, %v1108_v1 }
  0x2d   : > { %1014 = vmatmul.mubr.msk.bf16.gmra.mrb[12].mxu1 %vm267_vm1, %v880_v30 }
  0x2e   : > { %1017 = vmatprep.mubr.msk.bf16.mxu1 %vm1109_vm0, %v1108_v1 }
  0x33   : > { %990 = vmatmul.mubr.msk.bf16.gmra.mrb[12].mxu0 %vm267_vm1, %v251_v45 }
  0x34   : > { %993 = vmatprep.mubr.msk.bf16.mxu0 %vm1109_vm0, %v1108_v1 }
  0x35   : > { %1018 = vmatmul.mubr.msk.bf16.gmra.mrb[16].mxu1 %vm267_vm1, %v881_v38 }
  0x36   : > { %1049 = vmatprep.mubr.msk.bf16.mxu1 %vm1109_vm0, %v1108_v1 }
  0x3b   : > { %994 = vmatmul.mubr.msk.bf16.gmra.mrb[16].mxu0 %vm267_vm1, %v254_v51 }
  0x3c   : > { %1025 = vmatprep.mubr.msk.bf16.mxu0 %vm1109_vm0, %v1108_v1 }
  0x3d   : > { %1050 = vmatmul.mubr.msk.bf16.vlgmr.msra.gmra.mrb[20].mxu1 %vm267_vm1, %v619_v55 }
  0x3e   : > { %1053 = vmatprep.mubr.msk.bf16.mxu1 %vm1109_vm0, %v1108_v1 }
  0x43   : > { %1026 = vmatmul.mubr.msk.bf16.vlgmr.msra.gmra.mrb[20].mxu0 %vm267_vm1, %v472_v60 }
  0x44   : > { %1029 = vmatprep.mubr.msk.bf16.mxu0 %vm1109_vm0, %v1108_v1 }
  0x45   : > { %1054 = vmatmul.mubr.msk.bf16.gmra.mrb[24].mxu1 %vm267_vm1, %v621_v63 }
  0x46   : > { %1057 = vmatprep.mubr.msk.bf16.mxu1 %vm1109_vm0, %v1108_v1 }
  0x4b   : > { %1030 = vmatmul.mubr.msk.bf16.gmra.mrb[24].mxu0 %vm267_vm1, %v480_v7 }
  0x4c   : > { %1033 = vmatprep.mubr.msk.bf16.mxu0 %vm1109_vm0, %v1108_v1 }
  0x4d   : > { %1058 = vmatmul.mubr.msk.bf16.gmra.mrb[28].mxu1 %vm267_vm1, %v623_v10 }
  0x4e   : > { %1061 = vmatprep.mubr.msk.bf16.mxu1 %vm1109_vm0, %v1108_v1 }
  0x53   : > { %1034 = vmatmul.mubr.msk.bf16.gmra.mrb[28].mxu0 %vm267_vm1, %v488_v16 }
  0x54   : > { %1037 = vmatprep.mubr.msk.bf16.mxu0 %vm1109_vm0, %v1108_v1 }
  0x55   : > { %1062 = vmatmul.mubr.msk.bf16.gmra.mrb[32].mxu1 %vm267_vm1, %v625_v19 }
  0x56   : > { %1065 = vmatprep.mubr.msk.bf16.mxu1 %vm1109_vm0, %v1108_v1 }
  0x5b   : > { %1038 = vmatmul.mubr.msk.bf16.gmra.mrb[32].mxu0 %vm267_vm1, %v496_v22 }
  0x5c   : > { %1041 = vmatprep.mubr.msk.bf16.mxu0 %vm1109_vm0, %v1108_v1 }
  0x5d   : > { %1066 = vmatmul.mubr.msk.bf16.gmra.mrb[36].mxu1 %vm267_vm1, %v624_v15 }
  0x63   : > { %1042 = vmatmul.mubr.msk.bf16.gmra.mrb[36].mxu0 %vm267_vm1, %v499_v24 }
  0xe7   : > { %v411_v25 = vpop.f32.mrb[0].mxu1 }
  0xe8   : > { %v1003_v26 = vpop.f32.mrb[1].mxu1 }
  0xe9   : > { %v414_v27 = vpop.f32.mrb[2].mxu1 }
  0xea   : > { %v1004_v28 = vpop.f32.mrb[3].mxu1 }
  0xee   : > { %v317_v29 = vpop.f32.mrb[0].mxu0 }
  0xef   : > { %v412_v30 = vadd.f32 %v411_v25, %v317_v29  ;;  %v979_v31 = vpop.f32.mrb[1].mxu0 }
  0xf0   : > { %v320_v32 = vpop.f32.mrb[2].mxu0  ;;  %v419_v33 = vpop.f32.mrb[4].mxu1 }
  0xf1   : > { %v415_v34 = vadd.f32 %v414_v27, %v320_v32  ;;  %v980_v35 = vpop.f32.mrb[3].mxu0  ;;  %v1007_v36 = vpop.f32.mrb[5].mxu1 }
  0xf2   : > { %v422_v37 = vpop.f32.mrb[6].mxu1 }
  0xf3   : > { %v1008_v38 = vpop.f32.mrb[7].mxu1 }
  0xf6   : > { %v325_v1 = vpop.f32.mrb[4].mxu0 }
  0xf7   : > { %v420_v39 = vadd.f32 %v419_v33, %v325_v1  ;;  %v983_v40 = vpop.f32.mrb[5].mxu0 }
  0xf8   : > { %v328_v41 = vpop.f32.mrb[6].mxu0  ;;  %v427_v42 = vpop.f32.mrb[8].mxu1 }
  0xf9   : > { %v1269_v43 = vadd.f32 %v422_v37, %v328_v41  ;;  %v984_v44 = vpop.f32.mrb[7].mxu0  ;;  %v1011_v45 = vpop.f32.mrb[9].mxu1 }
  0xfa   : > { %v430_v46 = vpop.f32.mrb[10].mxu1 }
  0xfb   : > { %v1012_v47 = vpop.f32.mrb[11].mxu1 }
  0xfe   : > { %v333_v48 = vpop.f32.mrb[8].mxu0 }
  0xff   : > { %v1271_v49 = vadd.f32 %v427_v42, %v333_v48  ;;  %v987_v50 = vpop.f32.mrb[9].mxu0 }
 0x100   : > { %v336_v51 = vpop.f32.mrb[10].mxu0  ;;  %v435_v52 = vpop.f32.mrb[12].mxu1 }
 0x101   : > { %v1273_v53 = vadd.f32 %v430_v46, %v336_v51  ;;  %v988_v54 = vpop.f32.mrb[11].mxu0  ;;  %v1015_v55 = vpop.f32.mrb[13].mxu1 }
 0x102   : > { %v438_v56 = vpop.f32.mrb[14].mxu1 }
 0x103   : > { %v1016_v57 = vpop.f32.mrb[15].mxu1 }
 0x106   : > { %v341_v58 = vpop.f32.mrb[12].mxu0 }
 0x107   : > { %v1275_v59 = vadd.f32 %v435_v52, %v341_v58  ;;  %v991_v60 = vpop.f32.mrb[13].mxu0 }
 0x108   : > { %v344_v61 = vpop.f32.mrb[14].mxu0  ;;  %v443_v62 = vpop.f32.mrb[16].mxu1 }
 0x109   : > { %v1277_v63 = vadd.f32 %v438_v56, %v344_v61  ;;  %v992_v0 = vpop.f32.mrb[15].mxu0  ;;  %v1019_v2 = vpop.f32.mrb[17].mxu1 }
 0x10a   : > { %v446_v3 = vpop.f32.mrb[18].mxu1 }
 0x10b   : > { %v1020_v4 = vpop.f32.mrb[19].mxu1 }
 0x10e   : > { %v349_v5 = vpop.f32.mrb[16].mxu0 }
 0x10f   : > { %v1279_v6 = vadd.f32 %v443_v62, %v349_v5  ;;  %v995_v7 = vpop.f32.mrb[17].mxu0 }
 0x110   : > { %v352_v8 = vpop.f32.mrb[18].mxu0  ;;  %v687_v9 = vpop.f32.mrb[20].mxu1 }
 0x111   : > { %v996_v10 = vpop.f32.mrb[19].mxu0  ;;  %v1051_v11 = vpop.f32.mrb[21].mxu1 }
 0x112   : > { %v690_v12 = vpop.f32.mrb[22].mxu1 }
 0x113   : > { %v1052_v13 = vpop.f32.mrb[23].mxu1 }
 0x116   : > { %v561_v14 = vpop.f32.mrb[20].mxu0 }
 0x117   : > { %v599_v15 = vadd.f32 %v561_v14, %v412_v30  ;;  %v1027_v16 = vpop.f32.mrb[21].mxu0 }
 0x118   : > { %v564_v18 = vpop.f32.mrb[22].mxu0  ;;  %v695_v19 = vpop.f32.mrb[24].mxu1 }
 0x119   : > { %v725_v20 = vadd.f32 %v687_v9, %v599_v15  ;;  %v600_v21 = vadd.f32 %v564_v18, %v415_v34  ;;  %v1028_v22 = vpop.f32.mrb[23].mxu0  ;;  %v1055_v23 = vpop.f32.mrb[25].mxu1 }
 0x11a   : > { %v698_v24 = vpop.f32.mrb[26].mxu1 }
 0x11b   : > { %v741_v25 = vadd.f32 %v1284_v17, %v725_v20  ;;  %v726_v26 = vadd.f32 %v690_v12, %v600_v21  ;;  %v1056_v27 = vpop.f32.mrb[27].mxu1 }
 0x11d   : > { %v750_v28 = vmax.f32 %v741_v25, 0.0  ;;  %v742_v29 = vadd.f32 %v1284_v17, %v726_v26 }
 0x11e   : > { %v569_v30 = vpop.f32.mrb[24].mxu0 }
 0x11f   : > { %v936_v31 = vpack.c.bf16 %v750_v28, %v750_v28  ;;  %v751_v32 = vmax.f32 %v742_v29, 0.0  ;;  %v601_v33 = vadd.f32 %v569_v30, %v420_v39  ;;  %v1031_v34 = vpop.f32.mrb[25].mxu0 }
 0x120   : > { %v572_v35 = vpop.f32.mrb[26].mxu0  ;;  %v703_v36 = vpop.f32.mrb[28].mxu1 }
 0x121   : > { %797 = vst.msk [vmem:[%s1292_s14] sm:$0xf] %vm796_vm4, %v936_v31  ;;  %v937_v37 = vpack.c.bf16 %v751_v32, %v751_v32  ;;  %v727_v38 = vadd.f32 %v695_v19, %v601_v33  ;;  %v602_v1 = vadd.f32 %v572_v35, %v1269_v43  ;;  %v1032_v40 = vpop.f32.mrb[27].mxu0  ;;  %v1059_v41 = vpop.f32.mrb[29].mxu1  ;;  %v808_v33 = vld [vmem:[%s1292_s14 + $0x20] sm:$0xf] }
 0x122   : > { %v706_v42 = vpop.f32.mrb[30].mxu1 }
 0x123   : > { %798 = vst.msk [vmem:[%s1292_s14 + $0x4] sm:$0xf] %vm796_vm4, %v937_v37  ;;  %v743_v44 = vadd.f32 %v1284_v17, %v727_v38  ;;  %v728_v45 = vadd.f32 %v698_v24, %v602_v1  ;;  %v1060_v46 = vpop.f32.mrb[31].mxu1 }
 0x125   : > { %v752_v39 = vmax.f32 %v743_v44, 0.0  ;;  %v744_v47 = vadd.f32 %v1284_v17, %v728_v45 }
 0x126   : > { %v577_v48 = vpop.f32.mrb[28].mxu0 }
 0x127   : > { %v938_v50 = vpack.c.bf16 %v752_v39, %v752_v39  ;;  %v753_v51 = vmax.f32 %v744_v47, 0.0  ;;  %v603_v52 = vadd.f32 %v577_v48, %v1271_v49  ;;  %v1035_v43 = vpop.f32.mrb[29].mxu0 }
 0x128   : > { %v580_v54 = vpop.f32.mrb[30].mxu0  ;;  %v711_v55 = vpop.f32.mrb[32].mxu1 }
 0x129   : > { %799 = vst.msk [vmem:[%s1292_s14 + $0x8] sm:$0xf] %vm796_vm4, %v938_v50  ;;  %v939_v56 = vpack.c.bf16 %v753_v51, %v753_v51  ;;  %v729_v57 = vadd.f32 %v703_v36, %v603_v52  ;;  %v604_v58 = vadd.f32 %v580_v54, %v1273_v53  ;;  %v1036_v60 = vpop.f32.mrb[31].mxu0  ;;  %v1063_v61 = vpop.f32.mrb[33].mxu1 }
 0x12a   : > { %v714_v62 = vpop.f32.mrb[34].mxu1 }
 0x12b   : > { %800 = vst.msk [vmem:[%s1292_s14 + $0xc] sm:$0xf] %vm796_vm4, %v939_v56  ;;  %v745_v0 = vadd.f32 %v1284_v17, %v729_v57  ;;  %v730_v2 = vadd.f32 %v706_v42, %v604_v58  ;;  %v1064_v3 = vpop.f32.mrb[35].mxu1 }
 0x12d   : > { %v754_v49 = vmax.f32 %v745_v0, 0.0  ;;  %v746_v4 = vadd.f32 %v1284_v17, %v730_v2 }
 0x12e   : > { %v585_v5 = vpop.f32.mrb[32].mxu0 }
 0x12f   : > { %v940_v7 = vpack.c.bf16 %v754_v49, %v754_v49  ;;  %v755_v8 = vmax.f32 %v746_v4, 0.0  ;;  %v605_v9 = vadd.f32 %v585_v5, %v1275_v59  ;;  %v1039_v53 = vpop.f32.mrb[33].mxu0 }
 0x130   : > { %v588_v10 = vpop.f32.mrb[34].mxu0  ;;  %v719_v11 = vpop.f32.mrb[36].mxu1 }
 0x131   : > { %801 = vst.msk [vmem:[%s1292_s14 + $0x10] sm:$0xf] %vm796_vm4, %v940_v7  ;;  %v941_v12 = vpack.c.bf16 %v755_v8, %v755_v8  ;;  %v731_v13 = vadd.f32 %v711_v55, %v605_v9  ;;  %v606_v14 = vadd.f32 %v588_v10, %v1277_v63  ;;  %v1040_v15 = vpop.f32.mrb[35].mxu0  ;;  %v1067_v16 = vpop.f32.mrb[37].mxu1 }
 0x132   : > { %v722_v18 = vpop.f32.mrb[38].mxu1 }
 0x133   : > { %802 = vst.msk [vmem:[%s1292_s14 + $0x14] sm:$0xf] %vm796_vm4, %v941_v12  ;;  %v747_v19 = vadd.f32 %v1284_v17, %v731_v13  ;;  %v732_v20 = vadd.f32 %v714_v62, %v606_v14  ;;  %v1068_v59 = vpop.f32.mrb[39].mxu1 }
 0x135   : > { %v756_v21 = vmax.f32 %v747_v19, 0.0  ;;  %v748_v22 = vadd.f32 %v1284_v17, %v732_v20 }
 0x136   : > { %v593_v23 = vpop.f32.mrb[36].mxu0 }
 0x137   : > { %v942_v24 = vpack.c.bf16 %v756_v21, %v756_v21  ;;  %v757_v25 = vmax.f32 %v748_v22, 0.0  ;;  %v607_v63 = vadd.f32 %v593_v23, %v1279_v6  ;;  %v1043_v26 = vpop.f32.mrb[37].mxu0 }
 0x138   : > { %v596_v27 = vpop.f32.mrb[38].mxu0 }
 0x139   : > { %803 = vst.msk [vmem:[%s1292_s14 + $0x18] sm:$0xf] %vm796_vm4, %v942_v24  ;;  %v943_v28 = vpack.c.bf16 %v757_v25, %v757_v25  ;;  %v733_v29 = vadd.f32 %v719_v11, %v607_v63  ;;  %v1044_v30 = vpop.f32.mrb[39].mxu0 }
 0x13b   : > { %804 = vst.msk [vmem:[%s1292_s14 + $0x1c] sm:$0xf] %vm796_vm4, %v943_v28  ;;  %v749_v31 = vadd.f32 %v1284_v17, %v733_v29 }
 0x13d   : > { %v758_v32 = vmax.f32 %v749_v31, 0.0 }
 0x13f   : > { %v944_v34 = vpack.c.bf16 %v758_v32, %v758_v32 }
 0x141   : > { %v809_v35 = vsel %vm807_vm6, %v944_v34, %v808_v33 }
 0x142   : > { %810 = vst [vmem:[%s1292_s14 + $0x20] sm:$0xf] %v809_v35 }
 0x143 PF: > { %s13_s12 = sadd.s32 1, %s1106_s12  }
 0x144   : > { %p10_p4 = scmp.ge.s32.totalorder %s13_s12, 4  }
 0x146   :  { %12 = sbr.rel (!%p10_p4) target bundleno = 1 (0x1), region = 65 }

// kernel: _lambda_.18
= control target key start
LH: loop header
LB: loop body
LE: loop exit
PB: predicated region body
PF: predicated region fallthrough
CT: control target
= control target key end

     0   :  { %s854_s12 = smov 0   ;;  %s940_s0 = inlined_call_operand.vmem [shape: bf16[2,25,64], index: 0, kind: input, shape index: {}]   ;;  %s941_s1 = inlined_call_operand.vmem [shape: bf16[4,64,24], index: 1, kind: input, shape index: {}]   ;;  %s942_s2 = inlined_call_operand.vmem [shape: f32[1,24], index: 2, kind: input, shape index: {}]   ;;  %s943_s3 = inlined_call_operand.vmem [shape: bf16[2,19,24], index: 3, kind: output, shape index: {}]  }
   0x1 LB: > { %s657_s13 = sadd.s32 4294967295, %s832_s12   ;;  %p661_p0 = scmp.ge.s32.totalorder %s832_s12, 1  ;;  %s832_s12 = sphi %s854_s12, %s13_s12  }
   0x2   : > { %p137_p1 = scmp.lt.s32.totalorder %s832_s12, 3 }
   0x4   : > { %p138_p2 = pnand %p661_p0, %p137_p1 }
   0x5   : > { %v807_v0 = vld [vmem:[%s941_s1 + $0x20] sm:$0xff] (!%p138_p2)   ;;  %p161_p3 = scmp.lt.s32.totalorder (!%p138_p2), %s657_s13, 1  ;;  %v809_v2 = vld [vmem:[%s941_s1 + $0x28] sm:$0xff] (!%p138_p2)   ;;  %v811_v4 = vld [vmem:[%s941_s1 + $0x30] sm:$0xff] (!%p138_p2)   ;;  %vm241_vm0 = vcmask (!%p138_p2), 523264   ;;  %vm482_vm3 = vcmask (!%p138_p2), 1044480  }
   0x6   : > { %141 = sbr.rel (%p138_p2) target bundleno = 267 (0x10b), region = 32  ;;  %v808_v1 = vld [vmem:[%s941_s1] sm:$0xff] (!%p138_p2)   ;;  %750 = vmatprep.subr.bf16.mxu0 (!%p138_p2), %v807_v0  ;;  %v810_v3 = vld [vmem:[%s941_s1 + $0x8] sm:$0xff] (!%p138_p2)   ;;  %v812_v5 = vld [vmem:[%s941_s1 + $0x10] sm:$0xff] (!%p138_p2)   ;;  %vm201_vm1 = vsmask.f32 (!%p138_p2), 7424 }
   0x7   : > { %762 = vmatprep.subr.bf16.mxu1 (!%p138_p2), %v808_v1  ;;  %751 = vmatpush3.bf16.msra.mxu0 (!%p138_p2), %v807_v0  ;;  %v813_v6 = vld [vmem:[%s941_s1 + $0x38] sm:$0xff] (!%p138_p2)   ;;  %v817_v15 = vld [vmem:[%s941_s1 + $0x40] sm:$0xff] (!%p138_p2)   ;;  %v819_v25 = vld [vmem:[%s941_s1 + $0x48] sm:$0xff] (!%p138_p2)   ;;  %vm381_vm2 = vsmask.f32 (!%p138_p2), 5376  ;;  %vm596_vm4 = vcmask (!%p138_p2), 189440  }
   0x8   : > { %763 = vmatpush3.bf16.msra.mxu1 (!%p138_p2), %v808_v1  ;;  %752 = vmatprep.subr.bf16.mxu0 (!%p138_p2), %v809_v2  ;;  %v814_v8 = vld [vmem:[%s941_s1 + $0x18] sm:$0xff] (!%p138_p2)   ;;  %v818_v16 = vld [vmem:[%s941_s1 + $0x60] sm:$0xff] (!%p138_p2)   ;;  %v820_v28 = vld [vmem:[%s941_s1 + $0x68] sm:$0xff] (!%p138_p2)   ;;  %vm597_vm5 = vsmask.f32 (!%p138_p2), 1280  ;;  %vm593_vm7 = vcmask (!%p138_p2), 191488  }
   0x9   : > { %764 = vmatprep.subr.bf16.mxu1 (!%p138_p2), %v810_v3  ;;  %v821_v34 = vld [vmem:[%s941_s1 + $0x50] sm:$0xff] (!%p138_p2)   ;;  %v823_v38 = vld [vmem:[%s941_s1 + $0x58] sm:$0xff] (!%p138_p2)   ;;  %v716_v56 = vld [vmem:[%s942_s2] ss:$0 sm:$0xff] (!%p138_p2) }
   0xa   : > { %v822_v35 = vld [vmem:[%s941_s1 + $0x70] sm:$0xff] (!%p138_p2)   ;;  %v824_v39 = vld [vmem:[%s941_s1 + $0x78] sm:$0xff] (!%p138_p2)   ;;  %vm598_vm6 = vmand (!%p138_p2), %vm596_vm4, %vm597_vm5 }
   0xb   : > { %753 = vmatpush3.bf16.msra.mxu0 (!%p138_p2), %v809_v2 }
   0xc   : > { %765 = vmatpush3.bf16.msra.mxu1 (!%p138_p2), %v810_v3  ;;  %754 = vmatprep.subr.bf16.mxu0 (!%p138_p2), %v811_v4 }
   0xd   : > { %s945_s13 = smov (!%p161_p3, %s657_s13), 1  ;;  %766 = vmatprep.subr.bf16.mxu1 %v812_v5 }
   0xe   : > { %s722_s24 = sshll.u32 %s945_s13, 4  ;;  %s798_s25 = smul.u32 12, %s945_s13 }
   0xf   : > { %s886_s29 = scalar_lea.vmem %s940_s0, %s722_s24  ;;  %755 = vmatpush3.bf16.msra.mxu0 %v811_v4 }
  0x10   : > { %v174_v7 = vld [vmem:[%s886_s29 + $0x8] sm:$0xf]  ;;  %v815_v9 = vld [vmem:[%s886_s29] sm:$0xff]   ;;  %767 = vmatpush3.bf16.msra.mxu1 %v812_v5  ;;  %756 = vmatprep.subr.bf16.mxu0 %v813_v6  ;;  %v175_v30 = vld [vmem:[%s886_s29 + $0xc] sm:$0x1]  ;;  %s170_s30 = scalar_lea.vmem %s943_s3, %s798_s25 }
  0x11   : > { %v674_v10 = vcombine.low %v174_v7, %v174_v7  ;;  %v203_v11 = vshrl.u32 %v815_v9, 16  ;;  %v205_v12 = vshll.u32 %v815_v9, 16  ;;  %770 = vmatprep.mubr.msk.bf16.mxu1 %vm241_vm0, %v815_v9  ;;  %768 = vmatprep.subr.bf16.mxu1 %v814_v8  ;;  %v709_v32 = vcombine.low %v174_v7, %v175_v30  ;;  %v599_v5 = vld [vmem:[%s170_s30 + $0x8] sm:$0x3] }
  0x12   : > { %v483_v33 = vrot.slane %v815_v9, 3 }
  0x13   : > { %v210_v13 = vshll.u32 %v674_v10, 16  ;;  %v214_v14 = vshrl.u32 %v674_v10, 16  ;;  %v207_v17 = vrot.slane %v205_v12, 1  ;;  %v382_v19 = vrot.slane %v203_v11, 2  ;;  %757 = vmatpush3.bf16.msra.mxu0 %v813_v6 }
  0x14   : > { %v383_v21 = vrot.slane %v205_v12, 3  ;;  %769 = vmatpush3.bf16.msra.mxu1 %v814_v8  ;;  %774 = vmatprep.subr.bf16.mxu0 %v817_v15  ;;  %v484_v36 = vrot.slane %v709_v32, 3 }
  0x15   : > { %v212_v18 = vrot.slane %v210_v13, 1  ;;  %v386_v20 = vrot.slane %v210_v13, 3  ;;  %v208_v22 = vor.u32 %v207_v17, %v203_v11  ;;  %v385_v24 = vrot.slane %v214_v14, 2  ;;  %786 = vmatprep.subr.bf16.mxu1 %v818_v16 }
  0x16   : > { %v384_v26 = vor.u32 %v383_v21, %v382_v19  ;;  %v485_v37 = vsel %vm482_vm3, %v483_v33, %v484_v36 }
  0x17   : > { %v216_v23 = vor.u32 %v214_v14, %v212_v18  ;;  %v213_v27 = vsel %vm201_vm1, %v208_v22, %v212_v18  ;;  %v387_v29 = vor.u32 %v386_v20, %v385_v24  ;;  %771 = vmatmul.mubr.msk.bf16.vlgmr.msra.gmra.mrb[0].mxu1 %vm241_vm0, %v674_v10 }
  0x18   : > { %758 = vmatprep.mubr.msk.bf16.mxu0 %vm241_vm0, %v213_v27  ;;  %787 = vmatpush3.bf16.msra.mxu1 %v818_v16 }
  0x19   : > { %759 = vmatmul.mubr.msk.bf16.vlgmr.msra.gmra.mrb[0].mxu0 %vm241_vm0, %v216_v23  ;;  %v388_v31 = vsel %vm381_vm2, %v384_v26, %v387_v29  ;;  %788 = vmatprep.subr.bf16.mxu1 %v820_v28 }
  0x1a   : > { %775 = vmatpush3.bf16.msra.mxu0 %v817_v15  ;;  %782 = vmatprep.mubr.msk.bf16.mxu0 %vm241_vm0, %v388_v31 }
  0x1b   : > { %776 = vmatprep.subr.bf16.mxu0 %v819_v25  ;;  %794 = vmatprep.mubr.msk.bf16.mxu1 %vm241_vm0, %v485_v37 }
  0x1c   : > { %789 = vmatpush3.bf16.msra.mxu1 %v820_v28 }
  0x1d   : > { %790 = vmatprep.subr.bf16.mxu1 %v822_v35 }
  0x1e   : > { %777 = vmatpush3.bf16.msra.mxu0 %v819_v25 }
  0x1f   : > { %778 = vmatprep.subr.bf16.mxu0 %v821_v34 }
  0x20   : > { %791 = vmatpush3.bf16.msra.mxu1 %v822_v35 }
  0x21   : > { %792 = vmatprep.subr.bf16.mxu1 %v824_v39 }
  0x22   : > { %779 = vmatpush3.bf16.msra.mxu0 %v821_v34 }
  0x23   : > { %780 = vmatprep.subr.bf16.mxu0 %v823_v38 }
  0x24   : > { %793 = vmatpush3.bf16.msra.mxu1 %v824_v39 }
  0x26   : > { %781 = vmatpush3.bf16.msra.mxu0 %v823_v38 }
  0x27   : > { %795 = vmatmul.mubr.msk.bf16.vlgmr.msra.gmra.mrb[4].mxu1 %vm241_vm0, %v484_v36 }
  0x29   : > { %783 = vmatmul.mubr.msk.bf16.vlgmr.msra.gmra.mrb[4].mxu0 %vm241_vm0, %v387_v29 }
  0xea   : > { %v772_v41 = vpop.f32.mrb[0].mxu1 }
  0xeb   : > { %v358_v44 = vpop.f32.mrb[1].mxu1 }
  0xec   : > { %v760_v40 = vpop.f32.mrb[0].mxu0  ;;  %v773_v47 = vpop.f32.mrb[2].mxu1 }
  0xed   : > { %v367_v42 = vadd.f32 %v772_v41, %v760_v40  ;;  %v282_v43 = vpop.f32.mrb[1].mxu0  ;;  %v361_v49 = vpop.f32.mrb[3].mxu1 }
  0xee   : > { %v359_v45 = vadd.f32 %v358_v44, %v282_v43  ;;  %v761_v46 = vpop.f32.mrb[2].mxu0 }
  0xef   : > { %v285_v48 = vpop.f32.mrb[3].mxu0 }
  0xf0   : > { %v362_v50 = vadd.f32 %v361_v49, %v285_v48 }
  0xfa   : > { %v796_v52 = vpop.f32.mrb[4].mxu1 }
  0xfb   : > { %v550_v55 = vpop.f32.mrb[5].mxu1 }
  0xfc   : > { %v784_v51 = vpop.f32.mrb[4].mxu0  ;;  %v797_v59 = vpop.f32.mrb[6].mxu1 }
  0xfd   : > { %v469_v53 = vadd.f32 %v784_v51, %v367_v42  ;;  %v453_v54 = vpop.f32.mrb[5].mxu0  ;;  %v553_v62 = vpop.f32.mrb[7].mxu1 }
  0xfe   : > { %v467_v57 = vadd.f32 %v453_v54, %v359_v45  ;;  %v785_v58 = vpop.f32.mrb[6].mxu0 }
  0xff   : > { %v566_v60 = vadd.f32 %v796_v52, %v469_v53  ;;  %v456_v61 = vpop.f32.mrb[7].mxu0 }
 0x100   : > { %v564_v63 = vadd.f32 %v550_v55, %v467_v57  ;;  %v468_v0 = vadd.f32 %v456_v61, %v362_v50 }
 0x101   : > { %v576_v1 = vadd.f32 %v716_v56, %v566_v60 }
 0x102   : > { %v574_v2 = vadd.f32 %v716_v56, %v564_v63  ;;  %v565_v3 = vadd.f32 %v553_v62, %v468_v0 }
 0x103   : > { %v579_v4 = vmax.f32 %v576_v1, 0.0 }
 0x104   : > { %v577_v6 = vmax.f32 %v574_v2, 0.0  ;;  %v575_v7 = vadd.f32 %v716_v56, %v565_v3 }
 0x105   : > { %v725_v8 = vpack.c.bf16 %v579_v4, %v579_v4 }
 0x106   : > { %v723_v9 = vpack.c.bf16 %v577_v6, %v577_v6  ;;  %v578_v10 = vmax.f32 %v575_v7, 0.0 }
 0x107   : > { %v600_v11 = vsel %vm598_vm6, %v725_v8, %v599_v5 }
 0x108   : > { %601 = vst [vmem:[%s170_s30 + $0x8] sm:$0x3] %v600_v11  ;;  %594 = vst.msk [vmem:[%s170_s30] sm:$0xf] %vm593_vm7, %v723_v9  ;;  %v724_v12 = vpack.c.bf16 %v578_v10, %v578_v10 }
 0x10a   : > { %595 = vst.msk [vmem:[%s170_s30 + $0x4] sm:$0xf] %vm593_vm7, %v724_v12 }
 0x10b PF: > { %s13_s12 = sadd.s32 1, %s832_s12  }
 0x10c   : > { %p10_p4 = scmp.ge.s32.totalorder %s13_s12, 4  }
 0x10e   :  { %12 = sbr.rel (!%p10_p4) target bundleno = 1 (0x1), region = 65 }

// kernel: _lambda_.19
= control target key start
LH: loop header
LB: loop body
LE: loop exit
PB: predicated region body
PF: predicated region fallthrough
CT: control target
= control target key end

     0   :  { %s864_s12 = smov 0   ;;  %s1006_s0 = inlined_call_operand.vmem [shape: bf16[2,9,96], index: 0, kind: input, shape index: {}]   ;;  %s1007_s1 = inlined_call_operand.vmem [shape: bf16[4,96,32], index: 1, kind: input, shape index: {}]   ;;  %s1008_s2 = inlined_call_operand.vmem [shape: f32[1,32], index: 2, kind: input, shape index: {}]   ;;  %s1009_s3 = inlined_call_operand.vmem [shape: bf16[2,5,32], index: 3, kind: output, shape index: {}]  }
   0x1 LB: > { %s628_s13 = sadd.s32 4294967295, %s840_s12   ;;  %p632_p0 = scmp.ge.s32.totalorder %s840_s12, 1  ;;  %s840_s12 = sphi %s864_s12, %s13_s12  }
   0x2   : > { %p137_p1 = scmp.lt.s32.totalorder %s840_s12, 3 }
   0x4   : > { %p138_p2 = pnand %p632_p0, %p137_p1 }
   0x5   : > { %v808_v0 = vld [vmem:[%s1007_s1 + $0x30] sm:$0xff] (!%p138_p2)   ;;  %v842_v1 = vmov (!%p138_p2), 0.0   ;;  %v809_v2 = vld [vmem:[%s1007_s1] sm:$0xff] (!%p138_p2)   ;;  %v810_v3 = vld [vmem:[%s1007_s1 + $0x38] sm:$0xff] (!%p138_p2)   ;;  %vm843_vm0 = vmmov (!%p138_p2), 0   ;;  %p160_p3 = scmp.lt.s32.totalorder (!%p138_p2), %s628_s13, 1 }
   0x6   : > { %141 = sbr.rel (%p138_p2) target bundleno = 278 (0x116), region = 32  ;;  %734 = vmatprep.subr.bf16.mxu0 (!%p138_p2), %v842_v1  ;;  %750 = vmatprep.subr.bf16.mxu1 (!%p138_p2), %v842_v1  ;;  %v811_v4 = vld [vmem:[%s1007_s1 + $0x8] sm:$0xff] (!%p138_p2)   ;;  %v812_v5 = vld [vmem:[%s1007_s1 + $0x40] sm:$0xff] (!%p138_p2)   ;;  %v813_v6 = vld [vmem:[%s1007_s1 + $0x10] sm:$0xff] (!%p138_p2)   ;;  %vm243_vm1 = vcmask (!%p138_p2), 785408   ;;  %vm569_vm2 = vcmask (!%p138_p2), 256000  }
   0x7   : > { %735 = vmatpush3.bf16.msra.mxu0 (!%p138_p2), %v808_v0  ;;  %746 = vmatprep.mubr.msk.bf16.mxu0 (!%p138_p2), %vm843_vm0, %v842_v1  ;;  %v814_v7 = vld [vmem:[%s1007_s1 + $0x48] sm:$0xff] (!%p138_p2)   ;;  %v815_v8 = vld [vmem:[%s1007_s1 + $0x18] sm:$0xff] (!%p138_p2)   ;;  %v816_v11 = vld [vmem:[%s1007_s1 + $0x50] sm:$0xff] (!%p138_p2)   ;;  %vm570_vm3 = vsmask.f32 (!%p138_p2), 2304 }
   0x8   : > { %751 = vmatpush3.bf16.msra.mxu1 (!%p138_p2), %v809_v2  ;;  %736 = vmatprep.subr.bf16.mxu0 (!%p138_p2), %v842_v1  ;;  %v817_v12 = vld [vmem:[%s1007_s1 + $0x20] sm:$0xff] (!%p138_p2)   ;;  %v818_v16 = vld [vmem:[%s1007_s1 + $0x58] sm:$0xff] (!%p138_p2)   ;;  %v819_v17 = vld [vmem:[%s1007_s1 + $0x28] sm:$0xff] (!%p138_p2)  }
   0x9   : > { %752 = vmatprep.subr.bf16.mxu1 (!%p138_p2), %v842_v1  ;;  %762 = vmatprep.mubr.msk.bf16.mxu1 (!%p138_p2), %vm843_vm0, %v842_v1  ;;  %v821_v19 = vld [vmem:[%s1007_s1 + $0x60] sm:$0xff] (!%p138_p2)   ;;  %v822_v20 = vld [vmem:[%s1007_s1 + $0x90] sm:$0xff] (!%p138_p2)   ;;  %v823_v21 = vld [vmem:[%s1007_s1 + $0x68] sm:$0xff] (!%p138_p2)  }
   0xa   : > { %v824_v22 = vld [vmem:[%s1007_s1 + $0x98] sm:$0xff] (!%p138_p2)   ;;  %v825_v23 = vld [vmem:[%s1007_s1 + $0x70] sm:$0xff] (!%p138_p2)   ;;  %v826_v24 = vld [vmem:[%s1007_s1 + $0xa0] sm:$0xff] (!%p138_p2)  }
   0xb   : > { %737 = vmatpush3.bf16.msra.mxu0 (!%p138_p2), %v810_v3  ;;  %v827_v25 = vld [vmem:[%s1007_s1 + $0x78] sm:$0xff] (!%p138_p2)   ;;  %v828_v26 = vld [vmem:[%s1007_s1 + $0xa8] sm:$0xff] (!%p138_p2)   ;;  %v829_v27 = vld [vmem:[%s1007_s1 + $0x80] sm:$0xff] (!%p138_p2)  }
   0xc   : > { %753 = vmatpush3.bf16.msra.mxu1 (!%p138_p2), %v811_v4  ;;  %738 = vmatprep.subr.bf16.mxu0 (!%p138_p2), %v842_v1  ;;  %v830_v28 = vld [vmem:[%s1007_s1 + $0xb0] sm:$0xff] (!%p138_p2)   ;;  %v831_v32 = vld [vmem:[%s1007_s1 + $0x88] sm:$0xff] (!%p138_p2)   ;;  %v832_v34 = vld [vmem:[%s1007_s1 + $0xb8] sm:$0xff] (!%p138_p2)  }
   0xd   : > { %s1011_s13 = smov (!%p160_p3, %s628_s13), 1  ;;  %754 = vmatprep.subr.bf16.mxu1 %v842_v1  ;;  %v702_v50 = vld [vmem:[%s1008_s2] ss:$0 sm:$0xff]  ;;  %vm571_vm4 = vmand %vm569_vm2, %vm570_vm3 }
   0xe   : > { %s705_s24 = sshll.u32 %s1011_s13, 3 }
   0xf   : > { %s906_s29 = scalar_lea.vmem %s1006_s0, %s705_s24  ;;  %739 = vmatpush3.bf16.msra.mxu0 %v812_v5 }
  0x10   : > { %755 = vmatpush3.bf16.msra.mxu1 %v813_v6  ;;  %740 = vmatprep.subr.bf16.mxu0 %v842_v1  ;;  %v917_v9 = vld [vmem:[%s906_s29] sm:$0xf]  ;;  %v171_v29 = vld [vmem:[%s906_s29 + $0x4] sm:$0x1]  ;;  %s635_s29 = sshll.u32 %s1011_s13, 2 }
  0x11   : > { %756 = vmatprep.subr.bf16.mxu1 %v842_v1  ;;  %v648_v10 = vcombine.low %v917_v9, %v917_v9  ;;  %v694_v33 = vcombine.low %v917_v9, %v171_v29  ;;  %s168_s21 = scalar_lea.vmem %s1009_s3, %s635_s29 }
  0x12   : > { %v572_v59 = vld [vmem:[%s168_s21] sm:$0x7] }
  0x13   : > { %741 = vmatpush3.bf16.msra.mxu0 %v814_v7  ;;  %v203_v13 = vshll.u32 %v648_v10, 16  ;;  %v201_v14 = vshrl.u32 %v648_v10, 16  ;;  %v478_v36 = vrot.slane %v694_v33, 2 }
  0x14   : > { %757 = vmatpush3.bf16.msra.mxu1 %v815_v8  ;;  %742 = vmatprep.subr.bf16.mxu0 %v842_v1 }
  0x15   : > { %758 = vmatprep.subr.bf16.mxu1 %v842_v1  ;;  %v205_v15 = vrot.slane %v203_v13, 1  ;;  %v379_v30 = vrot.slane %v201_v14, 1  ;;  %v380_v31 = vrot.slane %v203_v13, 2 }
  0x17   : > { %743 = vmatpush3.bf16.msra.mxu0 %v816_v11  ;;  %v206_v18 = vor.u32 %v205_v15, %v201_v14  ;;  %v381_v35 = vor.u32 %v380_v31, %v379_v30 }
  0x18   : > { %759 = vmatpush3.bf16.msra.mxu1 %v817_v12  ;;  %744 = vmatprep.subr.bf16.mxu0 %v842_v1 }
  0x19   : > { %760 = vmatprep.subr.bf16.mxu1 %v842_v1 }
  0x1b   : > { %745 = vmatpush3.bf16.msra.mxu0 %v818_v16 }
  0x1c   : > { %761 = vmatpush3.bf16.msra.mxu1 %v819_v17  ;;  %766 = vmatprep.subr.bf16.mxu0 %v842_v1 }
  0x1d   : > { %782 = vmatprep.subr.bf16.mxu1 %v842_v1 }
  0x1e   : > { %747 = vmatmul.mubr.msk.bf16.vlgmr.msra.gmra.mrb[0].mxu0 %vm243_vm1, %v206_v18 }
  0x1f   : > { %763 = vmatmul.mubr.msk.bf16.vlgmr.msra.gmra.mrb[0].mxu1 %vm243_vm1, %v917_v9  ;;  %767 = vmatpush3.bf16.msra.mxu0 %v821_v19 }
  0x20   : > { %783 = vmatpush3.bf16.msra.mxu1 %v822_v20  ;;  %768 = vmatprep.subr.bf16.mxu0 %v842_v1 }
  0x21   : > { %784 = vmatprep.subr.bf16.mxu1 %v842_v1  ;;  %778 = vmatprep.mubr.msk.bf16.mxu0 %vm843_vm0, %v842_v1 }
  0x22   : > { %794 = vmatprep.mubr.msk.bf16.mxu1 %vm843_vm0, %v842_v1 }
  0x23   : > { %769 = vmatpush3.bf16.msra.mxu0 %v823_v21 }
  0x24   : > { %785 = vmatpush3.bf16.msra.mxu1 %v824_v22  ;;  %770 = vmatprep.subr.bf16.mxu0 %v842_v1 }
  0x25   : > { %786 = vmatprep.subr.bf16.mxu1 %v842_v1 }
  0x27   : > { %771 = vmatpush3.bf16.msra.mxu0 %v825_v23 }
  0x28   : > { %787 = vmatpush3.bf16.msra.mxu1 %v826_v24  ;;  %772 = vmatprep.subr.bf16.mxu0 %v842_v1 }
  0x29   : > { %788 = vmatprep.subr.bf16.mxu1 %v842_v1 }
  0x2b   : > { %773 = vmatpush3.bf16.msra.mxu0 %v827_v25 }
  0x2c   : > { %789 = vmatpush3.bf16.msra.mxu1 %v828_v26  ;;  %774 = vmatprep.subr.bf16.mxu0 %v842_v1 }
  0x2d   : > { %790 = vmatprep.subr.bf16.mxu1 %v842_v1 }
  0x2f   : > { %775 = vmatpush3.bf16.msra.mxu0 %v829_v27 }
  0x30   : > { %791 = vmatpush3.bf16.msra.mxu1 %v830_v28  ;;  %776 = vmatprep.subr.bf16.mxu0 %v842_v1 }
  0x31   : > { %792 = vmatprep.subr.bf16.mxu1 %v842_v1 }
  0x33   : > { %777 = vmatpush3.bf16.msra.mxu0 %v831_v32 }
  0x34   : > { %793 = vmatpush3.bf16.msra.mxu1 %v832_v34 }
  0x36   : > { %779 = vmatmul.mubr.msk.bf16.vlgmr.msra.gmra.mrb[4].mxu0 %vm243_vm1, %v381_v35 }
  0x37   : > { %795 = vmatmul.mubr.msk.bf16.vlgmr.msra.gmra.mrb[4].mxu1 %vm243_vm1, %v478_v36 }
  0xf1   : > { %v281_v37 = vpop.f32.mrb[0].mxu0 }
  0xf2   : > { %v360_v38 = vpop.f32.mrb[0].mxu1  ;;  %v748_v39 = vpop.f32.mrb[1].mxu0 }
  0xf3   : > { %v361_v40 = vadd.f32 %v360_v38, %v281_v37  ;;  %v764_v41 = vpop.f32.mrb[1].mxu1  ;;  %v284_v42 = vpop.f32.mrb[2].mxu0 }
  0xf4   : > { %v363_v43 = vpop.f32.mrb[2].mxu1  ;;  %v749_v44 = vpop.f32.mrb[3].mxu0 }
  0xf5   : > { %v765_v45 = vpop.f32.mrb[3].mxu1 }
 0x109   : > { %v455_v46 = vpop.f32.mrb[4].mxu0 }
 0x10a   : > { %v461_v47 = vadd.f32 %v455_v46, %v361_v40  ;;  %v552_v48 = vpop.f32.mrb[4].mxu1  ;;  %v780_v49 = vpop.f32.mrb[5].mxu0 }
 0x10b   : > { %v796_v51 = vpop.f32.mrb[5].mxu1  ;;  %v458_v52 = vpop.f32.mrb[6].mxu0 }
 0x10c   : > { %v558_v53 = vadd.f32 %v552_v48, %v461_v47  ;;  %v555_v54 = vpop.f32.mrb[6].mxu1  ;;  %v781_v55 = vpop.f32.mrb[7].mxu0 }
 0x10d   : > { %v797_v56 = vpop.f32.mrb[7].mxu1 }
 0x10e   : > { %v566_v57 = vadd.f32 %v702_v50, %v558_v53 }
 0x110   : > { %v567_v58 = vmax.f32 %v566_v57, 0.0 }
 0x112   : > { %v568_v60 = vpack.c.bf16 %v567_v58, %v567_v58 }
 0x114   : > { %v573_v61 = vsel %vm571_vm4, %v568_v60, %v572_v59 }
 0x115   : > { %574 = vst [vmem:[%s168_s21] sm:$0x7] %v573_v61 }
 0x116 PF: > { %s13_s12 = sadd.s32 1, %s840_s12  }
 0x117   : > { %p10_p4 = scmp.ge.s32.totalorder %s13_s12, 4  }
 0x119   :  { %12 = sbr.rel (!%p10_p4) target bundleno = 1 (0x1), region = 65 }

// kernel: _lambda_.20
= control target key start
LH: loop header
LB: loop body
LE: loop exit
PB: predicated region body
PF: predicated region fallthrough
CT: control target
= control target key end

     0   :  { %s938_s12 = smov 0   ;;  %s1106_s0 = inlined_call_operand.vmem [shape: bf16[2,4,128], index: 0, kind: input, shape index: {}]   ;;  %s1107_s1 = inlined_call_operand.vmem [shape: bf16[4,128,40], index: 1, kind: input, shape index: {}]   ;;  %s1108_s2 = inlined_call_operand.vmem [shape: f32[1,40], index: 2, kind: input, shape index: {}]   ;;  %s1109_s3 = inlined_call_operand.vmem [shape: bf16[2,1,40], index: 3, kind: output, shape index: {}]  }
   0x1 LB: > { %s660_s13 = sadd.s32 4294967295, %s913_s12   ;;  %p664_p0 = scmp.ge.s32.totalorder %s913_s12, 1  ;;  %s913_s12 = sphi %s938_s12, %s13_s12  }
   0x2   : > { %p136_p1 = scmp.lt.s32.totalorder %s913_s12, 3 }
   0x4   : > { %p137_p2 = pnand %p664_p0, %p136_p1 }
   0x5   : > { %v875_v0 = vld [vmem:[%s1107_s1 + $0x40] sm:$0xff] (!%p137_p2)   ;;  %v915_v1 = vmov (!%p137_p2), 0.0   ;;  %v877_v3 = vld [vmem:[%s1107_s1 + $0x48] sm:$0xff] (!%p137_p2)   ;;  %vm916_vm0 = vmmov (!%p137_p2), 0   ;;  %v879_v5 = vld [vmem:[%s1107_s1 + $0x50] sm:$0xff] (!%p137_p2)   ;;  %p157_p3 = scmp.lt.s32.totalorder (!%p137_p2), %s660_s13, 1  ;;  %v203_v9 = vlaneseq (!%p137_p2) }
   0x6   : > { %140 = sbr.rel (%p137_p2) target bundleno = 294 (0x126), region = 32  ;;  %784 = vmatprep.subr.bf16.mxu0 (!%p137_p2), %v915_v1  ;;  %804 = vmatprep.subr.bf16.mxu1 (!%p137_p2), %v915_v1  ;;  %v876_v2 = vld [vmem:[%s1107_s1] sm:$0xff] (!%p137_p2)   ;;  %v878_v4 = vld [vmem:[%s1107_s1 + $0x8] sm:$0xff] (!%p137_p2)   ;;  %v880_v6 = vld [vmem:[%s1107_s1 + $0x10] sm:$0xff] (!%p137_p2)   ;;  %v917_v12 = vmov (!%p137_p2), 1983009808  }
   0x7   : > { %785 = vmatpush3.bf16.msra.mxu0 (!%p137_p2), %v875_v0  ;;  %800 = vmatprep.mubr.msk.bf16.mxu0 (!%p137_p2), %vm916_vm0, %v915_v1  ;;  %v881_v7 = vld [vmem:[%s1107_s1 + $0x58] sm:$0xff] (!%p137_p2)   ;;  %v883_v10 = vld [vmem:[%s1107_s1 + $0x60] sm:$0xff] (!%p137_p2)   ;;  %v201_v13 = vunpack.c.l.s4 (!%p137_p2), %v917_v12  ;;  %v204_v14 = vshrl.u32 (!%p137_p2), %v203_v9, 7  ;;  %v885_v15 = vld [vmem:[%s1107_s1 + $0x68] sm:$0xff] (!%p137_p2)   ;;  %vm607_vm1 = vcmask (!%p137_p2), 319488  }
   0x8   : > { %805 = vmatpush3.bf16.msra.mxu1 (!%p137_p2), %v876_v2  ;;  %786 = vmatprep.subr.bf16.mxu0 (!%p137_p2), %v915_v1  ;;  %v882_v8 = vld [vmem:[%s1107_s1 + $0x18] sm:$0xff] (!%p137_p2)   ;;  %v884_v11 = vld [vmem:[%s1107_s1 + $0x20] sm:$0xff] (!%p137_p2)   ;;  %v886_v16 = vld [vmem:[%s1107_s1 + $0x28] sm:$0xff] (!%p137_p2)   ;;  %vm608_vm2 = vsmask.f32 (!%p137_p2), 256 }
   0x9   : > { %806 = vmatprep.subr.bf16.mxu1 (!%p137_p2), %v915_v1  ;;  %820 = vmatprep.mubr.msk.bf16.mxu1 (!%p137_p2), %vm916_vm0, %v915_v1  ;;  %v202_v17 = vunpack.c.0.s8 (!%p137_p2), %v201_v13  ;;  %v887_v18 = vld [vmem:[%s1107_s1 + $0x70] sm:$0xff] (!%p137_p2)   ;;  %v889_v23 = vld [vmem:[%s1107_s1 + $0x78] sm:$0xff] (!%p137_p2)   ;;  %v891_v26 = vld [vmem:[%s1107_s1 + $0x80] sm:$0xff] (!%p137_p2)  }
   0xa   : > { %v888_v21 = vld [vmem:[%s1107_s1 + $0x30] sm:$0xff] (!%p137_p2)   ;;  %v890_v24 = vld [vmem:[%s1107_s1 + $0x38] sm:$0xff] (!%p137_p2)   ;;  %v892_v27 = vld [vmem:[%s1107_s1 + $0xc0] sm:$0xff] (!%p137_p2)  }
   0xb   : > { %787 = vmatpush3.bf16.msra.mxu0 (!%p137_p2), %v877_v3  ;;  %v205_v19 = vsub.s32 (!%p137_p2), %v202_v17, %v204_v14  ;;  %v893_v28 = vld [vmem:[%s1107_s1 + $0x88] sm:$0xff] (!%p137_p2)   ;;  %v895_v30 = vld [vmem:[%s1107_s1 + $0x90] sm:$0xff] (!%p137_p2)   ;;  %v897_v32 = vld [vmem:[%s1107_s1 + $0x98] sm:$0xff] (!%p137_p2)  }
   0xc   : > { %807 = vmatpush3.bf16.msra.mxu1 (!%p137_p2), %v878_v4  ;;  %788 = vmatprep.subr.bf16.mxu0 (!%p137_p2), %v915_v1  ;;  %v894_v29 = vld [vmem:[%s1107_s1 + $0xc8] sm:$0xff] (!%p137_p2)   ;;  %v896_v31 = vld [vmem:[%s1107_s1 + $0xd0] sm:$0xff] (!%p137_p2)   ;;  %v898_v33 = vld [vmem:[%s1107_s1 + $0xd8] sm:$0xff] (!%p137_p2)  }
   0xd   : > { %808 = vmatprep.subr.bf16.mxu1 %v915_v1  ;;  %s1111_s13 = smov (!%p157_p3, %s660_s13), 1  ;;  %v899_v34 = vld [vmem:[%s1107_s1 + $0xa0] sm:$0xff]   ;;  %v901_v36 = vld [vmem:[%s1107_s1 + $0xa8] sm:$0xff]   ;;  %v903_v38 = vld [vmem:[%s1107_s1 + $0xb0] sm:$0xff]  }
   0xe   : > { %s665_s7 = sshll.u32 %s1111_s13, 1  ;;  %v900_v35 = vld [vmem:[%s1107_s1 + $0xe0] sm:$0xff]   ;;  %v902_v37 = vld [vmem:[%s1107_s1 + $0xe8] sm:$0xff]   ;;  %v904_v39 = vld [vmem:[%s1107_s1 + $0xf0] sm:$0xff]   ;;  %s163_s9 = scalar_lea.vmem %s1109_s3, %s1111_s13 }
   0xf   : > { %789 = vmatpush3.bf16.msra.mxu0 %v879_v5  ;;  %s160_s16 = scalar_lea.vmem %s1106_s0, %s665_s7  ;;  %v905_v40 = vld [vmem:[%s1107_s1 + $0xb8] sm:$0xff]   ;;  %v603_v57 = vld [vmem:[%s1108_s2] sm:$0x1]  ;;  %vm609_vm3 = vmand %vm607_vm1, %vm608_vm2 }
  0x10   : > { %809 = vmatpush3.bf16.msra.mxu1 %v880_v6  ;;  %790 = vmatprep.subr.bf16.mxu0 %v915_v1  ;;  %v165_v20 = vld [vmem:[%s160_s16] sm:$0x3]  ;;  %v906_v41 = vld [vmem:[%s1107_s1 + $0xf8] sm:$0xff]  }
  0x11   : > { %810 = vmatprep.subr.bf16.mxu1 %v915_v1  ;;  %v1016_v22 = vrot.slane %v165_v20, %v205_v19  ;;  %v610_v2 = vld [vmem:[%s163_s9] sm:$0x1] }
  0x13   : > { %791 = vmatpush3.bf16.msra.mxu0 %v881_v7  ;;  %v208_v25 = vshrl.u32 %v1016_v22, 16  ;;  %v404_v42 = vrot.slane %v1016_v22, 1 }
  0x14   : > { %811 = vmatpush3.bf16.msra.mxu1 %v882_v8  ;;  %792 = vmatprep.subr.bf16.mxu0 %v915_v1 }
  0x15   : > { %812 = vmatprep.subr.bf16.mxu1 %v915_v1  ;;  %v512_v43 = vrot.slane %v208_v25, 1 }
  0x17   : > { %793 = vmatpush3.bf16.msra.mxu0 %v883_v10 }
  0x18   : > { %813 = vmatpush3.bf16.msra.mxu1 %v884_v11  ;;  %794 = vmatprep.subr.bf16.mxu0 %v915_v1 }
  0x19   : > { %814 = vmatprep.subr.bf16.mxu1 %v915_v1 }
  0x1b   : > { %795 = vmatpush3.bf16.msra.mxu0 %v885_v15 }
  0x1c   : > { %815 = vmatpush3.bf16.msra.mxu1 %v886_v16  ;;  %796 = vmatprep.subr.bf16.mxu0 %v915_v1 }
  0x1d   : > { %816 = vmatprep.subr.bf16.mxu1 %v915_v1 }
  0x1f   : > { %797 = vmatpush3.bf16.msra.mxu0 %v887_v18 }
  0x20   : > { %817 = vmatpush3.bf16.msra.mxu1 %v888_v21  ;;  %798 = vmatprep.subr.bf16.mxu0 %v915_v1 }
  0x21   : > { %818 = vmatprep.subr.bf16.mxu1 %v915_v1 }
  0x23   : > { %799 = vmatpush3.bf16.msra.mxu0 %v889_v23 }
  0x24   : > { %819 = vmatpush3.bf16.msra.mxu1 %v890_v24  ;;  %824 = vmatprep.subr.bf16.mxu0 %v915_v1 }
  0x25   : > { %844 = vmatprep.subr.bf16.mxu1 %v915_v1 }
  0x26   : > { %801 = vmatmul.mubr.bf16.vlgmr.msra.gmra.mrb[0].mxu0 %v208_v25 }
  0x27   : > { %821 = vmatmul.mubr.bf16.vlgmr.msra.gmra.mrb[0].mxu1 %v165_v20  ;;  %825 = vmatpush3.bf16.msra.mxu0 %v891_v26 }
  0x28   : > { %845 = vmatpush3.bf16.msra.mxu1 %v892_v27  ;;  %826 = vmatprep.subr.bf16.mxu0 %v915_v1 }
  0x29   : > { %846 = vmatprep.subr.bf16.mxu1 %v915_v1  ;;  %840 = vmatprep.mubr.msk.bf16.mxu0 %vm916_vm0, %v915_v1 }
  0x2a   : > { %860 = vmatprep.mubr.msk.bf16.mxu1 %vm916_vm0, %v915_v1 }
  0x2b   : > { %827 = vmatpush3.bf16.msra.mxu0 %v893_v28 }
  0x2c   : > { %847 = vmatpush3.bf16.msra.mxu1 %v894_v29  ;;  %828 = vmatprep.subr.bf16.mxu0 %v915_v1 }
  0x2d   : > { %848 = vmatprep.subr.bf16.mxu1 %v915_v1 }
  0x2f   : > { %829 = vmatpush3.bf16.msra.mxu0 %v895_v30 }
  0x30   : > { %849 = vmatpush3.bf16.msra.mxu1 %v896_v31  ;;  %830 = vmatprep.subr.bf16.mxu0 %v915_v1 }
  0x31   : > { %850 = vmatprep.subr.bf16.mxu1 %v915_v1 }
  0x33   : > { %831 = vmatpush3.bf16.msra.mxu0 %v897_v32 }
  0x34   : > { %851 = vmatpush3.bf16.msra.mxu1 %v898_v33  ;;  %832 = vmatprep.subr.bf16.mxu0 %v915_v1 }
  0x35   : > { %852 = vmatprep.subr.bf16.mxu1 %v915_v1 }
  0x37   : > { %833 = vmatpush3.bf16.msra.mxu0 %v899_v34 }
  0x38   : > { %853 = vmatpush3.bf16.msra.mxu1 %v900_v35  ;;  %834 = vmatprep.subr.bf16.mxu0 %v915_v1 }
  0x39   : > { %854 = vmatprep.subr.bf16.mxu1 %v915_v1 }
  0x3b   : > { %835 = vmatpush3.bf16.msra.mxu0 %v901_v36 }
  0x3c   : > { %855 = vmatpush3.bf16.msra.mxu1 %v902_v37  ;;  %836 = vmatprep.subr.bf16.mxu0 %v915_v1 }
  0x3d   : > { %856 = vmatprep.subr.bf16.mxu1 %v915_v1 }
  0x3f   : > { %837 = vmatpush3.bf16.msra.mxu0 %v903_v38 }
  0x40   : > { %857 = vmatpush3.bf16.msra.mxu1 %v904_v39  ;;  %838 = vmatprep.subr.bf16.mxu0 %v915_v1 }
  0x41   : > { %858 = vmatprep.subr.bf16.mxu1 %v915_v1 }
  0x43   : > { %839 = vmatpush3.bf16.msra.mxu0 %v905_v40 }
  0x44   : > { %859 = vmatpush3.bf16.msra.mxu1 %v906_v41 }
  0x46   : > { %841 = vmatmul.mubr.bf16.vlgmr.msra.gmra.mrb[4].mxu0 %v404_v42 }
  0x47   : > { %861 = vmatmul.mubr.bf16.vlgmr.msra.gmra.mrb[4].mxu1 %v512_v43 }
  0xf9   : > { %v293_v44 = vpop.f32.mrb[0].mxu0 }
  0xfa   : > { %v381_v45 = vpop.f32.mrb[0].mxu1  ;;  %v802_v46 = vpop.f32.mrb[1].mxu0 }
  0xfb   : > { %v382_v47 = vadd.f32 %v381_v45, %v293_v44  ;;  %v822_v48 = vpop.f32.mrb[1].mxu1  ;;  %v296_v49 = vpop.f32.mrb[2].mxu0 }
  0xfc   : > { %v384_v50 = vpop.f32.mrb[2].mxu1  ;;  %v803_v51 = vpop.f32.mrb[3].mxu0 }
  0xfd   : > { %v823_v52 = vpop.f32.mrb[3].mxu1 }
 0x119   : > { %v488_v53 = vpop.f32.mrb[4].mxu0 }
 0x11a   : > { %v494_v54 = vadd.f32 %v488_v53, %v382_v47  ;;  %v596_v55 = vpop.f32.mrb[4].mxu1  ;;  %v842_v56 = vpop.f32.mrb[5].mxu0 }
 0x11b   : > { %v862_v58 = vpop.f32.mrb[5].mxu1  ;;  %v491_v59 = vpop.f32.mrb[6].mxu0 }
 0x11c   : > { %v602_v60 = vadd.f32 %v596_v55, %v494_v54  ;;  %v599_v61 = vpop.f32.mrb[6].mxu1  ;;  %v843_v62 = vpop.f32.mrb[7].mxu0 }
 0x11d   : > { %v863_v63 = vpop.f32.mrb[7].mxu1 }
 0x11e   : > { %v604_v0 = vadd.f32 %v603_v57, %v602_v60 }
 0x120   : > { %v605_v1 = vmax.f32 %v604_v0, 0.0 }
 0x122   : > { %v606_v3 = vpack.c.bf16 %v605_v1, %v605_v1 }
 0x124   : > { %v611_v4 = vsel %vm609_vm3, %v606_v3, %v610_v2 }
 0x125   : > { %612 = vst [vmem:[%s163_s9] sm:$0x1] %v611_v4 }
 0x126 PF: > { %s13_s12 = sadd.s32 1, %s913_s12  }
 0x127   : > { %p10_p4 = scmp.ge.s32.totalorder %s13_s12, 4  }
 0x129   :  { %12 = sbr.rel (!%p10_p4) target bundleno = 1 (0x1), region = 65 }

// kernel: _lambda_.21
= control target key start
LH: loop header
LB: loop body
LE: loop exit
PB: predicated region body
PF: predicated region fallthrough
CT: control target
= control target key end

     0   :  { %v122_v0 = vmov 0.0   ;;  %vm123_vm0 = vmmov 0   ;;  %vm47_vm1 = vcmask 1043456   ;;  %vm43_vm2 = vcmask 326656   ;;  %s162_s1 = inlined_call_operand.vmem [shape: bf16[40,32], index: 1, kind: input, shape index: {}]   ;;  %s163_s0 = inlined_call_operand.vmem [shape: bf16[2,40], index: 0, kind: input, shape index: {}]   ;;  %s164_s2 = inlined_call_operand.vmem [shape: f32[1,32], index: 2, kind: input, shape index: {}]   ;;  %s165_s3 = inlined_call_operand.vmem [shape: bf16[2,32], index: 3, kind: output, shape index: {}]  }
   0x1   :  { %107 = vmatprep.subr.bf16.mxu0 %v122_v0  ;;  %v119_v1 = vld [vmem:[%s162_s1] sm:$0xff]   ;;  %113 = vmatprep.mubr.msk.bf16.mxu0 %vm123_vm0, %v122_v0  ;;  %v120_v2 = vld [vmem:[%s162_s1 + $0x8] sm:$0xff]   ;;  %v121_v3 = vld [vmem:[%s162_s1 + $0x10] ss:$0 sps:$4 sm:$0xff]   ;;  %vm92_vm3 = vcmask 253952  }
   0x2   :  { %108 = vmatpush3.bf16.msra.mxu0 %v119_v1  ;;  %v49_v4 = vsel %vm47_vm1, %v121_v3, 0  ;;  %v15_v5 = vld [vmem:[%s163_s0] sm:$0x1] }
   0x3   :  { %109 = vmatprep.subr.bf16.mxu0 %v122_v0  ;;  %v98_v6 = vld [vmem:[%s164_s2] ss:$0 sm:$0xff] }
   0x6   :  { %110 = vmatpush3.bf16.msra.mxu0 %v120_v2 }
   0x7   :  { %111 = vmatprep.subr.bf16.mxu0 %v122_v0 }
   0xa   :  { %112 = vmatpush3.bf16.msra.mxu0 %v49_v4 }
   0xd   :  { %114 = vmatmul.mubr.msk.bf16.vlgmr.msra.gmra.mrb[0].mxu0 %vm43_vm2, %v15_v5 }
  0xe0   :  { %v85_v7 = vpop.f32.mrb[0].mxu0 }
  0xe1   :  { %v86_v8 = vadd.f32 %v98_v6, %v85_v7  ;;  %v115_v9 = vpop.f32.mrb[1].mxu0 }
  0xe2   :  { %v88_v10 = vpop.f32.mrb[2].mxu0 }
  0xe3   :  { %v91_v11 = vpack.c.bf16 %v86_v8, %v86_v8  ;;  %v116_v12 = vpop.f32.mrb[3].mxu0 }
  0xe5   :  { %93 = vst.msk [vmem:[%s165_s3] sm:$0x1] %vm92_vm3, %v91_v11 }

// kernel: _lambda_.22
= control target key start
LH: loop header
LB: loop body
LE: loop exit
PB: predicated region body
PF: predicated region fallthrough
CT: control target
= control target key end

     0   :  { %v109_v0 = vmov 0.0   ;;  %vm110_vm0 = vmmov 0   ;;  %vm39_vm1 = vcmask 261120   ;;  %vm84_vm2 = vcmask 257024   ;;  %s146_s1 = inlined_call_operand.vmem [shape: bf16[32,32], index: 1, kind: input, shape index: {}]   ;;  %s147_s0 = inlined_call_operand.vmem [shape: bf16[8,32], index: 0, kind: input, shape index: {}]   ;;  %s148_s2 = inlined_call_operand.vmem [shape: f32[1,32], index: 2, kind: input, shape index: {}]   ;;  %s149_s3 = inlined_call_operand.vmem [shape: bf16[8,32], index: 3, kind: output, shape index: {}]  }
   0x1   :  { %97 = vmatprep.subr.bf16.mxu0 %v109_v0  ;;  %v107_v1 = vld [vmem:[%s146_s1] sm:$0xff]   ;;  %101 = vmatprep.mubr.msk.bf16.mxu0 %vm110_vm0, %v109_v0  ;;  %v108_v2 = vld [vmem:[%s146_s1 + $0x8] sm:$0xff]  }
   0x2   :  { %98 = vmatpush3.bf16.msra.mxu0 %v107_v1  ;;  %v15_v3 = vld [vmem:[%s147_s0] sm:$0xf] }
   0x3   :  { %99 = vmatprep.subr.bf16.mxu0 %v109_v0  ;;  %v90_v4 = vld [vmem:[%s148_s2] ss:$0 sm:$0xff] }
   0x6   :  { %100 = vmatpush3.bf16.msra.mxu0 %v108_v2 }
   0x9   :  { %102 = vmatmul.mubr.msk.bf16.vlgmr.msra.gmra.mrb[0].mxu0 %vm39_vm1, %v15_v3 }
  0xdc   :  { %v77_v5 = vpop.f32.mrb[0].mxu0 }
  0xdd   :  { %v78_v6 = vadd.f32 %v90_v4, %v77_v5  ;;  %v103_v7 = vpop.f32.mrb[1].mxu0 }
  0xde   :  { %v80_v8 = vpop.f32.mrb[2].mxu0 }
  0xdf   :  { %v83_v9 = vpack.c.bf16 %v78_v6, %v78_v6  ;;  %v104_v10 = vpop.f32.mrb[3].mxu0 }
  0xe1   :  { %85 = vst.msk [vmem:[%s149_s3] sm:$0xf] %vm84_vm2, %v83_v9 }

// kernel: _lambda_.23
= control target key start
LH: loop header
LB: loop body
LE: loop exit
PB: predicated region body
PF: predicated region fallthrough
CT: control target
= control target key end

     0   :  { %s391_s12 = smov 0   ;;  %s417_s0 = inlined_call_operand.vmem [shape: bf16[32,24], index: 0, kind: input, shape index: {}]   ;;  %s418_s1 = inlined_call_operand.vmem [shape: bf16[24,32], index: 1, kind: input, shape index: {}]   ;;  %s419_s2 = inlined_call_operand.vmem [shape: f32[1,32], index: 2, kind: input, shape index: {}]   ;;  %s420_s3 = inlined_call_operand.vmem [shape: bf16[32,32], index: 3, kind: output, shape index: {}]  }
   0x1 LB: > { %s317_s13 = sadd.s32 4294967295, %s367_s12   ;;  %p321_p0 = scmp.ge.s32.totalorder %s367_s12, 1  ;;  %s367_s12 = sphi %s391_s12, %s13_s12  }
   0x2   : > { %p138_p1 = scmp.lt.s32.totalorder %s367_s12, 3 }
   0x4   : > { %p139_p2 = pnand %p321_p0, %p138_p1 }
   0x5   : > { %v358_v0 = vld [vmem:[%s418_s1] sm:$0xff] (!%p139_p2)   ;;  %v369_v1 = vmov (!%p139_p2), 0.0   ;;  %v359_v2 = vld [vmem:[%s418_s1 + $0x8] ss:$0 sps:$4 sm:$0xff] (!%p139_p2)   ;;  %vm205_vm0 = vcmask (!%p139_p2), 1043456   ;;  %vm370_vm1 = vmmov (!%p139_p2), 0  }
   0x6   : > { %142 = sbr.rel (%p139_p2) target bundleno = 236 (0xec), region = 32  ;;  %340 = vmatprep.subr.bf16.mxu0 (!%p139_p2), %v369_v1  ;;  %344 = vmatprep.mubr.msk.bf16.mxu0 (!%p139_p2), %vm370_vm1, %v369_v1  ;;  %s322_s18 = sshll.u32 (!%p139_p2), %s317_s13, 1  ;;  %v207_v3 = vsel (!%p139_p2), %vm205_vm0, %v359_v2, 0  ;;  %vm201_vm2 = vcmask (!%p139_p2), 195584   ;;  %v326_v5 = vld [vmem:[%s419_s2] ss:$0 sm:$0xff] (!%p139_p2) }
   0x7   : > { %341 = vmatpush3.bf16.msra.mxu0 (!%p139_p2), %v358_v0  ;;  %p163_p3 = scmp.lt.s32.totalorder (!%p139_p2), %s322_s18, 3  ;;  %vm258_vm3 = vcmask (!%p139_p2), 257024  }
   0x8   : > { %342 = vmatprep.subr.bf16.mxu0 (!%p139_p2), %v369_v1 }
   0xb   : > { %343 = vmatpush3.bf16.msra.mxu0 (!%p139_p2), %v207_v3 }
   0xd   : > { %s422_s18 = smov (!%p163_p3, %s322_s18), 3 }
   0xe   : > { %s323_s19 = sshll.u32 %s422_s18, 2 }
   0xf   : > { %s166_s22 = scalar_lea.vmem %s417_s0, %s323_s19  ;;  %s172_s27 = scalar_lea.vmem %s420_s3, %s323_s19 }
  0x10   : > { %v360_v4 = vld [vmem:[%s166_s22] sm:$0xff]  }
  0x11   : > { %345 = vmatmul.mubr.msk.bf16.vlgmr.msra.gmra.mrb[0].mxu0 %vm201_vm2, %v360_v4 }
  0xe4   : > { %v243_v6 = vpop.f32.mrb[0].mxu0 }
  0xe5   : > { %v244_v7 = vadd.f32 %v326_v5, %v243_v6  ;;  %v346_v8 = vpop.f32.mrb[1].mxu0 }
  0xe6   : > { %v246_v9 = vpop.f32.mrb[2].mxu0 }
  0xe7   : > { %v335_v10 = vpack.c.bf16 %v244_v7, %v244_v7  ;;  %v247_v11 = vadd.f32 %v326_v5, %v246_v9  ;;  %v347_v12 = vpop.f32.mrb[3].mxu0 }
  0xe9   : > { %259 = vst.msk [vmem:[%s172_s27] sm:$0xf] %vm258_vm3, %v335_v10  ;;  %v336_v13 = vpack.c.bf16 %v247_v11, %v247_v11 }
  0xeb   : > { %260 = vst.msk [vmem:[%s172_s27 + $0x4] sm:$0xf] %vm258_vm3, %v336_v13 }
  0xec PF: > { %s13_s12 = sadd.s32 1, %s367_s12  }
  0xed   : > { %p10_p4 = scmp.ge.s32.totalorder %s13_s12, 4  }
  0xef   :  { %12 = sbr.rel (!%p10_p4) target bundleno = 1 (0x1), region = 62 }

// kernel: _lambda_.24
= control target key start
LH: loop header
LB: loop body
LE: loop exit
PB: predicated region body
PF: predicated region fallthrough
CT: control target
= control target key end

     0   :  { %s488_s12 = smov 0   ;;  %s519_s0 = inlined_call_operand.vmem [shape: bf16[128,16], index: 0, kind: input, shape index: {}]   ;;  %s520_s1 = inlined_call_operand.vmem [shape: bf16[16,32], index: 1, kind: input, shape index: {}]   ;;  %s521_s2 = inlined_call_operand.vmem [shape: f32[1,32], index: 2, kind: input, shape index: {}]   ;;  %s522_s3 = inlined_call_operand.vmem [shape: bf16[128,32], index: 3, kind: output, shape index: {}]  }
   0x1 LB: > { %s393_s13 = sadd.s32 4294967295, %s466_s12   ;;  %p397_p0 = scmp.ge.s32.totalorder %s466_s12, 1  ;;  %s466_s12 = sphi %s488_s12, %s13_s12  }
   0x2   : > { %p138_p1 = scmp.lt.s32.totalorder %s466_s12, 3 }
   0x4   : > { %p139_p2 = pnand %p397_p0, %p138_p1 }
   0x5   : > { %v455_v0 = vld [vmem:[%s520_s1] sm:$0xff] (!%p139_p2)   ;;  %s398_s16 = sshll.u32 (!%p139_p2), %s393_s13, 3  ;;  %vm218_vm0 = vcmask (!%p139_p2), 130048   ;;  %vm328_vm1 = vcmask (!%p139_p2), 257024  }
   0x6   : > { %142 = sbr.rel (%p139_p2) target bundleno = 238 (0xee), region = 32  ;;  %p163_p3 = scmp.lt.s32.totalorder (!%p139_p2), %s398_s16, 15  ;;  %435 = vmatprep.subr.bf16.mxu0 (!%p139_p2), %v455_v0  ;;  %445 = vmatprep.subr.bf16.mxu1 (!%p139_p2), %v455_v0  ;;  %v402_v5 = vld [vmem:[%s521_s2] ss:$0 sm:$0xff] (!%p139_p2) }
   0x7   : > { %436 = vmatpush3.bf16.msra.mxu0 (!%p139_p2), %v455_v0  ;;  %446 = vmatpush3.bf16.msra.mxu1 (!%p139_p2), %v455_v0 }
   0xd   : > { %s524_s16 = smov (!%p163_p3, %s398_s16), 15 }
   0xe   : > { %s399_s17 = sshll.u32 %s524_s16, 2 }
   0xf   : > { %s166_s20 = scalar_lea.vmem %s519_s0, %s399_s17  ;;  %s172_s25 = scalar_lea.vmem %s522_s3, %s399_s17 }
  0x10   : > { %v456_v1 = vld [vmem:[%s166_s20] sm:$0xff]   ;;  %v457_v2 = vld [vmem:[%s166_s20 + $0x10] sm:$0xff]   ;;  %v458_v3 = vld [vmem:[%s166_s20 + $0x8] sm:$0xff]  }
  0x11   : > { %437 = vmatprep.mubr.msk.bf16.mxu0 %vm218_vm0, %v456_v1  ;;  %441 = vmatprep.mubr.msk.bf16.mxu1 %vm218_vm0, %v457_v2  ;;  %v459_v4 = vld [vmem:[%s166_s20 + $0x18] sm:$0xff]  }
  0x12   : > { %438 = vmatmul.mubr.msk.bf16.vlgmr.msra.gmra.mrb[0].mxu0 %vm218_vm0, %v458_v3  ;;  %442 = vmatmul.mubr.msk.bf16.vlgmr.msra.gmra.mrb[0].mxu1 %vm218_vm0, %v459_v4 }
  0xe5   : > { %v439_v6 = vpop.f32.mrb[0].mxu0  ;;  %v443_v8 = vpop.f32.mrb[0].mxu1 }
  0xe6   : > { %v274_v7 = vadd.f32 %v439_v6, %v402_v5  ;;  %v265_v9 = vpop.f32.mrb[1].mxu0  ;;  %v290_v10 = vadd.f32 %v443_v8, %v402_v5  ;;  %v281_v12 = vpop.f32.mrb[1].mxu1 }
  0xe7   : > { %v266_v11 = vadd.f32 %v402_v5, %v265_v9  ;;  %v440_v13 = vpop.f32.mrb[2].mxu0  ;;  %v282_v15 = vadd.f32 %v402_v5, %v281_v12  ;;  %v444_v17 = vpop.f32.mrb[2].mxu1 }
  0xe8   : > { %v424_v14 = vpack.c.bf16 %v274_v7, %v274_v7  ;;  %v277_v16 = vadd.f32 %v440_v13, %v402_v5  ;;  %v268_v18 = vpop.f32.mrb[3].mxu0  ;;  %v428_v19 = vpack.c.bf16 %v290_v10, %v290_v10  ;;  %v293_v21 = vadd.f32 %v444_v17, %v402_v5  ;;  %v284_v23 = vpop.f32.mrb[3].mxu1 }
  0xe9   : > { %v422_v20 = vpack.c.bf16 %v266_v11, %v266_v11  ;;  %v269_v22 = vadd.f32 %v402_v5, %v268_v18  ;;  %v426_v24 = vpack.c.bf16 %v282_v15, %v282_v15  ;;  %v285_v26 = vadd.f32 %v402_v5, %v284_v23 }
  0xea   : > { %331 = vst.msk [vmem:[%s172_s25 + $0x8] sm:$0xf] %vm328_vm1, %v424_v14  ;;  %v425_v25 = vpack.c.bf16 %v277_v16, %v277_v16  ;;  %335 = vst.msk [vmem:[%s172_s25 + $0x18] sm:$0xf] %vm328_vm1, %v428_v19  ;;  %v429_v27 = vpack.c.bf16 %v293_v21, %v293_v21 }
  0xeb   : > { %329 = vst.msk [vmem:[%s172_s25] sm:$0xf] %vm328_vm1, %v422_v20  ;;  %v423_v28 = vpack.c.bf16 %v269_v22, %v269_v22  ;;  %333 = vst.msk [vmem:[%s172_s25 + $0x10] sm:$0xf] %vm328_vm1, %v426_v24  ;;  %v427_v29 = vpack.c.bf16 %v285_v26, %v285_v26 }
  0xec   : > { %332 = vst.msk [vmem:[%s172_s25 + $0xc] sm:$0xf] %vm328_vm1, %v425_v25  ;;  %336 = vst.msk [vmem:[%s172_s25 + $0x1c] sm:$0xf] %vm328_vm1, %v429_v27 }
  0xed   : > { %330 = vst.msk [vmem:[%s172_s25 + $0x4] sm:$0xf] %vm328_vm1, %v423_v28  ;;  %334 = vst.msk [vmem:[%s172_s25 + $0x14] sm:$0xf] %vm328_vm1, %v427_v29 }
  0xee PF: > { %s13_s12 = sadd.s32 1, %s466_s12  }
  0xef   : > { %p10_p4 = scmp.ge.s32.totalorder %s13_s12, 4  }
  0xf1   :  { %12 = sbr.rel (!%p10_p4) target bundleno = 1 (0x1), region = 62 }

// kernel: _lambda_.25
= control target key start
LH: loop header
LB: loop body
LE: loop exit
PB: predicated region body
PF: predicated region fallthrough
CT: control target
= control target key end

     0   :  { %s2030_s12 = smov 0   ;;  %s2557_s0 = inlined_call_operand.vmem [shape: bf16[2,100,32], index: 0, kind: input, shape index: {}]   ;;  %s2558_s1 = inlined_call_operand.vmem [shape: bf16[9,32,8], index: 1, kind: input, shape index: {}]   ;;  %s2559_s2 = inlined_call_operand.vmem [shape: f32[1,8], index: 2, kind: input, shape index: {}]   ;;  %s2560_s3 = inlined_call_operand.vmem [shape: bf16[2,78,8], index: 3, kind: output, shape index: {}]  }
   0x1 LB: > { %s1536_s13 = sadd.s32 4294967295, %s2006_s12   ;;  %p1540_p0 = scmp.ge.s32.totalorder %s2006_s12, 1  ;;  %s2006_s12 = sphi %s2030_s12, %s13_s12  }
   0x2   : > { %p137_p1 = scmp.lt.s32.totalorder %s2006_s12, 3 }
   0x4   : > { %p138_p2 = pnand %p1540_p0, %p137_p1 }
   0x5   : > { %v1969_v0 = vld [vmem:[%s2558_s1 + $0x10] sm:$0xff] (!%p138_p2)   ;;  %v2008_v1 = vmov (!%p138_p2), 0.0   ;;  %v1970_v2 = vld [vmem:[%s2558_s1 + $0x18] sm:$0xff] (!%p138_p2)   ;;  %p161_p3 = scmp.lt.s32.totalorder (!%p138_p2), %s1536_s13, 1  ;;  %vm2009_vm0 = vmmov (!%p138_p2), 0   ;;  %vm271_vm2 = vcmask (!%p138_p2), 261120  }
   0x6   : > { %141 = sbr.rel (%p138_p2) target bundleno = 424 (0x1a8), region = 32  ;;  %1737 = vmatprep.subr.bf16.mxu0 (!%p138_p2), %v2008_v1  ;;  %1953 = vmatprep.subr.bf16.mxu1 (!%p138_p2), %v2008_v1  ;;  %vm219_vm1 = vsmask.f32 (!%p138_p2), 7424  ;;  %v1976_v29 = vld [vmem:[%s2558_s1 + $0x20] sm:$0xff] (!%p138_p2)   ;;  %v1979_v36 = vld [vmem:[%s2558_s1 + $0x28] sm:$0xff] (!%p138_p2)   ;;  %vm460_vm3 = vcmask (!%p138_p2), 1046528  }
   0x7   : > { %1738 = vmatpush3.bf16.msra.mxu0 (!%p138_p2), %v1969_v0  ;;  %1955 = vmatpush3.bf16.msra.mxu1 (!%p138_p2), %v1969_v0  ;;  %v1977_v33 = vld [vmem:[%s2558_s1] sm:$0xff] (!%p138_p2)   ;;  %v1980_v40 = vld [vmem:[%s2558_s1 + $0x8] sm:$0xff] (!%p138_p2)   ;;  %vm884_vm4 = vcmask (!%p138_p2), 1045504   ;;  %vm719_vm5 = vsmask.f32 (!%p138_p2), 6400  ;;  %vm1290_vm7 = vcmask (!%p138_p2), 1044480  }
   0x8   : > { %1739 = vmatprep.subr.bf16.mxu0 (!%p138_p2), %v2008_v1  ;;  %1954 = vmatprep.subr.bf16.mxu1 (!%p138_p2), %v2008_v1  ;;  %vm1141_vm6 = vsmask.f32 (!%p138_p2), 5376  ;;  %vm1469_vm8 = vcmask (!%p138_p2), 60416   ;;  %vm1479_vm9 = vcmask (!%p138_p2), 59392  }
   0x9   : > { %1741 = vmatprep.mubr.msk.bf16.mxu0 (!%p138_p2), %vm2009_vm0, %v2008_v1  ;;  %1753 = vmatprep.mubr.msk.bf16.mxu1 (!%p138_p2), %vm2009_vm0, %v2008_v1 }
   0xb   : > { %1740 = vmatpush3.bf16.msra.mxu0 (!%p138_p2), %v1970_v2  ;;  %1956 = vmatpush3.bf16.msra.mxu1 (!%p138_p2), %v1970_v2 }
   0xc   : > { %1785 = vmatprep.subr.bf16.mxu0 (!%p138_p2), %v2008_v1  ;;  %1761 = vmatprep.subr.bf16.mxu1 (!%p138_p2), %v2008_v1 }
   0xd   : > { %s2562_s13 = smov (!%p161_p3, %s1536_s13), 1 }
   0xe   : > { %s1957_s18 = smul.u32 52, %s2562_s13 }
  0x10   : > { %s2060_s21 = scalar_lea.vmem %s2557_s0, %s1957_s18 }
  0x11   : > { %v172_v3 = vld [vmem:[%s2060_s21] sm:$0xf]  ;;  %v2064_v4 = vld [vmem:[%s2060_s21 + $0x4] sm:$0xf]  ;;  %v2067_v5 = vld [vmem:[%s2060_s21 + $0x8] sm:$0xf] }
  0x12   : > { %v2070_v6 = vld [vmem:[%s2060_s21 + $0xc] sm:$0xf]  ;;  %v2073_v7 = vcombine.low %v172_v3, %v2064_v4  ;;  %v178_v8 = vld [vmem:[%s2060_s21 + $0x18] sm:$0xf]  ;;  %v179_v9 = vld [vmem:[%s2060_s21 + $0x1c] sm:$0xf] }
  0x13   : > { %v2079_v10 = vcombine.low %v2067_v5, %v2070_v6  ;;  %v180_v11 = vld [vmem:[%s2060_s21 + $0x20] sm:$0xf]  ;;  %v181_v12 = vld [vmem:[%s2060_s21 + $0x24] sm:$0xf]  ;;  %v2083_v13 = vcombine.low %v178_v8, %v179_v9  ;;  %v2086_v14 = vld [vmem:[%s2060_s21 + $0x10] sm:$0xf] }
  0x14   : > { %v221_v15 = vshrl.u32 %v2073_v7, 16  ;;  %v223_v16 = vshll.u32 %v2073_v7, 16  ;;  %v2090_v17 = vcombine.low %v180_v11, %v181_v12  ;;  %v177_v18 = vld [vmem:[%s2060_s21 + $0x14] sm:$0xf]  ;;  %v182_v43 = vld [vmem:[%s2060_s21 + $0x28] sm:$0xf]  ;;  %v2141_v46 = vcombine.low %v179_v9, %v180_v11 }
  0x15   : > { %v228_v19 = vshll.u32 %v2079_v10, 16  ;;  %v244_v20 = vshll.u32 %v2083_v13, 16  ;;  %v248_v21 = vshrl.u32 %v2083_v13, 16  ;;  %v2097_v22 = vcombine.low %v2086_v14, %v177_v18  ;;  %v183_v50 = vld [vmem:[%s2060_s21 + $0x2c] sm:$0xf] }
  0x16   : > { %v225_v23 = vrot.slane %v223_v16, 1  ;;  %v252_v24 = vshll.u32 %v2090_v17, 16  ;;  %v232_v30 = vshrl.u32 %v2079_v10, 16  ;;  %v256_v39 = vshrl.u32 %v2090_v17, 16 }
  0x17   : > { %v230_v25 = vrot.slane %v228_v19, 1  ;;  %v2102_v26 = vrot.slane %v244_v20, 1  ;;  %v236_v31 = vshll.u32 %v2097_v22, 16  ;;  %v2133_v41 = vcombine.low %v177_v18, %v178_v8 }
  0x18   : > { %v226_v27 = vor.u32 %v225_v23, %v221_v15  ;;  %v254_v28 = vrot.slane %v252_v24, 1  ;;  %v240_v42 = vshrl.u32 %v2097_v22, 16  ;;  %v2144_v48 = vrot.slane %v228_v19, 3 }
  0x19   : > { %v250_v32 = vor.u32 %v248_v21, %v2102_v26  ;;  %v234_v37 = vor.u32 %v232_v30, %v230_v25  ;;  %v238_v38 = vrot.slane %v236_v31, 1  ;;  %v738_v47 = vshrl.u32 %v2133_v41, 16 }
  0x1a   : > { %v231_v34 = vsel %vm219_vm1, %v226_v27, %v230_v25  ;;  %v258_v45 = vor.u32 %v256_v39, %v254_v28  ;;  %v461_v49 = vrot.slane %v2073_v7, 1  ;;  %v595_v51 = vrot.slane %v2133_v41, 1 }
  0x1b   : > { %1742 = vmatmul.mubr.msk.bf16.vlgmr.msra.gmra.mrb[0].mxu0 %vm271_vm2, %v231_v34  ;;  %v255_v35 = vsel %vm219_vm1, %v250_v32, %v254_v28  ;;  %v239_v44 = vsel %vm219_vm1, %v234_v37, %v238_v38  ;;  %v597_v52 = vrot.slane %v2141_v46, 1  ;;  %v740_v53 = vrot.slane %v738_v47, 1  ;;  %v1981_v28 = vld [vmem:[%s2558_s1 + $0x30] sm:$0xff]  }
  0x1c   : > { %1754 = vmatmul.mubr.msk.bf16.vlgmr.msra.gmra.mrb[0].mxu1 %vm271_vm2, %v255_v35  ;;  %1786 = vmatpush3.bf16.msra.mxu0 %v1976_v29  ;;  %v741_v54 = vshll.u32 %v2133_v41, 16  ;;  %v2154_v55 = vcombine.low %v181_v12, %v182_v43  ;;  %v747_v56 = vshrl.u32 %v2141_v46, 16  ;;  %v750_v57 = vshll.u32 %v2141_v46, 16 }
  0x1d   : > { %1762 = vmatpush3.bf16.msra.mxu1 %v1977_v33  ;;  %1745 = vmatprep.mubr.msk.bf16.mxu0 %vm2009_vm0, %v2008_v1  ;;  %v242_v58 = vor.u32 %v240_v42, %v238_v38  ;;  %v2164_v59 = vsel %vm460_vm3, %v595_v51, %v597_v52  ;;  %v1597_v61 = vcombine.low %v183_v50, %v183_v50  ;;  %v1142_v3 = vrot.slane %v232_v30, 2 }
  0x1e   : > { %1757 = vmatprep.mubr.msk.bf16.mxu1 %vm2009_vm0, %v2008_v1  ;;  %1787 = vmatprep.subr.bf16.mxu0 %v2008_v1  ;;  %v743_v60 = vrot.slane %v741_v54, 2  ;;  %v599_v62 = vrot.slane %v2154_v55, 1  ;;  %v749_v63 = vrot.slane %v747_v56, 1  ;;  %v752_v0 = vrot.slane %v750_v57, 2 }
  0x1f   : > { %1763 = vmatprep.subr.bf16.mxu1 %v2008_v1  ;;  %v756_v2 = vshrl.u32 %v2154_v55, 16  ;;  %v1146_v8 = vrot.slane %v236_v31, 3  ;;  %v759_v9 = vshll.u32 %v2154_v55, 16  ;;  %v765_v11 = vshll.u32 %v1597_v61, 16 }
  0x20   : > { %1788 = vmatpush3.bf16.msra.mxu0 %v1979_v36  ;;  %v2171_v12 = vor.u32 %v743_v60, %v740_v53  ;;  %v2176_v15 = vsel %vm460_vm3, %v597_v52, %v599_v62  ;;  %v753_v16 = vor.u32 %v752_v0, %v749_v63  ;;  %v247_v19 = vsel %vm219_vm1, %v242_v58, %v2102_v26  ;;  %v1982_v63 = vld [vmem:[%s2558_s1 + $0x40] sm:$0xff]  }
  0x21   : > { %1764 = vmatpush3.bf16.msra.mxu1 %v1980_v40  ;;  %1833 = vmatprep.subr.bf16.mxu0 %v2008_v1  ;;  %v758_v18 = vrot.slane %v756_v2, 1  ;;  %v761_v23 = vrot.slane %v759_v9, 2  ;;  %v767_v25 = vrot.slane %v765_v11, 2  ;;  %v1145_v27 = vrot.slane %v240_v42, 2 }
  0x22   : > { %1809 = vmatprep.subr.bf16.mxu1 %v2008_v1  ;;  %v2185_v29 = vsel %vm719_vm5, %v2171_v12, %v753_v16  ;;  %v2187_v30 = vcombine.low %v182_v43, %v183_v50  ;;  %v1015_v31 = vrot.slane %v2079_v10, 2  ;;  %v1016_v33 = vrot.slane %v2097_v22, 2 }
  0x23   : > { %1746 = vmatmul.mubr.msk.bf16.gmra.mrb[4].mxu0 %vm271_vm2, %v239_v44  ;;  %v762_v32 = vor.u32 %v761_v23, %v758_v18  ;;  %v890_v26 = vrot.slane %v2141_v46, 2  ;;  %v1018_v34 = vrot.slane %v2083_v13, 2  ;;  %v462_v35 = vrot.slane %v2079_v10, 1 }
  0x24   : > { %1758 = vmatmul.mubr.msk.bf16.gmra.mrb[4].mxu1 %vm271_vm2, %v258_v45  ;;  %1749 = vmatprep.mubr.msk.bf16.mxu0 %vm2009_vm0, %v2008_v1  ;;  %v888_v36 = vrot.slane %v2133_v41, 2  ;;  %v892_v37 = vrot.slane %v2154_v55, 2  ;;  %v1020_v38 = vrot.slane %v2090_v17, 2  ;;  %v2209_v43 = vsel %vm884_vm4, %v1015_v31, %v1016_v33  ;;  %v1983_v45 = vld [vmem:[%s2558_s1 + $0x38] sm:$0xff]  }
  0x25   : > { %1765 = vmatprep.mubr.msk.bf16.mxu1 %vm2009_vm0, %v2008_v1  ;;  %v2203_v40 = vsel %vm719_vm5, %v753_v16, %v762_v32  ;;  %v2206_v42 = vsel %vm719_vm5, %v762_v32, %v767_v25  ;;  %v894_v44 = vrot.slane %v1597_v61, 2  ;;  %v2222_v47 = vsel %vm884_vm4, %v1016_v33, %v1018_v34  ;;  %v1997_v55 = vld [vmem:[%s2558_s1 + $0x78] sm:$0xff]   ;;  %v1999_v41 = vld [vmem:[%s2060_s21 + $0x30] ss:$0 sps:$4 sm:$0x33]   ;;  %s1958_s21 = smul.u32 40, %s2562_s13 }
  0x26   : > { %v2219_v46 = vsel %vm884_vm4, %v888_v36, %v890_v26  ;;  %v2225_v50 = vsel %vm884_vm4, %v890_v26, %v892_v37  ;;  %v1022_v52 = vrot.slane %v2187_v30, 2  ;;  %v2230_v53 = vsel %vm884_vm4, %v1018_v34, %v1020_v38 }
  0x27   : > { %v2233_v54 = vsel %vm884_vm4, %v892_v37, %v894_v44  ;;  %v1144_v57 = vor.u32 %v2144_v48, %v1142_v3  ;;  %v1147_v58 = vor.u32 %v1146_v8, %v1145_v27  ;;  %v1149_v60 = vrot.slane %v248_v21, 2  ;;  %s2520_s13 = scalar_lea.vmem %s2560_s3, %s1958_s21 }
  0x28   : > { %v2238_v56 = vsel %vm884_vm4, %v1020_v38, %v1022_v52  ;;  %v463_v61 = vsel %vm460_vm3, %v461_v49, %v462_v35  ;;  %v1150_v0 = vrot.slane %v244_v20, 3  ;;  %v1291_v2 = vrot.slane %v2079_v10, 3 }
  0x29   : > { %v2253_v48 = vsel %vm1141_vm6, %v1144_v57, %v1147_v58  ;;  %v1292_v21 = vrot.slane %v2097_v22, 3  ;;  %v1154_v49 = vrot.slane %v252_v24, 3  ;;  %v1294_v20 = vrot.slane %v2083_v13, 3  ;;  %v1984_v24 = vld [vmem:[%s2558_s1 + $0x48] sm:$0xff]  }
  0x2a   : > { %v1151_v3 = vor.u32 %v1150_v0, %v1149_v60  ;;  %v1158_v18 = vshrl.u32 %v2187_v30, 16  ;;  %v1296_v31 = vrot.slane %v2090_v17, 3  ;;  %v466_v26 = vrot.slane %v2083_v13, 1  ;;  %v1986_v0 = vld [vmem:[%s2558_s1 + $0x50] sm:$0xff]  }
  0x2b   : > { %1750 = vmatmul.mubr.msk.bf16.gmra.mrb[8].mxu0 %vm271_vm2, %v247_v19  ;;  %v2264_v8 = vsel %vm1290_vm7, %v1291_v2, %v1292_v21  ;;  %v2276_v16 = vsel %vm1290_vm7, %v1292_v21, %v1294_v20  ;;  %v1161_v19 = vshll.u32 %v2187_v30, 16  ;;  %v1581_v44 = vcombine.low %v2064_v4, %v2067_v5 }
  0x2c   : > { %1766 = vmatmul.mubr.msk.bf16.vlgmr.msra.gmra.mrb[8].mxu1 %vm271_vm2, %v2073_v7  ;;  %1789 = vmatprep.mubr.msk.bf16.mxu0 %vm2009_vm0, %v2008_v1  ;;  %v1153_v7 = vrot.slane %v256_v39, 2  ;;  %v464_v39 = vrot.slane %v2097_v22, 1  ;;  %v2273_v11 = vsel %vm1141_vm6, %v1147_v58, %v1151_v3  ;;  %v1160_v23 = vrot.slane %v1158_v18, 2 }
  0x2d   : > { %1810 = vmatpush3.bf16.msra.mxu1 %v1981_v28  ;;  %1769 = vmatprep.mubr.msk.bf16.mxu1 %vm2009_vm0, %v2008_v1  ;;  %v1163_v25 = vrot.slane %v1161_v19, 3  ;;  %v2299_v33 = vsel %vm1290_vm7, %v1294_v20, %v1296_v31  ;;  %v724_v57 = vshll.u32 %v1581_v44, 16  ;;  %v592_v4 = vrot.slane %v1581_v44, 1 }
  0x2e   : > { %1811 = vmatprep.subr.bf16.mxu1 %v2008_v1  ;;  %v1155_v9 = vor.u32 %v1154_v49, %v1153_v7  ;;  %v465_v27 = vsel %vm460_vm3, %v462_v35, %v464_v39  ;;  %v467_v34 = vsel %vm460_vm3, %v464_v39, %v466_v26  ;;  %v1298_v35 = vrot.slane %v2187_v30, 3  ;;  %v1991_v7 = vld [vmem:[%s2558_s1 + $0x58] sm:$0xff]  }
  0x2f   : > { %v2290_v28 = vor.u32 %v1163_v25, %v1160_v23 }
  0x30   : > { %v2314_v37 = vsel %vm1290_vm7, %v1296_v31, %v1298_v35 }
  0x31   : > { %1812 = vmatpush3.bf16.msra.mxu1 %v1983_v45  ;;  %v2296_v32 = vsel %vm1141_vm6, %v1155_v9, %v2290_v28  ;;  %v2328_v45 = vcombine.low %v2070_v6, %v2086_v14  ;;  %v726_v14 = vrot.slane %v724_v57, 2 }
  0x32   : > { %1857 = vmatprep.subr.bf16.mxu1 %v2008_v1 }
  0x33   : > { %1790 = vmatmul.mubr.msk.bf16.vlgmr.msra.gmra.mrb[12].mxu0 %vm271_vm2, %v463_v61  ;;  %v729_v58 = vshrl.u32 %v2328_v45, 16  ;;  %v732_v60 = vshll.u32 %v2328_v45, 16  ;;  %v593_v5 = vrot.slane %v2328_v45, 1 }
  0x34   : > { %1770 = vmatmul.mubr.msk.bf16.gmra.mrb[12].mxu1 %vm271_vm2, %v2079_v10  ;;  %1834 = vmatpush3.bf16.msra.mxu0 %v1982_v63  ;;  %v2283_v10 = vsel %vm1141_vm6, %v1151_v3, %v1155_v9  ;;  %v1988_v3 = vld [vmem:[%s2558_s1 + $0x60] sm:$0xff]   ;;  %v1992_v9 = vld [vmem:[%s2558_s1 + $0x68] sm:$0xff]  }
  0x35   : > { %1773 = vmatprep.mubr.msk.bf16.mxu1 %vm2009_vm0, %v2008_v1  ;;  %1793 = vmatprep.mubr.msk.bf16.mxu0 %vm2009_vm0, %v2008_v1  ;;  %v731_v61 = vrot.slane %v729_v58, 1  ;;  %v734_v63 = vrot.slane %v732_v60, 2  ;;  %v596_v20 = vsel %vm460_vm3, %v593_v5, %v595_v51 }
  0x36   : > { %1835 = vmatprep.subr.bf16.mxu0 %v2008_v1 }
  0x37   : > { %v735_v21 = vor.u32 %v734_v63, %v731_v61 }
  0x38   : > { %1836 = vmatpush3.bf16.msra.mxu0 %v1984_v24 }
  0x39   : > { %1881 = vmatprep.subr.bf16.mxu0 %v2008_v1  ;;  %v745_v51 = vsel %vm719_vm5, %v735_v21, %v2171_v12  ;;  %v886_v12 = vrot.slane %v2328_v45, 2 }
  0x3b   : > { %1794 = vmatmul.mubr.msk.bf16.gmra.mrb[16].mxu0 %vm271_vm2, %v465_v27 }
  0x3c   : > { %1774 = vmatmul.mubr.msk.bf16.gmra.mrb[16].mxu1 %vm271_vm2, %v2097_v22  ;;  %1797 = vmatprep.mubr.msk.bf16.mxu0 %vm2009_vm0, %v2008_v1  ;;  %v468_v22 = vrot.slane %v2090_v17, 1 }
  0x3d   : > { %1777 = vmatprep.mubr.msk.bf16.mxu1 %vm2009_vm0, %v2008_v1 }
  0x3e   : > { %v469_v38 = vsel %vm460_vm3, %v466_v26, %v468_v22 }
  0x43   : > { %1798 = vmatmul.mubr.msk.bf16.gmra.mrb[20].mxu0 %vm271_vm2, %v467_v34 }
  0x44   : > { %1778 = vmatmul.mubr.msk.bf16.gmra.mrb[20].mxu1 %vm271_vm2, %v2083_v13  ;;  %1801 = vmatprep.mubr.msk.bf16.mxu0 %vm2009_vm0, %v2008_v1  ;;  %v721_v13 = vshrl.u32 %v1581_v44, 16 }
  0x45   : > { %1781 = vmatprep.mubr.msk.bf16.mxu1 %vm2009_vm0, %v2008_v1 }
  0x46   : > { %v723_v6 = vrot.slane %v721_v13, 1 }
  0x48   : > { %v727_v2 = vor.u32 %v726_v14, %v723_v6 }
  0x4a   : > { %v736_v49 = vsel %vm719_vm5, %v727_v2, %v735_v21 }
  0x4b   : > { %1802 = vmatmul.mubr.msk.bf16.gmra.mrb[24].mxu0 %vm271_vm2, %v469_v38 }
  0x4c   : > { %1782 = vmatmul.mubr.msk.bf16.gmra.mrb[24].mxu1 %vm271_vm2, %v2090_v17  ;;  %1805 = vmatprep.mubr.msk.bf16.mxu0 %vm2009_vm0, %v2008_v1  ;;  %v594_v17 = vsel %vm460_vm3, %v592_v4, %v593_v5 }
  0x4d   : > { %1813 = vmatprep.mubr.msk.bf16.mxu1 %vm2009_vm0, %v2008_v1 }
  0x53   : > { %1806 = vmatmul.mubr.msk.bf16.gmra.mrb[28].mxu0 %vm271_vm2, %v468_v22 }
  0x54   : > { %1814 = vmatmul.mubr.msk.bf16.vlgmr.msra.gmra.mrb[28].mxu1 %vm271_vm2, %v594_v17  ;;  %1837 = vmatprep.mubr.msk.bf16.mxu0 %vm2009_vm0, %v2008_v1 }
  0x55   : > { %1858 = vmatpush3.bf16.msra.mxu1 %v1986_v0  ;;  %1817 = vmatprep.mubr.msk.bf16.mxu1 %vm2009_vm0, %v2008_v1 }
  0x56   : > { %1859 = vmatprep.subr.bf16.mxu1 %v2008_v1 }
  0x59   : > { %1860 = vmatpush3.bf16.msra.mxu1 %v1991_v7 }
  0x5a   : > { %1905 = vmatprep.subr.bf16.mxu1 %v2008_v1 }
  0x5b   : > { %1838 = vmatmul.mubr.msk.bf16.vlgmr.msra.gmra.mrb[32].mxu0 %vm271_vm2, %v736_v49 }
  0x5c   : > { %1818 = vmatmul.mubr.msk.bf16.gmra.mrb[32].mxu1 %vm271_vm2, %v596_v20  ;;  %1882 = vmatpush3.bf16.msra.mxu0 %v1988_v3 }
  0x5d   : > { %1821 = vmatprep.mubr.msk.bf16.mxu1 %vm2009_vm0, %v2008_v1  ;;  %1841 = vmatprep.mubr.msk.bf16.mxu0 %vm2009_vm0, %v2008_v1 }
  0x5e   : > { %1883 = vmatprep.subr.bf16.mxu0 %v2008_v1 }
  0x60   : > { %1884 = vmatpush3.bf16.msra.mxu0 %v1992_v9 }
  0x61   : > { %1929 = vmatprep.subr.bf16.mxu0 %v2008_v1 }
  0x63   : > { %1842 = vmatmul.mubr.msk.bf16.gmra.mrb[36].mxu0 %vm271_vm2, %v745_v51 }
  0x64   : > { %1822 = vmatmul.mubr.msk.bf16.gmra.mrb[36].mxu1 %vm271_vm2, %v2164_v59  ;;  %1845 = vmatprep.mubr.msk.bf16.mxu0 %vm2009_vm0, %v2008_v1  ;;  %v885_v59 = vrot.slane %v1581_v44, 2 }
  0x65   : > { %1825 = vmatprep.mubr.msk.bf16.mxu1 %vm2009_vm0, %v2008_v1 }
  0x6b   : > { %1846 = vmatmul.mubr.msk.bf16.gmra.mrb[40].mxu0 %vm271_vm2, %v2185_v29  ;;  %v1995_v29 = vld [vmem:[%s2558_s1 + $0x70] sm:$0xff]  }
  0x6c   : > { %1826 = vmatmul.mubr.msk.bf16.gmra.mrb[40].mxu1 %vm271_vm2, %v2176_v15  ;;  %1849 = vmatprep.mubr.msk.bf16.mxu0 %vm2009_vm0, %v2008_v1  ;;  %v887_v15 = vsel %vm884_vm4, %v885_v59, %v886_v12 }
  0x6d   : > { %1829 = vmatprep.mubr.msk.bf16.mxu1 %vm2009_vm0, %v2008_v1 }
  0x73   : > { %1850 = vmatmul.mubr.msk.bf16.gmra.mrb[44].mxu0 %vm271_vm2, %v2203_v40  ;;  %v889_v40 = vsel %vm884_vm4, %v886_v12, %v888_v36  ;;  %v1024_v36 = vrot.slane %v1999_v41, 2 }
  0x74   : > { %1830 = vmatmul.mubr.msk.bf16.gmra.mrb[44].mxu1 %vm271_vm2, %v599_v62  ;;  %1853 = vmatprep.mubr.msk.bf16.mxu0 %vm2009_vm0, %v2008_v1  ;;  %v1996_v62 = vld [vmem:[%s2558_s1 + $0x80] sm:$0xff]  }
  0x75   : > { %1861 = vmatprep.mubr.msk.bf16.mxu1 %vm2009_vm0, %v2008_v1 }
  0x7b   : > { %1854 = vmatmul.mubr.msk.bf16.gmra.mrb[48].mxu0 %vm271_vm2, %v2206_v42  ;;  %v1998_v42 = vld [vmem:[%s2558_s1 + $0x88] sm:$0xff]  }
  0x7c   : > { %1862 = vmatmul.mubr.msk.bf16.vlgmr.msra.gmra.mrb[48].mxu1 %vm271_vm2, %v887_v15  ;;  %1885 = vmatprep.mubr.msk.bf16.mxu0 %vm2009_vm0, %v2008_v1 }
  0x7d   : > { %1906 = vmatpush3.bf16.msra.mxu1 %v1995_v29  ;;  %1865 = vmatprep.mubr.msk.bf16.mxu1 %vm2009_vm0, %v2008_v1 }
  0x7e   : > { %1907 = vmatprep.subr.bf16.mxu1 %v2008_v1 }
  0x81   : > { %1908 = vmatpush3.bf16.msra.mxu1 %v1997_v55 }
  0x83   : > { %1886 = vmatmul.mubr.msk.bf16.vlgmr.msra.gmra.mrb[52].mxu0 %vm271_vm2, %v2209_v43  ;;  %v1025_v43 = vsel %vm884_vm4, %v1022_v52, %v1024_v36 }
  0x84   : > { %1866 = vmatmul.mubr.msk.bf16.gmra.mrb[52].mxu1 %vm271_vm2, %v889_v40  ;;  %1930 = vmatpush3.bf16.msra.mxu0 %v1996_v62 }
  0x85   : > { %1869 = vmatprep.mubr.msk.bf16.mxu1 %vm2009_vm0, %v2008_v1  ;;  %1889 = vmatprep.mubr.msk.bf16.mxu0 %vm2009_vm0, %v2008_v1 }
  0x86   : > { %1931 = vmatprep.subr.bf16.mxu0 %v2008_v1 }
  0x88   : > { %1932 = vmatpush3.bf16.msra.mxu0 %v1998_v42 }
  0x8b   : > { %1890 = vmatmul.mubr.msk.bf16.gmra.mrb[56].mxu0 %vm271_vm2, %v2222_v47  ;;  %v1170_v47 = vshll.u32 %v1999_v41, 16 }
  0x8c   : > { %1870 = vmatmul.mubr.msk.bf16.gmra.mrb[56].mxu1 %vm271_vm2, %v2219_v46  ;;  %1893 = vmatprep.mubr.msk.bf16.mxu0 %vm2009_vm0, %v2008_v1  ;;  %v1167_v46 = vshrl.u32 %v1999_v41, 16 }
  0x8d   : > { %1873 = vmatprep.mubr.msk.bf16.mxu1 %vm2009_vm0, %v2008_v1  ;;  %v1172_v52 = vrot.slane %v1170_v47, 3 }
  0x93   : > { %1894 = vmatmul.mubr.msk.bf16.gmra.mrb[60].mxu0 %vm271_vm2, %v2230_v53 }
  0x94   : > { %1874 = vmatmul.mubr.msk.bf16.gmra.mrb[60].mxu1 %vm271_vm2, %v2225_v50  ;;  %1897 = vmatprep.mubr.msk.bf16.mxu0 %vm2009_vm0, %v2008_v1  ;;  %v1169_v50 = vrot.slane %v1167_v46, 2 }
  0x95   : > { %1877 = vmatprep.mubr.msk.bf16.mxu1 %vm2009_vm0, %v2008_v1 }
  0x96   : > { %v1173_v53 = vor.u32 %v1172_v52, %v1169_v50 }
  0x9b   : > { %1898 = vmatmul.mubr.msk.bf16.gmra.mrb[64].mxu0 %vm271_vm2, %v2238_v56  ;;  %v1300_v56 = vrot.slane %v1999_v41, 3 }
  0x9c   : > { %1878 = vmatmul.mubr.msk.bf16.gmra.mrb[64].mxu1 %vm271_vm2, %v2233_v54  ;;  %1901 = vmatprep.mubr.msk.bf16.mxu0 %vm2009_vm0, %v2008_v1  ;;  %v1174_v54 = vsel %vm1141_vm6, %v2290_v28, %v1173_v53 }
  0x9d   : > { %1909 = vmatprep.mubr.msk.bf16.mxu1 %vm2009_vm0, %v2008_v1 }
  0xa3   : > { %1902 = vmatmul.mubr.msk.bf16.gmra.mrb[68].mxu0 %vm271_vm2, %v1025_v43 }
  0xa4   : > { %1910 = vmatmul.mubr.msk.bf16.vlgmr.msra.gmra.mrb[68].mxu1 %vm271_vm2, %v2253_v48  ;;  %1933 = vmatprep.mubr.msk.bf16.mxu0 %vm2009_vm0, %v2008_v1  ;;  %v1301_v48 = vsel %vm1290_vm7, %v1298_v35, %v1300_v56 }
  0xa5   : > { %1913 = vmatprep.mubr.msk.bf16.mxu1 %vm2009_vm0, %v2008_v1 }
  0xab   : > { %1934 = vmatmul.mubr.msk.bf16.vlgmr.msra.gmra.mrb[72].mxu0 %vm271_vm2, %v2264_v8 }
  0xac   : > { %1914 = vmatmul.mubr.msk.bf16.gmra.mrb[72].mxu1 %vm271_vm2, %v2273_v11  ;;  %1937 = vmatprep.mubr.msk.bf16.mxu0 %vm2009_vm0, %v2008_v1 }
  0xad   : > { %1917 = vmatprep.mubr.msk.bf16.mxu1 %vm2009_vm0, %v2008_v1 }
  0xb3   : > { %1938 = vmatmul.mubr.msk.bf16.gmra.mrb[76].mxu0 %vm271_vm2, %v2276_v16 }
  0xb4   : > { %1918 = vmatmul.mubr.msk.bf16.gmra.mrb[76].mxu1 %vm271_vm2, %v2283_v10  ;;  %1941 = vmatprep.mubr.msk.bf16.mxu0 %vm2009_vm0, %v2008_v1 }
  0xb5   : > { %1921 = vmatprep.mubr.msk.bf16.mxu1 %vm2009_vm0, %v2008_v1 }
  0xbb   : > { %1942 = vmatmul.mubr.msk.bf16.gmra.mrb[80].mxu0 %vm271_vm2, %v2299_v33 }
  0xbc   : > { %1922 = vmatmul.mubr.msk.bf16.gmra.mrb[80].mxu1 %vm271_vm2, %v2296_v32  ;;  %1945 = vmatprep.mubr.msk.bf16.mxu0 %vm2009_vm0, %v2008_v1 }
  0xbd   : > { %1925 = vmatprep.mubr.msk.bf16.mxu1 %vm2009_vm0, %v2008_v1 }
  0xc3   : > { %1946 = vmatmul.mubr.msk.bf16.gmra.mrb[84].mxu0 %vm271_vm2, %v2314_v37 }
  0xc4   : > { %1926 = vmatmul.mubr.msk.bf16.gmra.mrb[84].mxu1 %vm271_vm2, %v1174_v54  ;;  %1949 = vmatprep.mubr.msk.bf16.mxu0 %vm2009_vm0, %v2008_v1 }
  0xcb   : > { %1950 = vmatmul.mubr.msk.bf16.gmra.mrb[88].mxu0 %vm271_vm2, %v1301_v48 }
  0xee   : > { %v321_v8 = vpop.f32.mrb[0].mxu0 }
  0xef   : > { %v1743_v39 = vpop.f32.mrb[1].mxu0  ;;  %v345_v24 = vpop.f32.mrb[0].mxu1 }
  0xf0   : > { %v324_v11 = vpop.f32.mrb[2].mxu0  ;;  %v1755_v16 = vpop.f32.mrb[1].mxu1 }
  0xf1   : > { %v1744_v10 = vpop.f32.mrb[3].mxu0  ;;  %v348_v18 = vpop.f32.mrb[2].mxu1 }
  0xf2   : > { %v1756_v19 = vpop.f32.mrb[3].mxu1 }
  0xf6   : > { %v329_v23 = vpop.f32.mrb[4].mxu0 }
  0xf7   : > { %v1747_v25 = vpop.f32.mrb[5].mxu0  ;;  %v353_v27 = vpop.f32.mrb[4].mxu1 }
  0xf8   : > { %v332_v28 = vpop.f32.mrb[6].mxu0  ;;  %v1759_v1 = vpop.f32.mrb[5].mxu1 }
  0xf9   : > { %v1748_v31 = vpop.f32.mrb[7].mxu0  ;;  %v356_v32 = vpop.f32.mrb[6].mxu1 }
  0xfa   : > { %v1760_v30 = vpop.f32.mrb[7].mxu1 }
  0xfe   : > { %v337_v33 = vpop.f32.mrb[8].mxu0 }
  0xff   : > { %v416_v26 = vpop.f32.mrb[8].mxu1  ;;  %v1751_v34 = vpop.f32.mrb[9].mxu0 }
 0x100   : > { %v417_v35 = vadd.f32 %v416_v26, %v321_v8  ;;  %v1767_v37 = vpop.f32.mrb[9].mxu1  ;;  %v340_v22 = vpop.f32.mrb[10].mxu0 }
 0x101   : > { %v419_v38 = vpop.f32.mrb[10].mxu1  ;;  %v1752_v44 = vpop.f32.mrb[11].mxu0 }
 0x102   : > { %v420_v45 = vadd.f32 %v419_v38, %v324_v11  ;;  %v1768_v13 = vpop.f32.mrb[11].mxu1 }
 0x106   : > { %v531_v57 = vpop.f32.mrb[12].mxu0 }
 0x107   : > { %v424_v58 = vpop.f32.mrb[12].mxu1  ;;  %v570_v60 = vadd.f32 %v531_v57, %v417_v35  ;;  %v1791_v4 = vpop.f32.mrb[13].mxu0 }
 0x108   : > { %v425_v5 = vadd.f32 %v424_v58, %v329_v23  ;;  %v1771_v6 = vpop.f32.mrb[13].mxu1  ;;  %v534_v14 = vpop.f32.mrb[14].mxu0 }
 0x109   : > { %v427_v61 = vpop.f32.mrb[14].mxu1  ;;  %v571_v63 = vadd.f32 %v534_v14, %v420_v45  ;;  %v1792_v17 = vpop.f32.mrb[15].mxu0 }
 0x10a   : > { %v428_v0 = vadd.f32 %v427_v61, %v332_v28  ;;  %v1772_v2 = vpop.f32.mrb[15].mxu1 }
 0x10e   : > { %v539_v21 = vpop.f32.mrb[16].mxu0 }
 0x10f   : > { %v432_v7 = vpop.f32.mrb[16].mxu1  ;;  %v572_v49 = vadd.f32 %v539_v21, %v425_v5  ;;  %v1795_v3 = vpop.f32.mrb[17].mxu0 }
 0x110   : > { %v433_v20 = vadd.f32 %v432_v7, %v337_v33  ;;  %v1775_v9 = vpop.f32.mrb[17].mxu1  ;;  %v542_v51 = vpop.f32.mrb[18].mxu0 }
 0x111   : > { %v435_v59 = vpop.f32.mrb[18].mxu1  ;;  %v573_v12 = vadd.f32 %v542_v51, %v428_v0  ;;  %v1796_v15 = vpop.f32.mrb[19].mxu0 }
 0x112   : > { %v436_v29 = vadd.f32 %v435_v59, %v340_v22  ;;  %v1776_v55 = vpop.f32.mrb[19].mxu1 }
 0x116   : > { %v547_v62 = vpop.f32.mrb[20].mxu0 }
 0x117   : > { %v440_v40 = vpop.f32.mrb[20].mxu1  ;;  %v574_v42 = vadd.f32 %v547_v62, %v433_v20  ;;  %v1799_v41 = vpop.f32.mrb[21].mxu0 }
 0x118   : > { %v441_v36 = vadd.f32 %v440_v40, %v345_v24  ;;  %v1779_v43 = vpop.f32.mrb[21].mxu1  ;;  %v550_v46 = vpop.f32.mrb[22].mxu0 }
 0x119   : > { %v443_v47 = vpop.f32.mrb[22].mxu1  ;;  %v575_v50 = vadd.f32 %v550_v46, %v436_v29  ;;  %v1800_v52 = vpop.f32.mrb[23].mxu0 }
 0x11a   : > { %v444_v53 = vadd.f32 %v443_v47, %v348_v18  ;;  %v1780_v54 = vpop.f32.mrb[23].mxu1 }
 0x11e   : > { %v555_v56 = vpop.f32.mrb[24].mxu0 }
 0x11f   : > { %v448_v48 = vpop.f32.mrb[24].mxu1  ;;  %v576_v8 = vadd.f32 %v555_v56, %v441_v36  ;;  %v1803_v39 = vpop.f32.mrb[25].mxu0 }
 0x120   : > { %v449_v11 = vadd.f32 %v448_v48, %v353_v27  ;;  %v1783_v16 = vpop.f32.mrb[25].mxu1  ;;  %v558_v10 = vpop.f32.mrb[26].mxu0 }
 0x121   : > { %v451_v19 = vpop.f32.mrb[26].mxu1  ;;  %v577_v23 = vadd.f32 %v558_v10, %v444_v53  ;;  %v1804_v25 = vpop.f32.mrb[27].mxu0 }
 0x122   : > { %v452_v28 = vadd.f32 %v451_v19, %v356_v32  ;;  %v1784_v1 = vpop.f32.mrb[27].mxu1 }
 0x126   : > { %v563_v24 = vpop.f32.mrb[28].mxu0 }
 0x127   : > { %v578_v31 = vadd.f32 %v563_v24, %v449_v11  ;;  %v662_v30 = vpop.f32.mrb[28].mxu1  ;;  %v1807_v33 = vpop.f32.mrb[29].mxu0 }
 0x128   : > { %v701_v26 = vadd.f32 %v662_v30, %v570_v60  ;;  %v1815_v34 = vpop.f32.mrb[29].mxu1  ;;  %v566_v18 = vpop.f32.mrb[30].mxu0 }
 0x129   : > { %v579_v35 = vadd.f32 %v566_v18, %v452_v28  ;;  %v665_v37 = vpop.f32.mrb[30].mxu1  ;;  %v1808_v22 = vpop.f32.mrb[31].mxu0 }
 0x12a   : > { %v702_v38 = vadd.f32 %v665_v37, %v571_v63  ;;  %v1816_v44 = vpop.f32.mrb[31].mxu1 }
 0x12e   : > { %v830_v27 = vpop.f32.mrb[32].mxu0 }
 0x12f   : > { %v670_v45 = vpop.f32.mrb[32].mxu1  ;;  %v869_v13 = vadd.f32 %v830_v27, %v701_v26  ;;  %v1839_v57 = vpop.f32.mrb[33].mxu0 }
 0x130   : > { %v703_v58 = vadd.f32 %v670_v45, %v572_v49  ;;  %v1819_v4 = vpop.f32.mrb[33].mxu1  ;;  %v833_v32 = vpop.f32.mrb[34].mxu0 }
 0x131   : > { %v673_v5 = vpop.f32.mrb[34].mxu1  ;;  %v870_v6 = vadd.f32 %v833_v32, %v702_v38  ;;  %v1840_v14 = vpop.f32.mrb[35].mxu0 }
 0x132   : > { %v704_v61 = vadd.f32 %v673_v5, %v573_v12  ;;  %v1820_v17 = vpop.f32.mrb[35].mxu1 }
 0x136   : > { %v838_v60 = vpop.f32.mrb[36].mxu0 }
 0x137   : > { %v678_v0 = vpop.f32.mrb[36].mxu1  ;;  %v871_v2 = vadd.f32 %v838_v60, %v703_v58  ;;  %v1843_v21 = vpop.f32.mrb[37].mxu0 }
 0x138   : > { %v705_v7 = vadd.f32 %v678_v0, %v574_v42  ;;  %v1823_v3 = vpop.f32.mrb[37].mxu1  ;;  %v841_v63 = vpop.f32.mrb[38].mxu0 }
 0x139   : > { %v681_v20 = vpop.f32.mrb[38].mxu1  ;;  %v872_v9 = vadd.f32 %v841_v63, %v704_v61  ;;  %v1844_v51 = vpop.f32.mrb[39].mxu0 }
 0x13a   : > { %v706_v59 = vadd.f32 %v681_v20, %v575_v50  ;;  %v1824_v15 = vpop.f32.mrb[39].mxu1 }
 0x13e   : > { %v846_v49 = vpop.f32.mrb[40].mxu0 }
 0x13f   : > { %v686_v29 = vpop.f32.mrb[40].mxu1  ;;  %v873_v55 = vadd.f32 %v846_v49, %v705_v7  ;;  %v1847_v62 = vpop.f32.mrb[41].mxu0 }
 0x140   : > { %v707_v40 = vadd.f32 %v686_v29, %v576_v8  ;;  %v1827_v41 = vpop.f32.mrb[41].mxu1  ;;  %v849_v12 = vpop.f32.mrb[42].mxu0 }
 0x141   : > { %v689_v36 = vpop.f32.mrb[42].mxu1  ;;  %v874_v43 = vadd.f32 %v849_v12, %v706_v59  ;;  %v1848_v46 = vpop.f32.mrb[43].mxu0 }
 0x142   : > { %v708_v47 = vadd.f32 %v689_v36, %v577_v23  ;;  %v1828_v52 = vpop.f32.mrb[43].mxu1 }
 0x146   : > { %v854_v42 = vpop.f32.mrb[44].mxu0 }
 0x147   : > { %v694_v53 = vpop.f32.mrb[44].mxu1  ;;  %v875_v54 = vadd.f32 %v854_v42, %v707_v40  ;;  %v1851_v56 = vpop.f32.mrb[45].mxu0 }
 0x148   : > { %v709_v48 = vadd.f32 %v694_v53, %v578_v31  ;;  %v1831_v39 = vpop.f32.mrb[45].mxu1  ;;  %v857_v50 = vpop.f32.mrb[46].mxu0 }
 0x149   : > { %v697_v11 = vpop.f32.mrb[46].mxu1  ;;  %v876_v16 = vadd.f32 %v857_v50, %v708_v47  ;;  %v1852_v10 = vpop.f32.mrb[47].mxu0 }
 0x14a   : > { %v710_v19 = vadd.f32 %v697_v11, %v579_v35  ;;  %v1832_v25 = vpop.f32.mrb[47].mxu1 }
 0x14e   : > { %v862_v8 = vpop.f32.mrb[48].mxu0 }
 0x14f   : > { %v877_v28 = vadd.f32 %v862_v8, %v709_v48  ;;  %v957_v1 = vpop.f32.mrb[48].mxu1  ;;  %v1855_v24 = vpop.f32.mrb[49].mxu0 }
 0x150   : > { %v996_v30 = vadd.f32 %v957_v1, %v869_v13  ;;  %v1863_v33 = vpop.f32.mrb[49].mxu1  ;;  %v865_v23 = vpop.f32.mrb[50].mxu0 }
 0x151   : > { %v878_v26 = vadd.f32 %v865_v23, %v710_v19  ;;  %v960_v34 = vpop.f32.mrb[50].mxu1  ;;  %v1856_v18 = vpop.f32.mrb[51].mxu0 }
 0x152   : > { %v997_v37 = vadd.f32 %v960_v34, %v870_v6  ;;  %v1864_v22 = vpop.f32.mrb[51].mxu1 }
 0x156   : > { %v1087_v31 = vpop.f32.mrb[52].mxu0 }
 0x157   : > { %v965_v38 = vpop.f32.mrb[52].mxu1  ;;  %v1126_v44 = vadd.f32 %v1087_v31, %v996_v30  ;;  %v1887_v27 = vpop.f32.mrb[53].mxu0 }
 0x158   : > { %v998_v45 = vadd.f32 %v965_v38, %v871_v2  ;;  %v1867_v57 = vpop.f32.mrb[53].mxu1  ;;  %v1090_v35 = vpop.f32.mrb[54].mxu0 }
 0x159   : > { %v968_v58 = vpop.f32.mrb[54].mxu1  ;;  %v1127_v4 = vadd.f32 %v1090_v35, %v997_v37  ;;  %v1888_v32 = vpop.f32.mrb[55].mxu0 }
 0x15a   : > { %v999_v5 = vadd.f32 %v968_v58, %v872_v9  ;;  %v1868_v14 = vpop.f32.mrb[55].mxu1 }
 0x15e   : > { %v1095_v13 = vpop.f32.mrb[56].mxu0 }
 0x15f   : > { %v973_v61 = vpop.f32.mrb[56].mxu1  ;;  %v1128_v17 = vadd.f32 %v1095_v13, %v998_v45  ;;  %v1891_v60 = vpop.f32.mrb[57].mxu0 }
 0x160   : > { %v1000_v0 = vadd.f32 %v973_v61, %v873_v55  ;;  %v1871_v21 = vpop.f32.mrb[57].mxu1  ;;  %v1098_v6 = vpop.f32.mrb[58].mxu0 }
 0x161   : > { %v976_v7 = vpop.f32.mrb[58].mxu1  ;;  %v1129_v3 = vadd.f32 %v1098_v6, %v999_v5  ;;  %v1892_v63 = vpop.f32.mrb[59].mxu0 }
 0x162   : > { %v1001_v20 = vadd.f32 %v976_v7, %v874_v43  ;;  %v1872_v51 = vpop.f32.mrb[59].mxu1 }
 0x166   : > { %v1103_v2 = vpop.f32.mrb[60].mxu0 }
 0x167   : > { %v981_v59 = vpop.f32.mrb[60].mxu1  ;;  %v1130_v15 = vadd.f32 %v1103_v2, %v1000_v0  ;;  %v1895_v49 = vpop.f32.mrb[61].mxu0 }
 0x168   : > { %v1002_v29 = vadd.f32 %v981_v59, %v875_v54  ;;  %v1875_v62 = vpop.f32.mrb[61].mxu1  ;;  %v1106_v9 = vpop.f32.mrb[62].mxu0 }
 0x169   : > { %v984_v40 = vpop.f32.mrb[62].mxu1  ;;  %v1131_v41 = vadd.f32 %v1106_v9, %v1001_v20  ;;  %v1896_v12 = vpop.f32.mrb[63].mxu0 }
 0x16a   : > { %v1003_v36 = vadd.f32 %v984_v40, %v876_v16  ;;  %v1876_v46 = vpop.f32.mrb[63].mxu1 }
 0x16e   : > { %v1111_v55 = vpop.f32.mrb[64].mxu0 }
 0x16f   : > { %v989_v47 = vpop.f32.mrb[64].mxu1  ;;  %v2502_v52 = vadd.f32 %v1111_v55, %v1002_v29  ;;  %v1899_v42 = vpop.f32.mrb[65].mxu0 }
 0x170   : > { %v1004_v53 = vadd.f32 %v989_v47, %v877_v28  ;;  %v1879_v43 = vpop.f32.mrb[65].mxu1  ;;  %v1114_v56 = vpop.f32.mrb[66].mxu0 }
 0x171   : > { %v992_v48 = vpop.f32.mrb[66].mxu1  ;;  %v2504_v39 = vadd.f32 %v1114_v56, %v1003_v36  ;;  %v1900_v54 = vpop.f32.mrb[67].mxu0 }
 0x172   : > { %v1005_v50 = vadd.f32 %v992_v48, %v878_v26  ;;  %v1880_v11 = vpop.f32.mrb[67].mxu1  ;;  %v2514_v26 = vld [vmem:[%s2559_s2] ss:$0 sm:$0xff] }
 0x176   : > { %v1119_v10 = vpop.f32.mrb[68].mxu0 }
 0x177   : > { %v2506_v19 = vadd.f32 %v1119_v10, %v1004_v53  ;;  %v1236_v16 = vpop.f32.mrb[68].mxu1  ;;  %v1903_v25 = vpop.f32.mrb[69].mxu0 }
 0x178   : > { %v1275_v8 = vadd.f32 %v1236_v16, %v1126_v44  ;;  %v1911_v1 = vpop.f32.mrb[69].mxu1  ;;  %v1122_v24 = vpop.f32.mrb[70].mxu0 }
 0x179   : > { %v2508_v30 = vadd.f32 %v1122_v24, %v1005_v50  ;;  %v1239_v28 = vpop.f32.mrb[70].mxu1  ;;  %v1904_v33 = vpop.f32.mrb[71].mxu0 }
 0x17a   : > { %v1276_v23 = vadd.f32 %v1239_v28, %v1127_v4  ;;  %v1912_v34 = vpop.f32.mrb[71].mxu1 }
 0x17e   : > { %v1363_v18 = vpop.f32.mrb[72].mxu0 }
 0x17f   : > { %v1244_v37 = vpop.f32.mrb[72].mxu1  ;;  %v1402_v22 = vadd.f32 %v1363_v18, %v1275_v8  ;;  %v1935_v31 = vpop.f32.mrb[73].mxu0 }
 0x180   : > { %v1277_v38 = vadd.f32 %v1244_v37, %v1128_v17  ;;  %v1915_v44 = vpop.f32.mrb[73].mxu1  ;;  %v1366_v27 = vpop.f32.mrb[74].mxu0 }
 0x181   : > { %v1419_v45 = vadd.f32 %v2514_v26, %v1402_v22  ;;  %v1247_v57 = vpop.f32.mrb[74].mxu1  ;;  %v1403_v35 = vadd.f32 %v1366_v27, %v1276_v23  ;;  %v1936_v58 = vpop.f32.mrb[75].mxu0 }
 0x182   : > { %v1278_v4 = vadd.f32 %v1247_v57, %v1129_v3  ;;  %v1916_v32 = vpop.f32.mrb[75].mxu1 }
 0x183   : > { %v1664_v5 = vpack.c.bf16 %v1419_v45, %v1419_v45  ;;  %v1420_v14 = vadd.f32 %v2514_v26, %v1403_v35 }
 0x185   : > { %1470 = vst.msk [vmem:[%s2520_s13] sm:$0xf] %vm1469_vm8, %v1664_v5  ;;  %v1665_v13 = vpack.c.bf16 %v1420_v14, %v1420_v14 }
 0x186   : > { %v1371_v61 = vpop.f32.mrb[76].mxu0 }
 0x187   : > { %1471 = vst.msk [vmem:[%s2520_s13 + $0x4] sm:$0xf] %vm1469_vm8, %v1665_v13  ;;  %v1252_v17 = vpop.f32.mrb[76].mxu1  ;;  %v1404_v60 = vadd.f32 %v1371_v61, %v1277_v38  ;;  %v1939_v0 = vpop.f32.mrb[77].mxu0 }
 0x188   : > { %v1279_v21 = vadd.f32 %v1252_v17, %v1130_v15  ;;  %v1919_v6 = vpop.f32.mrb[77].mxu1  ;;  %v1374_v7 = vpop.f32.mrb[78].mxu0 }
 0x189   : > { %v1421_v3 = vadd.f32 %v2514_v26, %v1404_v60  ;;  %v1255_v63 = vpop.f32.mrb[78].mxu1  ;;  %v1405_v20 = vadd.f32 %v1374_v7, %v1278_v4  ;;  %v1940_v51 = vpop.f32.mrb[79].mxu0 }
 0x18a   : > { %v1280_v2 = vadd.f32 %v1255_v63, %v1131_v41  ;;  %v1920_v59 = vpop.f32.mrb[79].mxu1 }
 0x18b   : > { %v1666_v49 = vpack.c.bf16 %v1421_v3, %v1421_v3  ;;  %v1422_v29 = vadd.f32 %v2514_v26, %v1405_v20 }
 0x18d   : > { %1472 = vst.msk [vmem:[%s2520_s13 + $0x8] sm:$0xf] %vm1469_vm8, %v1666_v49  ;;  %v1667_v62 = vpack.c.bf16 %v1422_v29, %v1422_v29 }
 0x18e   : > { %v1379_v9 = vpop.f32.mrb[80].mxu0 }
 0x18f   : > { %1473 = vst.msk [vmem:[%s2520_s13 + $0xc] sm:$0xf] %vm1469_vm8, %v1667_v62  ;;  %v1260_v15 = vpop.f32.mrb[80].mxu1  ;;  %v1406_v40 = vadd.f32 %v1379_v9, %v1279_v21  ;;  %v1943_v12 = vpop.f32.mrb[81].mxu0 }
 0x190   : > { %v1281_v36 = vadd.f32 %v1260_v15, %v2502_v52  ;;  %v1923_v46 = vpop.f32.mrb[81].mxu1  ;;  %v1382_v55 = vpop.f32.mrb[82].mxu0 }
 0x191   : > { %v1423_v41 = vadd.f32 %v2514_v26, %v1406_v40  ;;  %v1263_v47 = vpop.f32.mrb[82].mxu1  ;;  %v1407_v42 = vadd.f32 %v1382_v55, %v1280_v2  ;;  %v1944_v53 = vpop.f32.mrb[83].mxu0 }
 0x192   : > { %v1282_v43 = vadd.f32 %v1263_v47, %v2504_v39  ;;  %v1924_v56 = vpop.f32.mrb[83].mxu1 }
 0x193   : > { %v1668_v48 = vpack.c.bf16 %v1423_v41, %v1423_v41  ;;  %v1424_v54 = vadd.f32 %v2514_v26, %v1407_v42 }
 0x195   : > { %1474 = vst.msk [vmem:[%s2520_s13 + $0x10] sm:$0xf] %vm1469_vm8, %v1668_v48  ;;  %v1669_v50 = vpack.c.bf16 %v1424_v54, %v1424_v54 }
 0x196   : > { %v1387_v11 = vpop.f32.mrb[84].mxu0 }
 0x197   : > { %1475 = vst.msk [vmem:[%s2520_s13 + $0x14] sm:$0xf] %vm1469_vm8, %v1669_v50  ;;  %v1268_v52 = vpop.f32.mrb[84].mxu1  ;;  %v1408_v10 = vadd.f32 %v1387_v11, %v1281_v36  ;;  %v1947_v16 = vpop.f32.mrb[85].mxu0 }
 0x198   : > { %v1283_v25 = vadd.f32 %v1268_v52, %v2506_v19  ;;  %v1927_v8 = vpop.f32.mrb[85].mxu1  ;;  %v1390_v1 = vpop.f32.mrb[86].mxu0 }
 0x199   : > { %v1425_v39 = vadd.f32 %v2514_v26, %v1408_v10  ;;  %v1271_v24 = vpop.f32.mrb[86].mxu1  ;;  %v1409_v28 = vadd.f32 %v1390_v1, %v1282_v43  ;;  %v1948_v33 = vpop.f32.mrb[87].mxu0 }
 0x19a   : > { %v1284_v23 = vadd.f32 %v1271_v24, %v2508_v30  ;;  %v1928_v34 = vpop.f32.mrb[87].mxu1 }
 0x19b   : > { %v1670_v18 = vpack.c.bf16 %v1425_v39, %v1425_v39  ;;  %v1426_v37 = vadd.f32 %v2514_v26, %v1409_v28 }
 0x19d   : > { %1476 = vst.msk [vmem:[%s2520_s13 + $0x18] sm:$0xf] %vm1469_vm8, %v1670_v18  ;;  %v1671_v22 = vpack.c.bf16 %v1426_v37, %v1426_v37 }
 0x19e   : > { %v1395_v31 = vpop.f32.mrb[88].mxu0 }
 0x19f   : > { %1477 = vst.msk [vmem:[%s2520_s13 + $0x1c] sm:$0xf] %vm1469_vm8, %v1671_v22  ;;  %v1410_v19 = vadd.f32 %v1395_v31, %v1283_v25  ;;  %v1951_v38 = vpop.f32.mrb[89].mxu0 }
 0x1a0   : > { %v1398_v44 = vpop.f32.mrb[90].mxu0 }
 0x1a1   : > { %v1427_v27 = vadd.f32 %v2514_v26, %v1410_v19  ;;  %v1411_v45 = vadd.f32 %v1398_v44, %v1284_v23  ;;  %v1952_v57 = vpop.f32.mrb[91].mxu0 }
 0x1a3   : > { %v1672_v30 = vpack.c.bf16 %v1427_v27, %v1427_v27  ;;  %v1428_v35 = vadd.f32 %v2514_v26, %v1411_v45 }
 0x1a5   : > { %1478 = vst.msk [vmem:[%s2520_s13 + $0x20] sm:$0xf] %vm1469_vm8, %v1672_v30  ;;  %v1673_v58 = vpack.c.bf16 %v1428_v35, %v1428_v35 }
 0x1a7   : > { %1480 = vst.msk [vmem:[%s2520_s13 + $0x24] sm:$0x7] %vm1479_vm9, %v1673_v58 }
 0x1a8 PF: > { %s13_s12 = sadd.s32 1, %s2006_s12  }
 0x1a9   : > { %p10_p4 = scmp.ge.s32.totalorder %s13_s12, 4  }
 0x1ab   :  { %12 = sbr.rel (!%p10_p4) target bundleno = 1 (0x1), region = 70 }

// kernel: _lambda_.26
= control target key start
LH: loop header
LB: loop body
LE: loop exit
PB: predicated region body
PF: predicated region fallthrough
CT: control target
= control target key end

     0   :  { %s1255_s12 = smov 0   ;;  %s1381_s0 = inlined_call_operand.vmem [shape: bf16[2,36,32], index: 0, kind: input, shape index: {}]   ;;  %s1382_s1 = inlined_call_operand.vmem [shape: bf16[9,32,8], index: 1, kind: input, shape index: {}]   ;;  %s1383_s2 = inlined_call_operand.vmem [shape: f32[1,8], index: 2, kind: input, shape index: {}]   ;;  %s1384_s3 = inlined_call_operand.vmem [shape: bf16[2,22,8], index: 3, kind: output, shape index: {}]  }
   0x1 LB: > { %s995_s13 = sadd.s32 4294967295, %s1233_s12   ;;  %p999_p0 = scmp.ge.s32.totalorder %s1233_s12, 1  ;;  %s1233_s12 = sphi %s1255_s12, %s13_s12  }
   0x2   : > { %p137_p1 = scmp.lt.s32.totalorder %s1233_s12, 3 }
   0x4   : > { %p138_p2 = pnand %p999_p0, %p137_p1 }
   0x5   : > { %v1203_v0 = vld [vmem:[%s1382_s1 + $0x10] sm:$0xff] (!%p138_p2)   ;;  %p161_p3 = scmp.lt.s32.totalorder (!%p138_p2), %s995_s13, 1  ;;  %v1204_v1 = vld [vmem:[%s1382_s1] sm:$0xff] (!%p138_p2)   ;;  %v1205_v2 = vld [vmem:[%s1382_s1 + $0x18] sm:$0xff] (!%p138_p2)   ;;  %vm222_vm0 = vcmask (!%p138_p2), 261120   ;;  %vm346_vm2 = vcmask (!%p138_p2), 1046528  }
   0x6   : > { %141 = sbr.rel (%p138_p2) target bundleno = 282 (0x11a), region = 32  ;;  %1121 = vmatprep.subr.bf16.mxu0 (!%p138_p2), %v1203_v0  ;;  %1129 = vmatprep.subr.bf16.mxu1 (!%p138_p2), %v1204_v1  ;;  %v1206_v3 = vld [vmem:[%s1382_s1 + $0x8] sm:$0xff] (!%p138_p2)   ;;  %v1209_v4 = vld [vmem:[%s1382_s1 + $0x20] sm:$0xff] (!%p138_p2)   ;;  %v1210_v5 = vld [vmem:[%s1382_s1 + $0x30] sm:$0xff] (!%p138_p2)   ;;  %vm194_vm1 = vsmask.f32 (!%p138_p2), 7424 }
   0x7   : > { %1122 = vmatpush3.bf16.msra.mxu0 (!%p138_p2), %v1203_v0  ;;  %1130 = vmatpush3.bf16.msra.mxu1 (!%p138_p2), %v1204_v1  ;;  %v1212_v11 = vld [vmem:[%s1382_s1 + $0x38] sm:$0xff] (!%p138_p2)   ;;  %vm427_vm3 = vcmask (!%p138_p2), 1044480   ;;  %v1215_v26 = vld [vmem:[%s1382_s1 + $0x50] sm:$0xff] (!%p138_p2)   ;;  %v1211_v32 = vld [vmem:[%s1382_s1 + $0x28] sm:$0xff] (!%p138_p2)   ;;  %vm505_vm4 = vsmask.f32 (!%p138_p2), 4352 }
   0x8   : > { %1123 = vmatprep.subr.bf16.mxu0 (!%p138_p2), %v1205_v2  ;;  %1131 = vmatprep.subr.bf16.mxu1 (!%p138_p2), %v1206_v3  ;;  %v1217_v36 = vld [vmem:[%s1382_s1 + $0x58] sm:$0xff] (!%p138_p2)   ;;  %v1213_v41 = vld [vmem:[%s1382_s1 + $0x40] sm:$0xff] (!%p138_p2)   ;;  %v1221_v47 = vld [vmem:[%s1382_s1 + $0x70] sm:$0xff] (!%p138_p2)   ;;  %vm749_vm5 = vsmask.f32 (!%p138_p2), 5376  ;;  %vm671_vm6 = vcmask (!%p138_p2), 1045504  }
   0x9   : > { %v1216_v52 = vld [vmem:[%s1382_s1 + $0x48] sm:$0xff] (!%p138_p2)   ;;  %v1223_v57 = vld [vmem:[%s1382_s1 + $0x78] sm:$0xff] (!%p138_p2)   ;;  %v1218_v59 = vld [vmem:[%s1382_s1 + $0x60] sm:$0xff] (!%p138_p2)   ;;  %vm938_vm7 = vcmask (!%p138_p2), 59392   ;;  %vm935_vm8 = vcmask (!%p138_p2), 60416  }
   0xa   : > { %v1222_v63 = vld [vmem:[%s1382_s1 + $0x68] sm:$0xff] (!%p138_p2)   ;;  %v1225_v1 = vld [vmem:[%s1382_s1 + $0x80] sm:$0xff] (!%p138_p2)  }
   0xb   : > { %1124 = vmatpush3.bf16.msra.mxu0 (!%p138_p2), %v1205_v2  ;;  %1132 = vmatpush3.bf16.msra.mxu1 (!%p138_p2), %v1206_v3 }
   0xc   : > { %1137 = vmatprep.subr.bf16.mxu0 (!%p138_p2), %v1209_v4  ;;  %1145 = vmatprep.subr.bf16.mxu1 (!%p138_p2), %v1210_v5 }
   0xd   : > { %s1386_s13 = smov (!%p161_p3, %s995_s13), 1 }
   0xe   : > { %s1193_s22 = smul.u32 20, %s1386_s13 }
   0xf   : > { %s1194_s29 = smul.u32 12, %s1386_s13 }
  0x10   : > { %s1284_s27 = scalar_lea.vmem %s1381_s0, %s1193_s22 }
  0x11   : > { %v172_v6 = vld [vmem:[%s1284_s27] sm:$0xf]  ;;  %v173_v7 = vld [vmem:[%s1284_s27 + $0x4] sm:$0xf]  ;;  %v174_v8 = vld [vmem:[%s1284_s27 + $0x8] sm:$0xf]  ;;  %s170_s7 = scalar_lea.vmem %s1384_s3, %s1194_s29 }
  0x12   : > { %v1006_v9 = vcombine.low %v172_v6, %v173_v7  ;;  %v1292_v10 = vcombine.low %v174_v8, %v174_v8  ;;  %v1304_v18 = vld [vmem:[%s1284_s27 + $0xc] sm:$0xf]  ;;  %v1310_v30 = vcombine.low %v173_v7, %v174_v8  ;;  %v176_v39 = vld [vmem:[%s1284_s27 + $0x10] sm:$0x3] }
  0x13   : > { %v1028_v21 = vcombine.low %v174_v8, %v1304_v18  ;;  %v1055_v44 = vcombine.low %v1304_v18, %v176_v39  ;;  %v1046_v51 = vcombine.low %v1304_v18, %v1304_v18 }
  0x14   : > { %v196_v12 = vshrl.u32 %v1006_v9, 16  ;;  %v198_v13 = vshll.u32 %v1006_v9, 16  ;;  %v203_v14 = vshll.u32 %v1292_v10, 16  ;;  %v207_v15 = vshrl.u32 %v1292_v10, 16  ;;  %1133 = vmatprep.mubr.msk.bf16.mxu1 %vm222_vm0, %v1006_v9 }
  0x15   : > { %1134 = vmatmul.mubr.msk.bf16.vlgmr.msra.gmra.mrb[0].mxu1 %vm222_vm0, %v1292_v10  ;;  %v347_v16 = vrot.slane %v1006_v9, 1  ;;  %v348_v17 = vrot.slane %v1292_v10, 1  ;;  %v428_v22 = vrot.slane %v1006_v9, 3  ;;  %v429_v25 = vrot.slane %v1028_v21, 3 }
  0x16   : > { %v200_v19 = vrot.slane %v198_v13, 1  ;;  %v205_v20 = vrot.slane %v203_v14, 1  ;;  %1146 = vmatpush3.bf16.msra.mxu1 %v1210_v5  ;;  %v506_v27 = vrot.slane %v196_v12, 3  ;;  %v510_v28 = vshrl.u32 %v1028_v21, 16 }
  0x17   : > { %1147 = vmatprep.subr.bf16.mxu1 %v1212_v11  ;;  %v513_v29 = vshll.u32 %v1028_v21, 16  ;;  %v349_v33 = vsel %vm346_vm2, %v347_v16, %v348_v17  ;;  %v430_v34 = vsel %vm427_vm3, %v428_v22, %v429_v25  ;;  %v507_v35 = vrot.slane %v198_v13, 4 }
  0x18   : > { %v201_v23 = vor.u32 %v200_v19, %v196_v12  ;;  %v209_v24 = vor.u32 %v207_v15, %v205_v20  ;;  %1149 = vmatprep.mubr.msk.bf16.mxu1 %vm222_vm0, %v430_v34  ;;  %v512_v37 = vrot.slane %v510_v28, 3  ;;  %v750_v40 = vshrl.u32 %v1310_v30, 16 }
  0x19   : > { %v515_v38 = vrot.slane %v513_v29, 4  ;;  %v508_v42 = vor.u32 %v507_v35, %v506_v27  ;;  %v753_v45 = vshll.u32 %v1310_v30, 16  ;;  %v758_v49 = vshrl.u32 %v1055_v44, 16 }
  0x1a   : > { %v206_v31 = vsel %vm194_vm1, %v201_v23, %v205_v20  ;;  %1148 = vmatpush3.bf16.msra.mxu1 %v1212_v11  ;;  %v752_v46 = vrot.slane %v750_v40, 2  ;;  %v761_v50 = vshll.u32 %v1055_v44, 16  ;;  %v672_v60 = vrot.slane %v1310_v30, 2 }
  0x1b   : > { %1125 = vmatprep.mubr.msk.bf16.mxu0 %vm222_vm0, %v206_v31  ;;  %1161 = vmatprep.subr.bf16.mxu1 %v1215_v26  ;;  %v516_v43 = vor.u32 %v515_v38, %v512_v37  ;;  %v755_v48 = vrot.slane %v753_v45, 3  ;;  %v760_v55 = vrot.slane %v758_v49, 2  ;;  %v673_v61 = vrot.slane %v1055_v44, 2 }
  0x1c   : > { %1126 = vmatmul.mubr.msk.bf16.vlgmr.msra.gmra.mrb[0].mxu0 %vm222_vm0, %v209_v24  ;;  %v763_v56 = vrot.slane %v761_v50, 3  ;;  %v840_v2 = vrot.slane %v1310_v30, 3  ;;  %v841_v3 = vrot.slane %v1055_v44, 3 }
  0x1d   : > { %1138 = vmatpush3.bf16.msra.mxu0 %v1209_v4  ;;  %1141 = vmatprep.mubr.msk.bf16.mxu0 %vm222_vm0, %v349_v33  ;;  %v517_v53 = vsel %vm505_vm4, %v508_v42, %v516_v43  ;;  %v756_v54 = vor.u32 %v755_v48, %v752_v46  ;;  %v674_v0 = vsel %vm671_vm6, %v672_v60, %v673_v61  ;;  %v1226_v4 = vld [vmem:[%s1382_s1 + $0x88] sm:$0xff]   ;;  %v1076_v60 = vld [vmem:[%s1383_s2] ss:$0 sm:$0xff] }
  0x1e   : > { %1139 = vmatprep.subr.bf16.mxu0 %v1211_v32  ;;  %1150 = vmatmul.mubr.msk.bf16.vlgmr.msra.gmra.mrb[4].mxu1 %vm222_vm0, %v429_v25  ;;  %v764_v58 = vor.u32 %v763_v56, %v760_v55  ;;  %v842_v5 = vsel %vm427_vm3, %v840_v2, %v841_v3 }
  0x1f   : > { %1162 = vmatpush3.bf16.msra.mxu1 %v1215_v26  ;;  %1165 = vmatprep.mubr.msk.bf16.mxu1 %vm222_vm0, %v1310_v30 }
  0x20   : > { %1163 = vmatprep.subr.bf16.mxu1 %v1217_v36  ;;  %v765_v62 = vsel %vm749_vm5, %v756_v54, %v764_v58 }
  0x21   : > { %1140 = vmatpush3.bf16.msra.mxu0 %v1211_v32 }
  0x22   : > { %1153 = vmatprep.subr.bf16.mxu0 %v1213_v41 }
  0x23   : > { %1164 = vmatpush3.bf16.msra.mxu1 %v1217_v36 }
  0x24   : > { %1142 = vmatmul.mubr.msk.bf16.vlgmr.msra.gmra.mrb[4].mxu0 %vm222_vm0, %v348_v17  ;;  %1177 = vmatprep.subr.bf16.mxu1 %v1221_v47 }
  0x25   : > { %1154 = vmatpush3.bf16.msra.mxu0 %v1213_v41  ;;  %1157 = vmatprep.mubr.msk.bf16.mxu0 %vm222_vm0, %v517_v53 }
  0x26   : > { %1155 = vmatprep.subr.bf16.mxu0 %v1216_v52  ;;  %1166 = vmatmul.mubr.msk.bf16.vlgmr.msra.gmra.mrb[8].mxu1 %vm222_vm0, %v1046_v51 }
  0x27   : > { %1178 = vmatpush3.bf16.msra.mxu1 %v1221_v47  ;;  %1181 = vmatprep.mubr.msk.bf16.mxu1 %vm222_vm0, %v765_v62 }
  0x28   : > { %1179 = vmatprep.subr.bf16.mxu1 %v1223_v57 }
  0x29   : > { %1156 = vmatpush3.bf16.msra.mxu0 %v1216_v52 }
  0x2a   : > { %1169 = vmatprep.subr.bf16.mxu0 %v1218_v59 }
  0x2b   : > { %1180 = vmatpush3.bf16.msra.mxu1 %v1223_v57 }
  0x2c   : > { %1158 = vmatmul.mubr.msk.bf16.vlgmr.msra.gmra.mrb[8].mxu0 %vm222_vm0, %v516_v43 }
  0x2d   : > { %1170 = vmatpush3.bf16.msra.mxu0 %v1218_v59  ;;  %1173 = vmatprep.mubr.msk.bf16.mxu0 %vm222_vm0, %v674_v0 }
  0x2e   : > { %1171 = vmatprep.subr.bf16.mxu0 %v1222_v63  ;;  %1182 = vmatmul.mubr.msk.bf16.vlgmr.msra.gmra.mrb[12].mxu1 %vm222_vm0, %v764_v58 }
  0x31   : > { %1172 = vmatpush3.bf16.msra.mxu0 %v1222_v63 }
  0x32   : > { %1185 = vmatprep.subr.bf16.mxu0 %v1225_v1 }
  0x34   : > { %1174 = vmatmul.mubr.msk.bf16.vlgmr.msra.gmra.mrb[12].mxu0 %vm222_vm0, %v673_v61 }
  0x35   : > { %1186 = vmatpush3.bf16.msra.mxu0 %v1225_v1  ;;  %1189 = vmatprep.mubr.msk.bf16.mxu0 %vm222_vm0, %v842_v5 }
  0x36   : > { %1187 = vmatprep.subr.bf16.mxu0 %v1226_v4 }
  0x39   : > { %1188 = vmatpush3.bf16.msra.mxu0 %v1226_v4 }
  0x3c   : > { %1190 = vmatmul.mubr.msk.bf16.vlgmr.msra.gmra.mrb[16].mxu0 %vm222_vm0, %v841_v3 }
  0xe8   : > { %v1135_v6 = vpop.f32.mrb[0].mxu1 }
  0xe9   : > { %v327_v7 = vpop.f32.mrb[1].mxu1 }
  0xea   : > { %v1136_v8 = vpop.f32.mrb[2].mxu1 }
  0xeb   : > { %v330_v9 = vpop.f32.mrb[3].mxu1 }
  0xef   : > { %v1127_v10 = vpop.f32.mrb[0].mxu0 }
  0xf0   : > { %v336_v11 = vadd.f32 %v1135_v6, %v1127_v10  ;;  %v263_v12 = vpop.f32.mrb[1].mxu0 }
  0xf1   : > { %v328_v13 = vadd.f32 %v327_v7, %v263_v12  ;;  %v1128_v14 = vpop.f32.mrb[2].mxu0  ;;  %v1151_v15 = vpop.f32.mrb[4].mxu1 }
  0xf2   : > { %v266_v16 = vpop.f32.mrb[3].mxu0  ;;  %v483_v17 = vpop.f32.mrb[5].mxu1 }
  0xf3   : > { %v331_v18 = vadd.f32 %v330_v9, %v266_v16  ;;  %v1152_v19 = vpop.f32.mrb[6].mxu1 }
  0xf4   : > { %v486_v20 = vpop.f32.mrb[7].mxu1 }
  0xf7   : > { %v1143_v21 = vpop.f32.mrb[4].mxu0 }
  0xf8   : > { %v418_v22 = vadd.f32 %v1143_v21, %v336_v11  ;;  %v402_v23 = vpop.f32.mrb[5].mxu0 }
  0xf9   : > { %v416_v24 = vadd.f32 %v402_v23, %v328_v13  ;;  %v1144_v25 = vpop.f32.mrb[6].mxu0  ;;  %v1167_v26 = vpop.f32.mrb[8].mxu1 }
  0xfa   : > { %v499_v27 = vadd.f32 %v1151_v15, %v418_v22  ;;  %v405_v28 = vpop.f32.mrb[7].mxu0  ;;  %v646_v29 = vpop.f32.mrb[9].mxu1 }
  0xfb   : > { %v417_v30 = vadd.f32 %v405_v28, %v331_v18  ;;  %v497_v31 = vadd.f32 %v483_v17, %v416_v24  ;;  %v1168_v32 = vpop.f32.mrb[10].mxu1 }
  0xfc   : > { %v649_v33 = vpop.f32.mrb[11].mxu1 }
  0xfd   : > { %v498_v34 = vadd.f32 %v486_v20, %v417_v30 }
  0xff   : > { %v1159_v35 = vpop.f32.mrb[8].mxu0 }
 0x100   : > { %v586_v36 = vadd.f32 %v1159_v35, %v499_v27  ;;  %v570_v37 = vpop.f32.mrb[9].mxu0 }
 0x101   : > { %v584_v38 = vadd.f32 %v570_v37, %v497_v31  ;;  %v1160_v39 = vpop.f32.mrb[10].mxu0  ;;  %v1183_v40 = vpop.f32.mrb[12].mxu1 }
 0x102   : > { %v662_v41 = vadd.f32 %v1167_v26, %v586_v36  ;;  %v573_v42 = vpop.f32.mrb[11].mxu0  ;;  %v818_v43 = vpop.f32.mrb[13].mxu1 }
 0x103   : > { %v585_v44 = vadd.f32 %v573_v42, %v498_v34  ;;  %v660_v45 = vadd.f32 %v646_v29, %v584_v38  ;;  %v1184_v46 = vpop.f32.mrb[14].mxu1 }
 0x104   : > { %v821_v47 = vpop.f32.mrb[15].mxu1 }
 0x105   : > { %v661_v48 = vadd.f32 %v649_v33, %v585_v44 }
 0x107   : > { %v1175_v49 = vpop.f32.mrb[12].mxu0 }
 0x108   : > { %v743_v50 = vadd.f32 %v1175_v49, %v662_v41  ;;  %v727_v51 = vpop.f32.mrb[13].mxu0 }
 0x109   : > { %v741_v52 = vadd.f32 %v727_v51, %v660_v45  ;;  %v1176_v53 = vpop.f32.mrb[14].mxu0 }
 0x10a   : > { %v834_v54 = vadd.f32 %v1183_v40, %v743_v50  ;;  %v730_v55 = vpop.f32.mrb[15].mxu0 }
 0x10b   : > { %v742_v56 = vadd.f32 %v730_v55, %v661_v48  ;;  %v832_v57 = vadd.f32 %v818_v43, %v741_v52 }
 0x10d   : > { %v833_v58 = vadd.f32 %v821_v47, %v742_v56 }
 0x10f   : > { %v1191_v59 = vpop.f32.mrb[16].mxu0 }
 0x110   : > { %v911_v61 = vadd.f32 %v1191_v59, %v834_v54  ;;  %v895_v62 = vpop.f32.mrb[17].mxu0 }
 0x111   : > { %v909_v63 = vadd.f32 %v895_v62, %v832_v57  ;;  %v1192_v0 = vpop.f32.mrb[18].mxu0 }
 0x112   : > { %v921_v1 = vadd.f32 %v1076_v60, %v911_v61  ;;  %v898_v2 = vpop.f32.mrb[19].mxu0 }
 0x113   : > { %v919_v3 = vadd.f32 %v1076_v60, %v909_v63  ;;  %v910_v4 = vadd.f32 %v898_v2, %v833_v58 }
 0x114   : > { %v1084_v5 = vpack.c.bf16 %v921_v1, %v921_v1 }
 0x115   : > { %v1082_v6 = vpack.c.bf16 %v919_v3, %v919_v3  ;;  %v920_v7 = vadd.f32 %v1076_v60, %v910_v4 }
 0x116   : > { %939 = vst.msk [vmem:[%s170_s7 + $0x8] sm:$0x7] %vm938_vm7, %v1084_v5 }
 0x117   : > { %936 = vst.msk [vmem:[%s170_s7] sm:$0xf] %vm935_vm8, %v1082_v6  ;;  %v1083_v8 = vpack.c.bf16 %v920_v7, %v920_v7 }
 0x119   : > { %937 = vst.msk [vmem:[%s170_s7 + $0x4] sm:$0xf] %vm935_vm8, %v1083_v8 }
 0x11a PF: > { %s13_s12 = sadd.s32 1, %s1233_s12  }
 0x11b   : > { %p10_p4 = scmp.ge.s32.totalorder %s13_s12, 4  }
 0x11d   :  { %12 = sbr.rel (!%p10_p4) target bundleno = 1 (0x1), region = 70 }

// kernel: _lambda_.28
= control target key start
LH: loop header
LB: loop body
LE: loop exit
PB: predicated region body
PF: predicated region fallthrough
CT: control target
= control target key end

     0   :  { %s1013_s12 = smov 0   ;;  %s1140_s0 = inlined_call_operand.vmem [shape: bf16[2,9,32], index: 0, kind: input, shape index: {}]   ;;  %s1141_s1 = inlined_call_operand.vmem [shape: bf16[9,32,8], index: 1, kind: input, shape index: {}]   ;;  %s1142_s2 = inlined_call_operand.vmem [shape: f32[1,8], index: 2, kind: input, shape index: {}]   ;;  %s1143_s3 = inlined_call_operand.vmem [shape: bf16[2,1,8], index: 3, kind: output, shape index: {}]  }
   0x1 LB: > { %s785_s13 = sadd.s32 4294967295, %s989_s12   ;;  %p789_p0 = scmp.ge.s32.totalorder %s989_s12, 1  ;;  %s989_s12 = sphi %s1013_s12, %s13_s12  }
   0x2   : > { %p137_p1 = scmp.lt.s32.totalorder %s989_s12, 3 }
   0x4   : > { %p138_p2 = pnand %p789_p0, %p137_p1 }
   0x5   : > { %v964_v0 = vld [vmem:[%s1141_s1 + $0x10] sm:$0xff] (!%p138_p2)   ;;  %v991_v1 = vmov (!%p138_p2), 0.0   ;;  %v965_v2 = vld [vmem:[%s1141_s1] sm:$0xff] (!%p138_p2)   ;;  %v966_v3 = vld [vmem:[%s1141_s1 + $0x18] sm:$0xff] (!%p138_p2)   ;;  %vm992_vm0 = vmmov (!%p138_p2), 0   ;;  %p159_p3 = scmp.lt.s32.totalorder (!%p138_p2), %s785_s13, 1 }
   0x6   : > { %141 = sbr.rel (%p138_p2) target bundleno = 273 (0x111), region = 32  ;;  %882 = vmatprep.subr.bf16.mxu0 (!%p138_p2), %v991_v1  ;;  %890 = vmatprep.subr.bf16.mxu1 (!%p138_p2), %v991_v1  ;;  %v967_v4 = vld [vmem:[%s1141_s1 + $0x8] sm:$0xff] (!%p138_p2)   ;;  %vm197_vm1 = vcmask (!%p138_p2), 261120   ;;  %v970_v5 = vld [vmem:[%s1141_s1 + $0x30] sm:$0xff] (!%p138_p2)   ;;  %v969_v8 = vld [vmem:[%s1141_s1 + $0x20] sm:$0xff] (!%p138_p2)   ;;  %vm732_vm2 = vcmask (!%p138_p2), 57344  }
   0x7   : > { %883 = vmatpush3.bf16.msra.mxu0 (!%p138_p2), %v964_v0  ;;  %886 = vmatprep.mubr.msk.bf16.mxu0 (!%p138_p2), %vm992_vm0, %v991_v1  ;;  %v972_v10 = vld [vmem:[%s1141_s1 + $0x38] sm:$0xff] (!%p138_p2)   ;;  %v971_v11 = vld [vmem:[%s1141_s1 + $0x28] sm:$0xff] (!%p138_p2)   ;;  %v974_v13 = vld [vmem:[%s1141_s1 + $0x50] sm:$0xff] (!%p138_p2)   ;;  %vm733_vm3 = vsmask.f32 (!%p138_p2), 256 }
   0x8   : > { %891 = vmatpush3.bf16.msra.mxu1 (!%p138_p2), %v965_v2  ;;  %884 = vmatprep.subr.bf16.mxu0 (!%p138_p2), %v991_v1  ;;  %v973_v15 = vld [vmem:[%s1141_s1 + $0x40] sm:$0xff] (!%p138_p2)   ;;  %v976_v16 = vld [vmem:[%s1141_s1 + $0x58] sm:$0xff] (!%p138_p2)   ;;  %v975_v17 = vld [vmem:[%s1141_s1 + $0x48] sm:$0xff] (!%p138_p2)  }
   0x9   : > { %892 = vmatprep.subr.bf16.mxu1 (!%p138_p2), %v991_v1  ;;  %894 = vmatprep.mubr.msk.bf16.mxu1 (!%p138_p2), %vm992_vm0, %v991_v1  ;;  %v978_v19 = vld [vmem:[%s1141_s1 + $0x70] sm:$0xff] (!%p138_p2)   ;;  %v977_v21 = vld [vmem:[%s1141_s1 + $0x60] sm:$0xff] (!%p138_p2)   ;;  %v980_v22 = vld [vmem:[%s1141_s1 + $0x78] sm:$0xff] (!%p138_p2)  }
   0xa   : > { %v979_v23 = vld [vmem:[%s1141_s1 + $0x68] sm:$0xff] (!%p138_p2)   ;;  %v981_v26 = vld [vmem:[%s1141_s1 + $0x80] sm:$0xff] (!%p138_p2)   ;;  %vm734_vm4 = vmand (!%p138_p2), %vm732_vm2, %vm733_vm3 }
   0xb   : > { %885 = vmatpush3.bf16.msra.mxu0 (!%p138_p2), %v966_v3  ;;  %v982_v27 = vld [vmem:[%s1141_s1 + $0x88] sm:$0xff] (!%p138_p2)  }
   0xc   : > { %893 = vmatpush3.bf16.msra.mxu1 (!%p138_p2), %v967_v4  ;;  %898 = vmatprep.subr.bf16.mxu0 (!%p138_p2), %v991_v1 }
   0xd   : > { %s1145_s13 = smov (!%p159_p3, %s785_s13), 1  ;;  %906 = vmatprep.subr.bf16.mxu1 %v991_v1 }
   0xe   : > { %s854_s22 = sshll.u32 %s1145_s13, 3  ;;  %s166_s6 = scalar_lea.vmem %s1143_s3, %s1145_s13 }
   0xf   : > { %s1048_s25 = scalar_lea.vmem %s1140_s0, %s854_s22 }
  0x10   : > { %v168_v6 = vld [vmem:[%s1048_s25] sm:$0xf]  ;;  %v169_v28 = vld [vmem:[%s1048_s25 + $0x4] sm:$0x1] }
  0x11   : > { %v796_v7 = vcombine.low %v168_v6, %v168_v6  ;;  %895 = vmatmul.mubr.msk.bf16.vlgmr.msra.gmra.mrb[0].mxu1 %vm197_vm1, %v168_v6 }
  0x12   : > { %907 = vmatpush3.bf16.msra.mxu1 %v970_v5  ;;  %910 = vmatprep.mubr.msk.bf16.mxu1 %vm992_vm0, %v991_v1  ;;  %v729_v5 = vld [vmem:[%s1142_s2] sm:$0x1] }
  0x13   : > { %v183_v9 = vshrl.u32 %v796_v7, 16  ;;  %908 = vmatprep.subr.bf16.mxu1 %v991_v1  ;;  %v301_v14 = vrot.slane %v796_v7, 1  ;;  %v425_v20 = vrot.slane %v796_v7, 2  ;;  %v549_v25 = vrot.slane %v796_v7, 3 }
  0x15   : > { %887 = vmatmul.mubr.msk.bf16.vlgmr.msra.gmra.mrb[0].mxu0 %vm197_vm1, %v183_v9  ;;  %v363_v12 = vrot.slane %v183_v9, 1  ;;  %v487_v18 = vrot.slane %v183_v9, 2  ;;  %v611_v24 = vrot.slane %v183_v9, 3 }
  0x16   : > { %899 = vmatpush3.bf16.msra.mxu0 %v969_v8  ;;  %902 = vmatprep.mubr.msk.bf16.mxu0 %vm992_vm0, %v991_v1 }
  0x17   : > { %900 = vmatprep.subr.bf16.mxu0 %v991_v1  ;;  %909 = vmatpush3.bf16.msra.mxu1 %v972_v10 }
  0x18   : > { %922 = vmatprep.subr.bf16.mxu1 %v991_v1 }
  0x1a   : > { %901 = vmatpush3.bf16.msra.mxu0 %v971_v11  ;;  %911 = vmatmul.mubr.msk.bf16.vlgmr.msra.gmra.mrb[4].mxu1 %vm197_vm1, %v363_v12  ;;  %v735_v11 = vld [vmem:[%s166_s6] sm:$0x1] }
  0x1b   : > { %914 = vmatprep.subr.bf16.mxu0 %v991_v1  ;;  %923 = vmatpush3.bf16.msra.mxu1 %v974_v13 }
  0x1c   : > { %924 = vmatprep.subr.bf16.mxu1 %v991_v1  ;;  %926 = vmatprep.mubr.msk.bf16.mxu1 %vm992_vm0, %v991_v1 }
  0x1d   : > { %903 = vmatmul.mubr.msk.bf16.vlgmr.msra.gmra.mrb[4].mxu0 %vm197_vm1, %v301_v14 }
  0x1e   : > { %915 = vmatpush3.bf16.msra.mxu0 %v973_v15  ;;  %918 = vmatprep.mubr.msk.bf16.mxu0 %vm992_vm0, %v991_v1 }
  0x1f   : > { %916 = vmatprep.subr.bf16.mxu0 %v991_v1  ;;  %925 = vmatpush3.bf16.msra.mxu1 %v976_v16 }
  0x20   : > { %938 = vmatprep.subr.bf16.mxu1 %v991_v1 }
  0x22   : > { %917 = vmatpush3.bf16.msra.mxu0 %v975_v17  ;;  %927 = vmatmul.mubr.msk.bf16.vlgmr.msra.gmra.mrb[8].mxu1 %vm197_vm1, %v487_v18 }
  0x23   : > { %930 = vmatprep.subr.bf16.mxu0 %v991_v1  ;;  %939 = vmatpush3.bf16.msra.mxu1 %v978_v19 }
  0x24   : > { %940 = vmatprep.subr.bf16.mxu1 %v991_v1  ;;  %942 = vmatprep.mubr.msk.bf16.mxu1 %vm992_vm0, %v991_v1 }
  0x25   : > { %919 = vmatmul.mubr.msk.bf16.vlgmr.msra.gmra.mrb[8].mxu0 %vm197_vm1, %v425_v20 }
  0x26   : > { %931 = vmatpush3.bf16.msra.mxu0 %v977_v21  ;;  %934 = vmatprep.mubr.msk.bf16.mxu0 %vm992_vm0, %v991_v1 }
  0x27   : > { %932 = vmatprep.subr.bf16.mxu0 %v991_v1  ;;  %941 = vmatpush3.bf16.msra.mxu1 %v980_v22 }
  0x2a   : > { %933 = vmatpush3.bf16.msra.mxu0 %v979_v23  ;;  %943 = vmatmul.mubr.msk.bf16.vlgmr.msra.gmra.mrb[12].mxu1 %vm197_vm1, %v611_v24 }
  0x2b   : > { %946 = vmatprep.subr.bf16.mxu0 %v991_v1 }
  0x2d   : > { %935 = vmatmul.mubr.msk.bf16.vlgmr.msra.gmra.mrb[12].mxu0 %vm197_vm1, %v549_v25 }
  0x2e   : > { %947 = vmatpush3.bf16.msra.mxu0 %v981_v26  ;;  %950 = vmatprep.mubr.msk.bf16.mxu0 %vm992_vm0, %v991_v1 }
  0x2f   : > { %948 = vmatprep.subr.bf16.mxu0 %v991_v1 }
  0x32   : > { %949 = vmatpush3.bf16.msra.mxu0 %v982_v27 }
  0x35   : > { %951 = vmatmul.mubr.msk.bf16.vlgmr.msra.gmra.mrb[16].mxu0 %vm197_vm1, %v169_v28 }
  0xe4   : > { %v290_v29 = vpop.f32.mrb[0].mxu1 }
  0xe5   : > { %v896_v30 = vpop.f32.mrb[1].mxu1 }
  0xe6   : > { %v293_v31 = vpop.f32.mrb[2].mxu1 }
  0xe7   : > { %v897_v33 = vpop.f32.mrb[3].mxu1 }
  0xe8   : > { %v235_v32 = vpop.f32.mrb[0].mxu0 }
  0xe9   : > { %v291_v34 = vadd.f32 %v290_v29, %v235_v32  ;;  %v888_v35 = vpop.f32.mrb[1].mxu0 }
  0xea   : > { %v238_v36 = vpop.f32.mrb[2].mxu0 }
  0xeb   : > { %v889_v37 = vpop.f32.mrb[3].mxu0 }
  0xed   : > { %v413_v38 = vpop.f32.mrb[4].mxu1 }
  0xee   : > { %v912_v39 = vpop.f32.mrb[5].mxu1 }
  0xef   : > { %v416_v40 = vpop.f32.mrb[6].mxu1 }
  0xf0   : > { %v351_v41 = vpop.f32.mrb[4].mxu0  ;;  %v913_v42 = vpop.f32.mrb[7].mxu1 }
  0xf1   : > { %v357_v43 = vadd.f32 %v351_v41, %v291_v34  ;;  %v904_v44 = vpop.f32.mrb[5].mxu0 }
  0xf2   : > { %v354_v45 = vpop.f32.mrb[6].mxu0 }
  0xf3   : > { %v419_v46 = vadd.f32 %v413_v38, %v357_v43  ;;  %v905_v47 = vpop.f32.mrb[7].mxu0 }
  0xf5   : > { %v537_v48 = vpop.f32.mrb[8].mxu1 }
  0xf6   : > { %v928_v49 = vpop.f32.mrb[9].mxu1 }
  0xf7   : > { %v540_v50 = vpop.f32.mrb[10].mxu1 }
  0xf8   : > { %v475_v51 = vpop.f32.mrb[8].mxu0  ;;  %v929_v52 = vpop.f32.mrb[11].mxu1 }
  0xf9   : > { %v481_v53 = vadd.f32 %v475_v51, %v419_v46  ;;  %v920_v54 = vpop.f32.mrb[9].mxu0 }
  0xfa   : > { %v478_v55 = vpop.f32.mrb[10].mxu0 }
  0xfb   : > { %v543_v56 = vadd.f32 %v537_v48, %v481_v53  ;;  %v921_v57 = vpop.f32.mrb[11].mxu0 }
  0xfd   : > { %v661_v58 = vpop.f32.mrb[12].mxu1 }
  0xfe   : > { %v944_v59 = vpop.f32.mrb[13].mxu1 }
  0xff   : > { %v664_v60 = vpop.f32.mrb[14].mxu1 }
 0x100   : > { %v599_v61 = vpop.f32.mrb[12].mxu0  ;;  %v945_v62 = vpop.f32.mrb[15].mxu1 }
 0x101   : > { %v605_v63 = vadd.f32 %v599_v61, %v543_v56  ;;  %v936_v0 = vpop.f32.mrb[13].mxu0 }
 0x102   : > { %v602_v1 = vpop.f32.mrb[14].mxu0 }
 0x103   : > { %v667_v2 = vadd.f32 %v661_v58, %v605_v63  ;;  %v937_v3 = vpop.f32.mrb[15].mxu0 }
 0x108   : > { %v722_v4 = vpop.f32.mrb[16].mxu0 }
 0x109   : > { %v728_v6 = vadd.f32 %v722_v4, %v667_v2  ;;  %v952_v7 = vpop.f32.mrb[17].mxu0 }
 0x10a   : > { %v725_v8 = vpop.f32.mrb[18].mxu0 }
 0x10b   : > { %v730_v9 = vadd.f32 %v729_v5, %v728_v6  ;;  %v953_v10 = vpop.f32.mrb[19].mxu0 }
 0x10d   : > { %v731_v12 = vpack.c.bf16 %v730_v9, %v730_v9 }
 0x10f   : > { %v736_v13 = vsel %vm734_vm4, %v731_v12, %v735_v11 }
 0x110   : > { %737 = vst [vmem:[%s166_s6] sm:$0x1] %v736_v13 }
 0x111 PF: > { %s13_s12 = sadd.s32 1, %s989_s12  }
 0x112   : > { %p10_p4 = scmp.ge.s32.totalorder %s13_s12, 4  }
 0x114   :  { %12 = sbr.rel (!%p10_p4) target bundleno = 1 (0x1), region = 70 }

// kernel: _lambda_.27
= control target key start
LH: loop header
LB: loop body
LE: loop exit
PB: predicated region body
PF: predicated region fallthrough
CT: control target
= control target key end

     0   :  { %s1050_s12 = smov 0   ;;  %s1179_s0 = inlined_call_operand.vmem [shape: bf16[2,16,32], index: 0, kind: input, shape index: {}]   ;;  %s1180_s1 = inlined_call_operand.vmem [shape: bf16[9,32,8], index: 1, kind: input, shape index: {}]   ;;  %s1181_s2 = inlined_call_operand.vmem [shape: f32[1,8], index: 2, kind: input, shape index: {}]   ;;  %s1182_s3 = inlined_call_operand.vmem [shape: bf16[2,6,8], index: 3, kind: output, shape index: {}]  }
   0x1 LB: > { %s816_s13 = sadd.s32 4294967295, %s1026_s12   ;;  %p820_p0 = scmp.ge.s32.totalorder %s1026_s12, 1  ;;  %s1026_s12 = sphi %s1050_s12, %s13_s12  }
   0x2   : > { %p137_p1 = scmp.lt.s32.totalorder %s1026_s12, 3 }
   0x4   : > { %p138_p2 = pnand %p820_p0, %p137_p1 }
   0x5   : > { %v999_v0 = vld [vmem:[%s1180_s1 + $0x10] sm:$0xff] (!%p138_p2)   ;;  %v1028_v1 = vmov (!%p138_p2), 0.0   ;;  %v1000_v2 = vld [vmem:[%s1180_s1] sm:$0xff] (!%p138_p2)   ;;  %v1001_v3 = vld [vmem:[%s1180_s1 + $0x18] sm:$0xff] (!%p138_p2)   ;;  %vm1029_vm0 = vmmov (!%p138_p2), 0   ;;  %p160_p3 = scmp.lt.s32.totalorder (!%p138_p2), %s816_s13, 1 }
   0x6   : > { %141 = sbr.rel (%p138_p2) target bundleno = 276 (0x114), region = 32  ;;  %917 = vmatprep.subr.bf16.mxu0 (!%p138_p2), %v1028_v1  ;;  %925 = vmatprep.subr.bf16.mxu1 (!%p138_p2), %v1028_v1  ;;  %v1002_v4 = vld [vmem:[%s1180_s1 + $0x8] sm:$0xff] (!%p138_p2)   ;;  %vm203_vm1 = vcmask (!%p138_p2), 261120   ;;  %v1006_v5 = vld [vmem:[%s1180_s1 + $0x30] sm:$0xff] (!%p138_p2)   ;;  %v1008_v12 = vld [vmem:[%s1180_s1 + $0x38] sm:$0xff] (!%p138_p2)   ;;  %vm761_vm2 = vcmask (!%p138_p2), 59392  }
   0x7   : > { %918 = vmatpush3.bf16.msra.mxu0 (!%p138_p2), %v999_v0  ;;  %921 = vmatprep.mubr.msk.bf16.mxu0 (!%p138_p2), %vm1029_vm0, %v1028_v1  ;;  %v1005_v14 = vld [vmem:[%s1180_s1 + $0x20] sm:$0xff] (!%p138_p2)   ;;  %v1010_v17 = vld [vmem:[%s1180_s1 + $0x50] sm:$0xff] (!%p138_p2)   ;;  %v1007_v18 = vld [vmem:[%s1180_s1 + $0x28] sm:$0xff] (!%p138_p2)  }
   0x8   : > { %926 = vmatpush3.bf16.msra.mxu1 (!%p138_p2), %v1000_v2  ;;  %919 = vmatprep.subr.bf16.mxu0 (!%p138_p2), %v1028_v1  ;;  %v1012_v20 = vld [vmem:[%s1180_s1 + $0x58] sm:$0xff] (!%p138_p2)   ;;  %v1009_v24 = vld [vmem:[%s1180_s1 + $0x40] sm:$0xff] (!%p138_p2)   ;;  %v1014_v27 = vld [vmem:[%s1180_s1 + $0x70] sm:$0xff] (!%p138_p2)  }
   0x9   : > { %927 = vmatprep.subr.bf16.mxu1 (!%p138_p2), %v1028_v1  ;;  %929 = vmatprep.mubr.msk.bf16.mxu1 (!%p138_p2), %vm1029_vm0, %v1028_v1  ;;  %v1011_v30 = vld [vmem:[%s1180_s1 + $0x48] sm:$0xff] (!%p138_p2)   ;;  %v1016_v33 = vld [vmem:[%s1180_s1 + $0x78] sm:$0xff] (!%p138_p2)   ;;  %v1013_v35 = vld [vmem:[%s1180_s1 + $0x60] sm:$0xff] (!%p138_p2)  }
   0xa   : > { %v1015_v37 = vld [vmem:[%s1180_s1 + $0x68] sm:$0xff] (!%p138_p2)   ;;  %v1017_v38 = vld [vmem:[%s1180_s1 + $0x80] sm:$0xff] (!%p138_p2)  }
   0xb   : > { %920 = vmatpush3.bf16.msra.mxu0 (!%p138_p2), %v1001_v3  ;;  %v1019_v39 = vld [vmem:[%s1180_s1 + $0x88] sm:$0xff] (!%p138_p2)  }
   0xc   : > { %928 = vmatpush3.bf16.msra.mxu1 (!%p138_p2), %v1002_v4  ;;  %933 = vmatprep.subr.bf16.mxu0 (!%p138_p2), %v1028_v1 }
   0xd   : > { %s1184_s13 = smov (!%p160_p3, %s816_s13), 1  ;;  %941 = vmatprep.subr.bf16.mxu1 %v1028_v1 }
   0xe   : > { %s889_s22 = sshll.u32 %s1184_s13, 3  ;;  %s823_s4 = sshll.u32 %s1184_s13, 2 }
   0xf   : > { %s164_s25 = scalar_lea.vmem %s1179_s0, %s889_s22  ;;  %s168_s7 = scalar_lea.vmem %s1182_s3, %s823_s4 }
  0x10   : > { %v170_v6 = vld [vmem:[%s164_s25] sm:$0xf]  ;;  %v1088_v7 = vld [vmem:[%s164_s25 + $0x4] sm:$0xf] }
  0x11   : > { %v828_v8 = vcombine.low %v170_v6, %v170_v6  ;;  %930 = vmatmul.mubr.msk.bf16.vlgmr.msra.gmra.mrb[0].mxu1 %vm203_vm1, %v170_v6  ;;  %v846_v11 = vcombine.low %v170_v6, %v1088_v7  ;;  %v875_v19 = vcombine.low %v1088_v7, %v1088_v7 }
  0x12   : > { %942 = vmatpush3.bf16.msra.mxu1 %v1006_v5  ;;  %945 = vmatprep.mubr.msk.bf16.mxu1 %vm1029_vm0, %v1028_v1 }
  0x13   : > { %v185_v9 = vshrl.u32 %v828_v8, 16  ;;  %v187_v10 = vshll.u32 %v828_v8, 16  ;;  %943 = vmatprep.subr.bf16.mxu1 %v1028_v1  ;;  %v372_v16 = vrot.slane %v846_v11, 2  ;;  %v307_v21 = vrot.slane %v828_v8, 1 }
  0x14   : > { %v435_v22 = vshrl.u32 %v846_v11, 16  ;;  %v438_v23 = vshll.u32 %v846_v11, 16  ;;  %v503_v25 = vrot.slane %v846_v11, 3  ;;  %v630_v26 = vshll.u32 %v875_v19, 16 }
  0x15   : > { %v189_v13 = vrot.slane %v187_v10, 1  ;;  %v628_v31 = vshrl.u32 %v875_v19, 16  ;;  %v695_v40 = vrot.slane %v875_v19, 1 }
  0x16   : > { %944 = vmatpush3.bf16.msra.mxu1 %v1008_v12  ;;  %v437_v28 = vrot.slane %v435_v22, 2  ;;  %v440_v29 = vrot.slane %v438_v23, 3  ;;  %v632_v32 = vrot.slane %v630_v26, 1 }
  0x17   : > { %v190_v15 = vor.u32 %v189_v13, %v185_v9  ;;  %957 = vmatprep.subr.bf16.mxu1 %v1028_v1 }
  0x18   : > { %v441_v34 = vor.u32 %v440_v29, %v437_v28  ;;  %v633_v36 = vor.u32 %v632_v32, %v628_v31 }
  0x19   : > { %922 = vmatmul.mubr.msk.bf16.vlgmr.msra.gmra.mrb[0].mxu0 %vm203_vm1, %v190_v15  ;;  %946 = vmatmul.mubr.msk.bf16.vlgmr.msra.gmra.mrb[4].mxu1 %vm203_vm1, %v372_v16 }
  0x1a   : > { %934 = vmatpush3.bf16.msra.mxu0 %v1005_v14  ;;  %937 = vmatprep.mubr.msk.bf16.mxu0 %vm1029_vm0, %v1028_v1 }
  0x1b   : > { %935 = vmatprep.subr.bf16.mxu0 %v1028_v1  ;;  %958 = vmatpush3.bf16.msra.mxu1 %v1010_v17  ;;  %v886_v17 = vld [vmem:[%s1181_s2] ss:$0 sm:$0xff] }
  0x1c   : > { %961 = vmatprep.mubr.msk.bf16.mxu1 %vm1029_vm0, %v1028_v1  ;;  %959 = vmatprep.subr.bf16.mxu1 %v1028_v1 }
  0x1e   : > { %936 = vmatpush3.bf16.msra.mxu0 %v1007_v18 }
  0x1f   : > { %949 = vmatprep.subr.bf16.mxu0 %v1028_v1  ;;  %960 = vmatpush3.bf16.msra.mxu1 %v1012_v20 }
  0x20   : > { %973 = vmatprep.subr.bf16.mxu1 %v1028_v1 }
  0x21   : > { %938 = vmatmul.mubr.msk.bf16.vlgmr.msra.gmra.mrb[4].mxu0 %vm203_vm1, %v307_v21 }
  0x22   : > { %950 = vmatpush3.bf16.msra.mxu0 %v1009_v24  ;;  %953 = vmatprep.mubr.msk.bf16.mxu0 %vm1029_vm0, %v1028_v1 }
  0x23   : > { %951 = vmatprep.subr.bf16.mxu0 %v1028_v1  ;;  %962 = vmatmul.mubr.msk.bf16.vlgmr.msra.gmra.mrb[8].mxu1 %vm203_vm1, %v503_v25 }
  0x24   : > { %974 = vmatpush3.bf16.msra.mxu1 %v1014_v27  ;;  %977 = vmatprep.mubr.msk.bf16.mxu1 %vm1029_vm0, %v1028_v1 }
  0x25   : > { %975 = vmatprep.subr.bf16.mxu1 %v1028_v1 }
  0x26   : > { %952 = vmatpush3.bf16.msra.mxu0 %v1011_v30 }
  0x27   : > { %965 = vmatprep.subr.bf16.mxu0 %v1028_v1 }
  0x28   : > { %976 = vmatpush3.bf16.msra.mxu1 %v1016_v33 }
  0x29   : > { %954 = vmatmul.mubr.msk.bf16.vlgmr.msra.gmra.mrb[8].mxu0 %vm203_vm1, %v441_v34 }
  0x2a   : > { %966 = vmatpush3.bf16.msra.mxu0 %v1013_v35  ;;  %969 = vmatprep.mubr.msk.bf16.mxu0 %vm1029_vm0, %v1028_v1 }
  0x2b   : > { %967 = vmatprep.subr.bf16.mxu0 %v1028_v1  ;;  %978 = vmatmul.mubr.msk.bf16.vlgmr.msra.gmra.mrb[12].mxu1 %vm203_vm1, %v633_v36 }
  0x2e   : > { %968 = vmatpush3.bf16.msra.mxu0 %v1015_v37 }
  0x2f   : > { %981 = vmatprep.subr.bf16.mxu0 %v1028_v1 }
  0x31   : > { %970 = vmatmul.mubr.msk.bf16.vlgmr.msra.gmra.mrb[12].mxu0 %vm203_vm1, %v1088_v7 }
  0x32   : > { %982 = vmatpush3.bf16.msra.mxu0 %v1017_v38  ;;  %985 = vmatprep.mubr.msk.bf16.mxu0 %vm1029_vm0, %v1028_v1 }
  0x33   : > { %983 = vmatprep.subr.bf16.mxu0 %v1028_v1 }
  0x36   : > { %984 = vmatpush3.bf16.msra.mxu0 %v1019_v39 }
  0x39   : > { %986 = vmatmul.mubr.msk.bf16.vlgmr.msra.gmra.mrb[16].mxu0 %vm203_vm1, %v695_v40 }
  0xe4   : > { %v296_v41 = vpop.f32.mrb[0].mxu1 }
  0xe5   : > { %v931_v42 = vpop.f32.mrb[1].mxu1 }
  0xe6   : > { %v299_v43 = vpop.f32.mrb[2].mxu1 }
  0xe7   : > { %v932_v44 = vpop.f32.mrb[3].mxu1 }
  0xec   : > { %v241_v45 = vpop.f32.mrb[0].mxu0  ;;  %v422_v49 = vpop.f32.mrb[4].mxu1 }
  0xed   : > { %v297_v46 = vadd.f32 %v296_v41, %v241_v45  ;;  %v923_v47 = vpop.f32.mrb[1].mxu0  ;;  %v947_v51 = vpop.f32.mrb[5].mxu1 }
  0xee   : > { %v244_v48 = vpop.f32.mrb[2].mxu0  ;;  %v425_v52 = vpop.f32.mrb[6].mxu1 }
  0xef   : > { %v924_v50 = vpop.f32.mrb[3].mxu0  ;;  %v948_v53 = vpop.f32.mrb[7].mxu1 }
  0xf4   : > { %v357_v54 = vpop.f32.mrb[4].mxu0 }
  0xf5   : > { %v363_v55 = vadd.f32 %v357_v54, %v297_v46  ;;  %v939_v56 = vpop.f32.mrb[5].mxu0 }
  0xf6   : > { %v360_v57 = vpop.f32.mrb[6].mxu0  ;;  %v553_v58 = vpop.f32.mrb[8].mxu1 }
  0xf7   : > { %v428_v59 = vadd.f32 %v422_v49, %v363_v55  ;;  %v940_v60 = vpop.f32.mrb[7].mxu0  ;;  %v963_v61 = vpop.f32.mrb[9].mxu1 }
  0xf8   : > { %v556_v62 = vpop.f32.mrb[10].mxu1 }
  0xf9   : > { %v964_v63 = vpop.f32.mrb[11].mxu1 }
  0xfc   : > { %v491_v0 = vpop.f32.mrb[8].mxu0 }
  0xfd   : > { %v497_v1 = vadd.f32 %v491_v0, %v428_v59  ;;  %v955_v2 = vpop.f32.mrb[9].mxu0 }
  0xfe   : > { %v494_v3 = vpop.f32.mrb[10].mxu0  ;;  %v683_v4 = vpop.f32.mrb[12].mxu1 }
  0xff   : > { %v559_v5 = vadd.f32 %v553_v58, %v497_v1  ;;  %v956_v6 = vpop.f32.mrb[11].mxu0  ;;  %v979_v7 = vpop.f32.mrb[13].mxu1 }
 0x100   : > { %v686_v8 = vpop.f32.mrb[14].mxu1 }
 0x101   : > { %v980_v9 = vpop.f32.mrb[15].mxu1 }
 0x104   : > { %v614_v10 = vpop.f32.mrb[12].mxu0 }
 0x105   : > { %v620_v11 = vadd.f32 %v614_v10, %v559_v5  ;;  %v971_v12 = vpop.f32.mrb[13].mxu0 }
 0x106   : > { %v617_v13 = vpop.f32.mrb[14].mxu0 }
 0x107   : > { %v689_v14 = vadd.f32 %v683_v4, %v620_v11  ;;  %v972_v15 = vpop.f32.mrb[15].mxu0 }
 0x10c   : > { %v745_v16 = vpop.f32.mrb[16].mxu0 }
 0x10d   : > { %v751_v18 = vadd.f32 %v745_v16, %v689_v14  ;;  %v987_v19 = vpop.f32.mrb[17].mxu0 }
 0x10e   : > { %v748_v20 = vpop.f32.mrb[18].mxu0 }
 0x10f   : > { %v759_v21 = vadd.f32 %v886_v17, %v751_v18  ;;  %v988_v22 = vpop.f32.mrb[19].mxu0 }
 0x111   : > { %v760_v23 = vpack.c.bf16 %v759_v21, %v759_v21 }
 0x113   : > { %762 = vst.msk [vmem:[%s168_s7] sm:$0x7] %vm761_vm2, %v760_v23 }
 0x114 PF: > { %s13_s12 = sadd.s32 1, %s1026_s12  }
 0x115   : > { %p10_p4 = scmp.ge.s32.totalorder %s13_s12, 4  }
 0x117   :  { %12 = sbr.rel (!%p10_p4) target bundleno = 1 (0x1), region = 70 }

// kernel: _lambda_.30
= control target key start
LH: loop header
LB: loop body
LE: loop exit
PB: predicated region body
PF: predicated region fallthrough
CT: control target
= control target key end

     0   :  { %s777_s12 = smov 0   ;;  %s779_s13 = smov 0   ;;  %s883_s0 = inlined_call_operand.vmem [shape: f32[48,8], index: 0, kind: input, shape index: {}]   ;;  %s884_s1 = inlined_call_operand.vmem [shape: f32[8,32], index: 1, kind: input, shape index: {}]   ;;  %s885_s2 = inlined_call_operand.vmem [shape: f32[1,32], index: 2, kind: input, shape index: {}]   ;;  %s886_s3 = inlined_call_operand.vmem [shape: f32[48,32], index: 3, kind: output, shape index: {}]  }
   0x1   :  { %s781_s14 = smov 0  }
   0x2 LB: > { %s790_s15 = sadd.s32 4294967295, %s723_s14   ;;  %s792_s16 = sadd.s32 1, %s723_s14   ;;  %s723_s14 = sphi %s781_s14, %s893_s14   ;;  %s719_s13 = sphi %s779_s13, %s892_s13   ;;  %s715_s12 = sphi %s777_s12, %s891_s12  }
   0x3   : > { %s85_s17 = ssub.s32 %s723_s14, %s792_s16  ;;  %s88_s18 = sadd.s32 1, %s719_s13 }
   0x4   : > { %p86_p0 = scmp.eq.s32.totalorder %s85_s17, 0  ;;  %p98_p1 = scmp.ne.s32.totalorder %s719_s13, %s715_s12 }
   0x5   : > { %p99_p2 = scmp.eq.s32.totalorder %s790_s15, 1  ;;  %p537_p3 = scmp.ge.s32.totalorder %s723_s14, 1 }
   0x6   : > { %s800_s19 = scalar_select %p86_p0, %s719_s13, %s88_s18  }
   0x7   : > { %p802_p4 = por %p99_p2, %p98_p1  ;;  %p146_p5 = scmp.lt.s32.totalorder %s723_s14, 3 }
   0x9   : > { %p147_p6 = pnand %p537_p3, %p146_p5 }
   0xa   : > { %v196_v0 = vld [vmem:[%s884_s1] sm:$0xff] (!%p147_p6)  ;;  %s810_s23 = sshll.u32 (!%p147_p6), %s790_s15, 2  ;;  %vm204_vm0 = vcmask (!%p147_p6), 64512   ;;  %s170_s29 = sand.u32 (!%p147_p6), 1, %s715_s12   ;;  %vm302_vm1 = vcmask (!%p147_p6), 261120  }
   0xb   : > { %150 = sbr.rel (%p147_p6) target bundleno = 289 (0x121), region = 32  ;;  %571 = vmatprep.subr.mxu0 (!%p147_p6), %v196_v0  ;;  %579 = vmatprep.subr.mxu1 (!%p147_p6), %v196_v0  ;;  %p178_p7 = scmp.lt.s32.totalorder (!%p147_p6), %s810_s23, 5  ;;  %v541_v5 = vld [vmem:[%s885_s2] ss:$0 sm:$0xff] (!%p147_p6) }
   0xc   : > { %572 = vmatpush3.msra.mxu0 (!%p147_p6), %v196_v0  ;;  %580 = vmatpush3.msra.mxu1 (!%p147_p6), %v196_v0  ;;  %s538_s30 = sshll.u32 (!%p147_p6), %s170_s29, 5 }
   0xd   : > { %s821_s6 = scalar_lea.vmem (!%p147_p6), [#allocation2], %s538_s30  }
  0x12   : > { %s179_s24 = scalar_select %p178_p7, %s810_s23, 5 }
  0x13   : > { %s315_s7 = ssub.s32 (%p802_p4), 6, %s810_s23  ;;  %s563_s8 = sshll.u32 (%p802_p4), %s790_s15, 5 }
  0x14   : > { %s540_s25 = sshll.u32 %s179_s24, 3  ;;  %p316_p8 = scmp.lt.s32.totalorder (%p802_p4), %s315_s7, 4 }
  0x15   : > { %s181_s28 = scalar_lea.vmem %s883_s0, %s540_s25  ;;  %s834_s11 = scalar_lea.vmem (%p802_p4), %s886_s3, %s563_s8  }
  0x16   : > { %v192_v1 = vld [vmem:[%s181_s28] sm:$0xff]  ;;  %v194_v2 = vld [vmem:[%s181_s28 + $0x10] sm:$0xff]  ;;  %v193_v3 = vld [vmem:[%s181_s28 + $0x8] sm:$0xff] }
  0x17   : > { %573 = vmatprep.mubr.msk.f32.mxu0 %vm204_vm0, %v192_v1  ;;  %576 = vmatprep.mubr.msk.f32.mxu1 %vm204_vm0, %v194_v2  ;;  %v195_v4 = vld [vmem:[%s181_s28 + $0x18] sm:$0xff] }
  0x18   : > { %574 = vmatmul.mubr.msk.f32.vlgmr.msra.gmra.mrb[0].mxu0 %vm204_vm0, %v193_v3  ;;  %577 = vmatmul.mubr.msk.f32.vlgmr.msra.gmra.mrb[0].mxu1 %vm204_vm0, %v195_v4 }
  0xe9   : > { %313 = sbr.rel (!%p802_p4) target bundleno = 289 (0x121), region = 36 }
  0xeb   : > { %v575_v6 = vpop.f32.mrb[0].mxu0  ;;  %v578_v7 = vpop.f32.mrb[0].mxu1 }
  0xec   : > { %v289_v8 = vadd.f32 %v575_v6, %v541_v5  ;;  %v299_v9 = vadd.f32 %v578_v7, %v541_v5  ;;  %v283_v10 = vpop.f32.mrb[1].mxu0  ;;  %v293_v11 = vpop.f32.mrb[1].mxu1 }
  0xed   : > { %v284_v12 = vadd.f32 %v541_v5, %v283_v10  ;;  %v294_v13 = vadd.f32 %v541_v5, %v293_v11 }
  0xee   : > { %304 = vst.msk [vmem:[%s821_s6 + $0x8] sm:$0xff] %vm302_vm1, %v289_v8  ;;  %306 = vst.msk [vmem:[%s821_s6 + $0x18] sm:$0xff] %vm302_vm1, %v299_v9 }
  0xef   : > { %303 = vst.msk [vmem:[%s821_s6] sm:$0xff] %vm302_vm1, %v284_v12  ;;  %305 = vst.msk [vmem:[%s821_s6 + $0x10] sm:$0xff] %vm302_vm1, %v294_v13 }
  0xf0   : > { %s895_s7 = smov (!%p316_p8, %s315_s7), 4 }
  0xf1   : > { %s548_s12 = sshll.u32 %s895_s7, 7 }
  0xf2   : > { %p551_p9 = scmp.eq.s32.totalorder %s548_s12, 0 }
  0xf3   : > { %s840_s14 = sshrl.u32 (!%p551_p9), %s895_s7, 2 }
  0xf4   : > { %324 = sbr.rel (%p551_p9) target bundleno = 289 (0x121), region = 40  ;;  %p552_p10 = scmp.le.s32.totalorder (!%p551_p9), %s840_s14, 0 }
  0xfb   : > { %490 = sbr.rel (%p552_p10) target bundleno = 268 (0x10c), region = 116  ;;  %s888_s15 = smov (!%p552_p10), %s834_s11 }
  0xfc   : > { %s889_s17 = smov (!%p552_p10), %s821_s6  ;;  %s849_s18 = smov (!%p552_p10), 0  }
  0xfd   : > { %s737_s20 = smov (!%p552_p10), 0  }
 0x102 LB: >> { %v392_v14 = vld [vmem:[%s731_s17] sm:$0xff]  ;;  %v394_v15 = vld [vmem:[%s731_s17 + $0x8] sm:$0xff]  ;;  %v396_v16 = vld [vmem:[%s731_s17 + $0x10] sm:$0xff]  ;;  %s400_s21 = sadd.s32 1, %s735_s18  ;;  %s386_s20 = sadd.s32 1, %s739_s20   ;;  %s739_s20 = sphi %s737_s20, %s386_s20   ;;  %s735_s18 = sphi %s849_s18, %s890_s18   ;;  %s731_s17 = sphi %s889_s17, %s405_s17   ;;  %s727_s15 = sphi %s888_s15, %s406_s15  }
 0x103   : >> { %393 = vst [vmem:[%s727_s15] sm:$0xff] %v392_v14  ;;  %395 = vst [vmem:[%s727_s15 + $0x8] sm:$0xff] %v394_v15  ;;  %v398_v17 = vld [vmem:[%s731_s17 + $0x18] sm:$0xff]  ;;  %p401_p11 = scmp.ge.s32.totalorder %s400_s21, %s840_s14  ;;  %p385_p12 = scmp.ge.s32.totalorder %s386_s20, %s840_s14 }
 0x104   : >> { %397 = vst [vmem:[%s727_s15 + $0x10] sm:$0xff] %v396_v16  ;;  %399 = vst [vmem:[%s727_s15 + $0x18] sm:$0xff] %v398_v17 }
 0x105   : >> { %s897_s21 = smov (%p401_p11, %s400_s21), 0  ;;  %388 = sbr.rel (!%p385_p12) target bundleno = 258 (0x102), region = 122 }
 0x106   : >> { %s553_s22 = sshll.u32 %s897_s21, 5  ;;  %s890_s18 = smov %s897_s21 }
 0x107   : >> { %s405_s17 = scalar_lea.vmem %s821_s6, %s553_s22 [#allocation2]   ;;  %s406_s15 = scalar_lea.vmem %s834_s11, %s553_s22  }
 0x10c PF: > { %s865_s23 = sand.u32 3, %s895_s7   ;;  %s564_s24 = sshll.u32 %s840_s14, 5 }
 0x10d   : > { %s411_s25 = scalar_lea.vmem %s821_s6, %s564_s24 [#allocation2]   ;;  %s413_s26 = scalar_lea.vmem %s834_s11, %s564_s24  }
 0x10e   : > { %p558_p13 = scmp.le.s32.totalorder %s865_s23, 0 }
 0x10f   : > { %s741_s27 = smov (!%p558_p13), %s413_s26   ;;  %s745_s28 = smov (!%p558_p13), %s411_s25  }
 0x110   : > { %504 = sbr.rel (%p558_p13) target bundleno = 289 (0x121), region = 127  ;;  %s749_s29 = smov (!%p558_p13), 0  }
 0x111   : > { %s753_s30 = smov (!%p558_p13), 0  }
 0x117 LB: >> { %v423_v18 = vld [vmem:[%s747_s28] sm:$0xff]  ;;  %s425_s4 = sadd.s32 1, %s751_s29  ;;  %s417_s30 = sadd.s32 1, %s755_s30   ;;  %s755_s30 = sphi %s753_s30, %s417_s30   ;;  %s751_s29 = sphi %s749_s29, %s750_s29   ;;  %s747_s28 = sphi %s745_s28, %s430_s28   ;;  %s743_s27 = sphi %s741_s27, %s431_s27  }
 0x118   : >> { %424 = vst [vmem:[%s743_s27] sm:$0xff] %v423_v18  ;;  %p426_p0 = scmp.ge.s32.totalorder %s425_s4, %s865_s23  ;;  %p416_p1 = scmp.ge.s32.totalorder %s417_s30, %s865_s23 }
 0x11a   : >> { %s899_s4 = smov (%p426_p0, %s425_s4), 0  ;;  %419 = sbr.rel (!%p416_p1) target bundleno = 279 (0x117), region = 133 }
 0x11b   : >> { %s559_s5 = sshll.u32 %s899_s4, 3  ;;  %s750_s29 = smov %s899_s4  }
 0x11c   : >> { %s430_s28 = scalar_lea.vmem %s411_s25, %s559_s5 [#allocation2]   ;;  %s431_s27 = scalar_lea.vmem %s413_s26, %s559_s5  }
 0x121 PF: > { %p10_p2 = scmp.ge.s32.totalorder %s792_s16, 4   ;;  %s891_s12 = smov %s719_s13 }
 0x122   : > { %s892_s13 = smov %s800_s19  ;;  %s893_s14 = smov %s792_s16 }
 0x123   :  { %12 = sbr.rel (!%p10_p2) target bundleno = 2 (0x2), region = 144 }

// kernel: _lambda_.31
= control target key start
LH: loop header
LB: loop body
LE: loop exit
PB: predicated region body
PF: predicated region fallthrough
CT: control target
= control target key end

     0   :  { %7 = vsyncpa [#allocation3], 0  ;;  %s592_s0 = inlined_call_operand.vmem [shape: f32[6,8,32], index: 0, kind: input, shape index: {}]   ;;  %s593_s1 = inlined_call_operand.vmem [shape: f32[32,8], index: 1, kind: input, shape index: {}]   ;;  %s594_s2 = inlined_call_operand.hbm [shape: f32[6,32,32], index: 2, kind: output, shape index: {}]  }
   0x1   :  { %9 = vsyncpa [#allocation3 + $0x1], 0  ;;  %s477_s9 = smov 0   ;;  %s479_s10 = smov 0  }
   0x2   :  { %s481_s11 = smov 0   ;;  %s483_s12 = smov 0  }
   0x3 LB: > { %s498_s13 = sadd.s32 4294967295, %s457_s12   ;;  %s323_s14 = sadd.s32 4294967294, %s457_s12   ;;  %s457_s12 = sphi %s483_s12, %s600_s12   ;;  %s453_s11 = sphi %s481_s11, %s599_s11   ;;  %s449_s10 = sphi %s479_s10, %s598_s10   ;;  %s445_s9 = sphi %s477_s9, %s597_s9  }
   0x4   : > { %s502_s15 = sadd.s32 1, %s457_s12   ;;  %s69_s16 = sadd.s32 1, %s453_s11 }
   0x5   : > { %s66_s17 = ssub.s32 %s457_s12, %s502_s15  ;;  %p79_p0 = scmp.ne.s32.totalorder %s453_s11, %s449_s10 }
   0x6   : > { %p67_p1 = scmp.eq.s32.totalorder %s66_s17, 0  ;;  %p80_p2 = scmp.eq.s32.totalorder %s498_s13, 5 }
   0x7   : > { %p85_p3 = scmp.ne.s32.totalorder %s449_s10, %s445_s9  ;;  %p86_p4 = scmp.eq.s32.totalorder %s323_s14, 5 }
   0x8   : > { %s513_s18 = scalar_select %p67_p1, %s453_s11, %s69_s16  }
   0x9   : > { %p515_p5 = por %p80_p2, %p79_p0  ;;  %p519_p6 = por %p86_p4, %p85_p3 }
   0xa   : > { %p326_p7 = scmp.ge.s32.totalorder %s457_s12, 1  ;;  %p114_p8 = scmp.lt.s32.totalorder %s457_s12, 7 }
   0xc   : > { %p115_p9 = pnand %p326_p7, %p114_p8 }
   0xd   : > { %p135_p10 = scmp.lt.s32.totalorder (!%p115_p9), %s498_s13, 5  ;;  %v139_v0 = vld [vmem:[%s593_s1] sm:$0xff] (!%p115_p9)  ;;  %vm144_vm0 = vcmask (!%p115_p9), 64512   ;;  %v141_v1 = vld [vmem:[%s593_s1 + $0x10] sm:$0xff] (!%p115_p9)  ;;  %v140_v3 = vld [vmem:[%s593_s1 + $0x8] sm:$0xff] (!%p115_p9)  ;;  %s132_s6 = sand.u32 (!%p115_p9), 1, %s449_s10  }
   0xe   : > { %118 = sbr.rel (%p115_p9) target bundleno = 256 (0x100), region = 28  ;;  %346 = vmatprep.mubr.msk.f32.mxu0 (!%p115_p9), %vm144_vm0, %v139_v0  ;;  %349 = vmatprep.mubr.msk.f32.mxu1 (!%p115_p9), %vm144_vm0, %v141_v1  ;;  %v142_v4 = vld [vmem:[%s593_s1 + $0x18] sm:$0xff] (!%p115_p9)  ;;  %s327_s7 = sshll.u32 (!%p115_p9), %s132_s6, 5  ;;  %vm242_vm1 = vcmask (!%p115_p9), 261120  }
   0xf   : > { %s134_s8 = scalar_lea.vmem (!%p115_p9), [#allocation2], %s327_s7  ;;  %s338_s16 = sshll.u32 (!%p115_p9), %s498_s13, 9 }
  0x10   : > { %s261_s14 = sshll.u32 (!%p115_p9), %s134_s8, 4  ;;  %s549_s22 = scalar_lea.hbm (!%p115_p9), %s594_s2, %s338_s16  ;;  %s544_s14 = int_to_ptr.vmem [resolvable:$true] %s261_s14 }
  0x11   : > { %s395_s23 = scalar_lea.vmem (!%p115_p9), %s544_s14, 512  ;;  %s459_s24 = smov (!%p115_p9), [#allocation2]  }
  0x12   : > { %p396_p11 = scmp.ne.s32.totalorder (!%p115_p9), %s544_s14, %s395_s23 }
  0x14   : > { %p397_p12 = pnand (!%p115_p9), %p396_p11, %p515_p5 }
  0x15   : > { %s136_s25 = scalar_select %p135_p10, %s498_s13, 5 }
  0x16   : > { %s551_s13 = scalar_lea.sflag [#allocation3], %s132_s6  ;;  %p398_p13 = pneg %p397_p12 }
  0x17   : > { %s328_s26 = sshll.u32 %s136_s25, 3  ;;  %s399_s25 = sshll.u32 %s459_s24, 4  ;;  %s400_s25 = int_to_ptr.vmem [resolvable:$false] %s399_s25 }
  0x18   : > { %s138_s29 = scalar_lea.vmem %s592_s0, %s328_s26  ;;  %s401_s26 = scalar_lea.vmem %s400_s25, 1024 }
  0x19   : > { %v143_v2 = vld [vmem:[%s138_s29] sm:$0xff]  ;;  %p402_p0 = scmp.lt.s32.totalorder %s544_s14, %s400_s25  ;;  %p403_p1 = scmp.lt.s32.totalorder %s401_s26, %s395_s23 }
  0x1a   : > { %344 = vmatprep.subr.mxu0 %v143_v2  ;;  %352 = vmatprep.subr.mxu1 %v143_v2 }
  0x1b   : > { %345 = vmatpush3.msra.mxu0 %v143_v2  ;;  %353 = vmatpush3.msra.mxu1 %v143_v2  ;;  %p404_p2 = por %p403_p1, %p402_p0 }
  0x1c   : > { %347 = vmatmul.mubr.msk.f32.vlgmr.msra.gmra.mrb[0].mxu0 %vm144_vm0, %v140_v3  ;;  %350 = vmatmul.mubr.msk.f32.vlgmr.msra.gmra.mrb[0].mxu1 %vm144_vm0, %v142_v4 }
  0x1d   : > { %p405_p3 = pnand %p404_p2, %p398_p13 }
  0xef   : > { %v348_v5 = vpop.f32.mrb[0].mxu0  ;;  %v351_v6 = vpop.f32.mrb[0].mxu1 }
  0xf0   : > { %244 = vst.msk [vmem:[%s134_s8 + $0x8] sm:$0xff] %vm242_vm1, %v348_v5  ;;  %246 = vst.msk [vmem:[%s134_s8 + $0x18] sm:$0xff] %vm242_vm1, %v351_v6  ;;  %v223_v7 = vpop.f32.mrb[1].mxu0  ;;  %v233_v8 = vpop.f32.mrb[1].mxu1 }
  0xf1   : > { %243 = vst.msk [vmem:[%s134_s8] sm:$0xff] %vm242_vm1, %v223_v7  ;;  %245 = vst.msk [vmem:[%s134_s8 + $0x10] sm:$0xff] %vm242_vm1, %v233_v8 }
  0xf2   : > { %408 = shalt.err (!%p405_p3)
}
  0xf3   : > { %s409_s27 = scalar_lea.hbm %s549_s22, 512  ;;  %s413_s30 = scalar_lea.hbm %s594_s2, 3072 }
  0xf4   : > { %p410_p4 = scmp.ne.s32.totalorder %s549_s22, %s409_s27  ;;  %p414_p9 = scmp.lt.u32.totalorder %s549_s22, %s594_s2 }
  0xf5   : > { %p415_p10 = scmp.lt.u32.totalorder %s413_s30, %s409_s27  ;;  %p417_p12 = scmp.lt.u32.totalorder %s409_s27, %s549_s22 }
  0xf6   : > { %p411_p7 = pnand %p410_p4, %p515_p5 }
  0xf7   : > { %p416_p11 = por %p415_p10, %p414_p9 }
  0xf8   : > { %p412_p8 = pneg %p411_p7 }
  0xf9   : > { %p418_p13 = por %p417_p12, %p416_p11 }
  0xfb   : > { %p419_p0 = pnand %p418_p13, %p412_p8 }
  0xfd   : > { %422 = shalt.err (!%p419_p0)
}
  0xfe   : > { %s460_s5 = smov 128   ;;  %s461_s6 = smov 8  }
  0xff   : > { %354 = dma.vmem_to_hbm [thread:$0]  (%p515_p5), %s544_s14, 512, %s549_s22, %s551_s13, %s460_s5, %s460_s5, %s461_s6  }
 0x100 PF: > { %p360_p1 = scmp.ge.s32.totalorder %s457_s12, 2  ;;  %s276_s7 = sand.u32 1, %s445_s9  }
 0x101   : > { %s277_s8 = scalar_lea.sflag [#allocation3], %s276_s7 }
 0x102   : > { %p357_p2 = pnand %p360_p1, %p519_p6 }
 0x104   : > { %440 = dma.done.wait (!%p357_p2), %s277_s8, 512  }
 0x105   : > { %442 = vsyncadd (!%p357_p2), %s277_s8, 4294966784  ;;  %p12_p3 = scmp.ge.s32.totalorder %s502_s15, 8   ;;  %s597_s9 = smov %s449_s10 }
 0x106   : > { %s598_s10 = smov %s453_s11  ;;  %s599_s11 = smov %s513_s18 }
 0x107   : > { %s600_s12 = smov %s502_s15  ;;  %14 = sbr.rel (!%p12_p3) target bundleno = 3 (0x3), region = 63 }
 0x10e   :  { %282 = vsyncpa [#allocation3], 1 }
 0x10f   :  { %284 = vsyncpa [#allocation3 + $0x1], 1 }

// kernel: _lambda_.29
= control target key start
LH: loop header
LB: loop body
LE: loop exit
PB: predicated region body
PF: predicated region fallthrough
CT: control target
= control target key end

     0   :  { %s2567_s18 = smov 0   ;;  %s3159_s0 = inlined_call_operand.vmem [shape: bf16[2,100,32], index: 0, kind: input, shape index: {}]   ;;  %s3160_s1 = inlined_call_operand.vmem [shape: bf16[9,32,16], index: 1, kind: input, shape index: {}]   ;;  %s3161_s2 = inlined_call_operand.vmem [shape: f32[1,16], index: 2, kind: input, shape index: {}]   ;;  %s3162_s3 = inlined_call_operand.vmem [shape: f32[16,2], index: 3, kind: input, shape index: {}]   ;;  %s3163_s4 = inlined_call_operand.vmem [shape: f32[1,2], index: 4, kind: input, shape index: {}]   ;;  %s3164_s5 = inlined_call_operand.vmem [shape: f32[2,3,78], index: 5, kind: output, shape index: {}]  }
   0x1 LB: > { %s1954_s19 = sadd.s32 4294967295, %s2531_s18   ;;  %p1958_p0 = scmp.ge.s32.totalorder %s2531_s18, 1  ;;  %s2531_s18 = sphi %s2567_s18, %s15_s18  }
   0x2   : > { %p187_p1 = scmp.lt.s32.totalorder %s2531_s18, 3 }
   0x4   : > { %p188_p2 = pnand %p1958_p0, %p187_p1 }
   0x5   : > { %v2414_v0 = vld [vmem:[%s3160_s1 + $0x10] sm:$0xff] (!%p188_p2)   ;;  %v2533_v1 = vmov (!%p188_p2), 0.0   ;;  %v2415_v2 = vld [vmem:[%s3160_s1 + $0x18] sm:$0xff] (!%p188_p2)   ;;  %p214_p3 = scmp.lt.s32.totalorder (!%p188_p2), %s1954_s19, 1  ;;  %vm2534_vm0 = vmmov (!%p188_p2), 0   ;;  %vm323_vm2 = vcmask (!%p188_p2), 261120  }
   0x6   : > { %191 = sbr.rel (%p188_p2) target bundleno = 1036 (0x40c), region = 40  ;;  %2158 = vmatprep.subr.bf16.mxu0 (!%p188_p2), %v2533_v1  ;;  %2397 = vmatprep.subr.bf16.mxu1 (!%p188_p2), %v2533_v1  ;;  %vm271_vm1 = vsmask.f32 (!%p188_p2), 7424  ;;  %v2420_v23 = vld [vmem:[%s3160_s1] sm:$0xff] (!%p188_p2)   ;;  %v2422_v31 = vld [vmem:[%s3160_s1 + $0x8] sm:$0xff] (!%p188_p2)   ;;  %v2426_v40 = vld [vmem:[%s3160_s1 + $0x30] sm:$0xff] (!%p188_p2)  }
   0x7   : > { %2159 = vmatpush3.bf16.msra.mxu0 (!%p188_p2), %v2414_v0  ;;  %2399 = vmatpush3.bf16.msra.mxu1 (!%p188_p2), %v2414_v0  ;;  %v2421_v25 = vld [vmem:[%s3160_s1 + $0x20] sm:$0xff] (!%p188_p2)   ;;  %v2425_v37 = vld [vmem:[%s3160_s1 + $0x28] sm:$0xff] (!%p188_p2)   ;;  %vm512_vm3 = vcmask (!%p188_p2), 1046528   ;;  %v2428_v48 = vld [vmem:[%s3160_s1 + $0x38] sm:$0xff] (!%p188_p2)   ;;  %vm936_vm4 = vcmask (!%p188_p2), 1045504   ;;  %vm1342_vm7 = vcmask (!%p188_p2), 1044480  }
   0x8   : > { %2160 = vmatprep.subr.bf16.mxu0 (!%p188_p2), %v2533_v1  ;;  %2398 = vmatprep.subr.bf16.mxu1 (!%p188_p2), %v2533_v1  ;;  %vm771_vm5 = vsmask.f32 (!%p188_p2), 6400  ;;  %vm1193_vm6 = vsmask.f32 (!%p188_p2), 5376  ;;  %vm1500_vm8 = vcmask (!%p188_p2), 130048   ;;  %s2535_s22 = smov (!%p188_p2), 127  }
   0x9   : > { %2178 = vmatprep.mubr.msk.bf16.mxu1 (!%p188_p2), %vm2534_vm0, %v2533_v1  ;;  %2162 = vmatprep.mubr.msk.bf16.mxu0 (!%p188_p2), %vm2534_vm0, %v2533_v1  ;;  %s2536_s23 = smov (!%p188_p2), 2   ;;  %vm1856_vm9 = vcmask (!%p188_p2), 15360   ;;  %vm1899_vm10 = vcmask (!%p188_p2), 632832  }
   0xb   : > { %2161 = vmatpush3.bf16.msra.mxu0 (!%p188_p2), %v2415_v2  ;;  %2400 = vmatpush3.bf16.msra.mxu1 (!%p188_p2), %v2415_v2 }
   0xc   : > { %2182 = vmatprep.subr.bf16.mxu1 (!%p188_p2), %v2533_v1  ;;  %2206 = vmatprep.subr.bf16.mxu0 (!%p188_p2), %v2533_v1 }
   0xd   : > { %s3166_s19 = smov (!%p214_p3, %s1954_s19), 1 }
   0xe   : > { %s2401_s24 = smul.u32 52, %s3166_s19 }
  0x10   : > { %s2597_s27 = scalar_lea.vmem %s3159_s0, %s2401_s24  ;;  %s1960_s24 = sshll.u32 %s3166_s19, 2 }
  0x11   : > { %v232_v3 = vld [vmem:[%s2597_s27 + $0x20] sm:$0xf]  ;;  %v233_v4 = vld [vmem:[%s2597_s27 + $0x24] sm:$0xf]  ;;  %v2608_v8 = vld [vmem:[%s2597_s27 + $0x8] sm:$0xf] }
  0x12   : > { %v224_v5 = vld [vmem:[%s2597_s27] sm:$0xf]  ;;  %v2602_v6 = vcombine.low %v232_v3, %v233_v4  ;;  %v2605_v7 = vld [vmem:[%s2597_s27 + $0x4] sm:$0xf]  ;;  %v2611_v9 = vld [vmem:[%s2597_s27 + $0xc] sm:$0xf] }
  0x13   : > { %v2614_v10 = vcombine.low %v224_v5, %v2605_v7  ;;  %v2618_v11 = vcombine.low %v2608_v8, %v2611_v9  ;;  %v2621_v12 = vld [vmem:[%s2597_s27 + $0x10] sm:$0xf]  ;;  %v2624_v13 = vld [vmem:[%s2597_s27 + $0x14] sm:$0xf]  ;;  %v2649_v26 = vld [vmem:[%s2597_s27 + $0x18] sm:$0xf] }
  0x14   : > { %v304_v14 = vshll.u32 %v2602_v6, 16  ;;  %v308_v15 = vshrl.u32 %v2602_v6, 16  ;;  %v2633_v19 = vcombine.low %v2621_v12, %v2624_v13  ;;  %v231_v30 = vld [vmem:[%s2597_s27 + $0x1c] sm:$0xf]  ;;  %v234_v33 = vld [vmem:[%s2597_s27 + $0x28] sm:$0xf] }
  0x15   : > { %v273_v16 = vshrl.u32 %v2614_v10, 16  ;;  %v275_v17 = vshll.u32 %v2614_v10, 16  ;;  %v280_v18 = vshll.u32 %v2618_v11, 16  ;;  %v284_v28 = vshrl.u32 %v2618_v11, 16  ;;  %v235_v54 = vld [vmem:[%s2597_s27 + $0x2c] sm:$0xf] }
  0x16   : > { %v2637_v20 = vrot.slane %v304_v14, 1  ;;  %v288_v29 = vshll.u32 %v2633_v19, 16  ;;  %v2665_v34 = vcombine.low %v2649_v26, %v231_v30  ;;  %v2673_v38 = vcombine.low %v231_v30, %v232_v3 }
  0x17   : > { %v277_v21 = vrot.slane %v275_v17, 1  ;;  %v282_v22 = vrot.slane %v280_v18, 1  ;;  %v2675_v39 = vcombine.low %v233_v4, %v234_v33  ;;  %v292_v41 = vshrl.u32 %v2633_v19, 16 }
  0x18   : > { %v310_v24 = vor.u32 %v308_v15, %v2637_v20  ;;  %v290_v36 = vrot.slane %v288_v29, 1  ;;  %v296_v42 = vshll.u32 %v2665_v34, 16  ;;  %v649_v43 = vrot.slane %v2673_v38, 1 }
  0x19   : > { %v278_v27 = vor.u32 %v277_v21, %v273_v16  ;;  %v286_v35 = vor.u32 %v284_v28, %v282_v22  ;;  %v651_v44 = vrot.slane %v2675_v39, 1  ;;  %v300_v47 = vshrl.u32 %v2665_v34, 16 }
  0x1a   : > { %2179 = vmatmul.mubr.msk.bf16.vlgmr.msra.gmra.mrb[0].mxu1 %vm323_vm2, %v310_v24  ;;  %v294_v49 = vor.u32 %v292_v41, %v290_v36  ;;  %v298_v50 = vrot.slane %v296_v42, 1  ;;  %v799_v51 = vshrl.u32 %v2673_v38, 16  ;;  %v1195_v52 = vrot.slane %v280_v18, 3 }
  0x1b   : > { %v283_v32 = vsel %vm271_vm1, %v278_v27, %v282_v22  ;;  %2183 = vmatpush3.bf16.msra.mxu1 %v2420_v23  ;;  %2186 = vmatprep.mubr.msk.bf16.mxu1 %vm2534_vm0, %v2533_v1  ;;  %v291_v45 = vsel %vm271_vm1, %v286_v35, %v290_v36  ;;  %v2694_v46 = vsel %vm512_vm3, %v649_v43, %v651_v44  ;;  %v802_v53 = vshll.u32 %v2673_v38, 16 }
  0x1c   : > { %2163 = vmatmul.mubr.msk.bf16.vlgmr.msra.gmra.mrb[0].mxu0 %vm323_vm2, %v283_v32  ;;  %2184 = vmatprep.subr.bf16.mxu1 %v2533_v1  ;;  %v1194_v55 = vrot.slane %v284_v28, 2  ;;  %v801_v56 = vrot.slane %v799_v51, 1  ;;  %v808_v57 = vshrl.u32 %v2675_v39, 16  ;;  %v811_v58 = vshll.u32 %v2675_v39, 16 }
  0x1d   : > { %2207 = vmatpush3.bf16.msra.mxu0 %v2421_v25  ;;  %2166 = vmatprep.mubr.msk.bf16.mxu0 %vm2534_vm0, %v2533_v1  ;;  %v1198_v59 = vrot.slane %v288_v29, 3  ;;  %v1197_v60 = vrot.slane %v292_v41, 2  ;;  %v302_v61 = vor.u32 %v300_v47, %v298_v50  ;;  %v804_v62 = vrot.slane %v802_v53, 2  ;;  %v2735_v28 = vld [vmem:[%s2597_s27 + $0x30] ss:$0 sps:$4 sm:$0x33]   ;;  %s222_s27 = scalar_lea.vmem %s3164_s5, %s1960_s24 }
  0x1e   : > { %2208 = vmatprep.subr.bf16.mxu0 %v2533_v1  ;;  %v299_v63 = vsel %vm271_vm1, %v294_v49, %v298_v50  ;;  %v810_v0 = vrot.slane %v808_v57, 1  ;;  %v813_v2 = vrot.slane %v811_v58, 2  ;;  %v2015_v3 = vcombine.low %v235_v54, %v235_v54 }
  0x1f   : > { %2185 = vmatpush3.bf16.msra.mxu1 %v2422_v31  ;;  %v942_v4 = vrot.slane %v2673_v38, 2  ;;  %v2716_v5 = vcombine.low %v234_v33, %v235_v54  ;;  %v944_v16 = vrot.slane %v2675_v39, 2  ;;  %v2721_v17 = vor.u32 %v804_v62, %v801_v56  ;;  %v2440_v39 = vld [vmem:[%s3160_s1 + $0x70] sm:$0xff]   ;;  %v2443_v38 = vld [vmem:[%s3160_s1 + $0x88] sm:$0xff]  }
  0x20   : > { %2230 = vmatprep.subr.bf16.mxu1 %v2533_v1  ;;  %v814_v18 = vor.u32 %v813_v2, %v810_v0  ;;  %v817_v21 = vshll.u32 %v2015_v3, 16  ;;  %v1067_v22 = vrot.slane %v2618_v11, 2  ;;  %v307_v23 = vsel %vm271_vm1, %v302_v61, %v2637_v20 }
  0x21   : > { %2209 = vmatpush3.bf16.msra.mxu0 %v2425_v37  ;;  %v2731_v24 = vsel %vm936_vm4, %v942_v4, %v944_v16  ;;  %v1068_v25 = vrot.slane %v2633_v19, 2  ;;  %v946_v27 = vrot.slane %v2015_v3, 2  ;;  %v1070_v31 = vrot.slane %v2665_v34, 2 }
  0x22   : > { %2187 = vmatmul.mubr.msk.bf16.vlgmr.msra.gmra.mrb[4].mxu1 %vm323_vm2, %v2614_v10  ;;  %2254 = vmatprep.subr.bf16.mxu0 %v2533_v1  ;;  %v2740_v29 = vsel %vm771_vm5, %v2721_v17, %v814_v18  ;;  %v819_v30 = vrot.slane %v817_v21, 2  ;;  %v1196_v33 = vor.u32 %v1195_v52, %v1194_v55  ;;  %v1199_v35 = vor.u32 %v1198_v59, %v1197_v60 }
  0x23   : > { %2190 = vmatprep.mubr.msk.bf16.mxu1 %vm2534_vm0, %v2533_v1  ;;  %2231 = vmatpush3.bf16.msra.mxu1 %v2426_v40  ;;  %v2746_v20 = vsel %vm936_vm4, %v1067_v22, %v1068_v25  ;;  %v2749_v32 = vsel %vm936_vm4, %v944_v16, %v946_v27  ;;  %v2755_v37 = vsel %vm936_vm4, %v1068_v25, %v1070_v31  ;;  %v1072_v40 = vrot.slane %v2602_v6, 2  ;;  %v2427_v27 = vld [vmem:[%s3160_s1 + $0x40] sm:$0xff]  }
  0x24   : > { %2167 = vmatmul.mubr.msk.bf16.gmra.mrb[4].mxu0 %vm323_vm2, %v291_v45  ;;  %2232 = vmatprep.subr.bf16.mxu1 %v2533_v1  ;;  %v2752_v36 = vsel %vm771_vm5, %v814_v18, %v819_v30  ;;  %v1201_v41 = vrot.slane %v300_v47, 2  ;;  %v2759_v45 = vsel %vm1193_vm6, %v1196_v33, %v1199_v35  ;;  %v1074_v49 = vrot.slane %v2716_v5, 2  ;;  %v2430_v33 = vld [vmem:[%s3160_s1 + $0x48] sm:$0xff]  }
  0x25   : > { %2170 = vmatprep.mubr.msk.bf16.mxu0 %vm2534_vm0, %v2533_v1  ;;  %v1205_v50 = vrot.slane %v308_v15, 2  ;;  %v2767_v51 = vsel %vm936_vm4, %v1070_v31, %v1072_v40  ;;  %v1206_v52 = vrot.slane %v304_v14, 3  ;;  %v1076_v53 = vrot.slane %v2735_v28, 2 }
  0x26   : > { %v1210_v47 = vshrl.u32 %v2716_v5, 16  ;;  %v2774_v55 = vsel %vm936_vm4, %v1072_v40, %v1074_v49  ;;  %v1343_v56 = vrot.slane %v2618_v11, 3  ;;  %v1344_v60 = vrot.slane %v2633_v19, 3 }
  0x27   : > { %2233 = vmatpush3.bf16.msra.mxu1 %v2428_v48  ;;  %v1202_v48 = vrot.slane %v296_v42, 3  ;;  %v1213_v42 = vshll.u32 %v2716_v5, 16  ;;  %v1207_v15 = vor.u32 %v1206_v52, %v1205_v50  ;;  %v2781_v57 = vsel %vm936_vm4, %v1074_v49, %v1076_v53  ;;  %v2433_v52 = vld [vmem:[%s3160_s1 + $0x50] sm:$0xff]  }
  0x28   : > { %2278 = vmatprep.subr.bf16.mxu1 %v2533_v1  ;;  %v1212_v14 = vrot.slane %v1210_v47, 2  ;;  %v1219_v62 = vshrl.u32 %v2735_v28, 16  ;;  %v513_v0 = vrot.slane %v2614_v10, 1  ;;  %v514_v2 = vrot.slane %v2618_v11, 1 }
  0x29   : > { %v1203_v54 = vor.u32 %v1202_v48, %v1201_v41  ;;  %v1215_v59 = vrot.slane %v1213_v42, 3  ;;  %v2800_v16 = vsel %vm1342_vm7, %v1343_v56, %v1344_v60  ;;  %v1346_v10 = vrot.slane %v2665_v34, 3 }
  0x2a   : > { %2191 = vmatmul.mubr.msk.bf16.gmra.mrb[8].mxu1 %vm323_vm2, %v2618_v11  ;;  %v1221_v18 = vrot.slane %v1219_v62, 2  ;;  %v515_v25 = vsel %vm512_vm3, %v513_v0, %v514_v2  ;;  %v516_v31 = vrot.slane %v2633_v19, 1  ;;  %v2831_v40 = vcombine.low %v2605_v7, %v2608_v8 }
  0x2b   : > { %2194 = vmatprep.mubr.msk.bf16.mxu1 %vm2534_vm0, %v2533_v1  ;;  %v2786_v58 = vsel %vm1193_vm6, %v1199_v35, %v1203_v54  ;;  %v2791_v61 = vsel %vm1193_vm6, %v1203_v54, %v1207_v15  ;;  %v1216_v3 = vor.u32 %v1215_v59, %v1212_v14  ;;  %v2818_v30 = vsel %vm1342_vm7, %v1344_v60, %v1346_v10 }
  0x2c   : > { %2171 = vmatmul.mubr.msk.bf16.gmra.mrb[8].mxu0 %vm323_vm2, %v299_v63  ;;  %v1222_v63 = vshll.u32 %v2735_v28, 16  ;;  %v1348_v35 = vrot.slane %v2602_v6, 3  ;;  %v2835_v41 = vcombine.low %v2611_v9, %v2621_v12  ;;  %v644_v7 = vrot.slane %v2831_v40, 1 }
  0x2d   : > { %2174 = vmatprep.mubr.msk.bf16.mxu0 %vm2534_vm0, %v2533_v1  ;;  %v2803_v22 = vsel %vm1193_vm6, %v1207_v15, %v1216_v3  ;;  %v518_v9 = vrot.slane %v2665_v34, 1  ;;  %v1350_v12 = vrot.slane %v2716_v5, 3  ;;  %v2856_v50 = vcombine.low %v2624_v13, %v2649_v26  ;;  %v2436_v13 = vld [vmem:[%s3160_s1 + $0x58] sm:$0xff]  }
  0x2e   : > { %v1224_v21 = vrot.slane %v1222_v63, 3  ;;  %v2838_v48 = vsel %vm1342_vm7, %v1346_v10, %v1348_v35  ;;  %v645_v8 = vrot.slane %v2835_v41, 1  ;;  %v520_v26 = vrot.slane %v2602_v6, 1 }
  0x2f   : > { %v2862_v53 = vsel %vm1342_vm7, %v1348_v35, %v1350_v12  ;;  %v519_v47 = vsel %vm512_vm3, %v516_v31, %v518_v9  ;;  %v1352_v5 = vrot.slane %v2735_v28, 3  ;;  %v776_v28 = vshll.u32 %v2831_v40, 16 }
  0x30   : > { %v646_v49 = vsel %vm512_vm3, %v644_v7, %v645_v8  ;;  %v521_v56 = vsel %vm512_vm3, %v518_v9, %v520_v26  ;;  %v781_v15 = vshrl.u32 %v2835_v41, 16  ;;  %v784_v14 = vshll.u32 %v2835_v41, 16 }
  0x31   : > { %v2880_v42 = vsel %vm1342_vm7, %v1350_v12, %v1352_v5  ;;  %v778_v62 = vrot.slane %v776_v28, 2  ;;  %v938_v35 = vrot.slane %v2835_v41, 2  ;;  %v2442_v41 = vld [vmem:[%s3160_s1 + $0x78] sm:$0xff]  }
  0x32   : > { %2195 = vmatmul.mubr.msk.bf16.gmra.mrb[12].mxu1 %vm323_vm2, %v2633_v19  ;;  %v517_v19 = vsel %vm512_vm3, %v514_v2, %v516_v31  ;;  %v783_v63 = vrot.slane %v781_v15, 1  ;;  %v786_v0 = vrot.slane %v784_v14, 2  ;;  %v2437_v31 = vld [vmem:[%s3160_s1 + $0x68] sm:$0xff]  }
  0x33   : > { %2198 = vmatprep.mubr.msk.bf16.mxu1 %vm2534_vm0, %v2533_v1 }
  0x34   : > { %2175 = vmatmul.mubr.msk.bf16.gmra.mrb[12].mxu0 %vm323_vm2, %v307_v23  ;;  %v1225_v23 = vor.u32 %v1224_v21, %v1221_v18  ;;  %v790_v18 = vshrl.u32 %v2856_v50, 16 }
  0x35   : > { %2210 = vmatprep.mubr.msk.bf16.mxu0 %vm2534_vm0, %v2533_v1 }
  0x36   : > { %v2813_v11 = vsel %vm1193_vm6, %v1216_v3, %v1225_v23  ;;  %v787_v3 = vor.u32 %v786_v0, %v783_v63  ;;  %v2435_v23 = vld [vmem:[%s3160_s1 + $0x60] sm:$0xff]  }
  0x3a   : > { %2199 = vmatmul.mubr.msk.bf16.gmra.mrb[16].mxu1 %vm323_vm2, %v2665_v34  ;;  %v647_v34 = vrot.slane %v2856_v50, 1 }
  0x3b   : > { %2202 = vmatprep.mubr.msk.bf16.mxu1 %vm2534_vm0, %v2533_v1 }
  0x3c   : > { %2211 = vmatmul.mubr.msk.bf16.vlgmr.msra.gmra.mrb[16].mxu0 %vm323_vm2, %v515_v25  ;;  %v648_v54 = vsel %vm512_vm3, %v645_v8, %v647_v34  ;;  %v650_v59 = vsel %vm512_vm3, %v647_v34, %v649_v43  ;;  %v793_v43 = vshll.u32 %v2856_v50, 16  ;;  %v792_v25 = vrot.slane %v790_v18, 1 }
  0x3d   : > { %2255 = vmatpush3.bf16.msra.mxu0 %v2427_v27  ;;  %2214 = vmatprep.mubr.msk.bf16.mxu0 %vm2534_vm0, %v2533_v1 }
  0x3e   : > { %2256 = vmatprep.subr.bf16.mxu0 %v2533_v1  ;;  %v795_v27 = vrot.slane %v793_v43, 2 }
  0x40   : > { %v796_v10 = vor.u32 %v795_v27, %v792_v25 }
  0x41   : > { %2257 = vmatpush3.bf16.msra.mxu0 %v2430_v33 }
  0x42   : > { %2203 = vmatmul.mubr.msk.bf16.gmra.mrb[20].mxu1 %vm323_vm2, %v2602_v6  ;;  %2302 = vmatprep.subr.bf16.mxu0 %v2533_v1  ;;  %v773_v6 = vshrl.u32 %v2831_v40, 16  ;;  %v797_v33 = vsel %vm771_vm5, %v787_v3, %v796_v10 }
  0x43   : > { %2234 = vmatprep.mubr.msk.bf16.mxu1 %vm2534_vm0, %v2533_v1 }
  0x44   : > { %2215 = vmatmul.mubr.msk.bf16.gmra.mrb[20].mxu0 %vm323_vm2, %v517_v19  ;;  %v775_v60 = vrot.slane %v773_v6, 1 }
  0x45   : > { %2218 = vmatprep.mubr.msk.bf16.mxu0 %vm2534_vm0, %v2533_v1 }
  0x46   : > { %v779_v2 = vor.u32 %v778_v62, %v775_v60 }
  0x48   : > { %v788_v21 = vsel %vm771_vm5, %v779_v2, %v787_v3 }
  0x4a   : > { %2235 = vmatmul.mubr.msk.bf16.vlgmr.msra.gmra.mrb[24].mxu1 %vm323_vm2, %v646_v49 }
  0x4b   : > { %2238 = vmatprep.mubr.msk.bf16.mxu1 %vm2534_vm0, %v2533_v1  ;;  %2279 = vmatpush3.bf16.msra.mxu1 %v2433_v52 }
  0x4c   : > { %2219 = vmatmul.mubr.msk.bf16.gmra.mrb[24].mxu0 %vm323_vm2, %v519_v47  ;;  %2280 = vmatprep.subr.bf16.mxu1 %v2533_v1 }
  0x4d   : > { %2222 = vmatprep.mubr.msk.bf16.mxu0 %vm2534_vm0, %v2533_v1 }
  0x4f   : > { %2281 = vmatpush3.bf16.msra.mxu1 %v2436_v13 }
  0x50   : > { %2326 = vmatprep.subr.bf16.mxu1 %v2533_v1 }
  0x52   : > { %2239 = vmatmul.mubr.msk.bf16.gmra.mrb[28].mxu1 %vm323_vm2, %v648_v54 }
  0x53   : > { %2242 = vmatprep.mubr.msk.bf16.mxu1 %vm2534_vm0, %v2533_v1 }
  0x54   : > { %2223 = vmatmul.mubr.msk.bf16.gmra.mrb[28].mxu0 %vm323_vm2, %v521_v56 }
  0x55   : > { %2226 = vmatprep.mubr.msk.bf16.mxu0 %vm2534_vm0, %v2533_v1 }
  0x5a   : > { %2243 = vmatmul.mubr.msk.bf16.gmra.mrb[32].mxu1 %vm323_vm2, %v650_v59 }
  0x5b   : > { %2246 = vmatprep.mubr.msk.bf16.mxu1 %vm2534_vm0, %v2533_v1 }
  0x5c   : > { %2227 = vmatmul.mubr.msk.bf16.gmra.mrb[32].mxu0 %vm323_vm2, %v520_v26 }
  0x5d   : > { %2258 = vmatprep.mubr.msk.bf16.mxu0 %vm2534_vm0, %v2533_v1 }
  0x62   : > { %2247 = vmatmul.mubr.msk.bf16.gmra.mrb[36].mxu1 %vm323_vm2, %v2694_v46  ;;  %v937_v46 = vrot.slane %v2831_v40, 2  ;;  %v940_v40 = vrot.slane %v2856_v50, 2 }
  0x63   : > { %2250 = vmatprep.mubr.msk.bf16.mxu1 %vm2534_vm0, %v2533_v1 }
  0x64   : > { %2259 = vmatmul.mubr.msk.bf16.vlgmr.msra.gmra.mrb[36].mxu0 %vm323_vm2, %v788_v21  ;;  %v939_v19 = vsel %vm936_vm4, %v937_v46, %v938_v35  ;;  %v943_v7 = vsel %vm936_vm4, %v940_v40, %v942_v4  ;;  %v1491_v4 = vld [vmem:[%s3162_s3] sm:$0xff] }
  0x65   : > { %2303 = vmatpush3.bf16.msra.mxu0 %v2435_v23  ;;  %2262 = vmatprep.mubr.msk.bf16.mxu0 %vm2534_vm0, %v2533_v1 }
  0x66   : > { %2304 = vmatprep.subr.bf16.mxu0 %v2533_v1 }
  0x69   : > { %2305 = vmatpush3.bf16.msra.mxu0 %v2437_v31 }
  0x6a   : > { %2251 = vmatmul.mubr.msk.bf16.gmra.mrb[40].mxu1 %vm323_vm2, %v651_v44  ;;  %2350 = vmatprep.subr.bf16.mxu0 %v2533_v1  ;;  %v806_v44 = vsel %vm771_vm5, %v796_v10, %v2721_v17  ;;  %v941_v17 = vsel %vm936_vm4, %v938_v35, %v940_v40 }
  0x6b   : > { %2282 = vmatprep.mubr.msk.bf16.mxu1 %vm2534_vm0, %v2533_v1 }
  0x6c   : > { %2263 = vmatmul.mubr.msk.bf16.gmra.mrb[40].mxu0 %vm323_vm2, %v797_v33 }
  0x6d   : > { %2266 = vmatprep.mubr.msk.bf16.mxu0 %vm2534_vm0, %v2533_v1 }
  0x72   : > { %2283 = vmatmul.mubr.msk.bf16.vlgmr.msra.gmra.mrb[44].mxu1 %vm323_vm2, %v939_v19 }
  0x73   : > { %2286 = vmatprep.mubr.msk.bf16.mxu1 %vm2534_vm0, %v2533_v1  ;;  %2327 = vmatpush3.bf16.msra.mxu1 %v2440_v39 }
  0x74   : > { %2267 = vmatmul.mubr.msk.bf16.gmra.mrb[44].mxu0 %vm323_vm2, %v806_v44  ;;  %2328 = vmatprep.subr.bf16.mxu1 %v2533_v1 }
  0x75   : > { %2270 = vmatprep.mubr.msk.bf16.mxu0 %vm2534_vm0, %v2533_v1 }
  0x77   : > { %2329 = vmatpush3.bf16.msra.mxu1 %v2442_v41 }
  0x7a   : > { %2287 = vmatmul.mubr.msk.bf16.gmra.mrb[48].mxu1 %vm323_vm2, %v941_v17 }
  0x7b   : > { %2290 = vmatprep.mubr.msk.bf16.mxu1 %vm2534_vm0, %v2533_v1 }
  0x7c   : > { %2271 = vmatmul.mubr.msk.bf16.gmra.mrb[48].mxu0 %vm323_vm2, %v2740_v29  ;;  %v2441_v29 = vld [vmem:[%s3160_s1 + $0x80] sm:$0xff]  }
  0x7d   : > { %2274 = vmatprep.mubr.msk.bf16.mxu0 %vm2534_vm0, %v2533_v1 }
  0x82   : > { %2291 = vmatmul.mubr.msk.bf16.gmra.mrb[52].mxu1 %vm323_vm2, %v943_v7 }
  0x83   : > { %2294 = vmatprep.mubr.msk.bf16.mxu1 %vm2534_vm0, %v2533_v1 }
  0x84   : > { %2275 = vmatmul.mubr.msk.bf16.gmra.mrb[52].mxu0 %vm323_vm2, %v2752_v36 }
  0x85   : > { %2306 = vmatprep.mubr.msk.bf16.mxu0 %vm2534_vm0, %v2533_v1 }
  0x8a   : > { %2295 = vmatmul.mubr.msk.bf16.gmra.mrb[56].mxu1 %vm323_vm2, %v2731_v24  ;;  %v1492_v24 = vld [vmem:[%s3162_s3 + $0x8] sm:$0xff] }
  0x8b   : > { %2298 = vmatprep.mubr.msk.bf16.mxu1 %vm2534_vm0, %v2533_v1 }
  0x8c   : > { %2307 = vmatmul.mubr.msk.bf16.vlgmr.msra.gmra.mrb[56].mxu0 %vm323_vm2, %v2746_v20  ;;  %v2393_v20 = vpack.c.bf16 %v1492_v24, %v1491_v4 }
  0x8d   : > { %2351 = vmatpush3.bf16.msra.mxu0 %v2441_v29  ;;  %2310 = vmatprep.mubr.msk.bf16.mxu0 %vm2534_vm0, %v2533_v1 }
  0x8e   : > { %2352 = vmatprep.subr.bf16.mxu0 %v2533_v1  ;;  %2394 = vmatprep.subr.bf16.mxu1 %v2393_v20 }
  0x91   : > { %2353 = vmatpush3.bf16.msra.mxu0 %v2443_v38 }
  0x92   : > { %2299 = vmatmul.mubr.msk.bf16.gmra.mrb[60].mxu1 %vm323_vm2, %v2749_v32 }
  0x93   : > { %2330 = vmatprep.mubr.msk.bf16.mxu1 %vm2534_vm0, %v2533_v1 }
  0x94   : > { %2311 = vmatmul.mubr.msk.bf16.gmra.mrb[60].mxu0 %vm323_vm2, %v2755_v37 }
  0x95   : > { %2314 = vmatprep.mubr.msk.bf16.mxu0 %vm2534_vm0, %v2533_v1 }
  0x9a   : > { %2331 = vmatmul.mubr.msk.bf16.vlgmr.msra.gmra.mrb[64].mxu1 %vm323_vm2, %v2759_v45 }
  0x9b   : > { %2334 = vmatprep.mubr.msk.bf16.mxu1 %vm2534_vm0, %v2533_v1  ;;  %2396 = vmatpush3.bf16.msra.mxu1 %v2393_v20 }
  0x9c   : > { %2315 = vmatmul.mubr.msk.bf16.gmra.mrb[64].mxu0 %vm323_vm2, %v2767_v51 }
  0x9d   : > { %2318 = vmatprep.mubr.msk.bf16.mxu0 %vm2534_vm0, %v2533_v1 }
  0xa2   : > { %2335 = vmatmul.mubr.msk.bf16.gmra.mrb[68].mxu1 %vm323_vm2, %v2786_v58 }
  0xa3   : > { %2338 = vmatprep.mubr.msk.bf16.mxu1 %vm2534_vm0, %v2533_v1 }
  0xa4   : > { %2319 = vmatmul.mubr.msk.bf16.gmra.mrb[68].mxu0 %vm323_vm2, %v2774_v55 }
  0xa5   : > { %2322 = vmatprep.mubr.msk.bf16.mxu0 %vm2534_vm0, %v2533_v1 }
  0xaa   : > { %2339 = vmatmul.mubr.msk.bf16.gmra.mrb[72].mxu1 %vm323_vm2, %v2791_v61 }
  0xab   : > { %2342 = vmatprep.mubr.msk.bf16.mxu1 %vm2534_vm0, %v2533_v1 }
  0xac   : > { %2323 = vmatmul.mubr.msk.bf16.gmra.mrb[72].mxu0 %vm323_vm2, %v2781_v57 }
  0xad   : > { %2354 = vmatprep.mubr.msk.bf16.mxu0 %vm2534_vm0, %v2533_v1 }
  0xb2   : > { %2343 = vmatmul.mubr.msk.bf16.gmra.mrb[76].mxu1 %vm323_vm2, %v2803_v22 }
  0xb3   : > { %2346 = vmatprep.mubr.msk.bf16.mxu1 %vm2534_vm0, %v2533_v1 }
  0xb4   : > { %2355 = vmatmul.mubr.msk.bf16.vlgmr.msra.gmra.mrb[76].mxu0 %vm323_vm2, %v2800_v16 }
  0xb5   : > { %2358 = vmatprep.mubr.msk.bf16.mxu0 %vm2534_vm0, %v2533_v1 }
  0xba   : > { %2347 = vmatmul.mubr.msk.bf16.gmra.mrb[80].mxu1 %vm323_vm2, %v2813_v11 }
  0xbc   : > { %2359 = vmatmul.mubr.msk.bf16.gmra.mrb[80].mxu0 %vm323_vm2, %v2818_v30 }
  0xbd   : > { %2362 = vmatprep.mubr.msk.bf16.mxu0 %vm2534_vm0, %v2533_v1 }
  0xc4   : > { %2363 = vmatmul.mubr.msk.bf16.gmra.mrb[84].mxu0 %vm323_vm2, %v2838_v48 }
  0xc5   : > { %2366 = vmatprep.mubr.msk.bf16.mxu0 %vm2534_vm0, %v2533_v1 }
  0xcc   : > { %2367 = vmatmul.mubr.msk.bf16.gmra.mrb[88].mxu0 %vm323_vm2, %v2862_v53 }
  0xcd   : > { %2370 = vmatprep.mubr.msk.bf16.mxu0 %vm2534_vm0, %v2533_v1 }
  0xd4   : > { %2371 = vmatmul.mubr.msk.bf16.gmra.mrb[92].mxu0 %vm323_vm2, %v2880_v42 }
  0xed   : > { %v405_v32 = vpop.f32.mrb[0].mxu1 }
  0xee   : > { %v2180_v36 = vpop.f32.mrb[1].mxu1 }
  0xef   : > { %v373_v37 = vpop.f32.mrb[0].mxu0  ;;  %v408_v45 = vpop.f32.mrb[2].mxu1 }
  0xf0   : > { %v2164_v51 = vpop.f32.mrb[1].mxu0  ;;  %v2181_v1 = vpop.f32.mrb[3].mxu1 }
  0xf1   : > { %v376_v55 = vpop.f32.mrb[2].mxu0 }
  0xf2   : > { %v2165_v57 = vpop.f32.mrb[3].mxu0 }
  0xf5   : > { %v468_v58 = vpop.f32.mrb[4].mxu1 }
  0xf6   : > { %v469_v61 = vadd.f32 %v468_v58, %v373_v37  ;;  %v2188_v16 = vpop.f32.mrb[5].mxu1 }
  0xf7   : > { %v381_v22 = vpop.f32.mrb[4].mxu0  ;;  %v471_v11 = vpop.f32.mrb[6].mxu1 }
  0xf8   : > { %v2168_v30 = vpop.f32.mrb[5].mxu0  ;;  %v472_v48 = vadd.f32 %v471_v11, %v376_v55  ;;  %v2189_v8 = vpop.f32.mrb[7].mxu1 }
  0xf9   : > { %v384_v9 = vpop.f32.mrb[6].mxu0 }
  0xfa   : > { %v2169_v12 = vpop.f32.mrb[7].mxu0 }
  0xfd   : > { %v476_v49 = vpop.f32.mrb[8].mxu1 }
  0xfe   : > { %v477_v50 = vadd.f32 %v476_v49, %v381_v22  ;;  %v2192_v52 = vpop.f32.mrb[9].mxu1 }
  0xff   : > { %v389_v53 = vpop.f32.mrb[8].mxu0  ;;  %v479_v47 = vpop.f32.mrb[10].mxu1 }
 0x100   : > { %v2172_v34 = vpop.f32.mrb[9].mxu0  ;;  %v480_v13 = vadd.f32 %v479_v47, %v384_v9  ;;  %v2193_v26 = vpop.f32.mrb[11].mxu1 }
 0x101   : > { %v392_v5 = vpop.f32.mrb[10].mxu0 }
 0x102   : > { %v2173_v54 = vpop.f32.mrb[11].mxu0 }
 0x105   : > { %v484_v42 = vpop.f32.mrb[12].mxu1 }
 0x106   : > { %v485_v56 = vadd.f32 %v484_v42, %v389_v53  ;;  %v2196_v6 = vpop.f32.mrb[13].mxu1 }
 0x107   : > { %v397_v28 = vpop.f32.mrb[12].mxu0  ;;  %v487_v15 = vpop.f32.mrb[14].mxu1 }
 0x108   : > { %v2176_v14 = vpop.f32.mrb[13].mxu0  ;;  %v488_v59 = vadd.f32 %v487_v15, %v392_v5  ;;  %v2197_v60 = vpop.f32.mrb[15].mxu1 }
 0x109   : > { %v400_v62 = vpop.f32.mrb[14].mxu0 }
 0x10a   : > { %v2177_v63 = vpop.f32.mrb[15].mxu0 }
 0x10d   : > { %v492_v0 = vpop.f32.mrb[16].mxu1 }
 0x10e   : > { %v493_v2 = vadd.f32 %v492_v0, %v397_v28  ;;  %v2200_v3 = vpop.f32.mrb[17].mxu1 }
 0x10f   : > { %v583_v18 = vpop.f32.mrb[16].mxu0  ;;  %v495_v43 = vpop.f32.mrb[18].mxu1 }
 0x110   : > { %v622_v21 = vadd.f32 %v583_v18, %v469_v61  ;;  %v496_v23 = vadd.f32 %v495_v43, %v400_v62  ;;  %v2212_v25 = vpop.f32.mrb[17].mxu0  ;;  %v2201_v27 = vpop.f32.mrb[19].mxu1 }
 0x111   : > { %v586_v10 = vpop.f32.mrb[18].mxu0 }
 0x112   : > { %v623_v31 = vadd.f32 %v586_v10, %v472_v48  ;;  %v2213_v33 = vpop.f32.mrb[19].mxu0 }
 0x115   : > { %v500_v46 = vpop.f32.mrb[20].mxu1 }
 0x116   : > { %v501_v35 = vadd.f32 %v500_v46, %v405_v32  ;;  %v2204_v19 = vpop.f32.mrb[21].mxu1 }
 0x117   : > { %v591_v39 = vpop.f32.mrb[20].mxu0  ;;  %v503_v44 = vpop.f32.mrb[22].mxu1 }
 0x118   : > { %v624_v40 = vadd.f32 %v591_v39, %v477_v50  ;;  %v504_v41 = vadd.f32 %v503_v44, %v408_v45  ;;  %v2216_v17 = vpop.f32.mrb[21].mxu0  ;;  %v2205_v7 = vpop.f32.mrb[23].mxu1 }
 0x119   : > { %v594_v29 = vpop.f32.mrb[22].mxu0 }
 0x11a   : > { %v625_v38 = vadd.f32 %v594_v29, %v480_v13  ;;  %v2217_v4 = vpop.f32.mrb[23].mxu0 }
 0x11d   : > { %v714_v24 = vpop.f32.mrb[24].mxu1 }
 0x11e   : > { %v753_v20 = vadd.f32 %v714_v24, %v622_v21  ;;  %v2236_v36 = vpop.f32.mrb[25].mxu1 }
 0x11f   : > { %v599_v37 = vpop.f32.mrb[24].mxu0  ;;  %v717_v51 = vpop.f32.mrb[26].mxu1 }
 0x120   : > { %v626_v1 = vadd.f32 %v599_v37, %v485_v56  ;;  %v2220_v55 = vpop.f32.mrb[25].mxu0  ;;  %v754_v57 = vadd.f32 %v717_v51, %v623_v31  ;;  %v2237_v58 = vpop.f32.mrb[27].mxu1 }
 0x121   : > { %v602_v32 = vpop.f32.mrb[26].mxu0 }
 0x122   : > { %v627_v61 = vadd.f32 %v602_v32, %v488_v59  ;;  %v2221_v16 = vpop.f32.mrb[27].mxu0 }
 0x125   : > { %v722_v22 = vpop.f32.mrb[28].mxu1 }
 0x126   : > { %v755_v11 = vadd.f32 %v722_v22, %v624_v40  ;;  %v2240_v45 = vpop.f32.mrb[29].mxu1 }
 0x127   : > { %v607_v30 = vpop.f32.mrb[28].mxu0  ;;  %v725_v48 = vpop.f32.mrb[30].mxu1 }
 0x128   : > { %v628_v8 = vadd.f32 %v607_v30, %v493_v2  ;;  %v2224_v9 = vpop.f32.mrb[29].mxu0  ;;  %v756_v12 = vadd.f32 %v725_v48, %v625_v38  ;;  %v2241_v49 = vpop.f32.mrb[31].mxu1 }
 0x129   : > { %v610_v50 = vpop.f32.mrb[30].mxu0 }
 0x12a   : > { %v629_v52 = vadd.f32 %v610_v50, %v496_v23  ;;  %v2225_v53 = vpop.f32.mrb[31].mxu0 }
 0x12d   : > { %v730_v47 = vpop.f32.mrb[32].mxu1 }
 0x12e   : > { %v757_v34 = vadd.f32 %v730_v47, %v626_v1  ;;  %v2244_v13 = vpop.f32.mrb[33].mxu1 }
 0x12f   : > { %v615_v26 = vpop.f32.mrb[32].mxu0  ;;  %v733_v5 = vpop.f32.mrb[34].mxu1 }
 0x130   : > { %v630_v54 = vadd.f32 %v615_v26, %v501_v35  ;;  %v2228_v42 = vpop.f32.mrb[33].mxu0  ;;  %v758_v56 = vadd.f32 %v733_v5, %v627_v61  ;;  %v2245_v6 = vpop.f32.mrb[35].mxu1 }
 0x131   : > { %v618_v28 = vpop.f32.mrb[34].mxu0 }
 0x132   : > { %v631_v15 = vadd.f32 %v618_v28, %v504_v41  ;;  %v2229_v14 = vpop.f32.mrb[35].mxu0 }
 0x135   : > { %v738_v59 = vpop.f32.mrb[36].mxu1 }
 0x136   : > { %v759_v60 = vadd.f32 %v738_v59, %v628_v8  ;;  %v2248_v62 = vpop.f32.mrb[37].mxu1 }
 0x137   : > { %v882_v63 = vpop.f32.mrb[36].mxu0  ;;  %v741_v0 = vpop.f32.mrb[38].mxu1 }
 0x138   : > { %v921_v2 = vadd.f32 %v882_v63, %v753_v20  ;;  %v760_v3 = vadd.f32 %v741_v0, %v629_v52  ;;  %v2260_v18 = vpop.f32.mrb[37].mxu0  ;;  %v2249_v43 = vpop.f32.mrb[39].mxu1 }
 0x139   : > { %v885_v21 = vpop.f32.mrb[38].mxu0 }
 0x13a   : > { %v922_v23 = vadd.f32 %v885_v21, %v754_v57  ;;  %v2261_v25 = vpop.f32.mrb[39].mxu0 }
 0x13d   : > { %v746_v27 = vpop.f32.mrb[40].mxu1 }
 0x13e   : > { %v761_v10 = vadd.f32 %v746_v27, %v630_v54  ;;  %v2252_v31 = vpop.f32.mrb[41].mxu1 }
 0x13f   : > { %v890_v33 = vpop.f32.mrb[40].mxu0  ;;  %v749_v46 = vpop.f32.mrb[42].mxu1 }
 0x140   : > { %v923_v35 = vadd.f32 %v890_v33, %v755_v11  ;;  %v762_v19 = vadd.f32 %v749_v46, %v631_v15  ;;  %v2264_v39 = vpop.f32.mrb[41].mxu0  ;;  %v2253_v44 = vpop.f32.mrb[43].mxu1 }
 0x141   : > { %v893_v40 = vpop.f32.mrb[42].mxu0 }
 0x142   : > { %v924_v41 = vadd.f32 %v893_v40, %v756_v12  ;;  %v2265_v17 = vpop.f32.mrb[43].mxu0 }
 0x145   : > { %v1009_v7 = vpop.f32.mrb[44].mxu1 }
 0x146   : > { %v1048_v29 = vadd.f32 %v1009_v7, %v921_v2  ;;  %v2284_v38 = vpop.f32.mrb[45].mxu1 }
 0x147   : > { %v898_v4 = vpop.f32.mrb[44].mxu0  ;;  %v1012_v24 = vpop.f32.mrb[46].mxu1 }
 0x148   : > { %v925_v20 = vadd.f32 %v898_v4, %v757_v34  ;;  %v2268_v36 = vpop.f32.mrb[45].mxu0  ;;  %v1049_v37 = vadd.f32 %v1012_v24, %v922_v23  ;;  %v2285_v51 = vpop.f32.mrb[47].mxu1 }
 0x149   : > { %v901_v1 = vpop.f32.mrb[46].mxu0 }
 0x14a   : > { %v926_v55 = vadd.f32 %v901_v1, %v758_v56  ;;  %v2269_v57 = vpop.f32.mrb[47].mxu0 }
 0x14d   : > { %v1017_v58 = vpop.f32.mrb[48].mxu1 }
 0x14e   : > { %v1050_v32 = vadd.f32 %v1017_v58, %v923_v35  ;;  %v2288_v61 = vpop.f32.mrb[49].mxu1 }
 0x14f   : > { %v906_v16 = vpop.f32.mrb[48].mxu0  ;;  %v1020_v22 = vpop.f32.mrb[50].mxu1 }
 0x150   : > { %v927_v11 = vadd.f32 %v906_v16, %v759_v60  ;;  %v2272_v45 = vpop.f32.mrb[49].mxu0  ;;  %v1051_v30 = vadd.f32 %v1020_v22, %v924_v41  ;;  %v2289_v48 = vpop.f32.mrb[51].mxu1 }
 0x151   : > { %v909_v8 = vpop.f32.mrb[50].mxu0 }
 0x152   : > { %v928_v9 = vadd.f32 %v909_v8, %v760_v3  ;;  %v2273_v12 = vpop.f32.mrb[51].mxu0 }
 0x155   : > { %v1025_v49 = vpop.f32.mrb[52].mxu1 }
 0x156   : > { %v1052_v50 = vadd.f32 %v1025_v49, %v925_v20  ;;  %v2292_v52 = vpop.f32.mrb[53].mxu1 }
 0x157   : > { %v914_v53 = vpop.f32.mrb[52].mxu0  ;;  %v1028_v47 = vpop.f32.mrb[54].mxu1 }
 0x158   : > { %v929_v34 = vadd.f32 %v914_v53, %v761_v10  ;;  %v2276_v13 = vpop.f32.mrb[53].mxu0  ;;  %v1053_v26 = vadd.f32 %v1028_v47, %v926_v55  ;;  %v2293_v5 = vpop.f32.mrb[55].mxu1 }
 0x159   : > { %v917_v54 = vpop.f32.mrb[54].mxu0 }
 0x15a   : > { %v930_v42 = vadd.f32 %v917_v54, %v762_v19  ;;  %v2277_v56 = vpop.f32.mrb[55].mxu0 }
 0x15d   : > { %v1033_v6 = vpop.f32.mrb[56].mxu1 }
 0x15e   : > { %v1054_v28 = vadd.f32 %v1033_v6, %v927_v11  ;;  %v2296_v15 = vpop.f32.mrb[57].mxu1  ;;  %v3047_v6 = vld [vmem:[%s3161_s2] ss:$0 sm:$0xff] }
 0x15f   : > { %v1139_v14 = vpop.f32.mrb[56].mxu0  ;;  %v1036_v59 = vpop.f32.mrb[58].mxu1 }
 0x160   : > { %v1178_v60 = vadd.f32 %v1139_v14, %v1048_v29  ;;  %v1055_v62 = vadd.f32 %v1036_v59, %v928_v9  ;;  %v2308_v63 = vpop.f32.mrb[57].mxu0  ;;  %v2297_v0 = vpop.f32.mrb[59].mxu1 }
 0x161   : > { %v1142_v2 = vpop.f32.mrb[58].mxu0 }
 0x162   : > { %v1179_v3 = vadd.f32 %v1142_v2, %v1049_v37  ;;  %v2309_v18 = vpop.f32.mrb[59].mxu0 }
 0x165   : > { %v1041_v43 = vpop.f32.mrb[60].mxu1 }
 0x166   : > { %v1056_v21 = vadd.f32 %v1041_v43, %v929_v34  ;;  %v2300_v23 = vpop.f32.mrb[61].mxu1 }
 0x167   : > { %v1147_v25 = vpop.f32.mrb[60].mxu0  ;;  %v1044_v27 = vpop.f32.mrb[62].mxu1 }
 0x168   : > { %v1180_v10 = vadd.f32 %v1147_v25, %v1050_v32  ;;  %v1057_v31 = vadd.f32 %v1044_v27, %v930_v42  ;;  %v2312_v33 = vpop.f32.mrb[61].mxu0  ;;  %v2301_v46 = vpop.f32.mrb[63].mxu1 }
 0x169   : > { %v1150_v35 = vpop.f32.mrb[62].mxu0 }
 0x16a   : > { %v1181_v19 = vadd.f32 %v1150_v35, %v1051_v30  ;;  %v2313_v39 = vpop.f32.mrb[63].mxu0 }
 0x16d   : > { %v1288_v44 = vpop.f32.mrb[64].mxu1 }
 0x16e   : > { %v1327_v40 = vadd.f32 %v1288_v44, %v1178_v60  ;;  %v2332_v41 = vpop.f32.mrb[65].mxu1 }
 0x16f   : > { %v1155_v17 = vpop.f32.mrb[64].mxu0  ;;  %v1291_v7 = vpop.f32.mrb[66].mxu1 }
 0x170   : > { %v1182_v29 = vadd.f32 %v1155_v17, %v1052_v50  ;;  %v2316_v38 = vpop.f32.mrb[65].mxu0  ;;  %v1328_v4 = vadd.f32 %v1291_v7, %v1179_v3  ;;  %v2333_v24 = vpop.f32.mrb[67].mxu1 }
 0x171   : > { %v1158_v20 = vpop.f32.mrb[66].mxu0 }
 0x172   : > { %v1183_v36 = vadd.f32 %v1158_v20, %v1053_v26  ;;  %v2317_v37 = vpop.f32.mrb[67].mxu0 }
 0x175   : > { %v1296_v51 = vpop.f32.mrb[68].mxu1 }
 0x176   : > { %v1329_v1 = vadd.f32 %v1296_v51, %v1180_v10  ;;  %v2336_v55 = vpop.f32.mrb[69].mxu1 }
 0x177   : > { %v1163_v57 = vpop.f32.mrb[68].mxu0  ;;  %v1299_v58 = vpop.f32.mrb[70].mxu1 }
 0x178   : > { %v1184_v32 = vadd.f32 %v1163_v57, %v1054_v28  ;;  %v2320_v61 = vpop.f32.mrb[69].mxu0  ;;  %v1330_v16 = vadd.f32 %v1299_v58, %v1181_v19  ;;  %v2337_v22 = vpop.f32.mrb[71].mxu1 }
 0x179   : > { %v1166_v11 = vpop.f32.mrb[70].mxu0 }
 0x17a   : > { %v1185_v45 = vadd.f32 %v1166_v11, %v1055_v62  ;;  %v2321_v30 = vpop.f32.mrb[71].mxu0 }
 0x17d   : > { %v1304_v48 = vpop.f32.mrb[72].mxu1 }
 0x17e   : > { %v1331_v8 = vadd.f32 %v1304_v48, %v1182_v29  ;;  %v2340_v9 = vpop.f32.mrb[73].mxu1 }
 0x17f   : > { %v1171_v12 = vpop.f32.mrb[72].mxu0  ;;  %v1307_v49 = vpop.f32.mrb[74].mxu1 }
 0x180   : > { %v1186_v50 = vadd.f32 %v1171_v12, %v1056_v21  ;;  %v2324_v52 = vpop.f32.mrb[73].mxu0  ;;  %v1332_v53 = vadd.f32 %v1307_v49, %v1183_v36  ;;  %v2341_v47 = vpop.f32.mrb[75].mxu1 }
 0x181   : > { %v1174_v34 = vpop.f32.mrb[74].mxu0 }
 0x182   : > { %v1187_v13 = vadd.f32 %v1174_v34, %v1057_v31  ;;  %v2325_v26 = vpop.f32.mrb[75].mxu0 }
 0x183   : > { %v2070_v26 = vld [vmem:[%s3163_s4] ss:$0 sm:$0xff] }
 0x185   : > { %v1312_v5 = vpop.f32.mrb[76].mxu1 }
 0x186   : > { %v1333_v54 = vadd.f32 %v1312_v5, %v1184_v32  ;;  %v2344_v42 = vpop.f32.mrb[77].mxu1 }
 0x187   : > { %v1415_v56 = vpop.f32.mrb[76].mxu0  ;;  %v1315_v28 = vpop.f32.mrb[78].mxu1 }
 0x188   : > { %v1454_v15 = vadd.f32 %v1415_v56, %v1327_v40  ;;  %v1334_v14 = vadd.f32 %v1315_v28, %v1185_v45  ;;  %v2356_v59 = vpop.f32.mrb[77].mxu0  ;;  %v2345_v60 = vpop.f32.mrb[79].mxu1 }
 0x189   : > { %v1418_v62 = vpop.f32.mrb[78].mxu0 }
 0x18a   : > { %v1471_v63 = vadd.f32 %v3047_v6, %v1454_v15  ;;  %v1455_v0 = vadd.f32 %v1418_v62, %v1328_v4  ;;  %v2357_v2 = vpop.f32.mrb[79].mxu0 }
 0x18c   : > { %v1481_v3 = vmax.f32 %v1471_v63, 0.0  ;;  %v1472_v18 = vadd.f32 %v3047_v6, %v1455_v0 }
 0x18d   : > { %v1320_v43 = vpop.f32.mrb[80].mxu1 }
 0x18e   : > { %v1482_v21 = vmax.f32 %v1472_v18, 0.0  ;;  %v1335_v23 = vadd.f32 %v1320_v43, %v1186_v50  ;;  %2378 = vmatprep.mubr.msk.f32.mxu1 %vm1500_vm8, %v1481_v3  ;;  %v2348_v25 = vpop.f32.mrb[81].mxu1 }
 0x18f   : > { %v1423_v27 = vpop.f32.mrb[80].mxu0  ;;  %v1323_v10 = vpop.f32.mrb[82].mxu1 }
 0x190   : > { %v1456_v31 = vadd.f32 %v1423_v27, %v1329_v1  ;;  %v1336_v33 = vadd.f32 %v1323_v10, %v1187_v13  ;;  %v2360_v46 = vpop.f32.mrb[81].mxu0  ;;  %2379 = vmatmul.mubr.msk.f32.vlgmr.msra.gmra.mrb[84].mxu1 %vm1500_vm8, %v1482_v21  ;;  %v2349_v35 = vpop.f32.mrb[83].mxu1 }
 0x191   : > { %v1426_v19 = vpop.f32.mrb[82].mxu0 }
 0x192   : > { %v1473_v39 = vadd.f32 %v3047_v6, %v1456_v31  ;;  %v1457_v44 = vadd.f32 %v1426_v19, %v1330_v16  ;;  %v2361_v40 = vpop.f32.mrb[83].mxu0 }
 0x194   : > { %v1483_v41 = vmax.f32 %v1473_v39, 0.0  ;;  %v1474_v17 = vadd.f32 %v3047_v6, %v1457_v44 }
 0x196   : > { %v1484_v7 = vmax.f32 %v1474_v17, 0.0  ;;  %2381 = vmatprep.mubr.msk.f32.mxu1 %vm1500_vm8, %v1483_v41 }
 0x197   : > { %v1431_v29 = vpop.f32.mrb[84].mxu0 }
 0x198   : > { %v1458_v38 = vadd.f32 %v1431_v29, %v1331_v8  ;;  %v2364_v4 = vpop.f32.mrb[85].mxu0  ;;  %2382 = vmatmul.mubr.msk.f32.gmra.mrb[86].mxu1 %vm1500_vm8, %v1484_v7 }
 0x199   : > { %v1434_v24 = vpop.f32.mrb[86].mxu0 }
 0x19a   : > { %v1475_v20 = vadd.f32 %v3047_v6, %v1458_v38  ;;  %v1459_v36 = vadd.f32 %v1434_v24, %v1332_v53  ;;  %v2365_v37 = vpop.f32.mrb[87].mxu0 }
 0x19c   : > { %v1485_v51 = vmax.f32 %v1475_v20, 0.0  ;;  %v1476_v1 = vadd.f32 %v3047_v6, %v1459_v36 }
 0x19e   : > { %v1486_v55 = vmax.f32 %v1476_v1, 0.0  ;;  %2384 = vmatprep.mubr.msk.f32.mxu1 %vm1500_vm8, %v1485_v51 }
 0x19f   : > { %v1439_v57 = vpop.f32.mrb[88].mxu0 }
 0x1a0   : > { %v1460_v58 = vadd.f32 %v1439_v57, %v1333_v54  ;;  %v2368_v32 = vpop.f32.mrb[89].mxu0  ;;  %2385 = vmatmul.mubr.msk.f32.gmra.mrb[88].mxu1 %vm1500_vm8, %v1486_v55 }
 0x1a1   : > { %v1442_v61 = vpop.f32.mrb[90].mxu0 }
 0x1a2   : > { %v1477_v16 = vadd.f32 %v3047_v6, %v1460_v58  ;;  %v1461_v22 = vadd.f32 %v1442_v61, %v1334_v14  ;;  %v2369_v11 = vpop.f32.mrb[91].mxu0 }
 0x1a4   : > { %v1487_v45 = vmax.f32 %v1477_v16, 0.0  ;;  %v1478_v30 = vadd.f32 %v3047_v6, %v1461_v22 }
 0x1a6   : > { %v1488_v48 = vmax.f32 %v1478_v30, 0.0  ;;  %2387 = vmatprep.mubr.msk.f32.mxu1 %vm1500_vm8, %v1487_v45 }
 0x1a7   : > { %v1447_v8 = vpop.f32.mrb[92].mxu0 }
 0x1a8   : > { %v1462_v9 = vadd.f32 %v1447_v8, %v1335_v23  ;;  %v2372_v12 = vpop.f32.mrb[93].mxu0  ;;  %2388 = vmatmul.mubr.msk.f32.gmra.mrb[90].mxu1 %vm1500_vm8, %v1488_v48 }
 0x1a9   : > { %v1450_v49 = vpop.f32.mrb[94].mxu0 }
 0x1aa   : > { %v1479_v50 = vadd.f32 %v3047_v6, %v1462_v9  ;;  %v1463_v52 = vadd.f32 %v1450_v49, %v1336_v33  ;;  %v2373_v53 = vpop.f32.mrb[95].mxu0 }
 0x1ac   : > { %v1489_v47 = vmax.f32 %v1479_v50, 0.0  ;;  %v1480_v34 = vadd.f32 %v3047_v6, %v1463_v52 }
 0x1ae   : > { %v1490_v13 = vmax.f32 %v1480_v34, 0.0  ;;  %2390 = vmatprep.mubr.msk.f32.mxu1 %vm1500_vm8, %v1489_v47 }
 0x1b0   : > { %2391 = vmatmul.mubr.msk.f32.gmra.mrb[92].mxu1 %vm1500_vm8, %v1490_v13 }
 0x263   : > { %v2380_v5 = vpop.f32.mrb[84].mxu1 }
 0x264   : > { %v1603_v54 = vadd.f32 %v2380_v5, %v2070_v26  ;;  %v1597_v42 = vpop.f32.mrb[85].mxu1 }
 0x265   : > { %v1598_v56 = vadd.f32 %v2070_v26, %v1597_v42 }
 0x266   : > { %v1647_v28 = vsub.f32 0.0, %v1603_v54 }
 0x267   : > { %v1646_v15 = vsub.f32 0.0, %v1598_v56 }
 0x268   : > { %v1658_v14 = vmul.f32 1.442695, %v1647_v28 }
 0x269   : > { %v1656_v59 = vmul.f32 1.442695, %v1646_v15 }
 0x26a   : > { %2445 = vpow2.f32 %v1658_v14 }
 0x26b   : > { %2447 = vpow2.f32 %v1656_v59  ;;  %v2383_v6 = vpop.f32.mrb[86].mxu1 }
 0x26c   : > { %v1613_v60 = vadd.f32 %v2383_v6, %v2070_v26  ;;  %v1607_v62 = vpop.f32.mrb[87].mxu1 }
 0x26d   : > { %v1608_v63 = vadd.f32 %v2070_v26, %v1607_v62 }
 0x26e   : > { %v1649_v0 = vsub.f32 0.0, %v1613_v60 }
 0x26f   : > { %v1648_v2 = vsub.f32 0.0, %v1608_v63 }
 0x270   : > { %v1662_v3 = vmul.f32 1.442695, %v1649_v0 }
 0x271   : > { %v1660_v18 = vmul.f32 1.442695, %v1648_v2 }
 0x272   : > { %2449 = vpow2.f32 %v1662_v3 }
 0x273   : > { %2451 = vpow2.f32 %v1660_v18  ;;  %v2386_v43 = vpop.f32.mrb[88].mxu1 }
 0x274   : > { %v2446_v21 = vpop.eup %2445  ;;  %v1623_v23 = vadd.f32 %v2386_v43, %v2070_v26  ;;  %v1617_v25 = vpop.f32.mrb[89].mxu1 }
 0x275   : > { %v2448_v27 = vpop.eup %2447  ;;  %v1618_v10 = vadd.f32 %v2070_v26, %v1617_v25  ;;  %v1677_v35 = vadd.f32 1.0, %v2446_v21 }
 0x276   : > { %v1676_v31 = vadd.f32 1.0, %v2448_v27  ;;  %v1651_v33 = vsub.f32 0.0, %v1623_v23 }
 0x277   : > { %v1650_v46 = vsub.f32 0.0, %v1618_v10 }
 0x278   : > { %2453 = vrcp.f32 %v1676_v31  ;;  %v1666_v19 = vmul.f32 1.442695, %v1651_v33 }
 0x279   : > { %v1664_v39 = vmul.f32 1.442695, %v1650_v46 }
 0x27a   : > { %2455 = vpow2.f32 %v1666_v19 }
 0x27b   : > { %2457 = vpow2.f32 %v1664_v39  ;;  %v2389_v44 = vpop.f32.mrb[90].mxu1 }
 0x27c   : > { %v2450_v40 = vpop.eup %2449  ;;  %2459 = vrcp.f32 %v1677_v35  ;;  %v1633_v41 = vadd.f32 %v2389_v44, %v2070_v26  ;;  %v1627_v17 = vpop.f32.mrb[91].mxu1 }
 0x27d   : > { %v2452_v7 = vpop.eup %2451  ;;  %v1628_v29 = vadd.f32 %v2070_v26, %v1627_v17  ;;  %v1679_v20 = vadd.f32 1.0, %v2450_v40 }
 0x27e   : > { %v1678_v38 = vadd.f32 1.0, %v2452_v7  ;;  %v1653_v4 = vsub.f32 0.0, %v1633_v41 }
 0x27f   : > { %v1652_v24 = vsub.f32 0.0, %v1628_v29 }
 0x280   : > { %2461 = vrcp.f32 %v1678_v38  ;;  %v1670_v36 = vmul.f32 1.442695, %v1653_v4 }
 0x281   : > { %v1668_v37 = vmul.f32 1.442695, %v1652_v24 }
 0x282   : > { %v3072_v51 = vpop.eup %2453  ;;  %2463 = vpow2.f32 %v1670_v36 }
 0x283   : > { %2465 = vpow2.f32 %v1668_v37  ;;  %1716 = vrot.lane.b32.xlu0 %v3072_v51, %s2535_s22  ;;  %v2392_v1 = vpop.f32.mrb[92].mxu1 }
 0x284   : > { %v2456_v55 = vpop.eup %2455  ;;  %2467 = vrcp.f32 %v1679_v20  ;;  %v1643_v57 = vadd.f32 %v2392_v1, %v2070_v26  ;;  %v1637_v58 = vpop.f32.mrb[93].mxu1 }
 0x285   : > { %v2458_v32 = vpop.eup %2457  ;;  %v1681_v61 = vadd.f32 1.0, %v2456_v55  ;;  %v1638_v16 = vadd.f32 %v2070_v26, %v1637_v58 }
 0x286   : > { %v3076_v22 = vpop.eup %2459  ;;  %v1680_v11 = vadd.f32 1.0, %v2458_v32  ;;  %v1655_v45 = vsub.f32 0.0, %v1643_v57 }
 0x287   : > { %2469 = vrcp.f32 %v1681_v61  ;;  %v1654_v30 = vsub.f32 0.0, %v1638_v16  ;;  %1718 = vrot.lane.b32.xlu0 %v3076_v22, %s2535_s22 }
 0x288   : > { %2471 = vrcp.f32 %v1680_v11  ;;  %v1674_v48 = vmul.f32 1.442695, %v1655_v45 }
 0x289   : > { %v1672_v8 = vmul.f32 1.442695, %v1654_v30 }
 0x28a   : > { %v3080_v9 = vpop.eup %2461  ;;  %2473 = vpow2.f32 %v1674_v48 }
 0x28b   : > { %2475 = vpow2.f32 %v1672_v8  ;;  %1720 = vrot.lane.b32.xlu1 %v3080_v9, %s2535_s22 }
 0x28c   : > { %v2464_v12 = vpop.eup %2463 }
 0x28d   : > { %v2466_v49 = vpop.eup %2465  ;;  %v1683_v50 = vadd.f32 1.0, %v2464_v12 }
 0x28e   : > { %v3084_v52 = vpop.eup %2467  ;;  %v1682_v53 = vadd.f32 1.0, %v2466_v49 }
 0x28f   : > { %2477 = vrcp.f32 %v1683_v50  ;;  %1722 = vrot.lane.b32.xlu1 %v3084_v52, %s2535_s22 }
 0x290   : > { %2479 = vrcp.f32 %v1682_v53 }
 0x291   : > { %v3088_v47 = vpop.eup %2469 }
 0x292   : > { %v3090_v34 = vpop.eup %2471 }
 0x293   : > { %1726 = vrot.lane.b32.xlu1 %v3088_v47, %s2535_s22  ;;  %1724 = vrot.lane.b32.xlu0 %v3090_v34, %s2535_s22 }
 0x294   : > { %v2474_v13 = vpop.eup %2473 }
 0x295   : > { %v2476_v26 = vpop.eup %2475  ;;  %v1685_v5 = vadd.f32 1.0, %v2474_v13 }
 0x296   : > { %v1684_v54 = vadd.f32 1.0, %v2476_v26 }
 0x297   : > { %2481 = vrcp.f32 %v1685_v5 }
 0x298   : > { %2483 = vrcp.f32 %v1684_v54 }
 0x299   : > { %v3096_v42 = vpop.eup %2477 }
 0x29a   : > { %v3098_v56 = vpop.eup %2479  ;;  %1730 = vrot.lane.b32.xlu1 %v3096_v42, %s2535_s22 }
 0x29b   : > { %1728 = vrot.lane.b32.xlu0 %v3098_v56, %s2535_s22 }
 0x2a1   : > { %v3104_v28 = vpop.eup %2481 }
 0x2a2   : > { %v3106_v15 = vpop.eup %2483  ;;  %1734 = vrot.lane.b32.xlu1 %v3104_v28, %s2535_s22 }
 0x2a3   : > { %1732 = vrot.lane.b32.xlu0 %v3106_v15, %s2535_s22 }
 0x2f5   : > { %v1717_v14 = vpop.permute.xlu0 %1716 }
 0x2f6   : > { %v1746_v59 = vsub.f32 %v3072_v51, %v1717_v14 }
 0x2f8   : > { %v1756_v6 = vmul.f32 -50.0, %v1746_v59 }
 0x2f9   : > { %v1719_v60 = vpop.permute.xlu0 %1718 }
 0x2fa   : > { %v1766_v62 = vmul.f32 1.442695, %v1756_v6  ;;  %v1747_v63 = vsub.f32 %v3076_v22, %v1719_v60 }
 0x2fc   : > { %2485 = vpow2.f32 %v1766_v62  ;;  %v1757_v0 = vmul.f32 -50.0, %v1747_v63 }
 0x2fd   : > { %v1721_v2 = vpop.permute.xlu1 %1720 }
 0x2fe   : > { %v1768_v3 = vmul.f32 1.442695, %v1757_v0  ;;  %v1748_v18 = vsub.f32 %v3080_v9, %v1721_v2 }
 0x300   : > { %2487 = vpow2.f32 %v1768_v3  ;;  %v1758_v43 = vmul.f32 -50.0, %v1748_v18 }
 0x301   : > { %v1723_v21 = vpop.permute.xlu1 %1722 }
 0x302   : > { %v1770_v23 = vmul.f32 1.442695, %v1758_v43  ;;  %v1749_v25 = vsub.f32 %v3084_v52, %v1723_v21 }
 0x304   : > { %2489 = vpow2.f32 %v1770_v23  ;;  %v1759_v27 = vmul.f32 -50.0, %v1749_v25 }
 0x305   : > { %v1727_v10 = vpop.permute.xlu1 %1726  ;;  %v1725_v31 = vpop.permute.xlu0 %1724 }
 0x306   : > { %v2486_v33 = vpop.eup %2485  ;;  %v1772_v46 = vmul.f32 1.442695, %v1759_v27  ;;  %v1751_v35 = vsub.f32 %v3088_v47, %v1727_v10  ;;  %v1750_v19 = vsub.f32 %v3090_v34, %v1725_v31 }
 0x307   : > { %v1786_v39 = vadd.f32 1.0, %v2486_v33 }
 0x308   : > { %2491 = vpow2.f32 %v1772_v46  ;;  %v1761_v44 = vmul.f32 -50.0, %v1751_v35  ;;  %v1760_v40 = vmul.f32 -50.0, %v1750_v19 }
 0x309   : > { %2493 = vrcp.f32 %v1786_v39 }
 0x30a   : > { %v2488_v41 = vpop.eup %2487  ;;  %v1776_v17 = vmul.f32 1.442695, %v1761_v44  ;;  %v1774_v7 = vmul.f32 1.442695, %v1760_v40 }
 0x30b   : > { %v1787_v29 = vadd.f32 1.0, %v2488_v41 }
 0x30c   : > { %2495 = vpow2.f32 %v1776_v17  ;;  %v1731_v38 = vpop.permute.xlu1 %1730 }
 0x30d   : > { %2497 = vrcp.f32 %v1787_v29  ;;  %v1753_v4 = vsub.f32 %v3096_v42, %v1731_v38  ;;  %v1729_v24 = vpop.permute.xlu0 %1728 }
 0x30e   : > { %v2490_v20 = vpop.eup %2489  ;;  %2499 = vpow2.f32 %v1774_v7  ;;  %v1752_v36 = vsub.f32 %v3098_v56, %v1729_v24 }
 0x30f   : > { %v1788_v37 = vadd.f32 1.0, %v2490_v20  ;;  %v1763_v1 = vmul.f32 -50.0, %v1753_v4 }
 0x310   : > { %v1762_v55 = vmul.f32 -50.0, %v1752_v36 }
 0x311   : > { %2501 = vrcp.f32 %v1788_v37  ;;  %v1780_v57 = vmul.f32 1.442695, %v1763_v1 }
 0x312   : > { %v2492_v58 = vpop.eup %2491  ;;  %v1778_v32 = vmul.f32 1.442695, %v1762_v55 }
 0x313   : > { %v2494_v61 = vpop.eup %2493  ;;  %v1789_v16 = vadd.f32 1.0, %v2492_v58  ;;  %2503 = vpow2.f32 %v1780_v57 }
 0x314   : > { %2505 = vpow2.f32 %v1778_v32  ;;  %v1735_v11 = vpop.permute.xlu1 %1734  ;;  %1826 = vrot.lane.b32.xlu0 %v2494_v61, %s2536_s23 }
 0x315   : > { %2507 = vrcp.f32 %v1789_v16  ;;  %v1755_v45 = vsub.f32 %v3104_v28, %v1735_v11  ;;  %v1733_v30 = vpop.permute.xlu0 %1732 }
 0x316   : > { %v2496_v48 = vpop.eup %2495  ;;  %v1754_v8 = vsub.f32 %v3106_v15, %v1733_v30 }
 0x317   : > { %v2498_v12 = vpop.eup %2497  ;;  %v1791_v49 = vadd.f32 1.0, %v2496_v48  ;;  %v1765_v50 = vmul.f32 -50.0, %v1755_v45 }
 0x318   : > { %v2500_v53 = vpop.eup %2499  ;;  %v1764_v13 = vmul.f32 -50.0, %v1754_v8  ;;  %1828 = vrot.lane.b32.xlu1 %v2498_v12, %s2536_s23 }
 0x319   : > { %2509 = vrcp.f32 %v1791_v49  ;;  %v1790_v26 = vadd.f32 1.0, %v2500_v53  ;;  %v1784_v5 = vmul.f32 1.442695, %v1765_v50 }
 0x31a   : > { %v1782_v54 = vmul.f32 1.442695, %v1764_v13 }
 0x31b   : > { %v2502_v14 = vpop.eup %2501  ;;  %2511 = vrcp.f32 %v1790_v26 }
 0x31c   : > { %2513 = vpow2.f32 %v1784_v5  ;;  %1830 = vrot.lane.b32.xlu0 %v2502_v14, %s2536_s23 }
 0x31d   : > { %v2504_v59 = vpop.eup %2503  ;;  %2515 = vpow2.f32 %v1782_v54 }
 0x31e   : > { %v2506_v6 = vpop.eup %2505  ;;  %v1793_v60 = vadd.f32 1.0, %v2504_v59 }
 0x31f   : > { %v2508_v62 = vpop.eup %2507  ;;  %v1792_v63 = vadd.f32 1.0, %v2506_v6 }
 0x320   : > { %2517 = vrcp.f32 %v1793_v60  ;;  %1832 = vrot.lane.b32.xlu1 %v2508_v62, %s2536_s23 }
 0x321   : > { %2519 = vrcp.f32 %v1792_v63 }
 0x323   : > { %v2510_v0 = vpop.eup %2509 }
 0x324   : > { %1836 = vrot.lane.b32.xlu1 %v2510_v0, %s2536_s23 }
 0x325   : > { %v2512_v2 = vpop.eup %2511 }
 0x326   : > { %v2514_v3 = vpop.eup %2513  ;;  %1834 = vrot.lane.b32.xlu0 %v2512_v2, %s2536_s23 }
 0x327   : > { %v2516_v18 = vpop.eup %2515  ;;  %v1795_v43 = vadd.f32 1.0, %v2514_v3 }
 0x328   : > { %v1794_v21 = vadd.f32 1.0, %v2516_v18 }
 0x329   : > { %2521 = vrcp.f32 %v1795_v43 }
 0x32a   : > { %v2518_v23 = vpop.eup %2517  ;;  %2523 = vrcp.f32 %v1794_v21 }
 0x32b   : > { %v2520_v25 = vpop.eup %2519  ;;  %1840 = vrot.lane.b32.xlu1 %v2518_v23, %s2536_s23 }
 0x32c   : > { %1838 = vrot.lane.b32.xlu0 %v2520_v25, %s2536_s23 }
 0x333   : > { %v2522_v27 = vpop.eup %2521 }
 0x334   : > { %v2524_v10 = vpop.eup %2523  ;;  %1844 = vrot.lane.b32.xlu1 %v2522_v27, %s2536_s23 }
 0x335   : > { %1842 = vrot.lane.b32.xlu0 %v2524_v10, %s2536_s23 }
 0x386   : > { %v1827_v31 = vpop.permute.xlu0 %1826 }
 0x387   : > { %v1857_v33 = vsel %vm1856_vm9, %v3072_v51, %v1827_v31 }
 0x388   : > { %1867 = vxpose.xlu0.b32.start [1/10] (short) (narrow) %v1857_v33, 8 }
 0x38a   : > { %v1829_v46 = vpop.permute.xlu1 %1828 }
 0x38b   : > { %v1858_v35 = vsel %vm1856_vm9, %v3076_v22, %v1829_v46 }
 0x38c   : > { %1868 = vxpose.xlu0.b32.cont [2/10] (short) (narrow) %v1858_v35, 8 }
 0x38e   : > { %v1831_v19 = vpop.permute.xlu0 %1830 }
 0x38f   : > { %v1859_v39 = vsel %vm1856_vm9, %v3080_v9, %v1831_v19 }
 0x390   : > { %1869 = vxpose.xlu0.b32.cont [3/10] (short) (narrow) %v1859_v39, 8 }
 0x392   : > { %v1833_v44 = vpop.permute.xlu1 %1832 }
 0x393   : > { %v1860_v40 = vsel %vm1856_vm9, %v3084_v52, %v1833_v44 }
 0x394   : > { %1870 = vxpose.xlu0.b32.cont [4/10] (short) (narrow) %v1860_v40, 8 }
 0x396   : > { %v1837_v17 = vpop.permute.xlu1 %1836 }
 0x397   : > { %v1862_v22 = vsel %vm1856_vm9, %v3088_v47, %v1837_v17 }
 0x398   : > { %v1835_v41 = vpop.permute.xlu0 %1834 }
 0x399   : > { %v1861_v51 = vsel %vm1856_vm9, %v3090_v34, %v1835_v41 }
 0x39a   : > { %1871 = vxpose.xlu0.b32.cont [5/10] (short) (narrow) %v1861_v51, 8 }
 0x39d   : > { %v1841_v29 = vpop.permute.xlu1 %1840 }
 0x39e   : > { %1872 = vxpose.xlu0.b32.cont [6/10] (short) (narrow) %v1862_v22, 8  ;;  %v1839_v7 = vpop.permute.xlu0 %1838  ;;  %v1864_v52 = vsel %vm1856_vm9, %v3096_v42, %v1841_v29 }
 0x39f   : > { %v1863_v9 = vsel %vm1856_vm9, %v3098_v56, %v1839_v7 }
 0x3a2   : > { %1873 = vxpose.xlu0.b32.cont [7/10] (short) (narrow) %v1863_v9, 8 }
 0x3a6   : > { %1874 = vxpose.xlu0.b32.cont [8/10] (short) (narrow) %v1864_v52, 8  ;;  %v1845_v4 = vpop.permute.xlu1 %1844 }
 0x3a7   : > { %v1843_v38 = vpop.permute.xlu0 %1842  ;;  %v1866_v47 = vsel %vm1856_vm9, %v3104_v28, %v1845_v4 }
 0x3a8   : > { %v1865_v34 = vsel %vm1856_vm9, %v3106_v15, %v1843_v38 }
 0x3aa   : > { %1875 = vxpose.xlu0.b32.cont [9/10] (short) (narrow) %v1865_v34, 8 }
 0x3ae   : > { %1876 = vxpose.xlu0.b32.end [10/10] (short) (narrow) %v1866_v47, 8 }
 0x40a   : > { %v1883_v56 = vpop.trf.xlu0 }
 0x40b   : > { %1900 = vst.msk [vmem:[%s222_s27] sm:$0x7] %vm1899_vm10, %v1883_v56 }
 0x40c PF: > { %s15_s18 = sadd.s32 1, %s2531_s18  }
 0x40d   : > { %p12_p4 = scmp.ge.s32.totalorder %s15_s18, 4  }
 0x40f   :  { %14 = sbr.rel (!%p12_p4) target bundleno = 1 (0x1), region = 78 }

</bundles_post_ra>
